<compile_context>
chip_gen: v7x
topology: tpu7x:2x2x1
jax: 0.10.0
libtpu: 0.0.40
codegen_flags: <defaults>
</compile_context>

<pallas_src>
import functools

import jax
import jax.numpy as jnp
from jax.experimental import pallas as pl
from jax.experimental.pallas import tpu as pltpu


NUM_CLASSES = 10
NUM_ANCHORS = 9
FEATURE_DIM = 256
BACKBONE_DIM = 2048
BN_EPS = 1e-5
CLS_OUT = NUM_ANCHORS * NUM_CLASSES      # 90
REG_OUT = NUM_ANCHORS * 4                # 36
HEAD_OUT_PAD = 128                       # 90 + 36 = 126 -> lane-dense 128
VMEM_LIMIT = 64 * 1024 * 1024


def _round_up(x, m):
    return (x + m - 1) // m * m


# ----------------------------------------------------------------------------
# Kernel A: feature_proj  (1x1 conv + BN(eval) + ReLU)  ==  relu(x @ w + b)
# ----------------------------------------------------------------------------
def _proj_kernel(x_ref, w_ref, b_ref, o_ref):
    acc = jnp.dot(x_ref[...], w_ref[...], preferred_element_type=jnp.float32)
    o_ref[...] = jnp.maximum(acc + b_ref[...], 0.0).astype(o_ref.dtype)


def feature_proj(x2d, w, b, *, tm=512):
    """x2d: [M, 2048] bf16, w: [2048, 256] bf16, b: [1, 256] f32 -> [M, 256] bf16.

    M is tiled on a 1-D "parallel" grid; the weight/bias use a constant
    index_map so they stay VMEM-resident while x tiles are double-buffered.
    """
    M, K = x2d.shape
    N = w.shape[1]
    tm = min(tm, _round_up(M, 8))
    Mp = _round_up(M, tm)
    if Mp != M:
        x2d = jnp.pad(x2d, ((0, Mp - M), (0, 0)))

    out = pl.pallas_call(
        _proj_kernel,
        out_shape=jax.ShapeDtypeStruct((Mp, N), jnp.bfloat16),
        grid=(Mp // tm,),
        in_specs=[
            pl.BlockSpec((tm, K), lambda i: (i, 0)),   # streamed activations
            pl.BlockSpec((K, N), lambda i: (0, 0)),    # resident weight
            pl.BlockSpec((1, N), lambda i: (0, 0)),    # resident bias (BN folded)
        ],
        out_specs=pl.BlockSpec((tm, N), lambda i: (i, 0)),
        compiler_params=pltpu.CompilerParams(
            dimension_semantics=("parallel",),
            vmem_limit_bytes=VMEM_LIMIT),
    )(x2d, w, b)
    return out[:M]


# ----------------------------------------------------------------------------
# Kernel B: fused detection head (cls_head + reg_head, 3 chained 3x3 convs)
# ----------------------------------------------------------------------------
def _head_kernel(mask_l_ref, mask_r_ref, feat_ref,
                 w1_ref, b1_ref, w2c_ref, b2c_ref, w2r_ref, b2r_ref,
                 w3_ref, b3_ref, out_ref, pf0, pf1, pf2, *, H, W):
    HW = H * W
    FP = W + 8                     # zero halo rows at front/back of flat buffers
    HWP = HW + 2 * FP
    C = FEATURE_DIM

    mask_l = mask_l_ref[...]       # (HW,1) bf16: 0 where spatial col == 0
    mask_r = mask_r_ref[...]       # (HW,1) bf16: 0 where spatial col == W-1

    def shifted(pf_ref, t):
        """Tap t of a 3x3 conv: shifted slice of the zero-padded flat buffer."""
        ky, kx = t // 3 - 1, t % 3 - 1
        s = FP + ky * W + kx
        src = pf_ref[s:s + HW, :].astype(jnp.bfloat16)
        if kx == -1:
            src = src * mask_l     # kill column-wrap rows (c == 0)
        elif kx == 1:
            src = src * mask_r     # kill column-wrap rows (c == W-1)
        return src

    # Stage input features into a zero-padded flat buffer (halo absorbs ky=+-1).
    pf0[...] = jnp.zeros((HWP, C), jnp.float32)
    pf0[FP:FP + HW, :] = feat_ref[0].astype(jnp.float32)

    # ---- layer 1: fused cls||reg 3x3 conv, 256 -> 512, ReLU ----
    acc1 = jnp.zeros((HW, 2 * C), jnp.float32)
    for t in range(9):
        acc1 = acc1 + jnp.dot(shifted(pf0, t), w1_ref[t],
                              preferred_element_type=jnp.float32)
    y1 = jnp.maximum(acc1 + b1_ref[...], 0.0)
    pf1[...] = jnp.zeros((HWP, 2 * C), jnp.float32)
    pf1[FP:FP + HW, :] = y1

    # ---- layer 2: per-head 3x3 conv, 256 -> 256, ReLU (channel-sliced input) ----
    acc_c = jnp.zeros((HW, C), jnp.float32)
    acc_r = jnp.zeros((HW, C), jnp.float32)
    for t in range(9):
        src = shifted(pf1, t)                       # (HW, 512) bf16
        acc_c = acc_c + jnp.dot(src[:, :C], w2c_ref[t],
                                preferred_element_type=jnp.float32)
        acc_r = acc_r + jnp.dot(src[:, C:], w2r_ref[t],
                                preferred_element_type=jnp.float32)
    y2c = jnp.maximum(acc_c + b2c_ref[...], 0.0)
    y2r = jnp.maximum(acc_r + b2r_ref[...], 0.0)
    pf2[...] = jnp.zeros((HWP, 2 * C), jnp.float32)
    pf2[FP:FP + HW, :C] = y2c
    pf2[FP:FP + HW, C:] = y2r

    # ---- layer 3: fused block-diagonal 3x3 conv, 512 -> 126 (padded to 128) ----
    acc3 = jnp.zeros((HW, HEAD_OUT_PAD), jnp.float32)
    for t in range(9):
        acc3 = acc3 + jnp.dot(shifted(pf2, t), w3_ref[t],
                              preferred_element_type=jnp.float32)
    out_ref[0] = acc3 + b3_ref[...]                 # lane-dense (HW, 128) store


def detection_head(feat, hw_params, *, H, W):
    """feat: [B, H*W, 256] bf16 -> [B, H*W, 128] f32 (cls in 0:90, reg in 90:126)."""
    B, HW, C = feat.shape
    FP = W + 8
    HWP = HW + 2 * FP

    # Column-wrap masks for the flat-shift conv taps (computed once, XLA glue).
    col = jnp.arange(HW, dtype=jnp.int32) % W
    mask_l = (col != 0).astype(jnp.bfloat16).reshape(HW, 1)
    mask_r = (col != W - 1).astype(jnp.bfloat16).reshape(HW, 1)

    kernel = functools.partial(_head_kernel, H=H, W=W)
    const3 = lambda b: (0, 0, 0)
    const2 = lambda b: (0, 0)

    out = pl.pallas_call(
        kernel,
        out_shape=jax.ShapeDtypeStruct((B, HW, HEAD_OUT_PAD), jnp.float32),
        grid=(B,),
        in_specs=[
            pl.BlockSpec((HW, 1), const2),                      # mask_l
            pl.BlockSpec((HW, 1), const2),                      # mask_r
            pl.BlockSpec((1, HW, C), lambda b: (b, 0, 0)),      # features
            pl.BlockSpec((9, C, 2 * C), const3),                # w1 (cls||reg)
            pl.BlockSpec((1, 2 * C), const2),                   # b1
            pl.BlockSpec((9, C, C), const3),                    # w2 cls
            pl.BlockSpec((1, C), const2),                       # b2 cls
            pl.BlockSpec((9, C, C), const3),                    # w2 reg
            pl.BlockSpec((1, C), const2),                       # b2 reg
            pl.BlockSpec((9, 2 * C, HEAD_OUT_PAD), const3),     # w3 (block-diag)
            pl.BlockSpec((1, HEAD_OUT_PAD), const2),            # b3
        ],
        out_specs=pl.BlockSpec((1, HW, HEAD_OUT_PAD), lambda b: (b, 0, 0)),
        scratch_shapes=[
            pltpu.VMEM((HWP, C), jnp.float32),        # padded input features
            pltpu.VMEM((HWP, 2 * C), jnp.float32),    # padded layer-1 output
            pltpu.VMEM((HWP, 2 * C), jnp.float32),    # padded layer-2 output
        ],
        compiler_params=pltpu.CompilerParams(
            dimension_semantics=("parallel",),
            vmem_limit_bytes=VMEM_LIMIT),
    )(mask_l, mask_r, feat,
      hw_params["w1"], hw_params["b1"], hw_params["w2c"], hw_params["b2c"],
      hw_params["w2r"], hw_params["b2r"], hw_params["w3"], hw_params["b3"])
    return out


def _pack_head_weights(p):
    """Repack the six HWIO conv weights into the fused tap-major kernel layout."""
    C = FEATURE_DIM

    def taps(w):  # [3,3,Cin,Cout] -> [9, Cin, Cout]   (tap t = dy*3 + dx)
        return w.reshape(9, w.shape[2], w.shape[3])

    w1 = jnp.concatenate([p["cls_w1"], p["reg_w1"]], axis=-1)        # 256 -> 512
    b1 = jnp.concatenate([p["cls_b1"], p["reg_b1"]])
    # Layer 3: block-diagonal fused weight, lane-padded 126 -> 128.
    w3 = jnp.zeros((9, 2 * C, HEAD_OUT_PAD), jnp.float32)
    w3 = w3.at[:, :C, :CLS_OUT].set(taps(p["cls_w3"]))
    w3 = w3.at[:, C:, CLS_OUT:CLS_OUT + REG_OUT].set(taps(p["reg_w3"]))
    b3 = jnp.zeros((HEAD_OUT_PAD,), jnp.float32)
    b3 = b3.at[:CLS_OUT].set(p["cls_b3"])
    b3 = b3.at[CLS_OUT:CLS_OUT + REG_OUT].set(p["reg_b3"])
    return {
        "w1": taps(w1).astype(jnp.bfloat16), "b1": b1.reshape(1, 2 * C),
        "w2c": taps(p["cls_w2"]).astype(jnp.bfloat16), "b2c": p["cls_b2"].reshape(1, C),
        "w2r": taps(p["reg_w2"]).astype(jnp.bfloat16), "b2r": p["reg_b2"].reshape(1, C),
        "w3": w3.astype(jnp.bfloat16), "b3": b3.reshape(1, HEAD_OUT_PAD),
    }


# ----------------------------------------------------------------------------
# Full forward (eval mode): feature_proj + ObjectDetectionHead
# ----------------------------------------------------------------------------
def dann_forward(backbone_feats_nchw, params):
    B, Cb, H, W = backbone_feats_nchw.shape
    HW = H * W

    # NCHW (torch) -> NHWC -> [M, 2048]: channels on the 128-lane axis.
    x2d = jnp.transpose(backbone_feats_nchw, (0, 2, 3, 1)).reshape(B * HW, Cb)
    x2d = x2d.astype(jnp.bfloat16)

    # feature_proj: Conv2d(2048->256, k=1) + BatchNorm2d(eval) + ReLU, BN folded.
    scale = params["bn_gamma"] * jax.lax.rsqrt(params["bn_var"] + BN_EPS)
    w_eff = (params["proj_w"] * scale[None, :]).astype(jnp.bfloat16)
    b_eff = ((params["proj_b"] - params["bn_mean"]) * scale
             + params["bn_beta"]).reshape(1, FEATURE_DIM)
    feat = feature_proj(x2d, w_eff, b_eff).reshape(B, HW, FEATURE_DIM)

    out = detection_head(feat, _pack_head_weights(params), H=H, W=W)

    # Matches torch: view(B, A, C, H*W).permute(0, 3, 1, 2)
    cls_logits = out[..., :CLS_OUT].reshape(B, HW, NUM_ANCHORS, NUM_CLASSES)
    bbox_regression = out[..., CLS_OUT:CLS_OUT + REG_OUT].reshape(B, HW, NUM_ANCHORS, 4)
    return {"cls_logits": cls_logits, "bbox_regression": bbox_regression}


# ----------------------------------------------------------------------------
# Deterministic parameter init (shapes per the module's __init__)
# ----------------------------------------------------------------------------
def init_params(key):
    keys = jax.random.split(key, 20)
    p = {}
    p["proj_w"] = 0.02 * jax.random.normal(keys[0], (BACKBONE_DIM, FEATURE_DIM), jnp.float32)
    p["proj_b"] = 0.02 * jax.random.normal(keys[1], (FEATURE_DIM,), jnp.float32)
    p["bn_gamma"] = 1.0 + 0.1 * jax.random.normal(keys[2], (FEATURE_DIM,), jnp.float32)
    p["bn_beta"] = 0.02 * jax.random.normal(keys[3], (FEATURE_DIM,), jnp.float32)
    p["bn_mean"] = 0.02 * jax.random.normal(keys[4], (FEATURE_DIM,), jnp.float32)
    p["bn_var"] = 1.0 + 0.1 * jnp.abs(jax.random.normal(keys[5], (FEATURE_DIM,), jnp.float32))

    def conv_init(kw, kb, cin, cout):
        w = 0.02 * jax.random.normal(kw, (3, 3, cin, cout), jnp.float32)  # HWIO
        b = 0.02 * jax.random.normal(kb, (cout,), jnp.float32)
        return w, b

    p["cls_w1"], p["cls_b1"] = conv_init(keys[6], keys[7], FEATURE_DIM, FEATURE_DIM)
    p["cls_w2"], p["cls_b2"] = conv_init(keys[8], keys[9], FEATURE_DIM, FEATURE_DIM)
    p["cls_w3"], p["cls_b3"] = conv_init(keys[10], keys[11], FEATURE_DIM, CLS_OUT)
    p["reg_w1"], p["reg_b1"] = conv_init(keys[12], keys[13], FEATURE_DIM, FEATURE_DIM)
    p["reg_w2"], p["reg_b2"] = conv_init(keys[14], keys[15], FEATURE_DIM, FEATURE_DIM)
    p["reg_w3"], p["reg_b3"] = conv_init(keys[16], keys[17], FEATURE_DIM, REG_OUT)
    return p


if __name__ == "__main__":
    key = jax.random.PRNGKey(0)
    pkey, xkey = jax.random.split(key)
    params = init_params(pkey)

    # Backbone output feature map (torch NCHW): small spatial 4x4, batch 2.
    B, H, W = 2, 4, 4
    backbone_feats = jax.random.normal(xkey, (B, BACKBONE_DIM, H, W), jnp.float32)

    fwd = jax.jit(dann_forward)
    out = fwd(backbone_feats, params)
    jax.block_until_ready(out)

    assert out["cls_logits"].shape == (B, H * W, NUM_ANCHORS, NUM_CLASSES)
    assert out["bbox_regression"].shape == (B, H * W, NUM_ANCHORS, 4)
    print("KERNEL_OK")
</pallas_src>

<mosaic_0001>
module attributes {stable_mosaic.version = 11 : i64} {
  func.func @_proj_kernel(%arg0: i32, %arg1: memref<32x2048xbf16, #tpu.memory_space<vmem>>, %arg2: memref<2048x256xbf16, #tpu.memory_space<vmem>>, %arg3: memref<1x256xf32, #tpu.memory_space<vmem>>, %arg4: memref<32x256xbf16, #tpu.memory_space<vmem>>) attributes {dimension_semantics = [#tpu.dimension_semantics<parallel>], iteration_bounds = array<i64: 1>, scalar_prefetch = 0 : i64, scratch_operands = 0 : i64, tpu.core_type = #tpu.core_type<tc>, window_params = [{transform_indices = @transform_0, window_bounds = array<i64: 32, 2048>}, {pipeline_mode = #tpu.pipeline_mode<synchronous>, transform_indices = @transform_1, window_bounds = array<i64: 2048, 256>}, {pipeline_mode = #tpu.pipeline_mode<synchronous>, transform_indices = @transform_2, window_bounds = array<i64: 1, 256>}, {transform_indices = @transform_3, window_bounds = array<i64: 32, 256>}]} {
    %c0 = arith.constant 0 : index
    %c0_0 = arith.constant 0 : index
    %0 = vector.load %arg1[%c0, %c0_0] : memref<32x2048xbf16, #tpu.memory_space<vmem>>, vector<32x2048xbf16>
    %c0_1 = arith.constant 0 : index
    %c0_2 = arith.constant 0 : index
    %1 = vector.load %arg2[%c0_1, %c0_2] : memref<2048x256xbf16, #tpu.memory_space<vmem>>, vector<2048x256xbf16>
    %cst = arith.constant dense<0.000000e+00> : vector<32x256xf32>
    %2 = tpu.matmul %0, %1, %cst {dimension_numbers = #tpu.dot_dimension_numbers<[1], [0], [0], [1], [0, 0, 1, 1], [], []>} : vector<32x2048xbf16>, vector<2048x256xbf16>, vector<32x256xf32> -> vector<32x256xf32>
    %c0_3 = arith.constant 0 : index
    %c0_4 = arith.constant 0 : index
    %3 = vector.load %arg3[%c0_3, %c0_4] : memref<1x256xf32, #tpu.memory_space<vmem>>, vector<1x256xf32>
    %4 = vector.broadcast %3 : vector<1x256xf32> to vector<32x256xf32>
    %5 = arith.addf %2, %4 : vector<32x256xf32>
    %cst_5 = arith.constant 0.000000e+00 : f32
    %6 = vector.broadcast %cst_5 : f32 to vector<32x256xf32>
    %7 = arith.maximumf %5, %6 : vector<32x256xf32>
    %8 = arith.truncf %7 : vector<32x256xf32> to vector<32x256xbf16>
    %c0_6 = arith.constant 0 : index
    %c0_7 = arith.constant 0 : index
    %9 = vector.load %arg4[%c0_6, %c0_7] : memref<32x256xbf16, #tpu.memory_space<vmem>>, vector<32x256xbf16>
    tpu.vector_store %arg4[%c0_6, %c0_7], %8 {strides = array<i32>} : memref<32x256xbf16, #tpu.memory_space<vmem>>, vector<32x256xbf16>,
    return
  }
  func.func @transform_0(%arg0: i32) -> (i32, i32) {
    %c0_i32 = arith.constant 0 : i32
    %c0_i32_0 = arith.constant 0 : i32
    return %arg0, %c0_i32 : i32, i32
  }
  func.func @transform_1(%arg0: i32) -> (i32, i32) {
    %c0_i32 = arith.constant 0 : i32
    %c0_i32_0 = arith.constant 0 : i32
    %c0_i32_1 = arith.constant 0 : i32
    return %c0_i32, %c0_i32_0 : i32, i32
  }
  func.func @transform_2(%arg0: i32) -> (i32, i32) {
    %c0_i32 = arith.constant 0 : i32
    %c0_i32_0 = arith.constant 0 : i32
    %c0_i32_1 = arith.constant 0 : i32
    return %c0_i32, %c0_i32_0 : i32, i32
  }
  func.func @transform_3(%arg0: i32) -> (i32, i32) {
    %c0_i32 = arith.constant 0 : i32
    %c0_i32_0 = arith.constant 0 : i32
    return %arg0, %c0_i32 : i32, i32
  }
}

module attributes {stable_mosaic.version = 11 : i64} {
  func.func @_head_kernel(%arg0: i32, %arg1: memref<16x1xbf16, #tpu.memory_space<vmem>>, %arg2: memref<16x1xbf16, #tpu.memory_space<vmem>>, %arg3: memref<1x16x256xbf16, #tpu.memory_space<vmem>>, %arg4: memref<9x256x512xbf16, #tpu.memory_space<vmem>>, %arg5: memref<1x512xf32, #tpu.memory_space<vmem>>, %arg6: memref<9x256x256xbf16, #tpu.memory_space<vmem>>, %arg7: memref<1x256xf32, #tpu.memory_space<vmem>>, %arg8: memref<9x256x256xbf16, #tpu.memory_space<vmem>>, %arg9: memref<1x256xf32, #tpu.memory_space<vmem>>, %arg10: memref<9x512x128xbf16, #tpu.memory_space<vmem>>, %arg11: memref<1x128xf32, #tpu.memory_space<vmem>>, %arg12: memref<1x16x128xf32, #tpu.memory_space<vmem>>, %arg13: memref<40x256xf32, #tpu.memory_space<vmem>>, %arg14: memref<40x512xf32, #tpu.memory_space<vmem>>, %arg15: memref<40x512xf32, #tpu.memory_space<vmem>>) attributes {dimension_semantics = [#tpu.dimension_semantics<parallel>], iteration_bounds = array<i64: 2>, scalar_prefetch = 0 : i64, scratch_operands = 3 : i64, tpu.core_type = #tpu.core_type<tc>, window_params = [{pipeline_mode = #tpu.pipeline_mode<synchronous>, transform_indices = @transform_0, window_bounds = array<i64: 16, 1>}, {pipeline_mode = #tpu.pipeline_mode<synchronous>, transform_indices = @transform_1, window_bounds = array<i64: 16, 1>}, {transform_indices = @transform_2, window_bounds = array<i64: 1, 16, 256>}, {pipeline_mode = #tpu.pipeline_mode<synchronous>, transform_indices = @transform_3, window_bounds = array<i64: 9, 256, 512>}, {pipeline_mode = #tpu.pipeline_mode<synchronous>, transform_indices = @transform_4, window_bounds = array<i64: 1, 512>}, {pipeline_mode = #tpu.pipeline_mode<synchronous>, transform_indices = @transform_5, window_bounds = array<i64: 9, 256, 256>}, {pipeline_mode = #tpu.pipeline_mode<synchronous>, transform_indices = @transform_6, window_bounds = array<i64: 1, 256>}, {pipeline_mode = #tpu.pipeline_mode<synchronous>, transform_indices = @transform_7, window_bounds = array<i64: 9, 256, 256>}, {pipeline_mode = #tpu.pipeline_mode<synchronous>, transform_indices = @transform_8, window_bounds = array<i64: 1, 256>}, {pipeline_mode = #tpu.pipeline_mode<synchronous>, transform_indices = @transform_9, window_bounds = array<i64: 9, 512, 128>}, {pipeline_mode = #tpu.pipeline_mode<synchronous>, transform_indices = @transform_10, window_bounds = array<i64: 1, 128>}, {transform_indices = @transform_11, window_bounds = array<i64: 1, 16, 128>}]} {
    %c0 = arith.constant 0 : index
    %c0_0 = arith.constant 0 : index
    %0 = vector.load %arg1[%c0, %c0_0] : memref<16x1xbf16, #tpu.memory_space<vmem>>, vector<16x1xbf16>
    %c0_1 = arith.constant 0 : index
    %c0_2 = arith.constant 0 : index
    %1 = vector.load %arg2[%c0_1, %c0_2] : memref<16x1xbf16, #tpu.memory_space<vmem>>, vector<16x1xbf16>
    %cst = arith.constant 0.000000e+00 : f32
    %2 = vector.broadcast %cst : f32 to vector<40x256xf32>
    %c0_3 = arith.constant 0 : index
    %c0_4 = arith.constant 0 : index
    %3 = vector.load %arg13[%c0_3, %c0_4] : memref<40x256xf32, #tpu.memory_space<vmem>>, vector<40x256xf32>
    tpu.vector_store %arg13[%c0_3, %c0_4], %2 {strides = array<i32>} : memref<40x256xf32, #tpu.memory_space<vmem>>, vector<40x256xf32>,
    %c0_5 = arith.constant 0 : index
    %c0_6 = arith.constant 0 : index
    %c0_7 = arith.constant 0 : index
    %4 = vector.load %arg3[%c0_5, %c0_6, %c0_7] : memref<1x16x256xbf16, #tpu.memory_space<vmem>>, vector<1x16x256xbf16>
    %5 = vector.shape_cast %4 : vector<1x16x256xbf16> to vector<16x256xbf16>
    %6 = arith.extf %5 : vector<16x256xbf16> to vector<16x256xf32>
    %c12 = arith.constant 12 : index
    %c0_8 = arith.constant 0 : index
    %7 = vector.load %arg13[%c12, %c0_8] : memref<40x256xf32, #tpu.memory_space<vmem>>, vector<16x256xf32>
    tpu.vector_store %arg13[%c12, %c0_8], %6 {strides = array<i32>} : memref<40x256xf32, #tpu.memory_space<vmem>>, vector<16x256xf32>,
    %cst_9 = arith.constant 0.000000e+00 : f32
    %8 = vector.broadcast %cst_9 : f32 to vector<16x512xf32>
    %c7 = arith.constant 7 : index
    %c0_10 = arith.constant 0 : index
    %9 = vector.load %arg13[%c7, %c0_10] : memref<40x256xf32, #tpu.memory_space<vmem>>, vector<16x256xf32>
    %10 = arith.truncf %9 : vector<16x256xf32> to vector<16x256xbf16>
    %11 = vector.broadcast %0 : vector<16x1xbf16> to vector<16x256xbf16>
    %12 = arith.mulf %10, %11 : vector<16x256xbf16>
    %c0_11 = arith.constant 0 : index
    %c0_12 = arith.constant 0 : index
    %c0_13 = arith.constant 0 : index
    %13 = vector.load %arg4[%c0_11, %c0_12, %c0_13] : memref<9x256x512xbf16, #tpu.memory_space<vmem>>, vector<1x256x512xbf16>
    %14 = vector.shape_cast %13 : vector<1x256x512xbf16> to vector<256x512xbf16>
    %cst_14 = arith.constant dense<0.000000e+00> : vector<16x512xf32>
    %15 = tpu.matmul %12, %14, %cst_14 {dimension_numbers = #tpu.dot_dimension_numbers<[1], [0], [0], [1], [0, 0, 1, 1], [], []>} : vector<16x256xbf16>, vector<256x512xbf16>, vector<16x512xf32> -> vector<16x512xf32>
    %16 = arith.addf %8, %15 : vector<16x512xf32>
    %c8 = arith.constant 8 : index
    %c0_15 = arith.constant 0 : index
    %17 = vector.load %arg13[%c8, %c0_15] : memref<40x256xf32, #tpu.memory_space<vmem>>, vector<16x256xf32>
    %18 = arith.truncf %17 : vector<16x256xf32> to vector<16x256xbf16>
    %c1 = arith.constant 1 : index
    %c0_16 = arith.constant 0 : index
    %c0_17 = arith.constant 0 : index
    %19 = vector.load %arg4[%c1, %c0_16, %c0_17] : memref<9x256x512xbf16, #tpu.memory_space<vmem>>, vector<1x256x512xbf16>
    %20 = vector.shape_cast %19 : vector<1x256x512xbf16> to vector<256x512xbf16>
    %cst_18 = arith.constant dense<0.000000e+00> : vector<16x512xf32>
    %21 = tpu.matmul %18, %20, %cst_18 {dimension_numbers = #tpu.dot_dimension_numbers<[1], [0], [0], [1], [0, 0, 1, 1], [], []>} : vector<16x256xbf16>, vector<256x512xbf16>, vector<16x512xf32> -> vector<16x512xf32>
    %22 = arith.addf %16, %21 : vector<16x512xf32>
    %c9 = arith.constant 9 : index
    %c0_19 = arith.constant 0 : index
    %23 = vector.load %arg13[%c9, %c0_19] : memref<40x256xf32, #tpu.memory_space<vmem>>, vector<16x256xf32>
    %24 = arith.truncf %23 : vector<16x256xf32> to vector<16x256xbf16>
    %25 = vector.broadcast %1 : vector<16x1xbf16> to vector<16x256xbf16>
    %26 = arith.mulf %24, %25 : vector<16x256xbf16>
    %c2 = arith.constant 2 : index
    %c0_20 = arith.constant 0 : index
    %c0_21 = arith.constant 0 : index
    %27 = vector.load %arg4[%c2, %c0_20, %c0_21] : memref<9x256x512xbf16, #tpu.memory_space<vmem>>, vector<1x256x512xbf16>
    %28 = vector.shape_cast %27 : vector<1x256x512xbf16> to vector<256x512xbf16>
    %cst_22 = arith.constant dense<0.000000e+00> : vector<16x512xf32>
    %29 = tpu.matmul %26, %28, %cst_22 {dimension_numbers = #tpu.dot_dimension_numbers<[1], [0], [0], [1], [0, 0, 1, 1], [], []>} : vector<16x256xbf16>, vector<256x512xbf16>, vector<16x512xf32> -> vector<16x512xf32>
    %30 = arith.addf %22, %29 : vector<16x512xf32>
    %c11 = arith.constant 11 : index
    %c0_23 = arith.constant 0 : index
    %31 = vector.load %arg13[%c11, %c0_23] : memref<40x256xf32, #tpu.memory_space<vmem>>, vector<16x256xf32>
    %32 = arith.truncf %31 : vector<16x256xf32> to vector<16x256xbf16>
    %33 = vector.broadcast %0 : vector<16x1xbf16> to vector<16x256xbf16>
    %34 = arith.mulf %32, %33 : vector<16x256xbf16>
    %c3 = arith.constant 3 : index
    %c0_24 = arith.constant 0 : index
    %c0_25 = arith.constant 0 : index
    %35 = vector.load %arg4[%c3, %c0_24, %c0_25] : memref<9x256x512xbf16, #tpu.memory_space<vmem>>, vector<1x256x512xbf16>
    %36 = vector.shape_cast %35 : vector<1x256x512xbf16> to vector<256x512xbf16>
    %cst_26 = arith.constant dense<0.000000e+00> : vector<16x512xf32>
    %37 = tpu.matmul %34, %36, %cst_26 {dimension_numbers = #tpu.dot_dimension_numbers<[1], [0], [0], [1], [0, 0, 1, 1], [], []>} : vector<16x256xbf16>, vector<256x512xbf16>, vector<16x512xf32> -> vector<16x512xf32>
    %38 = arith.addf %30, %37 : vector<16x512xf32>
    %c12_27 = arith.constant 12 : index
    %c0_28 = arith.constant 0 : index
    %39 = vector.load %arg13[%c12_27, %c0_28] : memref<40x256xf32, #tpu.memory_space<vmem>>, vector<16x256xf32>
    %40 = arith.truncf %39 : vector<16x256xf32> to vector<16x256xbf16>
    %c4 = arith.constant 4 : index
    %c0_29 = arith.constant 0 : index
    %c0_30 = arith.constant 0 : index
    %41 = vector.load %arg4[%c4, %c0_29, %c0_30] : memref<9x256x512xbf16, #tpu.memory_space<vmem>>, vector<1x256x512xbf16>
    %42 = vector.shape_cast %41 : vector<1x256x512xbf16> to vector<256x512xbf16>
    %cst_31 = arith.constant dense<0.000000e+00> : vector<16x512xf32>
    %43 = tpu.matmul %40, %42, %cst_31 {dimension_numbers = #tpu.dot_dimension_numbers<[1], [0], [0], [1], [0, 0, 1, 1], [], []>} : vector<16x256xbf16>, vector<256x512xbf16>, vector<16x512xf32> -> vector<16x512xf32>
    %44 = arith.addf %38, %43 : vector<16x512xf32>
    %c13 = arith.constant 13 : index
    %c0_32 = arith.constant 0 : index
    %45 = vector.load %arg13[%c13, %c0_32] : memref<40x256xf32, #tpu.memory_space<vmem>>, vector<16x256xf32>
    %46 = arith.truncf %45 : vector<16x256xf32> to vector<16x256xbf16>
    %47 = vector.broadcast %1 : vector<16x1xbf16> to vector<16x256xbf16>
    %48 = arith.mulf %46, %47 : vector<16x256xbf16>
    %c5 = arith.constant 5 : index
    %c0_33 = arith.constant 0 : index
    %c0_34 = arith.constant 0 : index
    %49 = vector.load %arg4[%c5, %c0_33, %c0_34] : memref<9x256x512xbf16, #tpu.memory_space<vmem>>, vector<1x256x512xbf16>
    %50 = vector.shape_cast %49 : vector<1x256x512xbf16> to vector<256x512xbf16>
    %cst_35 = arith.constant dense<0.000000e+00> : vector<16x512xf32>
    %51 = tpu.matmul %48, %50, %cst_35 {dimension_numbers = #tpu.dot_dimension_numbers<[1], [0], [0], [1], [0, 0, 1, 1], [], []>} : vector<16x256xbf16>, vector<256x512xbf16>, vector<16x512xf32> -> vector<16x512xf32>
    %52 = arith.addf %44, %51 : vector<16x512xf32>
    %c15 = arith.constant 15 : index
    %c0_36 = arith.constant 0 : index
    %53 = vector.load %arg13[%c15, %c0_36] : memref<40x256xf32, #tpu.memory_space<vmem>>, vector<16x256xf32>
    %54 = arith.truncf %53 : vector<16x256xf32> to vector<16x256xbf16>
    %55 = vector.broadcast %0 : vector<16x1xbf16> to vector<16x256xbf16>
    %56 = arith.mulf %54, %55 : vector<16x256xbf16>
    %c6 = arith.constant 6 : index
    %c0_37 = arith.constant 0 : index
    %c0_38 = arith.constant 0 : index
    %57 = vector.load %arg4[%c6, %c0_37, %c0_38] : memref<9x256x512xbf16, #tpu.memory_space<vmem>>, vector<1x256x512xbf16>
    %58 = vector.shape_cast %57 : vector<1x256x512xbf16> to vector<256x512xbf16>
    %cst_39 = arith.constant dense<0.000000e+00> : vector<16x512xf32>
    %59 = tpu.matmul %56, %58, %cst_39 {dimension_numbers = #tpu.dot_dimension_numbers<[1], [0], [0], [1], [0, 0, 1, 1], [], []>} : vector<16x256xbf16>, vector<256x512xbf16>, vector<16x512xf32> -> vector<16x512xf32>
    %60 = arith.addf %52, %59 : vector<16x512xf32>
    %c16 = arith.constant 16 : index
    %c0_40 = arith.constant 0 : index
    %61 = vector.load %arg13[%c16, %c0_40] : memref<40x256xf32, #tpu.memory_space<vmem>>, vector<16x256xf32>
    %62 = arith.truncf %61 : vector<16x256xf32> to vector<16x256xbf16>
    %c7_41 = arith.constant 7 : index
    %c0_42 = arith.constant 0 : index
    %c0_43 = arith.constant 0 : index
    %63 = vector.load %arg4[%c7_41, %c0_42, %c0_43] : memref<9x256x512xbf16, #tpu.memory_space<vmem>>, vector<1x256x512xbf16>
    %64 = vector.shape_cast %63 : vector<1x256x512xbf16> to vector<256x512xbf16>
    %cst_44 = arith.constant dense<0.000000e+00> : vector<16x512xf32>
    %65 = tpu.matmul %62, %64, %cst_44 {dimension_numbers = #tpu.dot_dimension_numbers<[1], [0], [0], [1], [0, 0, 1, 1], [], []>} : vector<16x256xbf16>, vector<256x512xbf16>, vector<16x512xf32> -> vector<16x512xf32>
    %66 = arith.addf %60, %65 : vector<16x512xf32>
    %c17 = arith.constant 17 : index
    %c0_45 = arith.constant 0 : index
    %67 = vector.load %arg13[%c17, %c0_45] : memref<40x256xf32, #tpu.memory_space<vmem>>, vector<16x256xf32>
    %68 = arith.truncf %67 : vector<16x256xf32> to vector<16x256xbf16>
    %69 = vector.broadcast %1 : vector<16x1xbf16> to vector<16x256xbf16>
    %70 = arith.mulf %68, %69 : vector<16x256xbf16>
    %c8_46 = arith.constant 8 : index
    %c0_47 = arith.constant 0 : index
    %c0_48 = arith.constant 0 : index
    %71 = vector.load %arg4[%c8_46, %c0_47, %c0_48] : memref<9x256x512xbf16, #tpu.memory_space<vmem>>, vector<1x256x512xbf16>
    %72 = vector.shape_cast %71 : vector<1x256x512xbf16> to vector<256x512xbf16>
    %cst_49 = arith.constant dense<0.000000e+00> : vector<16x512xf32>
    %73 = tpu.matmul %70, %72, %cst_49 {dimension_numbers = #tpu.dot_dimension_numbers<[1], [0], [0], [1], [0, 0, 1, 1], [], []>} : vector<16x256xbf16>, vector<256x512xbf16>, vector<16x512xf32> -> vector<16x512xf32>
    %74 = arith.addf %66, %73 : vector<16x512xf32>
    %c0_50 = arith.constant 0 : index
    %c0_51 = arith.constant 0 : index
    %75 = vector.load %arg5[%c0_50, %c0_51] : memref<1x512xf32, #tpu.memory_space<vmem>>, vector<1x512xf32>
    %76 = vector.broadcast %75 : vector<1x512xf32> to vector<16x512xf32>
    %77 = arith.addf %74, %76 : vector<16x512xf32>
    %cst_52 = arith.constant 0.000000e+00 : f32
    %78 = vector.broadcast %cst_52 : f32 to vector<16x512xf32>
    %79 = arith.maximumf %77, %78 : vector<16x512xf32>
    %cst_53 = arith.constant 0.000000e+00 : f32
    %80 = vector.broadcast %cst_53 : f32 to vector<40x512xf32>
    %c0_54 = arith.constant 0 : index
    %c0_55 = arith.constant 0 : index
    %81 = vector.load %arg14[%c0_54, %c0_55] : memref<40x512xf32, #tpu.memory_space<vmem>>, vector<40x512xf32>
    tpu.vector_store %arg14[%c0_54, %c0_55], %80 {strides = array<i32>} : memref<40x512xf32, #tpu.memory_space<vmem>>, vector<40x512xf32>,
    %c12_56 = arith.constant 12 : index
    %c0_57 = arith.constant 0 : index
    %82 = vector.load %arg14[%c12_56, %c0_57] : memref<40x512xf32, #tpu.memory_space<vmem>>, vector<16x512xf32>
    tpu.vector_store %arg14[%c12_56, %c0_57], %79 {strides = array<i32>} : memref<40x512xf32, #tpu.memory_space<vmem>>, vector<16x512xf32>,
    %cst_58 = arith.constant 0.000000e+00 : f32
    %83 = vector.broadcast %cst_58 : f32 to vector<16x256xf32>
    %cst_59 = arith.constant 0.000000e+00 : f32
    %84 = vector.broadcast %cst_59 : f32 to vector<16x256xf32>
    %c7_60 = arith.constant 7 : index
    %c0_61 = arith.constant 0 : index
    %85 = vector.load %arg14[%c7_60, %c0_61] : memref<40x512xf32, #tpu.memory_space<vmem>>, vector<16x512xf32>
    %86 = arith.truncf %85 : vector<16x512xf32> to vector<16x512xbf16>
    %87 = vector.broadcast %0 : vector<16x1xbf16> to vector<16x512xbf16>
    %88 = arith.mulf %86, %87 : vector<16x512xbf16>
    %89 = vector.extract_strided_slice %88 {offsets = [0, 0], sizes = [16, 256], strides = [1, 1]} : vector<16x512xbf16> to vector<16x256xbf16>
    %c0_62 = arith.constant 0 : index
    %c0_63 = arith.constant 0 : index
    %c0_64 = arith.constant 0 : index
    %90 = vector.load %arg6[%c0_62, %c0_63, %c0_64] : memref<9x256x256xbf16, #tpu.memory_space<vmem>>, vector<1x256x256xbf16>
    %91 = vector.shape_cast %90 : vector<1x256x256xbf16> to vector<256x256xbf16>
    %cst_65 = arith.constant dense<0.000000e+00> : vector<16x256xf32>
    %92 = tpu.matmul %89, %91, %cst_65 {dimension_numbers = #tpu.dot_dimension_numbers<[1], [0], [0], [1], [0, 0, 1, 1], [], []>} : vector<16x256xbf16>, vector<256x256xbf16>, vector<16x256xf32> -> vector<16x256xf32>
    %93 = arith.addf %83, %92 : vector<16x256xf32>
    %94 = vector.extract_strided_slice %88 {offsets = [0, 256], sizes = [16, 256], strides = [1, 1]} : vector<16x512xbf16> to vector<16x256xbf16>
    %c0_66 = arith.constant 0 : index
    %c0_67 = arith.constant 0 : index
    %c0_68 = arith.constant 0 : index
    %95 = vector.load %arg8[%c0_66, %c0_67, %c0_68] : memref<9x256x256xbf16, #tpu.memory_space<vmem>>, vector<1x256x256xbf16>
    %96 = vector.shape_cast %95 : vector<1x256x256xbf16> to vector<256x256xbf16>
    %cst_69 = arith.constant dense<0.000000e+00> : vector<16x256xf32>
    %97 = tpu.matmul %94, %96, %cst_69 {dimension_numbers = #tpu.dot_dimension_numbers<[1], [0], [0], [1], [0, 0, 1, 1], [], []>} : vector<16x256xbf16>, vector<256x256xbf16>, vector<16x256xf32> -> vector<16x256xf32>
    %98 = arith.addf %84, %97 : vector<16x256xf32>
    %c8_70 = arith.constant 8 : index
    %c0_71 = arith.constant 0 : index
    %99 = vector.load %arg14[%c8_70, %c0_71] : memref<40x512xf32, #tpu.memory_space<vmem>>, vector<16x512xf32>
    %100 = arith.truncf %99 : vector<16x512xf32> to vector<16x512xbf16>
    %101 = vector.extract_strided_slice %100 {offsets = [0, 0], sizes = [16, 256], strides = [1, 1]} : vector<16x512xbf16> to vector<16x256xbf16>
    %c1_72 = arith.constant 1 : index
    %c0_73 = arith.constant 0 : index
    %c0_74 = arith.constant 0 : index
    %102 = vector.load %arg6[%c1_72, %c0_73, %c0_74] : memref<9x256x256xbf16, #tpu.memory_space<vmem>>, vector<1x256x256xbf16>
    %103 = vector.shape_cast %102 : vector<1x256x256xbf16> to vector<256x256xbf16>
    %cst_75 = arith.constant dense<0.000000e+00> : vector<16x256xf32>
    %104 = tpu.matmul %101, %103, %cst_75 {dimension_numbers = #tpu.dot_dimension_numbers<[1], [0], [0], [1], [0, 0, 1, 1], [], []>} : vector<16x256xbf16>, vector<256x256xbf16>, vector<16x256xf32> -> vector<16x256xf32>
    %105 = arith.addf %93, %104 : vector<16x256xf32>
    %106 = vector.extract_strided_slice %100 {offsets = [0, 256], sizes = [16, 256], strides = [1, 1]} : vector<16x512xbf16> to vector<16x256xbf16>
    %c1_76 = arith.constant 1 : index
    %c0_77 = arith.constant 0 : index
    %c0_78 = arith.constant 0 : index
    %107 = vector.load %arg8[%c1_76, %c0_77, %c0_78] : memref<9x256x256xbf16, #tpu.memory_space<vmem>>, vector<1x256x256xbf16>
    %108 = vector.shape_cast %107 : vector<1x256x256xbf16> to vector<256x256xbf16>
    %cst_79 = arith.constant dense<0.000000e+00> : vector<16x256xf32>
    %109 = tpu.matmul %106, %108, %cst_79 {dimension_numbers = #tpu.dot_dimension_numbers<[1], [0], [0], [1], [0, 0, 1, 1], [], []>} : vector<16x256xbf16>, vector<256x256xbf16>, vector<16x256xf32> -> vector<16x256xf32>
    %110 = arith.addf %98, %109 : vector<16x256xf32>
    %c9_80 = arith.constant 9 : index
    %c0_81 = arith.constant 0 : index
    %111 = vector.load %arg14[%c9_80, %c0_81] : memref<40x512xf32, #tpu.memory_space<vmem>>, vector<16x512xf32>
    %112 = arith.truncf %111 : vector<16x512xf32> to vector<16x512xbf16>
    %113 = vector.broadcast %1 : vector<16x1xbf16> to vector<16x512xbf16>
    %114 = arith.mulf %112, %113 : vector<16x512xbf16>
    %115 = vector.extract_strided_slice %114 {offsets = [0, 0], sizes = [16, 256], strides = [1, 1]} : vector<16x512xbf16> to vector<16x256xbf16>
    %c2_82 = arith.constant 2 : index
    %c0_83 = arith.constant 0 : index
    %c0_84 = arith.constant 0 : index
    %116 = vector.load %arg6[%c2_82, %c0_83, %c0_84] : memref<9x256x256xbf16, #tpu.memory_space<vmem>>, vector<1x256x256xbf16>
    %117 = vector.shape_cast %116 : vector<1x256x256xbf16> to vector<256x256xbf16>
    %cst_85 = arith.constant dense<0.000000e+00> : vector<16x256xf32>
    %118 = tpu.matmul %115, %117, %cst_85 {dimension_numbers = #tpu.dot_dimension_numbers<[1], [0], [0], [1], [0, 0, 1, 1], [], []>} : vector<16x256xbf16>, vector<256x256xbf16>, vector<16x256xf32> -> vector<16x256xf32>
    %119 = arith.addf %105, %118 : vector<16x256xf32>
    %120 = vector.extract_strided_slice %114 {offsets = [0, 256], sizes = [16, 256], strides = [1, 1]} : vector<16x512xbf16> to vector<16x256xbf16>
    %c2_86 = arith.constant 2 : index
    %c0_87 = arith.constant 0 : index
    %c0_88 = arith.constant 0 : index
    %121 = vector.load %arg8[%c2_86, %c0_87, %c0_88] : memref<9x256x256xbf16, #tpu.memory_space<vmem>>, vector<1x256x256xbf16>
    %122 = vector.shape_cast %121 : vector<1x256x256xbf16> to vector<256x256xbf16>
    %cst_89 = arith.constant dense<0.000000e+00> : vector<16x256xf32>
    %123 = tpu.matmul %120, %122, %cst_89 {dimension_numbers = #tpu.dot_dimension_numbers<[1], [0], [0], [1], [0, 0, 1, 1], [], []>} : vector<16x256xbf16>, vector<256x256xbf16>, vector<16x256xf32> -> vector<16x256xf32>
    %124 = arith.addf %110, %123 : vector<16x256xf32>
    %c11_90 = arith.constant 11 : index
    %c0_91 = arith.constant 0 : index
    %125 = vector.load %arg14[%c11_90, %c0_91] : memref<40x512xf32, #tpu.memory_space<vmem>>, vector<16x512xf32>
    %126 = arith.truncf %125 : vector<16x512xf32> to vector<16x512xbf16>
    %127 = vector.broadcast %0 : vector<16x1xbf16> to vector<16x512xbf16>
    %128 = arith.mulf %126, %127 : vector<16x512xbf16>
    %129 = vector.extract_strided_slice %128 {offsets = [0, 0], sizes = [16, 256], strides = [1, 1]} : vector<16x512xbf16> to vector<16x256xbf16>
    %c3_92 = arith.constant 3 : index
    %c0_93 = arith.constant 0 : index
    %c0_94 = arith.constant 0 : index
    %130 = vector.load %arg6[%c3_92, %c0_93, %c0_94] : memref<9x256x256xbf16, #tpu.memory_space<vmem>>, vector<1x256x256xbf16>
    %131 = vector.shape_cast %130 : vector<1x256x256xbf16> to vector<256x256xbf16>
    %cst_95 = arith.constant dense<0.000000e+00> : vector<16x256xf32>
    %132 = tpu.matmul %129, %131, %cst_95 {dimension_numbers = #tpu.dot_dimension_numbers<[1], [0], [0], [1], [0, 0, 1, 1], [], []>} : vector<16x256xbf16>, vector<256x256xbf16>, vector<16x256xf32> -> vector<16x256xf32>
    %133 = arith.addf %119, %132 : vector<16x256xf32>
    %134 = vector.extract_strided_slice %128 {offsets = [0, 256], sizes = [16, 256], strides = [1, 1]} : vector<16x512xbf16> to vector<16x256xbf16>
    %c3_96 = arith.constant 3 : index
    %c0_97 = arith.constant 0 : index
    %c0_98 = arith.constant 0 : index
    %135 = vector.load %arg8[%c3_96, %c0_97, %c0_98] : memref<9x256x256xbf16, #tpu.memory_space<vmem>>, vector<1x256x256xbf16>
    %136 = vector.shape_cast %135 : vector<1x256x256xbf16> to vector<256x256xbf16>
    %cst_99 = arith.constant dense<0.000000e+00> : vector<16x256xf32>
    %137 = tpu.matmul %134, %136, %cst_99 {dimension_numbers = #tpu.dot_dimension_numbers<[1], [0], [0], [1], [0, 0, 1, 1], [], []>} : vector<16x256xbf16>, vector<256x256xbf16>, vector<16x256xf32> -> vector<16x256xf32>
    %138 = arith.addf %124, %137 : vector<16x256xf32>
    %c12_100 = arith.constant 12 : index
    %c0_101 = arith.constant 0 : index
    %139 = vector.load %arg14[%c12_100, %c0_101] : memref<40x512xf32, #tpu.memory_space<vmem>>, vector<16x512xf32>
    %140 = arith.truncf %139 : vector<16x512xf32> to vector<16x512xbf16>
    %141 = vector.extract_strided_slice %140 {offsets = [0, 0], sizes = [16, 256], strides = [1, 1]} : vector<16x512xbf16> to vector<16x256xbf16>
    %c4_102 = arith.constant 4 : index
    %c0_103 = arith.constant 0 : index
    %c0_104 = arith.constant 0 : index
    %142 = vector.load %arg6[%c4_102, %c0_103, %c0_104] : memref<9x256x256xbf16, #tpu.memory_space<vmem>>, vector<1x256x256xbf16>
    %143 = vector.shape_cast %142 : vector<1x256x256xbf16> to vector<256x256xbf16>
    %cst_105 = arith.constant dense<0.000000e+00> : vector<16x256xf32>
    %144 = tpu.matmul %141, %143, %cst_105 {dimension_numbers = #tpu.dot_dimension_numbers<[1], [0], [0], [1], [0, 0, 1, 1], [], []>} : vector<16x256xbf16>, vector<256x256xbf16>, vector<16x256xf32> -> vector<16x256xf32>
    %145 = arith.addf %133, %144 : vector<16x256xf32>
    %146 = vector.extract_strided_slice %140 {offsets = [0, 256], sizes = [16, 256], strides = [1, 1]} : vector<16x512xbf16> to vector<16x256xbf16>
    %c4_106 = arith.constant 4 : index
    %c0_107 = arith.constant 0 : index
    %c0_108 = arith.constant 0 : index
    %147 = vector.load %arg8[%c4_106, %c0_107, %c0_108] : memref<9x256x256xbf16, #tpu.memory_space<vmem>>, vector<1x256x256xbf16>
    %148 = vector.shape_cast %147 : vector<1x256x256xbf16> to vector<256x256xbf16>
    %cst_109 = arith.constant dense<0.000000e+00> : vector<16x256xf32>
    %149 = tpu.matmul %146, %148, %cst_109 {dimension_numbers = #tpu.dot_dimension_numbers<[1], [0], [0], [1], [0, 0, 1, 1], [], []>} : vector<16x256xbf16>, vector<256x256xbf16>, vector<16x256xf32> -> vector<16x256xf32>
    %150 = arith.addf %138, %149 : vector<16x256xf32>
    %c13_110 = arith.constant 13 : index
    %c0_111 = arith.constant 0 : index
    %151 = vector.load %arg14[%c13_110, %c0_111] : memref<40x512xf32, #tpu.memory_space<vmem>>, vector<16x512xf32>
    %152 = arith.truncf %151 : vector<16x512xf32> to vector<16x512xbf16>
    %153 = vector.broadcast %1 : vector<16x1xbf16> to vector<16x512xbf16>
    %154 = arith.mulf %152, %153 : vector<16x512xbf16>
    %155 = vector.extract_strided_slice %154 {offsets = [0, 0], sizes = [16, 256], strides = [1, 1]} : vector<16x512xbf16> to vector<16x256xbf16>
    %c5_112 = arith.constant 5 : index
    %c0_113 = arith.constant 0 : index
    %c0_114 = arith.constant 0 : index
    %156 = vector.load %arg6[%c5_112, %c0_113, %c0_114] : memref<9x256x256xbf16, #tpu.memory_space<vmem>>, vector<1x256x256xbf16>
    %157 = vector.shape_cast %156 : vector<1x256x256xbf16> to vector<256x256xbf16>
    %cst_115 = arith.constant dense<0.000000e+00> : vector<16x256xf32>
    %158 = tpu.matmul %155, %157, %cst_115 {dimension_numbers = #tpu.dot_dimension_numbers<[1], [0], [0], [1], [0, 0, 1, 1], [], []>} : vector<16x256xbf16>, vector<256x256xbf16>, vector<16x256xf32> -> vector<16x256xf32>
    %159 = arith.addf %145, %158 : vector<16x256xf32>
    %160 = vector.extract_strided_slice %154 {offsets = [0, 256], sizes = [16, 256], strides = [1, 1]} : vector<16x512xbf16> to vector<16x256xbf16>
    %c5_116 = arith.constant 5 : index
    %c0_117 = arith.constant 0 : index
    %c0_118 = arith.constant 0 : index
    %161 = vector.load %arg8[%c5_116, %c0_117, %c0_118] : memref<9x256x256xbf16, #tpu.memory_space<vmem>>, vector<1x256x256xbf16>
    %162 = vector.shape_cast %161 : vector<1x256x256xbf16> to vector<256x256xbf16>
    %cst_119 = arith.constant dense<0.000000e+00> : vector<16x256xf32>
    %163 = tpu.matmul %160, %162, %cst_119 {dimension_numbers = #tpu.dot_dimension_numbers<[1], [0], [0], [1], [0, 0, 1, 1], [], []>} : vector<16x256xbf16>, vector<256x256xbf16>, vector<16x256xf32> -> vector<16x256xf32>
    %164 = arith.addf %150, %163 : vector<16x256xf32>
    %c15_120 = arith.constant 15 : index
    %c0_121 = arith.constant 0 : index
    %165 = vector.load %arg14[%c15_120, %c0_121] : memref<40x512xf32, #tpu.memory_space<vmem>>, vector<16x512xf32>
    %166 = arith.truncf %165 : vector<16x512xf32> to vector<16x512xbf16>
    %167 = vector.broadcast %0 : vector<16x1xbf16> to vector<16x512xbf16>
    %168 = arith.mulf %166, %167 : vector<16x512xbf16>
    %169 = vector.extract_strided_slice %168 {offsets = [0, 0], sizes = [16, 256], strides = [1, 1]} : vector<16x512xbf16> to vector<16x256xbf16>
    %c6_122 = arith.constant 6 : index
    %c0_123 = arith.constant 0 : index
    %c0_124 = arith.constant 0 : index
    %170 = vector.load %arg6[%c6_122, %c0_123, %c0_124] : memref<9x256x256xbf16, #tpu.memory_space<vmem>>, vector<1x256x256xbf16>
    %171 = vector.shape_cast %170 : vector<1x256x256xbf16> to vector<256x256xbf16>
    %cst_125 = arith.constant dense<0.000000e+00> : vector<16x256xf32>
    %172 = tpu.matmul %169, %171, %cst_125 {dimension_numbers = #tpu.dot_dimension_numbers<[1], [0], [0], [1], [0, 0, 1, 1], [], []>} : vector<16x256xbf16>, vector<256x256xbf16>, vector<16x256xf32> -> vector<16x256xf32>
    %173 = arith.addf %159, %172 : vector<16x256xf32>
    %174 = vector.extract_strided_slice %168 {offsets = [0, 256], sizes = [16, 256], strides = [1, 1]} : vector<16x512xbf16> to vector<16x256xbf16>
    %c6_126 = arith.constant 6 : index
    %c0_127 = arith.constant 0 : index
    %c0_128 = arith.constant 0 : index
    %175 = vector.load %arg8[%c6_126, %c0_127, %c0_128] : memref<9x256x256xbf16, #tpu.memory_space<vmem>>, vector<1x256x256xbf16>
    %176 = vector.shape_cast %175 : vector<1x256x256xbf16> to vector<256x256xbf16>
    %cst_129 = arith.constant dense<0.000000e+00> : vector<16x256xf32>
    %177 = tpu.matmul %174, %176, %cst_129 {dimension_numbers = #tpu.dot_dimension_numbers<[1], [0], [0], [1], [0, 0, 1, 1], [], []>} : vector<16x256xbf16>, vector<256x256xbf16>, vector<16x256xf32> -> vector<16x256xf32>
    %178 = arith.addf %164, %177 : vector<16x256xf32>
    %c16_130 = arith.constant 16 : index
    %c0_131 = arith.constant 0 : index
    %179 = vector.load %arg14[%c16_130, %c0_131] : memref<40x512xf32, #tpu.memory_space<vmem>>, vector<16x512xf32>
    %180 = arith.truncf %179 : vector<16x512xf32> to vector<16x512xbf16>
    %181 = vector.extract_strided_slice %180 {offsets = [0, 0], sizes = [16, 256], strides = [1, 1]} : vector<16x512xbf16> to vector<16x256xbf16>
    %c7_132 = arith.constant 7 : index
    %c0_133 = arith.constant 0 : index
    %c0_134 = arith.constant 0 : index
    %182 = vector.load %arg6[%c7_132, %c0_133, %c0_134] : memref<9x256x256xbf16, #tpu.memory_space<vmem>>, vector<1x256x256xbf16>
    %183 = vector.shape_cast %182 : vector<1x256x256xbf16> to vector<256x256xbf16>
    %cst_135 = arith.constant dense<0.000000e+00> : vector<16x256xf32>
    %184 = tpu.matmul %181, %183, %cst_135 {dimension_numbers = #tpu.dot_dimension_numbers<[1], [0], [0], [1], [0, 0, 1, 1], [], []>} : vector<16x256xbf16>, vector<256x256xbf16>, vector<16x256xf32> -> vector<16x256xf32>
    %185 = arith.addf %173, %184 : vector<16x256xf32>
    %186 = vector.extract_strided_slice %180 {offsets = [0, 256], sizes = [16, 256], strides = [1, 1]} : vector<16x512xbf16> to vector<16x256xbf16>
    %c7_136 = arith.constant 7 : index
    %c0_137 = arith.constant 0 : index
    %c0_138 = arith.constant 0 : index
    %187 = vector.load %arg8[%c7_136, %c0_137, %c0_138] : memref<9x256x256xbf16, #tpu.memory_space<vmem>>, vector<1x256x256xbf16>
    %188 = vector.shape_cast %187 : vector<1x256x256xbf16> to vector<256x256xbf16>
    %cst_139 = arith.constant dense<0.000000e+00> : vector<16x256xf32>
    %189 = tpu.matmul %186, %188, %cst_139 {dimension_numbers = #tpu.dot_dimension_numbers<[1], [0], [0], [1], [0, 0, 1, 1], [], []>} : vector<16x256xbf16>, vector<256x256xbf16>, vector<16x256xf32> -> vector<16x256xf32>
    %190 = arith.addf %178, %189 : vector<16x256xf32>
    %c17_140 = arith.constant 17 : index
    %c0_141 = arith.constant 0 : index
    %191 = vector.load %arg14[%c17_140, %c0_141] : memref<40x512xf32, #tpu.memory_space<vmem>>, vector<16x512xf32>
    %192 = arith.truncf %191 : vector<16x512xf32> to vector<16x512xbf16>
    %193 = vector.broadcast %1 : vector<16x1xbf16> to vector<16x512xbf16>
    %194 = arith.mulf %192, %193 : vector<16x512xbf16>
    %195 = vector.extract_strided_slice %194 {offsets = [0, 0], sizes = [16, 256], strides = [1, 1]} : vector<16x512xbf16> to vector<16x256xbf16>
    %c8_142 = arith.constant 8 : index
    %c0_143 = arith.constant 0 : index
    %c0_144 = arith.constant 0 : index
    %196 = vector.load %arg6[%c8_142, %c0_143, %c0_144] : memref<9x256x256xbf16, #tpu.memory_space<vmem>>, vector<1x256x256xbf16>
    %197 = vector.shape_cast %196 : vector<1x256x256xbf16> to vector<256x256xbf16>
    %cst_145 = arith.constant dense<0.000000e+00> : vector<16x256xf32>
    %198 = tpu.matmul %195, %197, %cst_145 {dimension_numbers = #tpu.dot_dimension_numbers<[1], [0], [0], [1], [0, 0, 1, 1], [], []>} : vector<16x256xbf16>, vector<256x256xbf16>, vector<16x256xf32> -> vector<16x256xf32>
    %199 = arith.addf %185, %198 : vector<16x256xf32>
    %200 = vector.extract_strided_slice %194 {offsets = [0, 256], sizes = [16, 256], strides = [1, 1]} : vector<16x512xbf16> to vector<16x256xbf16>
    %c8_146 = arith.constant 8 : index
    %c0_147 = arith.constant 0 : index
    %c0_148 = arith.constant 0 : index
    %201 = vector.load %arg8[%c8_146, %c0_147, %c0_148] : memref<9x256x256xbf16, #tpu.memory_space<vmem>>, vector<1x256x256xbf16>
    %202 = vector.shape_cast %201 : vector<1x256x256xbf16> to vector<256x256xbf16>
    %cst_149 = arith.constant dense<0.000000e+00> : vector<16x256xf32>
    %203 = tpu.matmul %200, %202, %cst_149 {dimension_numbers = #tpu.dot_dimension_numbers<[1], [0], [0], [1], [0, 0, 1, 1], [], []>} : vector<16x256xbf16>, vector<256x256xbf16>, vector<16x256xf32> -> vector<16x256xf32>
    %204 = arith.addf %190, %203 : vector<16x256xf32>
    %c0_150 = arith.constant 0 : index
    %c0_151 = arith.constant 0 : index
    %205 = vector.load %arg7[%c0_150, %c0_151] : memref<1x256xf32, #tpu.memory_space<vmem>>, vector<1x256xf32>
    %206 = vector.broadcast %205 : vector<1x256xf32> to vector<16x256xf32>
    %207 = arith.addf %199, %206 : vector<16x256xf32>
    %cst_152 = arith.constant 0.000000e+00 : f32
    %208 = vector.broadcast %cst_152 : f32 to vector<16x256xf32>
    %209 = arith.maximumf %207, %208 : vector<16x256xf32>
    %c0_153 = arith.constant 0 : index
    %c0_154 = arith.constant 0 : index
    %210 = vector.load %arg9[%c0_153, %c0_154] : memref<1x256xf32, #tpu.memory_space<vmem>>, vector<1x256xf32>
    %211 = vector.broadcast %210 : vector<1x256xf32> to vector<16x256xf32>
    %212 = arith.addf %204, %211 : vector<16x256xf32>
    %cst_155 = arith.constant 0.000000e+00 : f32
    %213 = vector.broadcast %cst_155 : f32 to vector<16x256xf32>
    %214 = arith.maximumf %212, %213 : vector<16x256xf32>
    %cst_156 = arith.constant 0.000000e+00 : f32
    %215 = vector.broadcast %cst_156 : f32 to vector<40x512xf32>
    %c0_157 = arith.constant 0 : index
    %c0_158 = arith.constant 0 : index
    %216 = vector.load %arg15[%c0_157, %c0_158] : memref<40x512xf32, #tpu.memory_space<vmem>>, vector<40x512xf32>
    tpu.vector_store %arg15[%c0_157, %c0_158], %215 {strides = array<i32>} : memref<40x512xf32, #tpu.memory_space<vmem>>, vector<40x512xf32>,
    %c12_159 = arith.constant 12 : index
    %c0_160 = arith.constant 0 : index
    %217 = vector.load %arg15[%c12_159, %c0_160] : memref<40x512xf32, #tpu.memory_space<vmem>>, vector<16x256xf32>
    tpu.vector_store %arg15[%c12_159, %c0_160], %209 {strides = array<i32>} : memref<40x512xf32, #tpu.memory_space<vmem>>, vector<16x256xf32>,
    %c12_161 = arith.constant 12 : index
    %c256 = arith.constant 256 : index
    %218 = vector.load %arg15[%c12_161, %c256] : memref<40x512xf32, #tpu.memory_space<vmem>>, vector<16x256xf32>
    tpu.vector_store %arg15[%c12_161, %c256], %214 {strides = array<i32>} : memref<40x512xf32, #tpu.memory_space<vmem>>, vector<16x256xf32>,
    %cst_162 = arith.constant 0.000000e+00 : f32
    %219 = vector.broadcast %cst_162 : f32 to vector<16x128xf32>
    %c7_163 = arith.constant 7 : index
    %c0_164 = arith.constant 0 : index
    %220 = vector.load %arg15[%c7_163, %c0_164] : memref<40x512xf32, #tpu.memory_space<vmem>>, vector<16x512xf32>
    %221 = arith.truncf %220 : vector<16x512xf32> to vector<16x512xbf16>
    %222 = vector.broadcast %0 : vector<16x1xbf16> to vector<16x512xbf16>
    %223 = arith.mulf %221, %222 : vector<16x512xbf16>
    %c0_165 = arith.constant 0 : index
    %c0_166 = arith.constant 0 : index
    %c0_167 = arith.constant 0 : index
    %224 = vector.load %arg10[%c0_165, %c0_166, %c0_167] : memref<9x512x128xbf16, #tpu.memory_space<vmem>>, vector<1x512x128xbf16>
    %225 = vector.shape_cast %224 : vector<1x512x128xbf16> to vector<512x128xbf16>
    %cst_168 = arith.constant dense<0.000000e+00> : vector<16x128xf32>
    %226 = tpu.matmul %223, %225, %cst_168 {dimension_numbers = #tpu.dot_dimension_numbers<[1], [0], [0], [1], [0, 0, 1, 1], [], []>} : vector<16x512xbf16>, vector<512x128xbf16>, vector<16x128xf32> -> vector<16x128xf32>
    %227 = arith.addf %219, %226 : vector<16x128xf32>
    %c8_169 = arith.constant 8 : index
    %c0_170 = arith.constant 0 : index
    %228 = vector.load %arg15[%c8_169, %c0_170] : memref<40x512xf32, #tpu.memory_space<vmem>>, vector<16x512xf32>
    %229 = arith.truncf %228 : vector<16x512xf32> to vector<16x512xbf16>
    %c1_171 = arith.constant 1 : index
    %c0_172 = arith.constant 0 : index
    %c0_173 = arith.constant 0 : index
    %230 = vector.load %arg10[%c1_171, %c0_172, %c0_173] : memref<9x512x128xbf16, #tpu.memory_space<vmem>>, vector<1x512x128xbf16>
    %231 = vector.shape_cast %230 : vector<1x512x128xbf16> to vector<512x128xbf16>
    %cst_174 = arith.constant dense<0.000000e+00> : vector<16x128xf32>
    %232 = tpu.matmul %229, %231, %cst_174 {dimension_numbers = #tpu.dot_dimension_numbers<[1], [0], [0], [1], [0, 0, 1, 1], [], []>} : vector<16x512xbf16>, vector<512x128xbf16>, vector<16x128xf32> -> vector<16x128xf32>
    %233 = arith.addf %227, %232 : vector<16x128xf32>
    %c9_175 = arith.constant 9 : index
    %c0_176 = arith.constant 0 : index
    %234 = vector.load %arg15[%c9_175, %c0_176] : memref<40x512xf32, #tpu.memory_space<vmem>>, vector<16x512xf32>
    %235 = arith.truncf %234 : vector<16x512xf32> to vector<16x512xbf16>
    %236 = vector.broadcast %1 : vector<16x1xbf16> to vector<16x512xbf16>
    %237 = arith.mulf %235, %236 : vector<16x512xbf16>
    %c2_177 = arith.constant 2 : index
    %c0_178 = arith.constant 0 : index
    %c0_179 = arith.constant 0 : index
    %238 = vector.load %arg10[%c2_177, %c0_178, %c0_179] : memref<9x512x128xbf16, #tpu.memory_space<vmem>>, vector<1x512x128xbf16>
    %239 = vector.shape_cast %238 : vector<1x512x128xbf16> to vector<512x128xbf16>
    %cst_180 = arith.constant dense<0.000000e+00> : vector<16x128xf32>
    %240 = tpu.matmul %237, %239, %cst_180 {dimension_numbers = #tpu.dot_dimension_numbers<[1], [0], [0], [1], [0, 0, 1, 1], [], []>} : vector<16x512xbf16>, vector<512x128xbf16>, vector<16x128xf32> -> vector<16x128xf32>
    %241 = arith.addf %233, %240 : vector<16x128xf32>
    %c11_181 = arith.constant 11 : index
    %c0_182 = arith.constant 0 : index
    %242 = vector.load %arg15[%c11_181, %c0_182] : memref<40x512xf32, #tpu.memory_space<vmem>>, vector<16x512xf32>
    %243 = arith.truncf %242 : vector<16x512xf32> to vector<16x512xbf16>
    %244 = vector.broadcast %0 : vector<16x1xbf16> to vector<16x512xbf16>
    %245 = arith.mulf %243, %244 : vector<16x512xbf16>
    %c3_183 = arith.constant 3 : index
    %c0_184 = arith.constant 0 : index
    %c0_185 = arith.constant 0 : index
    %246 = vector.load %arg10[%c3_183, %c0_184, %c0_185] : memref<9x512x128xbf16, #tpu.memory_space<vmem>>, vector<1x512x128xbf16>
    %247 = vector.shape_cast %246 : vector<1x512x128xbf16> to vector<512x128xbf16>
    %cst_186 = arith.constant dense<0.000000e+00> : vector<16x128xf32>
    %248 = tpu.matmul %245, %247, %cst_186 {dimension_numbers = #tpu.dot_dimension_numbers<[1], [0], [0], [1], [0, 0, 1, 1], [], []>} : vector<16x512xbf16>, vector<512x128xbf16>, vector<16x128xf32> -> vector<16x128xf32>
    %249 = arith.addf %241, %248 : vector<16x128xf32>
    %c12_187 = arith.constant 12 : index
    %c0_188 = arith.constant 0 : index
    %250 = vector.load %arg15[%c12_187, %c0_188] : memref<40x512xf32, #tpu.memory_space<vmem>>, vector<16x512xf32>
    %251 = arith.truncf %250 : vector<16x512xf32> to vector<16x512xbf16>
    %c4_189 = arith.constant 4 : index
    %c0_190 = arith.constant 0 : index
    %c0_191 = arith.constant 0 : index
    %252 = vector.load %arg10[%c4_189, %c0_190, %c0_191] : memref<9x512x128xbf16, #tpu.memory_space<vmem>>, vector<1x512x128xbf16>
    %253 = vector.shape_cast %252 : vector<1x512x128xbf16> to vector<512x128xbf16>
    %cst_192 = arith.constant dense<0.000000e+00> : vector<16x128xf32>
    %254 = tpu.matmul %251, %253, %cst_192 {dimension_numbers = #tpu.dot_dimension_numbers<[1], [0], [0], [1], [0, 0, 1, 1], [], []>} : vector<16x512xbf16>, vector<512x128xbf16>, vector<16x128xf32> -> vector<16x128xf32>
    %255 = arith.addf %249, %254 : vector<16x128xf32>
    %c13_193 = arith.constant 13 : index
    %c0_194 = arith.constant 0 : index
    %256 = vector.load %arg15[%c13_193, %c0_194] : memref<40x512xf32, #tpu.memory_space<vmem>>, vector<16x512xf32>
    %257 = arith.truncf %256 : vector<16x512xf32> to vector<16x512xbf16>
    %258 = vector.broadcast %1 : vector<16x1xbf16> to vector<16x512xbf16>
    %259 = arith.mulf %257, %258 : vector<16x512xbf16>
    %c5_195 = arith.constant 5 : index
    %c0_196 = arith.constant 0 : index
    %c0_197 = arith.constant 0 : index
    %260 = vector.load %arg10[%c5_195, %c0_196, %c0_197] : memref<9x512x128xbf16, #tpu.memory_space<vmem>>, vector<1x512x128xbf16>
    %261 = vector.shape_cast %260 : vector<1x512x128xbf16> to vector<512x128xbf16>
    %cst_198 = arith.constant dense<0.000000e+00> : vector<16x128xf32>
    %262 = tpu.matmul %259, %261, %cst_198 {dimension_numbers = #tpu.dot_dimension_numbers<[1], [0], [0], [1], [0, 0, 1, 1], [], []>} : vector<16x512xbf16>, vector<512x128xbf16>, vector<16x128xf32> -> vector<16x128xf32>
    %263 = arith.addf %255, %262 : vector<16x128xf32>
    %c15_199 = arith.constant 15 : index
    %c0_200 = arith.constant 0 : index
    %264 = vector.load %arg15[%c15_199, %c0_200] : memref<40x512xf32, #tpu.memory_space<vmem>>, vector<16x512xf32>
    %265 = arith.truncf %264 : vector<16x512xf32> to vector<16x512xbf16>
    %266 = vector.broadcast %0 : vector<16x1xbf16> to vector<16x512xbf16>
    %267 = arith.mulf %265, %266 : vector<16x512xbf16>
    %c6_201 = arith.constant 6 : index
    %c0_202 = arith.constant 0 : index
    %c0_203 = arith.constant 0 : index
    %268 = vector.load %arg10[%c6_201, %c0_202, %c0_203] : memref<9x512x128xbf16, #tpu.memory_space<vmem>>, vector<1x512x128xbf16>
    %269 = vector.shape_cast %268 : vector<1x512x128xbf16> to vector<512x128xbf16>
    %cst_204 = arith.constant dense<0.000000e+00> : vector<16x128xf32>
    %270 = tpu.matmul %267, %269, %cst_204 {dimension_numbers = #tpu.dot_dimension_numbers<[1], [0], [0], [1], [0, 0, 1, 1], [], []>} : vector<16x512xbf16>, vector<512x128xbf16>, vector<16x128xf32> -> vector<16x128xf32>
    %271 = arith.addf %263, %270 : vector<16x128xf32>
    %c16_205 = arith.constant 16 : index
    %c0_206 = arith.constant 0 : index
    %272 = vector.load %arg15[%c16_205, %c0_206] : memref<40x512xf32, #tpu.memory_space<vmem>>, vector<16x512xf32>
    %273 = arith.truncf %272 : vector<16x512xf32> to vector<16x512xbf16>
    %c7_207 = arith.constant 7 : index
    %c0_208 = arith.constant 0 : index
    %c0_209 = arith.constant 0 : index
    %274 = vector.load %arg10[%c7_207, %c0_208, %c0_209] : memref<9x512x128xbf16, #tpu.memory_space<vmem>>, vector<1x512x128xbf16>
    %275 = vector.shape_cast %274 : vector<1x512x128xbf16> to vector<512x128xbf16>
    %cst_210 = arith.constant dense<0.000000e+00> : vector<16x128xf32>
    %276 = tpu.matmul %273, %275, %cst_210 {dimension_numbers = #tpu.dot_dimension_numbers<[1], [0], [0], [1], [0, 0, 1, 1], [], []>} : vector<16x512xbf16>, vector<512x128xbf16>, vector<16x128xf32> -> vector<16x128xf32>
    %277 = arith.addf %271, %276 : vector<16x128xf32>
    %c17_211 = arith.constant 17 : index
    %c0_212 = arith.constant 0 : index
    %278 = vector.load %arg15[%c17_211, %c0_212] : memref<40x512xf32, #tpu.memory_space<vmem>>, vector<16x512xf32>
    %279 = arith.truncf %278 : vector<16x512xf32> to vector<16x512xbf16>
    %280 = vector.broadcast %1 : vector<16x1xbf16> to vector<16x512xbf16>
    %281 = arith.mulf %279, %280 : vector<16x512xbf16>
    %c8_213 = arith.constant 8 : index
    %c0_214 = arith.constant 0 : index
    %c0_215 = arith.constant 0 : index
    %282 = vector.load %arg10[%c8_213, %c0_214, %c0_215] : memref<9x512x128xbf16, #tpu.memory_space<vmem>>, vector<1x512x128xbf16>
    %283 = vector.shape_cast %282 : vector<1x512x128xbf16> to vector<512x128xbf16>
    %cst_216 = arith.constant dense<0.000000e+00> : vector<16x128xf32>
    %284 = tpu.matmul %281, %283, %cst_216 {dimension_numbers = #tpu.dot_dimension_numbers<[1], [0], [0], [1], [0, 0, 1, 1], [], []>} : vector<16x512xbf16>, vector<512x128xbf16>, vector<16x128xf32> -> vector<16x128xf32>
    %285 = arith.addf %277, %284 : vector<16x128xf32>
    %c0_217 = arith.constant 0 : index
    %c0_218 = arith.constant 0 : index
    %286 = vector.load %arg11[%c0_217, %c0_218] : memref<1x128xf32, #tpu.memory_space<vmem>>, vector<1x128xf32>
    %287 = vector.broadcast %286 : vector<1x128xf32> to vector<16x128xf32>
    %288 = arith.addf %285, %287 : vector<16x128xf32>
    %c0_219 = arith.constant 0 : index
    %c0_220 = arith.constant 0 : index
    %c0_221 = arith.constant 0 : index
    %289 = vector.load %arg12[%c0_219, %c0_220, %c0_221] : memref<1x16x128xf32, #tpu.memory_space<vmem>>, vector<1x16x128xf32>
    %290 = vector.shape_cast %289 : vector<1x16x128xf32> to vector<16x128xf32>
    %291 = vector.shape_cast %288 : vector<16x128xf32> to vector<1x16x128xf32>
    tpu.vector_store %arg12[%c0_219, %c0_220, %c0_221], %291 {strides = array<i32>} : memref<1x16x128xf32, #tpu.memory_space<vmem>>, vector<1x16x128xf32>,
    return
  }
  func.func @transform_0(%arg0: i32) -> (i32, i32) {
    %c0_i32 = arith.constant 0 : i32
    %c0_i32_0 = arith.constant 0 : i32
    %c0_i32_1 = arith.constant 0 : i32
    return %c0_i32, %c0_i32_0 : i32, i32
  }
  func.func @transform_1(%arg0: i32) -> (i32, i32) {
    %c0_i32 = arith.constant 0 : i32
    %c0_i32_0 = arith.constant 0 : i32
    %c0_i32_1 = arith.constant 0 : i32
    return %c0_i32, %c0_i32_0 : i32, i32
  }
  func.func @transform_2(%arg0: i32) -> (i32, i32, i32) {
    %c0_i32 = arith.constant 0 : i32
    %c0_i32_0 = arith.constant 0 : i32
    %c0_i32_1 = arith.constant 0 : i32
    return %arg0, %c0_i32, %c0_i32_0 : i32, i32, i32
  }
  func.func @transform_3(%arg0: i32) -> (i32, i32, i32) {
    %c0_i32 = arith.constant 0 : i32
    %c0_i32_0 = arith.constant 0 : i32
    %c0_i32_1 = arith.constant 0 : i32
    %c0_i32_2 = arith.constant 0 : i32
    return %c0_i32, %c0_i32_0, %c0_i32_1 : i32, i32, i32
  }
  func.func @transform_4(%arg0: i32) -> (i32, i32) {
    %c0_i32 = arith.constant 0 : i32
    %c0_i32_0 = arith.constant 0 : i32
    %c0_i32_1 = arith.constant 0 : i32
    return %c0_i32, %c0_i32_0 : i32, i32
  }
  func.func @transform_5(%arg0: i32) -> (i32, i32, i32) {
    %c0_i32 = arith.constant 0 : i32
    %c0_i32_0 = arith.constant 0 : i32
    %c0_i32_1 = arith.constant 0 : i32
    %c0_i32_2 = arith.constant 0 : i32
    return %c0_i32, %c0_i32_0, %c0_i32_1 : i32, i32, i32
  }
  func.func @transform_6(%arg0: i32) -> (i32, i32) {
    %c0_i32 = arith.constant 0 : i32
    %c0_i32_0 = arith.constant 0 : i32
    %c0_i32_1 = arith.constant 0 : i32
    return %c0_i32, %c0_i32_0 : i32, i32
  }
  func.func @transform_7(%arg0: i32) -> (i32, i32, i32) {
    %c0_i32 = arith.constant 0 : i32
    %c0_i32_0 = arith.constant 0 : i32
    %c0_i32_1 = arith.constant 0 : i32
    %c0_i32_2 = arith.constant 0 : i32
    return %c0_i32, %c0_i32_0, %c0_i32_1 : i32, i32, i32
  }
  func.func @transform_8(%arg0: i32) -> (i32, i32) {
    %c0_i32 = arith.constant 0 : i32
    %c0_i32_0 = arith.constant 0 : i32
    %c0_i32_1 = arith.constant 0 : i32
    return %c0_i32, %c0_i32_0 : i32, i32
  }
  func.func @transform_9(%arg0: i32) -> (i32, i32, i32) {
    %c0_i32 = arith.constant 0 : i32
    %c0_i32_0 = arith.constant 0 : i32
    %c0_i32_1 = arith.constant 0 : i32
    %c0_i32_2 = arith.constant 0 : i32
    return %c0_i32, %c0_i32_0, %c0_i32_1 : i32, i32, i32
  }
  func.func @transform_10(%arg0: i32) -> (i32, i32) {
    %c0_i32 = arith.constant 0 : i32
    %c0_i32_0 = arith.constant 0 : i32
    %c0_i32_1 = arith.constant 0 : i32
    return %c0_i32, %c0_i32_0 : i32, i32
  }
  func.func @transform_11(%arg0: i32) -> (i32, i32, i32) {
    %c0_i32 = arith.constant 0 : i32
    %c0_i32_0 = arith.constant 0 : i32
    %c0_i32_1 = arith.constant 0 : i32
    return %arg0, %c0_i32, %c0_i32_0 : i32, i32, i32
  }
}

</mosaic_0001>

<bundles_post_ra>
// kernel: dann_forward.2
= control target key start
LH: loop header
LB: loop body
LE: loop exit
PB: predicated region body
PF: predicated region fallthrough
CT: control target
= control target key end

     0   :  { %8 = vsyncpa [#allocation3], 0  ;;  %s3248_s0 = inlined_call_operand.hbm [shape: bf16[32,2048], index: 0, kind: input, shape index: {}]   ;;  %s3249_s1 = inlined_call_operand.hbm [shape: bf16[2048,256], index: 1, kind: input, shape index: {}]   ;;  %s3250_s2 = inlined_call_operand.hbm [shape: f32[1,256], index: 2, kind: input, shape index: {}]   ;;  %s3251_s3 = inlined_call_operand.hbm [shape: bf16[32,256], index: 3, kind: output, shape index: {}]  }
   0x1   :  { %9 = vsyncpa [#allocation6], 0 }
   0x2   :  { %10 = vsyncpa [#allocation4], 0  ;;  %s3118_s12 = smov [#allocation5]   ;;  %s3024_s16 = scalar_lea.hbm %s3249_s1, 32768 }
   0x3   :  { %s28_s13 = sshll.u32 %s3118_s12, 4  ;;  %p3025_p0 = scmp.ne.s32.totalorder %s3249_s1, %s3024_s16  ;;  %s29_s13 = int_to_ptr.vmem [resolvable:$true] %s28_s13 }
   0x4   :  { %p3028_p1 = scmp.lt.u32.totalorder %s3024_s16, %s3249_s1 }
   0x6   :  { %p3030_p2 = pnand %p3028_p1, %p3025_p0 }
   0x8   :  { %3033 = shalt.err (!%p3030_p2)
}
   0x9   :  { %s3034_s21 = scalar_lea.vmem %s29_s13, 32768  ;;  %p3039_p4 = scmp.lt.s32.totalorder %s29_s13, %s29_s13 }
   0xa   :  { %p3035_p3 = scmp.ne.s32.totalorder %s29_s13, %s3034_s21  ;;  %p3040_p5 = scmp.lt.s32.totalorder %s3034_s21, %s3034_s21 }
   0xc   :  { %p3041_p6 = por %p3040_p5, %p3039_p4 }
   0xe   :  { %p3042_p7 = pnand %p3041_p6, %p3035_p3 }
  0x10   :  { %3045 = shalt.err (!%p3042_p7)
}
  0x11   :  { %s3119_s22 = smov 128   ;;  %s3120_s23 = smov 8  }
  0x12   :  { %34 = dma.hbm_to_vmem [thread:$0]  %s3249_s1, 32768, %s29_s13, [#allocation6], %s3119_s22, %s3119_s22, %s3120_s23  }
  0x13   :  { %s3121_s26 = smov [#allocation2]   ;;  %s3046_s30 = scalar_lea.hbm %s3248_s0, 4096 }
  0x14   :  { %s16_s27 = sshll.u32 %s3121_s26, 4  ;;  %p3047_p8 = scmp.ne.s32.totalorder %s3248_s0, %s3046_s30  ;;  %s17_s27 = int_to_ptr.vmem [resolvable:$true] %s16_s27 }
  0x15   :  { %p3050_p9 = scmp.lt.u32.totalorder %s3046_s30, %s3248_s0 }
  0x17   :  { %p3052_p10 = pnand %p3050_p9, %p3047_p8 }
  0x19   :  { %3055 = shalt.err (!%p3052_p10)
}
  0x1a   :  { %s3056_s8 = scalar_lea.vmem %s17_s27, 4096  ;;  %p3061_p12 = scmp.lt.s32.totalorder %s17_s27, %s17_s27 }
  0x1b   :  { %p3057_p11 = scmp.ne.s32.totalorder %s17_s27, %s3056_s8  ;;  %p3062_p13 = scmp.lt.s32.totalorder %s3056_s8, %s3056_s8 }
  0x1d   :  { %p3063_p0 = por %p3062_p13, %p3061_p12 }
  0x1f   :  { %p3064_p1 = pnand %p3063_p0, %p3057_p11 }
  0x21   :  { %3067 = shalt.err (!%p3064_p1)
}
  0x22   :  { %s3122_s1 = smov 1024   ;;  %s3123_s9 = smov 64  }
  0x23   :  { %22 = dma.hbm_to_vmem [thread:$0]  %s3248_s0, 4096, %s17_s27, [#allocation3], %s3122_s1, %s3122_s1, %s3123_s9  }
  0x24   :  { %s3124_s12 = smov [#allocation7]   ;;  %s3068_s16 = scalar_lea.hbm %s3250_s2, 32 }
  0x25   :  { %s41_s13 = sshll.u32 %s3124_s12, 4  ;;  %p3069_p2 = scmp.ne.s32.totalorder %s3250_s2, %s3068_s16  ;;  %s42_s13 = int_to_ptr.vmem [resolvable:$true] %s41_s13 }
  0x26   :  { %p3072_p3 = scmp.lt.u32.totalorder %s3068_s16, %s3250_s2 }
  0x28   :  { %p3074_p4 = pnand %p3072_p3, %p3069_p2 }
  0x2a   :  { %3077 = shalt.err (!%p3074_p4)
}
  0x2b   :  { %s3078_s21 = scalar_lea.vmem %s42_s13, 32  ;;  %p3083_p6 = scmp.lt.s32.totalorder %s42_s13, %s42_s13 }
  0x2c   :  { %p3079_p5 = scmp.ne.s32.totalorder %s42_s13, %s3078_s21  ;;  %p3084_p7 = scmp.lt.s32.totalorder %s3078_s21, %s3078_s21 }
  0x2e   :  { %p3085_p8 = por %p3084_p7, %p3083_p6 }
  0x30   :  { %p3086_p9 = pnand %p3085_p8, %p3079_p5 }
  0x32   :  { %3089 = shalt.err (!%p3086_p9)
}
  0x33   :  { %44 = dma.hbm_to_vmem [thread:$0]  %s3250_s2, 32, %s42_s13, [#allocation6]  }
  0x34   :  { %3112 = dma.done.wait [#allocation3], 4096  }
  0x35   :  { %3113 = vsyncadd [#allocation3], 4294963200 }
  0x36   :  { %3114 = dma.done.wait [#allocation6], 32800  }
  0x37   :  { %3115 = vsyncadd [#allocation6], 4294934496  ;;  %v2640_v0 = vld [vmem:[#allocation5 + $0x4] ss:$8 sps:$4 sm:$0xff]   ;;  %v2644_v2 = vld [vmem:[#allocation5] ss:$8 sps:$4 sm:$0xff]  }
  0x38   :  { %v2642_v1 = vld [vmem:[#allocation5 + $0x404] ss:$8 sps:$4 sm:$0xff]   ;;  %1794 = vmatprep.subr.bf16.mxu1 %v2640_v0  ;;  %v2645_v3 = vld [vmem:[#allocation5 + $0x400] ss:$8 sps:$4 sm:$0xff]   ;;  %v2646_v4 = vld [vmem:[#allocation5 + $0x14] ss:$8 sps:$4 sm:$0xff]  }
  0x39   :  { %2006 = vmatprep.subr.bf16.mxu0 %v2642_v1  ;;  %1795 = vmatpush1.bf16.msra.mxu1 %v2644_v2  ;;  %v2648_v5 = vld [vmem:[#allocation5 + $0x414] ss:$8 sps:$4 sm:$0xff]   ;;  %v2650_v6 = vld [vmem:[#allocation5 + $0x10] ss:$8 sps:$4 sm:$0xff]   ;;  %v2652_v8 = vld [vmem:[#allocation5 + $0x24] ss:$8 sps:$4 sm:$0xff]  }
  0x3a   :  { %2007 = vmatpush1.bf16.msra.mxu0 %v2645_v3  ;;  %1796 = vmatprep.subr.bf16.mxu1 %v2646_v4  ;;  %v2651_v7 = vld [vmem:[#allocation5 + $0x410] ss:$8 sps:$4 sm:$0xff]   ;;  %v2654_v9 = vld [vmem:[#allocation5 + $0x424] ss:$8 sps:$4 sm:$0xff]   ;;  %v2656_v10 = vld [vmem:[#allocation5 + $0x20] ss:$8 sps:$4 sm:$0xff]  }
  0x3b   :  { %2008 = vmatprep.subr.bf16.mxu0 %v2648_v5  ;;  %v2657_v11 = vld [vmem:[#allocation5 + $0x420] ss:$8 sps:$4 sm:$0xff]   ;;  %v2658_v12 = vld [vmem:[#allocation5 + $0x34] ss:$8 sps:$4 sm:$0xff]   ;;  %v2662_v14 = vld [vmem:[#allocation5 + $0x30] ss:$8 sps:$4 sm:$0xff]  }
  0x3c   :  { %v2660_v13 = vld [vmem:[#allocation5 + $0x434] ss:$8 sps:$4 sm:$0xff]   ;;  %v2663_v15 = vld [vmem:[#allocation5 + $0x430] ss:$8 sps:$4 sm:$0xff]   ;;  %v2664_v16 = vld [vmem:[#allocation5 + $0x44] ss:$8 sps:$4 sm:$0xff]  }
  0x3d   :  { %1797 = vmatpush1.bf16.msra.mxu1 %v2650_v6  ;;  %v2666_v17 = vld [vmem:[#allocation5 + $0x444] ss:$8 sps:$4 sm:$0xff]   ;;  %v2668_v18 = vld [vmem:[#allocation5 + $0x40] ss:$8 sps:$4 sm:$0xff]   ;;  %v2670_v20 = vld [vmem:[#allocation5 + $0x54] ss:$8 sps:$4 sm:$0xff]  }
  0x3e   :  { %2009 = vmatpush1.bf16.msra.mxu0 %v2651_v7  ;;  %1798 = vmatprep.subr.bf16.mxu1 %v2652_v8  ;;  %v2669_v19 = vld [vmem:[#allocation5 + $0x440] ss:$8 sps:$4 sm:$0xff]   ;;  %v2672_v21 = vld [vmem:[#allocation5 + $0x454] ss:$8 sps:$4 sm:$0xff]   ;;  %v2674_v22 = vld [vmem:[#allocation5 + $0x50] ss:$8 sps:$4 sm:$0xff]  }
  0x3f   :  { %2010 = vmatprep.subr.bf16.mxu0 %v2654_v9  ;;  %v2675_v23 = vld [vmem:[#allocation5 + $0x450] ss:$8 sps:$4 sm:$0xff]   ;;  %v2676_v24 = vld [vmem:[#allocation5 + $0x64] ss:$8 sps:$4 sm:$0xff]   ;;  %v2680_v26 = vld [vmem:[#allocation5 + $0x60] ss:$8 sps:$4 sm:$0xff]  }
  0x40   :  { %v2678_v25 = vld [vmem:[#allocation5 + $0x464] ss:$8 sps:$4 sm:$0xff]   ;;  %v2681_v27 = vld [vmem:[#allocation5 + $0x460] ss:$8 sps:$4 sm:$0xff]   ;;  %v2682_v28 = vld [vmem:[#allocation5 + $0x74] ss:$8 sps:$4 sm:$0xff]  }
  0x41   :  { %1799 = vmatpush1.bf16.msra.mxu1 %v2656_v10  ;;  %v2684_v29 = vld [vmem:[#allocation5 + $0x474] ss:$8 sps:$4 sm:$0xff]   ;;  %v2686_v30 = vld [vmem:[#allocation5 + $0x70] ss:$8 sps:$4 sm:$0xff]   ;;  %v2688_v32 = vld [vmem:[#allocation5 + $0x84] ss:$8 sps:$4 sm:$0xff]  }
  0x42   :  { %2011 = vmatpush1.bf16.msra.mxu0 %v2657_v11  ;;  %1800 = vmatprep.subr.bf16.mxu1 %v2658_v12  ;;  %v2687_v31 = vld [vmem:[#allocation5 + $0x470] ss:$8 sps:$4 sm:$0xff]   ;;  %v2690_v33 = vld [vmem:[#allocation5 + $0x484] ss:$8 sps:$4 sm:$0xff]   ;;  %v2692_v34 = vld [vmem:[#allocation5 + $0x80] ss:$8 sps:$4 sm:$0xff]  }
  0x43   :  { %2012 = vmatprep.subr.bf16.mxu0 %v2660_v13  ;;  %v2693_v35 = vld [vmem:[#allocation5 + $0x480] ss:$8 sps:$4 sm:$0xff]   ;;  %v2694_v36 = vld [vmem:[#allocation5 + $0x94] ss:$8 sps:$4 sm:$0xff]   ;;  %v2698_v38 = vld [vmem:[#allocation5 + $0x90] ss:$8 sps:$4 sm:$0xff]  }
  0x44   :  { %v2696_v37 = vld [vmem:[#allocation5 + $0x494] ss:$8 sps:$4 sm:$0xff]   ;;  %v2699_v39 = vld [vmem:[#allocation5 + $0x490] ss:$8 sps:$4 sm:$0xff]   ;;  %v2700_v40 = vld [vmem:[#allocation5 + $0xa4] ss:$8 sps:$4 sm:$0xff]  }
  0x45   :  { %1801 = vmatpush1.bf16.msra.mxu1 %v2662_v14  ;;  %v2702_v41 = vld [vmem:[#allocation5 + $0x4a4] ss:$8 sps:$4 sm:$0xff]   ;;  %v2704_v42 = vld [vmem:[#allocation5 + $0xa0] ss:$8 sps:$4 sm:$0xff]   ;;  %v2706_v44 = vld [vmem:[#allocation5 + $0xb4] ss:$8 sps:$4 sm:$0xff]  }
  0x46   :  { %2013 = vmatpush1.bf16.msra.mxu0 %v2663_v15  ;;  %1802 = vmatprep.subr.bf16.mxu1 %v2664_v16  ;;  %v2705_v43 = vld [vmem:[#allocation5 + $0x4a0] ss:$8 sps:$4 sm:$0xff]   ;;  %v2708_v45 = vld [vmem:[#allocation5 + $0x4b4] ss:$8 sps:$4 sm:$0xff]   ;;  %v2710_v46 = vld [vmem:[#allocation5 + $0xb0] ss:$8 sps:$4 sm:$0xff]  }
  0x47   :  { %2014 = vmatprep.subr.bf16.mxu0 %v2666_v17  ;;  %v2711_v47 = vld [vmem:[#allocation5 + $0x4b0] ss:$8 sps:$4 sm:$0xff]   ;;  %v54_v48 = vld [vmem:[#allocation2] sm:$0xff]  ;;  %v2718_v58 = vld [vmem:[#allocation5 + $0xd4] ss:$8 sps:$4 sm:$0xff]   ;;  %s3125_s2 = smov [#allocation8]  }
  0x48   :  { %v62_v49 = vld [vmem:[#allocation2 + $0x40] sm:$0xff]  ;;  %v2720_v59 = vld [vmem:[#allocation5 + $0x4d4] ss:$8 sps:$4 sm:$0xff]   ;;  %v2722_v60 = vld [vmem:[#allocation5 + $0xd0] ss:$8 sps:$4 sm:$0xff]   ;;  %s2259_s25 = sshll.u32 %s3125_s2, 4  ;;  %s2260_s25 = int_to_ptr.vmem [resolvable:$true] %s2259_s25 }
  0x49   :  { %1803 = vmatpush1.bf16.msra.mxu1 %v2668_v18  ;;  %v2712_v50 = vld [vmem:[#allocation5 + $0xc4] ss:$8 sps:$4 sm:$0xff]   ;;  %v2273_v52 = vcombine.high %v54_v48, %v62_v49  ;;  %v2716_v56 = vld [vmem:[#allocation5 + $0xc0] ss:$8 sps:$4 sm:$0xff]   ;;  %v2723_v61 = vld [vmem:[#allocation5 + $0x4d0] ss:$8 sps:$4 sm:$0xff]   ;;  %v2272_v8 = vcombine.low %v54_v48, %v62_v49  ;;  %p3095_p11 = scmp.lt.s32.totalorder %s2260_s25, %s2260_s25 }
  0x4a   :  { %2015 = vmatpush1.bf16.msra.mxu0 %v2669_v19  ;;  %1804 = vmatprep.subr.bf16.mxu1 %v2670_v20  ;;  %v2714_v51 = vld [vmem:[#allocation5 + $0x4c4] ss:$8 sps:$4 sm:$0xff]   ;;  %v2717_v57 = vld [vmem:[#allocation5 + $0x4c0] ss:$8 sps:$4 sm:$0xff]   ;;  %v2730_v2 = vld [vmem:[#allocation5 + $0xf4] ss:$8 sps:$4 sm:$0xff]  }
  0x4b   :  { %2016 = vmatprep.subr.bf16.mxu0 %v2672_v21  ;;  %v58_v53 = vld [vmem:[#allocation2 + $0x20] sm:$0xff]  ;;  %1826 = vmatprep.mubr.bf16.mxu1 %v2273_v52  ;;  %v2732_v3 = vld [vmem:[#allocation5 + $0x4f4] ss:$8 sps:$4 sm:$0xff]   ;;  %v2734_v4 = vld [vmem:[#allocation5 + $0xf0] ss:$8 sps:$4 sm:$0xff]   ;;  %s3090_s26 = scalar_lea.vmem %s2260_s25, 512 }
  0x4c   :  { %v66_v54 = vld [vmem:[#allocation2 + $0x60] sm:$0xff]  ;;  %v2735_v5 = vld [vmem:[#allocation5 + $0x4f0] ss:$8 sps:$4 sm:$0xff]   ;;  %v2744_v12 = vld [vmem:[#allocation5 + $0x114] ss:$8 sps:$4 sm:$0xff]   ;;  %p3091_p10 = scmp.ne.s32.totalorder %s2260_s25, %s3090_s26  ;;  %p3096_p12 = scmp.lt.s32.totalorder %s3090_s26, %s3090_s26 }
  0x4d   :  { %1805 = vmatpush1.bf16.msra.mxu1 %v2674_v22  ;;  %v2281_v55 = vcombine.high %v58_v53, %v66_v54  ;;  %v2724_v62 = vld [vmem:[#allocation5 + $0xe4] ss:$8 sps:$4 sm:$0xff]   ;;  %v2728_v0 = vld [vmem:[#allocation5 + $0xe0] ss:$8 sps:$4 sm:$0xff]   ;;  %v2280_v10 = vcombine.low %v58_v53, %v66_v54  ;;  %v2747_v13 = vld [vmem:[#allocation5 + $0x514] ss:$8 sps:$4 sm:$0xff]  }
  0x4e   :  { %2017 = vmatpush1.bf16.msra.mxu0 %v2675_v23  ;;  %1806 = vmatprep.subr.bf16.mxu1 %v2676_v24  ;;  %v2726_v63 = vld [vmem:[#allocation5 + $0x4e4] ss:$8 sps:$4 sm:$0xff]   ;;  %v2729_v1 = vld [vmem:[#allocation5 + $0x4e0] ss:$8 sps:$4 sm:$0xff]   ;;  %v2742_v14 = vld [vmem:[#allocation5 + $0x110] ss:$8 sps:$4 sm:$0xff]   ;;  %p3097_p13 = por %p3096_p12, %p3095_p11 }
  0x4f   :  { %2018 = vmatprep.subr.bf16.mxu0 %v2678_v25  ;;  %2038 = vmatprep.mubr.bf16.mxu0 %v2281_v55  ;;  %v2738_v6 = vld [vmem:[#allocation5 + $0x104] ss:$8 sps:$4 sm:$0xff]   ;;  %v2736_v9 = vld [vmem:[#allocation5 + $0x100] ss:$8 sps:$4 sm:$0xff]   ;;  %v2745_v15 = vld [vmem:[#allocation5 + $0x510] ss:$8 sps:$4 sm:$0xff]  }
  0x50   :  { %v2741_v7 = vld [vmem:[#allocation5 + $0x504] ss:$8 sps:$4 sm:$0xff]   ;;  %v2739_v11 = vld [vmem:[#allocation5 + $0x500] ss:$8 sps:$4 sm:$0xff]   ;;  %v2756_v20 = vld [vmem:[#allocation5 + $0x134] ss:$8 sps:$4 sm:$0xff]   ;;  %p3098_p0 = pnand %p3097_p13, %p3091_p10 }
  0x51   :  { %1807 = vmatpush1.bf16.msra.mxu1 %v2680_v26  ;;  %v2750_v16 = vld [vmem:[#allocation5 + $0x124] ss:$8 sps:$4 sm:$0xff]   ;;  %v2748_v18 = vld [vmem:[#allocation5 + $0x120] ss:$8 sps:$4 sm:$0xff]   ;;  %v2759_v21 = vld [vmem:[#allocation5 + $0x534] ss:$8 sps:$4 sm:$0xff]  }
  0x52   :  { %2019 = vmatpush1.bf16.msra.mxu0 %v2681_v27  ;;  %1808 = vmatprep.subr.bf16.mxu1 %v2682_v28  ;;  %v2753_v17 = vld [vmem:[#allocation5 + $0x524] ss:$8 sps:$4 sm:$0xff]   ;;  %v2751_v19 = vld [vmem:[#allocation5 + $0x520] ss:$8 sps:$4 sm:$0xff]   ;;  %v2754_v22 = vld [vmem:[#allocation5 + $0x130] ss:$8 sps:$4 sm:$0xff]  }
  0x53   :  { %2020 = vmatprep.subr.bf16.mxu0 %v2684_v29  ;;  %v2757_v23 = vld [vmem:[#allocation5 + $0x530] ss:$8 sps:$4 sm:$0xff]   ;;  %v2762_v24 = vld [vmem:[#allocation5 + $0x144] ss:$8 sps:$4 sm:$0xff]   ;;  %v2760_v26 = vld [vmem:[#allocation5 + $0x140] ss:$8 sps:$4 sm:$0xff]  }
  0x54   :  { %v2765_v25 = vld [vmem:[#allocation5 + $0x544] ss:$8 sps:$4 sm:$0xff]   ;;  %v2763_v27 = vld [vmem:[#allocation5 + $0x540] ss:$8 sps:$4 sm:$0xff]   ;;  %v2768_v28 = vld [vmem:[#allocation5 + $0x154] ss:$8 sps:$4 sm:$0xff]  }
  0x55   :  { %1809 = vmatpush1.bf16.msra.mxu1 %v2686_v30  ;;  %v2771_v29 = vld [vmem:[#allocation5 + $0x554] ss:$8 sps:$4 sm:$0xff]   ;;  %v70_v30 = vld [vmem:[#allocation2 + $0x80] sm:$0xff]  ;;  %v3191_v49 = vld [vmem:[#allocation2 + $0x28] sm:$0xff] }
  0x56   :  { %2021 = vmatpush1.bf16.msra.mxu0 %v2687_v31  ;;  %1810 = vmatprep.subr.bf16.mxu1 %v2688_v32  ;;  %v78_v31 = vld [vmem:[#allocation2 + $0xc0] sm:$0xff]  ;;  %v2766_v32 = vld [vmem:[#allocation5 + $0x150] ss:$8 sps:$4 sm:$0xff]  }
  0x57   :  { %2022 = vmatprep.subr.bf16.mxu0 %v2690_v33  ;;  %v2289_v33 = vcombine.high %v70_v30, %v78_v31  ;;  %v2781_v52 = vld [vmem:[#allocation5 + $0x570] ss:$8 sps:$4 sm:$0xff]   ;;  %v2786_v54 = vld [vmem:[#allocation5 + $0x184] ss:$8 sps:$4 sm:$0xff]  }
  0x58   :  { %v2789_v55 = vld [vmem:[#allocation5 + $0x584] ss:$8 sps:$4 sm:$0xff]  }
  0x59   :  { %1811 = vmatpush1.bf16.msra.mxu1 %v2692_v34  ;;  %v2769_v34 = vld [vmem:[#allocation5 + $0x550] ss:$8 sps:$4 sm:$0xff]  }
  0x5a   :  { %2023 = vmatpush1.bf16.msra.mxu0 %v2693_v35  ;;  %1812 = vmatprep.subr.bf16.mxu1 %v2694_v36  ;;  %v74_v35 = vld [vmem:[#allocation2 + $0xa0] sm:$0xff] }
  0x5b   :  { %2024 = vmatprep.subr.bf16.mxu0 %v2696_v37  ;;  %v82_v36 = vld [vmem:[#allocation2 + $0xe0] sm:$0xff]  ;;  %v2288_v37 = vcombine.low %v70_v30, %v78_v31  ;;  %v2840_v30 = vld [vmem:[#allocation5 + $0x214] ss:$8 sps:$4 sm:$0xff]  }
  0x5c   :  { %v2843_v31 = vld [vmem:[#allocation5 + $0x614] ss:$8 sps:$4 sm:$0xff]  }
  0x5d   :  { %1813 = vmatpush1.bf16.msra.mxu1 %v2698_v38  ;;  %v2774_v38 = vld [vmem:[#allocation5 + $0x164] ss:$8 sps:$4 sm:$0xff]  }
  0x5e   :  { %2025 = vmatpush1.bf16.msra.mxu0 %v2699_v39  ;;  %1814 = vmatprep.subr.bf16.mxu1 %v2700_v40  ;;  %v2297_v39 = vcombine.high %v74_v35, %v82_v36  ;;  %v2296_v40 = vcombine.low %v74_v35, %v82_v36  ;;  %v2838_v36 = vld [vmem:[#allocation5 + $0x210] ss:$8 sps:$4 sm:$0xff]  }
  0x5f   :  { %2026 = vmatprep.subr.bf16.mxu0 %v2702_v41  ;;  %v2777_v41 = vld [vmem:[#allocation5 + $0x564] ss:$8 sps:$4 sm:$0xff]  }
  0x61   :  { %1815 = vmatpush1.bf16.msra.mxu1 %v2704_v42  ;;  %v2772_v42 = vld [vmem:[#allocation5 + $0x160] ss:$8 sps:$4 sm:$0xff]  }
  0x62   :  { %2027 = vmatpush1.bf16.msra.mxu0 %v2705_v43  ;;  %1816 = vmatprep.subr.bf16.mxu1 %v2706_v44  ;;  %v2775_v43 = vld [vmem:[#allocation5 + $0x560] ss:$8 sps:$4 sm:$0xff]  }
  0x63   :  { %2028 = vmatprep.subr.bf16.mxu0 %v2708_v45  ;;  %v3185_v44 = vld [vmem:[#allocation2 + $0x8] sm:$0xff] }
  0x64   :  { %v3187_v45 = vld [vmem:[#allocation2 + $0x48] sm:$0xff] }
  0x65   :  { %1817 = vmatpush1.bf16.msra.mxu1 %v2710_v46  ;;  %v2780_v46 = vld [vmem:[#allocation5 + $0x174] ss:$8 sps:$4 sm:$0xff]   ;;  %v2275_v48 = vcombine.high %v3185_v44, %v3187_v45 }
  0x66   :  { %2029 = vmatpush1.bf16.msra.mxu0 %v2711_v47  ;;  %1818 = vmatprep.subr.bf16.mxu1 %v2712_v50  ;;  %v2783_v47 = vld [vmem:[#allocation5 + $0x574] ss:$8 sps:$4 sm:$0xff]   ;;  %v3193_v50 = vld [vmem:[#allocation2 + $0x68] sm:$0xff] }
  0x67   :  { %2030 = vmatprep.subr.bf16.mxu0 %v2714_v51  ;;  %v2778_v51 = vld [vmem:[#allocation5 + $0x170] ss:$8 sps:$4 sm:$0xff]   ;;  %v2283_v53 = vcombine.high %v3191_v49, %v3193_v50 }
  0x69   :  { %1819 = vmatpush1.bf16.msra.mxu1 %v2716_v56  ;;  %v2784_v56 = vld [vmem:[#allocation5 + $0x180] ss:$8 sps:$4 sm:$0xff]  }
  0x6a   :  { %2031 = vmatpush1.bf16.msra.mxu0 %v2717_v57  ;;  %1820 = vmatprep.subr.bf16.mxu1 %v2718_v58  ;;  %v2787_v57 = vld [vmem:[#allocation5 + $0x580] ss:$8 sps:$4 sm:$0xff]   ;;  %v2792_v58 = vld [vmem:[#allocation5 + $0x194] ss:$8 sps:$4 sm:$0xff]  }
  0x6b   :  { %2032 = vmatprep.subr.bf16.mxu0 %v2720_v59  ;;  %v2795_v59 = vld [vmem:[#allocation5 + $0x594] ss:$8 sps:$4 sm:$0xff]  }
  0x6d   :  { %1821 = vmatpush1.bf16.msra.mxu1 %v2722_v60  ;;  %v2790_v60 = vld [vmem:[#allocation5 + $0x190] ss:$8 sps:$4 sm:$0xff]  }
  0x6e   :  { %2033 = vmatpush1.bf16.msra.mxu0 %v2723_v61  ;;  %1822 = vmatprep.subr.bf16.mxu1 %v2724_v62  ;;  %v2793_v61 = vld [vmem:[#allocation5 + $0x590] ss:$8 sps:$4 sm:$0xff]   ;;  %v2798_v62 = vld [vmem:[#allocation5 + $0x1a4] ss:$8 sps:$4 sm:$0xff]  }
  0x6f   :  { %2034 = vmatprep.subr.bf16.mxu0 %v2726_v63  ;;  %v2801_v63 = vld [vmem:[#allocation5 + $0x5a4] ss:$8 sps:$4 sm:$0xff]  }
  0x71   :  { %1823 = vmatpush1.bf16.msra.mxu1 %v2728_v0  ;;  %v2796_v0 = vld [vmem:[#allocation5 + $0x1a0] ss:$8 sps:$4 sm:$0xff]  }
  0x72   :  { %2035 = vmatpush1.bf16.msra.mxu0 %v2729_v1  ;;  %1824 = vmatprep.subr.bf16.mxu1 %v2730_v2  ;;  %v2799_v1 = vld [vmem:[#allocation5 + $0x5a0] ss:$8 sps:$4 sm:$0xff]   ;;  %v2804_v2 = vld [vmem:[#allocation5 + $0x1b4] ss:$8 sps:$4 sm:$0xff]  }
  0x73   :  { %2036 = vmatprep.subr.bf16.mxu0 %v2732_v3  ;;  %v2807_v3 = vld [vmem:[#allocation5 + $0x5b4] ss:$8 sps:$4 sm:$0xff]  }
  0x75   :  { %1825 = vmatpush1.bf16.msra.mxu1 %v2734_v4  ;;  %v2802_v4 = vld [vmem:[#allocation5 + $0x1b0] ss:$8 sps:$4 sm:$0xff]  }
  0x76   :  { %2037 = vmatpush1.bf16.msra.mxu0 %v2735_v5  ;;  %1847 = vmatprep.subr.bf16.mxu1 %v2738_v6  ;;  %v2805_v5 = vld [vmem:[#allocation5 + $0x5b0] ss:$8 sps:$4 sm:$0xff]   ;;  %v2810_v6 = vld [vmem:[#allocation5 + $0x1c4] ss:$8 sps:$4 sm:$0xff]  }
  0x77   :  { %2059 = vmatprep.subr.bf16.mxu0 %v2741_v7  ;;  %v2813_v7 = vld [vmem:[#allocation5 + $0x5c4] ss:$8 sps:$4 sm:$0xff]  }
  0x78   :  { %1827 = vmatmul.mubr.bf16.vlgmr.msra.gmra.mrb[0].mxu1 %v2272_v8  ;;  %v2808_v8 = vld [vmem:[#allocation5 + $0x1c0] ss:$8 sps:$4 sm:$0xff]  }
  0x79   :  { %2039 = vmatmul.mubr.bf16.vlgmr.msra.gmra.mrb[0].mxu0 %v2280_v10  ;;  %1848 = vmatpush1.bf16.msra.mxu1 %v2736_v9  ;;  %v2811_v9 = vld [vmem:[#allocation5 + $0x5c0] ss:$8 sps:$4 sm:$0xff]   ;;  %v2816_v10 = vld [vmem:[#allocation5 + $0x1d4] ss:$8 sps:$4 sm:$0xff]  }
  0x7a   :  { %2060 = vmatpush1.bf16.msra.mxu0 %v2739_v11  ;;  %1849 = vmatprep.subr.bf16.mxu1 %v2744_v12  ;;  %v2819_v11 = vld [vmem:[#allocation5 + $0x5d4] ss:$8 sps:$4 sm:$0xff]   ;;  %v2814_v12 = vld [vmem:[#allocation5 + $0x1d0] ss:$8 sps:$4 sm:$0xff]  }
  0x7b   :  { %2061 = vmatprep.subr.bf16.mxu0 %v2747_v13  ;;  %1836 = vmatprep.mubr.bf16.mxu1 %v2289_v33  ;;  %v2817_v13 = vld [vmem:[#allocation5 + $0x5d0] ss:$8 sps:$4 sm:$0xff]   ;;  %v83_v33 = vld [vmem:[#allocation2 + $0xe8] sm:$0xff] }
  0x7c   :  { %2048 = vmatprep.mubr.bf16.mxu0 %v2297_v39  ;;  %v2849_v39 = vld [vmem:[#allocation5 + $0x624] ss:$8 sps:$4 sm:$0xff]  }
  0x7d   :  { %1850 = vmatpush1.bf16.msra.mxu1 %v2742_v14  ;;  %v2822_v14 = vld [vmem:[#allocation5 + $0x1e4] ss:$8 sps:$4 sm:$0xff]  }
  0x7e   :  { %2062 = vmatpush1.bf16.msra.mxu0 %v2745_v15  ;;  %1851 = vmatprep.subr.bf16.mxu1 %v2750_v16  ;;  %v2825_v15 = vld [vmem:[#allocation5 + $0x5e4] ss:$8 sps:$4 sm:$0xff]   ;;  %v2820_v16 = vld [vmem:[#allocation5 + $0x1e0] ss:$8 sps:$4 sm:$0xff]  }
  0x7f   :  { %2063 = vmatprep.subr.bf16.mxu0 %v2753_v17  ;;  %v2823_v17 = vld [vmem:[#allocation5 + $0x5e0] ss:$8 sps:$4 sm:$0xff]  }
  0x80   :  { %1837 = vmatmul.mubr.bf16.gmra.mrb[4].mxu1 %v2288_v37  ;;  %v2841_v37 = vld [vmem:[#allocation5 + $0x610] ss:$8 sps:$4 sm:$0xff]  }
  0x81   :  { %1852 = vmatpush1.bf16.msra.mxu1 %v2748_v18  ;;  %2049 = vmatmul.mubr.bf16.gmra.mrb[4].mxu0 %v2296_v40  ;;  %v2828_v18 = vld [vmem:[#allocation5 + $0x1f4] ss:$8 sps:$4 sm:$0xff]   ;;  %v2844_v40 = vld [vmem:[#allocation5 + $0x220] ss:$8 sps:$4 sm:$0xff]  }
  0x82   :  { %2064 = vmatpush1.bf16.msra.mxu0 %v2751_v19  ;;  %1853 = vmatprep.subr.bf16.mxu1 %v2756_v20  ;;  %v2831_v19 = vld [vmem:[#allocation5 + $0x5f4] ss:$8 sps:$4 sm:$0xff]   ;;  %v2826_v20 = vld [vmem:[#allocation5 + $0x1f0] ss:$8 sps:$4 sm:$0xff]  }
  0x83   :  { %2065 = vmatprep.subr.bf16.mxu0 %v2759_v21  ;;  %1879 = vmatprep.mubr.bf16.mxu1 %v2275_v48  ;;  %v2829_v21 = vld [vmem:[#allocation5 + $0x5f0] ss:$8 sps:$4 sm:$0xff]   ;;  %v2852_v48 = vld [vmem:[#allocation5 + $0x234] ss:$8 sps:$4 sm:$0xff]  }
  0x84   :  { %2091 = vmatprep.mubr.bf16.mxu0 %v2283_v53  ;;  %v2853_v53 = vld [vmem:[#allocation5 + $0x630] ss:$8 sps:$4 sm:$0xff]  }
  0x85   :  { %1854 = vmatpush1.bf16.msra.mxu1 %v2754_v22  ;;  %v2834_v22 = vld [vmem:[#allocation5 + $0x204] ss:$8 sps:$4 sm:$0xff]  }
  0x86   :  { %2066 = vmatpush1.bf16.msra.mxu0 %v2757_v23  ;;  %1855 = vmatprep.subr.bf16.mxu1 %v2762_v24  ;;  %v2837_v23 = vld [vmem:[#allocation5 + $0x604] ss:$8 sps:$4 sm:$0xff]   ;;  %v2832_v24 = vld [vmem:[#allocation5 + $0x200] ss:$8 sps:$4 sm:$0xff]  }
  0x87   :  { %2067 = vmatprep.subr.bf16.mxu0 %v2765_v25  ;;  %v2835_v25 = vld [vmem:[#allocation5 + $0x600] ss:$8 sps:$4 sm:$0xff]  }
  0x89   :  { %1856 = vmatpush1.bf16.msra.mxu1 %v2760_v26  ;;  %v71_v26 = vld [vmem:[#allocation2 + $0x88] sm:$0xff] }
  0x8a   :  { %2068 = vmatpush1.bf16.msra.mxu0 %v2763_v27  ;;  %1857 = vmatprep.subr.bf16.mxu1 %v2768_v28  ;;  %v2274_v27 = vcombine.low %v3185_v44, %v3187_v45  ;;  %v2282_v28 = vcombine.low %v3191_v49, %v3193_v50  ;;  %v3203_v45 = vld [vmem:[#allocation2 + $0x50] sm:$0xff] }
  0x8b   :  { %2069 = vmatprep.subr.bf16.mxu0 %v2771_v29  ;;  %v79_v29 = vld [vmem:[#allocation2 + $0xc8] sm:$0xff]  ;;  %v2855_v49 = vld [vmem:[#allocation5 + $0x634] ss:$8 sps:$4 sm:$0xff]  }
  0x8d   :  { %1858 = vmatpush1.bf16.msra.mxu1 %v2766_v32  ;;  %v75_v32 = vld [vmem:[#allocation2 + $0xa8] sm:$0xff] }
  0x8e   :  { %2070 = vmatpush1.bf16.msra.mxu0 %v2769_v34  ;;  %1859 = vmatprep.subr.bf16.mxu1 %v2774_v38  ;;  %v2291_v34 = vcombine.high %v71_v26, %v79_v29  ;;  %v2299_v35 = vcombine.high %v75_v32, %v83_v33  ;;  %v2846_v38 = vld [vmem:[#allocation5 + $0x224] ss:$8 sps:$4 sm:$0xff]   ;;  %v2298_v44 = vcombine.low %v75_v32, %v83_v33  ;;  %v2916_v32 = vld [vmem:[#allocation5 + $0x2e0] ss:$8 sps:$4 sm:$0xff]  }
  0x8f   :  { %2071 = vmatprep.subr.bf16.mxu0 %v2777_v41  ;;  %v2847_v41 = vld [vmem:[#allocation5 + $0x620] ss:$8 sps:$4 sm:$0xff]  }
  0x90   :  { %v2919_v33 = vld [vmem:[#allocation5 + $0x6e0] ss:$8 sps:$4 sm:$0xff]  }
  0x91   :  { %1860 = vmatpush1.bf16.msra.mxu1 %v2772_v42  ;;  %v3201_v42 = vld [vmem:[#allocation2 + $0x10] sm:$0xff] }
  0x92   :  { %2072 = vmatpush1.bf16.msra.mxu0 %v2775_v43  ;;  %1861 = vmatprep.subr.bf16.mxu1 %v2780_v46  ;;  %v2290_v43 = vcombine.low %v71_v26, %v79_v29  ;;  %v3205_v46 = vld [vmem:[#allocation2 + $0x30] sm:$0xff]  ;;  %v2277_v50 = vcombine.high %v3201_v42, %v3203_v45 }
  0x93   :  { %2073 = vmatprep.subr.bf16.mxu0 %v2783_v47  ;;  %v3207_v47 = vld [vmem:[#allocation2 + $0x70] sm:$0xff] }
  0x94   :  { %v2912_v26 = vld [vmem:[#allocation5 + $0x2d4] ss:$8 sps:$4 sm:$0xff]   ;;  %v2913_v29 = vld [vmem:[#allocation5 + $0x6d0] ss:$8 sps:$4 sm:$0xff]  }
  0x95   :  { %1862 = vmatpush1.bf16.msra.mxu1 %v2778_v51  ;;  %v2285_v51 = vcombine.high %v3205_v46, %v3207_v47 }
  0x96   :  { %2074 = vmatpush1.bf16.msra.mxu0 %v2781_v52  ;;  %1863 = vmatprep.subr.bf16.mxu1 %v2786_v54  ;;  %v2850_v52 = vld [vmem:[#allocation5 + $0x230] ss:$8 sps:$4 sm:$0xff]   ;;  %v2858_v54 = vld [vmem:[#allocation5 + $0x244] ss:$8 sps:$4 sm:$0xff]  }
  0x97   :  { %2075 = vmatprep.subr.bf16.mxu0 %v2789_v55  ;;  %v2861_v55 = vld [vmem:[#allocation5 + $0x644] ss:$8 sps:$4 sm:$0xff]  }
  0x99   :  { %1864 = vmatpush1.bf16.msra.mxu1 %v2784_v56  ;;  %v2856_v56 = vld [vmem:[#allocation5 + $0x240] ss:$8 sps:$4 sm:$0xff]  }
  0x9a   :  { %2076 = vmatpush1.bf16.msra.mxu0 %v2787_v57  ;;  %1865 = vmatprep.subr.bf16.mxu1 %v2792_v58  ;;  %v2859_v57 = vld [vmem:[#allocation5 + $0x640] ss:$8 sps:$4 sm:$0xff]   ;;  %v2864_v58 = vld [vmem:[#allocation5 + $0x254] ss:$8 sps:$4 sm:$0xff]  }
  0x9b   :  { %2077 = vmatprep.subr.bf16.mxu0 %v2795_v59  ;;  %v2867_v59 = vld [vmem:[#allocation5 + $0x654] ss:$8 sps:$4 sm:$0xff]  }
  0x9d   :  { %1866 = vmatpush1.bf16.msra.mxu1 %v2790_v60  ;;  %v2862_v60 = vld [vmem:[#allocation5 + $0x250] ss:$8 sps:$4 sm:$0xff]  }
  0x9e   :  { %2078 = vmatpush1.bf16.msra.mxu0 %v2793_v61  ;;  %1867 = vmatprep.subr.bf16.mxu1 %v2798_v62  ;;  %v2865_v61 = vld [vmem:[#allocation5 + $0x650] ss:$8 sps:$4 sm:$0xff]   ;;  %v2870_v62 = vld [vmem:[#allocation5 + $0x264] ss:$8 sps:$4 sm:$0xff]  }
  0x9f   :  { %2079 = vmatprep.subr.bf16.mxu0 %v2801_v63  ;;  %v2873_v63 = vld [vmem:[#allocation5 + $0x664] ss:$8 sps:$4 sm:$0xff]  }
  0xa1   :  { %1868 = vmatpush1.bf16.msra.mxu1 %v2796_v0  ;;  %v2868_v0 = vld [vmem:[#allocation5 + $0x260] ss:$8 sps:$4 sm:$0xff]  }
  0xa2   :  { %2080 = vmatpush1.bf16.msra.mxu0 %v2799_v1  ;;  %1869 = vmatprep.subr.bf16.mxu1 %v2804_v2  ;;  %v2871_v1 = vld [vmem:[#allocation5 + $0x660] ss:$8 sps:$4 sm:$0xff]   ;;  %v2876_v2 = vld [vmem:[#allocation5 + $0x274] ss:$8 sps:$4 sm:$0xff]  }
  0xa3   :  { %2081 = vmatprep.subr.bf16.mxu0 %v2807_v3  ;;  %v2879_v3 = vld [vmem:[#allocation5 + $0x674] ss:$8 sps:$4 sm:$0xff]  }
  0xa5   :  { %1870 = vmatpush1.bf16.msra.mxu1 %v2802_v4  ;;  %v2874_v4 = vld [vmem:[#allocation5 + $0x270] ss:$8 sps:$4 sm:$0xff]  }
  0xa6   :  { %2082 = vmatpush1.bf16.msra.mxu0 %v2805_v5  ;;  %1871 = vmatprep.subr.bf16.mxu1 %v2810_v6  ;;  %v2877_v5 = vld [vmem:[#allocation5 + $0x670] ss:$8 sps:$4 sm:$0xff]   ;;  %v2882_v6 = vld [vmem:[#allocation5 + $0x284] ss:$8 sps:$4 sm:$0xff]  }
  0xa7   :  { %2083 = vmatprep.subr.bf16.mxu0 %v2813_v7  ;;  %v2885_v7 = vld [vmem:[#allocation5 + $0x684] ss:$8 sps:$4 sm:$0xff]  }
  0xa9   :  { %1872 = vmatpush1.bf16.msra.mxu1 %v2808_v8  ;;  %v2880_v8 = vld [vmem:[#allocation5 + $0x280] ss:$8 sps:$4 sm:$0xff]  }
  0xaa   :  { %2084 = vmatpush1.bf16.msra.mxu0 %v2811_v9  ;;  %1873 = vmatprep.subr.bf16.mxu1 %v2816_v10  ;;  %v2883_v9 = vld [vmem:[#allocation5 + $0x680] ss:$8 sps:$4 sm:$0xff]   ;;  %v2888_v10 = vld [vmem:[#allocation5 + $0x294] ss:$8 sps:$4 sm:$0xff]  }
  0xab   :  { %2085 = vmatprep.subr.bf16.mxu0 %v2819_v11  ;;  %v2891_v11 = vld [vmem:[#allocation5 + $0x694] ss:$8 sps:$4 sm:$0xff]  }
  0xad   :  { %1874 = vmatpush1.bf16.msra.mxu1 %v2814_v12  ;;  %v2886_v12 = vld [vmem:[#allocation5 + $0x290] ss:$8 sps:$4 sm:$0xff]  }
  0xae   :  { %2086 = vmatpush1.bf16.msra.mxu0 %v2817_v13  ;;  %1875 = vmatprep.subr.bf16.mxu1 %v2822_v14  ;;  %v2889_v13 = vld [vmem:[#allocation5 + $0x690] ss:$8 sps:$4 sm:$0xff]   ;;  %v2894_v14 = vld [vmem:[#allocation5 + $0x2a4] ss:$8 sps:$4 sm:$0xff]  }
  0xaf   :  { %2087 = vmatprep.subr.bf16.mxu0 %v2825_v15  ;;  %v2897_v15 = vld [vmem:[#allocation5 + $0x6a4] ss:$8 sps:$4 sm:$0xff]  }
  0xb1   :  { %1876 = vmatpush1.bf16.msra.mxu1 %v2820_v16  ;;  %v2892_v16 = vld [vmem:[#allocation5 + $0x2a0] ss:$8 sps:$4 sm:$0xff]  }
  0xb2   :  { %2088 = vmatpush1.bf16.msra.mxu0 %v2823_v17  ;;  %1877 = vmatprep.subr.bf16.mxu1 %v2828_v18  ;;  %v2895_v17 = vld [vmem:[#allocation5 + $0x6a0] ss:$8 sps:$4 sm:$0xff]   ;;  %v2900_v18 = vld [vmem:[#allocation5 + $0x2b4] ss:$8 sps:$4 sm:$0xff]  }
  0xb3   :  { %2089 = vmatprep.subr.bf16.mxu0 %v2831_v19  ;;  %v2903_v19 = vld [vmem:[#allocation5 + $0x6b4] ss:$8 sps:$4 sm:$0xff]  }
  0xb5   :  { %1878 = vmatpush1.bf16.msra.mxu1 %v2826_v20  ;;  %v2898_v20 = vld [vmem:[#allocation5 + $0x2b0] ss:$8 sps:$4 sm:$0xff]  }
  0xb6   :  { %2090 = vmatpush1.bf16.msra.mxu0 %v2829_v21  ;;  %1900 = vmatprep.subr.bf16.mxu1 %v2834_v22  ;;  %v2901_v21 = vld [vmem:[#allocation5 + $0x6b0] ss:$8 sps:$4 sm:$0xff]   ;;  %v2906_v22 = vld [vmem:[#allocation5 + $0x2c4] ss:$8 sps:$4 sm:$0xff]  }
  0xb7   :  { %2112 = vmatprep.subr.bf16.mxu0 %v2837_v23  ;;  %v2909_v23 = vld [vmem:[#allocation5 + $0x6c4] ss:$8 sps:$4 sm:$0xff]  }
  0xb8   :  { %1880 = vmatmul.mubr.bf16.vlgmr.msra.gmra.mrb[0].mxu1 %v2274_v27  ;;  %v2915_v27 = vld [vmem:[#allocation5 + $0x6d4] ss:$8 sps:$4 sm:$0xff]  }
  0xb9   :  { %2092 = vmatmul.mubr.bf16.vlgmr.msra.gmra.mrb[0].mxu0 %v2282_v28  ;;  %1901 = vmatpush1.bf16.msra.mxu1 %v2832_v24  ;;  %v2904_v24 = vld [vmem:[#allocation5 + $0x2c0] ss:$8 sps:$4 sm:$0xff]   ;;  %v2910_v28 = vld [vmem:[#allocation5 + $0x2d0] ss:$8 sps:$4 sm:$0xff]  }
  0xba   :  { %2113 = vmatpush1.bf16.msra.mxu0 %v2835_v25  ;;  %1902 = vmatprep.subr.bf16.mxu1 %v2840_v30  ;;  %v2907_v25 = vld [vmem:[#allocation5 + $0x6c0] ss:$8 sps:$4 sm:$0xff]   ;;  %v2918_v30 = vld [vmem:[#allocation5 + $0x2e4] ss:$8 sps:$4 sm:$0xff]  }
  0xbb   :  { %2114 = vmatprep.subr.bf16.mxu0 %v2843_v31  ;;  %1889 = vmatprep.mubr.bf16.mxu1 %v2291_v34  ;;  %v2921_v31 = vld [vmem:[#allocation5 + $0x6e4] ss:$8 sps:$4 sm:$0xff]   ;;  %v2924_v34 = vld [vmem:[#allocation5 + $0x2f4] ss:$8 sps:$4 sm:$0xff]  }
  0xbc   :  { %2101 = vmatprep.mubr.bf16.mxu0 %v2299_v35  ;;  %v2927_v35 = vld [vmem:[#allocation5 + $0x6f4] ss:$8 sps:$4 sm:$0xff]  }
  0xbd   :  { %1903 = vmatpush1.bf16.msra.mxu1 %v2838_v36  ;;  %v2922_v36 = vld [vmem:[#allocation5 + $0x2f0] ss:$8 sps:$4 sm:$0xff]  }
  0xbe   :  { %2115 = vmatpush1.bf16.msra.mxu0 %v2841_v37  ;;  %1904 = vmatprep.subr.bf16.mxu1 %v2846_v38  ;;  %v2925_v37 = vld [vmem:[#allocation5 + $0x6f0] ss:$8 sps:$4 sm:$0xff]   ;;  %v2930_v38 = vld [vmem:[#allocation5 + $0x304] ss:$8 sps:$4 sm:$0xff]  }
  0xbf   :  { %2116 = vmatprep.subr.bf16.mxu0 %v2849_v39  ;;  %v2933_v39 = vld [vmem:[#allocation5 + $0x704] ss:$8 sps:$4 sm:$0xff]  }
  0xc0   :  { %1890 = vmatmul.mubr.bf16.gmra.mrb[4].mxu1 %v2290_v43  ;;  %v2284_v43 = vcombine.low %v3205_v46, %v3207_v47  ;;  %v2942_v46 = vld [vmem:[#allocation5 + $0x324] ss:$8 sps:$4 sm:$0xff]  }
  0xc1   :  { %2102 = vmatmul.mubr.bf16.gmra.mrb[4].mxu0 %v2298_v44  ;;  %1905 = vmatpush1.bf16.msra.mxu1 %v2844_v40  ;;  %v72_v40 = vld [vmem:[#allocation2 + $0x90] sm:$0xff]  ;;  %v2945_v47 = vld [vmem:[#allocation5 + $0x724] ss:$8 sps:$4 sm:$0xff]  }
  0xc2   :  { %2117 = vmatpush1.bf16.msra.mxu0 %v2847_v41  ;;  %1906 = vmatprep.subr.bf16.mxu1 %v2852_v48  ;;  %v2276_v41 = vcombine.low %v3201_v42, %v3203_v45  ;;  %v80_v44 = vld [vmem:[#allocation2 + $0xd0] sm:$0xff] }
  0xc3   :  { %2118 = vmatprep.subr.bf16.mxu0 %v2855_v49  ;;  %1932 = vmatprep.mubr.bf16.mxu1 %v2277_v50  ;;  %v76_v48 = vld [vmem:[#allocation2 + $0xb0] sm:$0xff]  ;;  %v2928_v50 = vld [vmem:[#allocation5 + $0x300] ss:$8 sps:$4 sm:$0xff]  }
  0xc4   :  { %2144 = vmatprep.mubr.bf16.mxu0 %v2285_v51  ;;  %v84_v49 = vld [vmem:[#allocation2 + $0xf0] sm:$0xff]  ;;  %v2931_v51 = vld [vmem:[#allocation5 + $0x700] ss:$8 sps:$4 sm:$0xff]  }
  0xc5   :  { %1907 = vmatpush1.bf16.msra.mxu1 %v2850_v52  ;;  %v2936_v52 = vld [vmem:[#allocation5 + $0x314] ss:$8 sps:$4 sm:$0xff]   ;;  %v2934_v42 = vld [vmem:[#allocation5 + $0x310] ss:$8 sps:$4 sm:$0xff]  }
  0xc6   :  { %2119 = vmatpush1.bf16.msra.mxu0 %v2853_v53  ;;  %1908 = vmatprep.subr.bf16.mxu1 %v2858_v54  ;;  %v2939_v53 = vld [vmem:[#allocation5 + $0x714] ss:$8 sps:$4 sm:$0xff]   ;;  %v2293_v54 = vcombine.high %v72_v40, %v80_v44  ;;  %v2937_v45 = vld [vmem:[#allocation5 + $0x710] ss:$8 sps:$4 sm:$0xff]  }
  0xc7   :  { %2120 = vmatprep.subr.bf16.mxu0 %v2861_v55  ;;  %v2301_v55 = vcombine.high %v76_v48, %v84_v49 }
  0xc9   :  { %1909 = vmatpush1.bf16.msra.mxu1 %v2856_v56  ;;  %v3217_v56 = vld [vmem:[#allocation2 + $0x18] sm:$0xff] }
  0xca   :  { %2121 = vmatpush1.bf16.msra.mxu0 %v2859_v57  ;;  %1910 = vmatprep.subr.bf16.mxu1 %v2864_v58  ;;  %v2292_v57 = vcombine.low %v72_v40, %v80_v44  ;;  %v2300_v58 = vcombine.low %v76_v48, %v84_v49  ;;  %v3000_v40 = vld [vmem:[#allocation5 + $0x3c0] ss:$8 sps:$4 sm:$0xff]   ;;  %v3011_v44 = vld [vmem:[#allocation5 + $0x7d4] ss:$8 sps:$4 sm:$0xff]   ;;  %v3006_v48 = vld [vmem:[#allocation5 + $0x3d0] ss:$8 sps:$4 sm:$0xff]  }
  0xcb   :  { %2122 = vmatprep.subr.bf16.mxu0 %v2867_v59  ;;  %v3219_v59 = vld [vmem:[#allocation2 + $0x58] sm:$0xff] }
  0xcc   :  { %v3009_v49 = vld [vmem:[#allocation5 + $0x7d0] ss:$8 sps:$4 sm:$0xff]  }
  0xcd   :  { %1911 = vmatpush1.bf16.msra.mxu1 %v2862_v60  ;;  %v3221_v60 = vld [vmem:[#allocation2 + $0x38] sm:$0xff] }
  0xce   :  { %2123 = vmatpush1.bf16.msra.mxu0 %v2865_v61  ;;  %1912 = vmatprep.subr.bf16.mxu1 %v2870_v62  ;;  %v3223_v61 = vld [vmem:[#allocation2 + $0x78] sm:$0xff]  ;;  %v2940_v62 = vld [vmem:[#allocation5 + $0x320] ss:$8 sps:$4 sm:$0xff]  }
  0xcf   :  { %2124 = vmatprep.subr.bf16.mxu0 %v2873_v63  ;;  %v2943_v63 = vld [vmem:[#allocation5 + $0x720] ss:$8 sps:$4 sm:$0xff]  }
  0xd1   :  { %1913 = vmatpush1.bf16.msra.mxu1 %v2868_v0  ;;  %v2948_v0 = vld [vmem:[#allocation5 + $0x334] ss:$8 sps:$4 sm:$0xff]  }
  0xd2   :  { %2125 = vmatpush1.bf16.msra.mxu0 %v2871_v1  ;;  %1914 = vmatprep.subr.bf16.mxu1 %v2876_v2  ;;  %v2951_v1 = vld [vmem:[#allocation5 + $0x734] ss:$8 sps:$4 sm:$0xff]   ;;  %v2279_v2 = vcombine.high %v3217_v56, %v3219_v59 }
  0xd3   :  { %2126 = vmatprep.subr.bf16.mxu0 %v2879_v3  ;;  %v2287_v3 = vcombine.high %v3221_v60, %v3223_v61 }
  0xd5   :  { %1915 = vmatpush1.bf16.msra.mxu1 %v2874_v4  ;;  %v2946_v4 = vld [vmem:[#allocation5 + $0x330] ss:$8 sps:$4 sm:$0xff]  }
  0xd6   :  { %2127 = vmatpush1.bf16.msra.mxu0 %v2877_v5  ;;  %1916 = vmatprep.subr.bf16.mxu1 %v2882_v6  ;;  %v2949_v5 = vld [vmem:[#allocation5 + $0x730] ss:$8 sps:$4 sm:$0xff]   ;;  %v2954_v6 = vld [vmem:[#allocation5 + $0x344] ss:$8 sps:$4 sm:$0xff]  }
  0xd7   :  { %2128 = vmatprep.subr.bf16.mxu0 %v2885_v7  ;;  %v2957_v7 = vld [vmem:[#allocation5 + $0x744] ss:$8 sps:$4 sm:$0xff]  }
  0xd9   :  { %1917 = vmatpush1.bf16.msra.mxu1 %v2880_v8  ;;  %v2952_v8 = vld [vmem:[#allocation5 + $0x340] ss:$8 sps:$4 sm:$0xff]  }
  0xda   :  { %2129 = vmatpush1.bf16.msra.mxu0 %v2883_v9  ;;  %1918 = vmatprep.subr.bf16.mxu1 %v2888_v10  ;;  %v2955_v9 = vld [vmem:[#allocation5 + $0x740] ss:$8 sps:$4 sm:$0xff]   ;;  %v2960_v10 = vld [vmem:[#allocation5 + $0x354] ss:$8 sps:$4 sm:$0xff]  }
  0xdb   :  { %2130 = vmatprep.subr.bf16.mxu0 %v2891_v11  ;;  %v2963_v11 = vld [vmem:[#allocation5 + $0x754] ss:$8 sps:$4 sm:$0xff]  }
  0xdd   :  { %1919 = vmatpush1.bf16.msra.mxu1 %v2886_v12  ;;  %v2958_v12 = vld [vmem:[#allocation5 + $0x350] ss:$8 sps:$4 sm:$0xff]  }
  0xde   :  { %2131 = vmatpush1.bf16.msra.mxu0 %v2889_v13  ;;  %1920 = vmatprep.subr.bf16.mxu1 %v2894_v14  ;;  %v2961_v13 = vld [vmem:[#allocation5 + $0x750] ss:$8 sps:$4 sm:$0xff]   ;;  %v2966_v14 = vld [vmem:[#allocation5 + $0x364] ss:$8 sps:$4 sm:$0xff]  }
  0xdf   :  { %2132 = vmatprep.subr.bf16.mxu0 %v2897_v15  ;;  %v2969_v15 = vld [vmem:[#allocation5 + $0x764] ss:$8 sps:$4 sm:$0xff]  }
  0xe1   :  { %1921 = vmatpush1.bf16.msra.mxu1 %v2892_v16  ;;  %v2964_v16 = vld [vmem:[#allocation5 + $0x360] ss:$8 sps:$4 sm:$0xff]  }
  0xe2   :  { %2133 = vmatpush1.bf16.msra.mxu0 %v2895_v17  ;;  %1922 = vmatprep.subr.bf16.mxu1 %v2900_v18  ;;  %v2967_v17 = vld [vmem:[#allocation5 + $0x760] ss:$8 sps:$4 sm:$0xff]   ;;  %v2972_v18 = vld [vmem:[#allocation5 + $0x374] ss:$8 sps:$4 sm:$0xff]  }
  0xe3   :  { %2134 = vmatprep.subr.bf16.mxu0 %v2903_v19  ;;  %v2975_v19 = vld [vmem:[#allocation5 + $0x774] ss:$8 sps:$4 sm:$0xff]  }
  0xe5   :  { %1923 = vmatpush1.bf16.msra.mxu1 %v2898_v20  ;;  %v2970_v20 = vld [vmem:[#allocation5 + $0x370] ss:$8 sps:$4 sm:$0xff]  }
  0xe6   :  { %2135 = vmatpush1.bf16.msra.mxu0 %v2901_v21  ;;  %1924 = vmatprep.subr.bf16.mxu1 %v2906_v22  ;;  %v2973_v21 = vld [vmem:[#allocation5 + $0x770] ss:$8 sps:$4 sm:$0xff]   ;;  %v2978_v22 = vld [vmem:[#allocation5 + $0x384] ss:$8 sps:$4 sm:$0xff]  }
  0xe7   :  { %2136 = vmatprep.subr.bf16.mxu0 %v2909_v23  ;;  %v2981_v23 = vld [vmem:[#allocation5 + $0x784] ss:$8 sps:$4 sm:$0xff]  }
  0xe9   :  { %1925 = vmatpush1.bf16.msra.mxu1 %v2904_v24  ;;  %v2976_v24 = vld [vmem:[#allocation5 + $0x380] ss:$8 sps:$4 sm:$0xff]  }
  0xea   :  { %2137 = vmatpush1.bf16.msra.mxu0 %v2907_v25  ;;  %1926 = vmatprep.subr.bf16.mxu1 %v2912_v26  ;;  %v2979_v25 = vld [vmem:[#allocation5 + $0x780] ss:$8 sps:$4 sm:$0xff]   ;;  %v2984_v26 = vld [vmem:[#allocation5 + $0x394] ss:$8 sps:$4 sm:$0xff]  }
  0xeb   :  { %2138 = vmatprep.subr.bf16.mxu0 %v2915_v27  ;;  %v2987_v27 = vld [vmem:[#allocation5 + $0x794] ss:$8 sps:$4 sm:$0xff]  }
  0xed   :  { %1927 = vmatpush1.bf16.msra.mxu1 %v2910_v28  ;;  %v2982_v28 = vld [vmem:[#allocation5 + $0x390] ss:$8 sps:$4 sm:$0xff]  }
  0xee   :  { %2139 = vmatpush1.bf16.msra.mxu0 %v2913_v29  ;;  %1928 = vmatprep.subr.bf16.mxu1 %v2918_v30  ;;  %v2985_v29 = vld [vmem:[#allocation5 + $0x790] ss:$8 sps:$4 sm:$0xff]   ;;  %v2990_v30 = vld [vmem:[#allocation5 + $0x3a4] ss:$8 sps:$4 sm:$0xff]  }
  0xef   :  { %2140 = vmatprep.subr.bf16.mxu0 %v2921_v31  ;;  %v2993_v31 = vld [vmem:[#allocation5 + $0x7a4] ss:$8 sps:$4 sm:$0xff]  }
  0xf1   :  { %1929 = vmatpush1.bf16.msra.mxu1 %v2916_v32  ;;  %v2988_v32 = vld [vmem:[#allocation5 + $0x3a0] ss:$8 sps:$4 sm:$0xff]  }
  0xf2   :  { %2141 = vmatpush1.bf16.msra.mxu0 %v2919_v33  ;;  %1930 = vmatprep.subr.bf16.mxu1 %v2924_v34  ;;  %v2991_v33 = vld [vmem:[#allocation5 + $0x7a0] ss:$8 sps:$4 sm:$0xff]   ;;  %v2996_v34 = vld [vmem:[#allocation5 + $0x3b4] ss:$8 sps:$4 sm:$0xff]  }
  0xf3   :  { %2142 = vmatprep.subr.bf16.mxu0 %v2927_v35  ;;  %v2999_v35 = vld [vmem:[#allocation5 + $0x7b4] ss:$8 sps:$4 sm:$0xff]  }
  0xf5   :  { %1931 = vmatpush1.bf16.msra.mxu1 %v2922_v36  ;;  %v2994_v36 = vld [vmem:[#allocation5 + $0x3b0] ss:$8 sps:$4 sm:$0xff]  }
  0xf6   :  { %2143 = vmatpush1.bf16.msra.mxu0 %v2925_v37  ;;  %1953 = vmatprep.subr.bf16.mxu1 %v2930_v38  ;;  %v2997_v37 = vld [vmem:[#allocation5 + $0x7b0] ss:$8 sps:$4 sm:$0xff]   ;;  %v3002_v38 = vld [vmem:[#allocation5 + $0x3c4] ss:$8 sps:$4 sm:$0xff]  }
  0xf7   :  { %2165 = vmatprep.subr.bf16.mxu0 %v2933_v39  ;;  %v3005_v39 = vld [vmem:[#allocation5 + $0x7c4] ss:$8 sps:$4 sm:$0xff]  }
  0xf8   :  { %1933 = vmatmul.mubr.bf16.vlgmr.msra.gmra.mrb[0].mxu1 %v2276_v41  ;;  %v3003_v41 = vld [vmem:[#allocation5 + $0x7c0] ss:$8 sps:$4 sm:$0xff]  }
  0xf9   :  { %2145 = vmatmul.mubr.bf16.vlgmr.msra.gmra.mrb[0].mxu0 %v2284_v43  ;;  %1954 = vmatpush1.bf16.msra.mxu1 %v2928_v50  ;;  %v3008_v43 = vld [vmem:[#allocation5 + $0x3d4] ss:$8 sps:$4 sm:$0xff]   ;;  %v3014_v50 = vld [vmem:[#allocation5 + $0x3e4] ss:$8 sps:$4 sm:$0xff]  }
  0xfa   :  { %2166 = vmatpush1.bf16.msra.mxu0 %v2931_v51  ;;  %1955 = vmatprep.subr.bf16.mxu1 %v2936_v52  ;;  %v3017_v51 = vld [vmem:[#allocation5 + $0x7e4] ss:$8 sps:$4 sm:$0xff]   ;;  %v3012_v52 = vld [vmem:[#allocation5 + $0x3e0] ss:$8 sps:$4 sm:$0xff]  }
  0xfb   :  { %2167 = vmatprep.subr.bf16.mxu0 %v2939_v53  ;;  %1942 = vmatprep.mubr.bf16.mxu1 %v2293_v54  ;;  %v3015_v53 = vld [vmem:[#allocation5 + $0x7e0] ss:$8 sps:$4 sm:$0xff]   ;;  %v3020_v54 = vld [vmem:[#allocation5 + $0x3f4] ss:$8 sps:$4 sm:$0xff]  }
  0xfc   :  { %2154 = vmatprep.mubr.bf16.mxu0 %v2301_v55  ;;  %v3023_v55 = vld [vmem:[#allocation5 + $0x7f4] ss:$8 sps:$4 sm:$0xff]  }
  0xfd   :  { %1956 = vmatpush1.bf16.msra.mxu1 %v2934_v42  ;;  %v3018_v42 = vld [vmem:[#allocation5 + $0x3f0] ss:$8 sps:$4 sm:$0xff]  }
  0xfe   :  { %2168 = vmatpush1.bf16.msra.mxu0 %v2937_v45  ;;  %1957 = vmatprep.subr.bf16.mxu1 %v2942_v46  ;;  %v3021_v45 = vld [vmem:[#allocation5 + $0x7f0] ss:$8 sps:$4 sm:$0xff]  }
  0xff   :  { %2169 = vmatprep.subr.bf16.mxu0 %v2945_v47  ;;  %v73_v46 = vld [vmem:[#allocation2 + $0x98] sm:$0xff] }
 0x100   :  { %1943 = vmatmul.mubr.bf16.gmra.mrb[4].mxu1 %v2292_v57  ;;  %v81_v47 = vld [vmem:[#allocation2 + $0xd8] sm:$0xff] }
 0x101   :  { %2155 = vmatmul.mubr.bf16.gmra.mrb[4].mxu0 %v2300_v58  ;;  %1958 = vmatpush1.bf16.msra.mxu1 %v2940_v62  ;;  %v77_v57 = vld [vmem:[#allocation2 + $0xb8] sm:$0xff]  ;;  %v2278_v62 = vcombine.low %v3217_v56, %v3219_v59 }
 0x102   :  { %2170 = vmatpush1.bf16.msra.mxu0 %v2943_v63  ;;  %1959 = vmatprep.subr.bf16.mxu1 %v2948_v0  ;;  %v85_v58 = vld [vmem:[#allocation2 + $0xf8] sm:$0xff]  ;;  %v2286_v63 = vcombine.low %v3221_v60, %v3223_v61  ;;  %v2295_v0 = vcombine.high %v73_v46, %v81_v47 }
 0x103   :  { %2171 = vmatprep.subr.bf16.mxu0 %v2951_v1  ;;  %1985 = vmatprep.mubr.bf16.mxu1 %v2279_v2  ;;  %v2303_v1 = vcombine.high %v77_v57, %v85_v58  ;;  %v2294_v2 = vcombine.low %v73_v46, %v81_v47 }
 0x104   :  { %2197 = vmatprep.mubr.bf16.mxu0 %v2287_v3  ;;  %v2302_v3 = vcombine.low %v77_v57, %v85_v58 }
 0x105   :  { %1960 = vmatpush1.bf16.msra.mxu1 %v2946_v4  ;;  %v344_v4 = vlaneseq }
 0x106   :  { %2172 = vmatpush1.bf16.msra.mxu0 %v2949_v5  ;;  %1961 = vmatprep.subr.bf16.mxu1 %v2954_v6 }
 0x107   :  { %2173 = vmatprep.subr.bf16.mxu0 %v2957_v7  ;;  %v345_v5 = vshrl.u32 %v344_v4, 7  ;;  %v342_v7 = vld [vmem:[#allocation7] sm:$0x3] }
 0x109   :  { %1962 = vmatpush1.bf16.msra.mxu1 %v2952_v8  ;;  %v346_v6 = vsub.s32 0, %v345_v5  ;;  %v350_v56 = vsub.s32 1, %v345_v5 }
 0x10a   :  { %2174 = vmatpush1.bf16.msra.mxu0 %v2955_v9  ;;  %1963 = vmatprep.subr.bf16.mxu1 %v2960_v10 }
 0x10b   :  { %2175 = vmatprep.subr.bf16.mxu0 %v2963_v11  ;;  %v347_v59 = vrot.slane %v342_v7, %v346_v6  ;;  %v351_v8 = vrot.slane %v342_v7, %v350_v56 }
 0x10d   :  { %1964 = vmatpush1.bf16.msra.mxu1 %v2958_v12 }
 0x10e   :  { %2176 = vmatpush1.bf16.msra.mxu0 %v2961_v13  ;;  %1965 = vmatprep.subr.bf16.mxu1 %v2966_v14 }
 0x10f   :  { %2177 = vmatprep.subr.bf16.mxu0 %v2969_v15 }
 0x111   :  { %1966 = vmatpush1.bf16.msra.mxu1 %v2964_v16 }
 0x112   :  { %2178 = vmatpush1.bf16.msra.mxu0 %v2967_v17  ;;  %1967 = vmatprep.subr.bf16.mxu1 %v2972_v18 }
 0x113   :  { %2179 = vmatprep.subr.bf16.mxu0 %v2975_v19 }
 0x115   :  { %1968 = vmatpush1.bf16.msra.mxu1 %v2970_v20 }
 0x116   :  { %2180 = vmatpush1.bf16.msra.mxu0 %v2973_v21  ;;  %1969 = vmatprep.subr.bf16.mxu1 %v2978_v22 }
 0x117   :  { %2181 = vmatprep.subr.bf16.mxu0 %v2981_v23 }
 0x119   :  { %1970 = vmatpush1.bf16.msra.mxu1 %v2976_v24 }
 0x11a   :  { %2182 = vmatpush1.bf16.msra.mxu0 %v2979_v25  ;;  %1971 = vmatprep.subr.bf16.mxu1 %v2984_v26 }
 0x11b   :  { %2183 = vmatprep.subr.bf16.mxu0 %v2987_v27 }
 0x11d   :  { %1972 = vmatpush1.bf16.msra.mxu1 %v2982_v28 }
 0x11e   :  { %2184 = vmatpush1.bf16.msra.mxu0 %v2985_v29  ;;  %1973 = vmatprep.subr.bf16.mxu1 %v2990_v30 }
 0x11f   :  { %2185 = vmatprep.subr.bf16.mxu0 %v2993_v31 }
 0x121   :  { %1974 = vmatpush1.bf16.msra.mxu1 %v2988_v32 }
 0x122   :  { %2186 = vmatpush1.bf16.msra.mxu0 %v2991_v33  ;;  %1975 = vmatprep.subr.bf16.mxu1 %v2996_v34 }
 0x123   :  { %2187 = vmatprep.subr.bf16.mxu0 %v2999_v35 }
 0x125   :  { %1976 = vmatpush1.bf16.msra.mxu1 %v2994_v36 }
 0x126   :  { %2188 = vmatpush1.bf16.msra.mxu0 %v2997_v37  ;;  %1977 = vmatprep.subr.bf16.mxu1 %v3002_v38 }
 0x127   :  { %2189 = vmatprep.subr.bf16.mxu0 %v3005_v39 }
 0x129   :  { %1978 = vmatpush1.bf16.msra.mxu1 %v3000_v40 }
 0x12a   :  { %2190 = vmatpush1.bf16.msra.mxu0 %v3003_v41  ;;  %1979 = vmatprep.subr.bf16.mxu1 %v3008_v43 }
 0x12b   :  { %2191 = vmatprep.subr.bf16.mxu0 %v3011_v44 }
 0x12d   :  { %1980 = vmatpush1.bf16.msra.mxu1 %v3006_v48 }
 0x12e   :  { %2192 = vmatpush1.bf16.msra.mxu0 %v3009_v49  ;;  %1981 = vmatprep.subr.bf16.mxu1 %v3014_v50 }
 0x12f   :  { %2193 = vmatprep.subr.bf16.mxu0 %v3017_v51 }
 0x131   :  { %1982 = vmatpush1.bf16.msra.mxu1 %v3012_v52 }
 0x132   :  { %2194 = vmatpush1.bf16.msra.mxu0 %v3015_v53  ;;  %1983 = vmatprep.subr.bf16.mxu1 %v3020_v54 }
 0x133   :  { %2195 = vmatprep.subr.bf16.mxu0 %v3023_v55 }
 0x135   :  { %1984 = vmatpush1.bf16.msra.mxu1 %v3018_v42 }
 0x136   :  { %2196 = vmatpush1.bf16.msra.mxu0 %v3021_v45 }
 0x138   :  { %1986 = vmatmul.mubr.bf16.vlgmr.msra.gmra.mrb[0].mxu1 %v2278_v62 }
 0x139   :  { %2198 = vmatmul.mubr.bf16.vlgmr.msra.gmra.mrb[0].mxu0 %v2286_v63  ;;  %1995 = vmatprep.mubr.bf16.mxu1 %v2295_v0 }
 0x13a   :  { %2207 = vmatprep.mubr.bf16.mxu0 %v2303_v1 }
 0x140   :  { %1996 = vmatmul.mubr.bf16.gmra.mrb[4].mxu1 %v2294_v2 }
 0x141   :  { %2208 = vmatmul.mubr.bf16.gmra.mrb[4].mxu0 %v2302_v3 }
 0x20b   :  { %v1987_v60 = vpop.f32.mrb[0].mxu1 }
 0x20c   :  { %v2199_v61 = vpop.f32.mrb[0].mxu0  ;;  %v2568_v9 = vadd.f32 %v1987_v60, %v347_v59  ;;  %v1989_v10 = vpop.f32.mrb[1].mxu1 }
 0x20d   :  { %v2201_v11 = vpop.f32.mrb[1].mxu0  ;;  %v2570_v12 = vadd.f32 %v1989_v10, %v351_v8  ;;  %v1991_v13 = vpop.f32.mrb[2].mxu1 }
 0x20e   :  { %v2203_v14 = vpop.f32.mrb[2].mxu0  ;;  %v2569_v15 = vadd.f32 %v2568_v9, %v2199_v61  ;;  %v2572_v16 = vadd.f32 %v1991_v13, %v347_v59  ;;  %v1993_v17 = vpop.f32.mrb[3].mxu1 }
 0x20f   :  { %v2205_v18 = vpop.f32.mrb[3].mxu0  ;;  %v2571_v19 = vadd.f32 %v2570_v12, %v2201_v11  ;;  %v2574_v20 = vadd.f32 %v1993_v17, %v351_v8 }
 0x210   :  { %v2218_v21 = vmax.f32 %v2569_v15, 0.0  ;;  %v2573_v22 = vadd.f32 %v2572_v16, %v2203_v14 }
 0x211   :  { %v2219_v23 = vmax.f32 %v2571_v19, 0.0  ;;  %v2575_v24 = vadd.f32 %v2574_v20, %v2205_v18 }
 0x212   :  { %v2220_v25 = vmax.f32 %v2573_v22, 0.0 }
 0x213   :  { %v2564_v26 = vpack.c.bf16 %v2219_v23, %v2218_v21  ;;  %v2221_v27 = vmax.f32 %v2575_v24, 0.0  ;;  %v1997_v28 = vpop.f32.mrb[4].mxu1 }
 0x214   :  { %v2209_v29 = vpop.f32.mrb[4].mxu0  ;;  %v2576_v30 = vadd.f32 %v1997_v28, %v347_v59  ;;  %v1999_v31 = vpop.f32.mrb[5].mxu1 }
 0x215   :  { %v2211_v32 = vpop.f32.mrb[5].mxu0  ;;  %2250 = vst [vmem:[#allocation8] sm:$0xff] %v2564_v26  ;;  %v2565_v33 = vpack.c.bf16 %v2221_v27, %v2220_v25  ;;  %v2578_v34 = vadd.f32 %v1999_v31, %v351_v8  ;;  %v2001_v35 = vpop.f32.mrb[6].mxu1 }
 0x216   :  { %v2213_v36 = vpop.f32.mrb[6].mxu0  ;;  %v2577_v37 = vadd.f32 %v2576_v30, %v2209_v29  ;;  %v2580_v38 = vadd.f32 %v2001_v35, %v347_v59  ;;  %v2003_v39 = vpop.f32.mrb[7].mxu1 }
 0x217   :  { %v2215_v40 = vpop.f32.mrb[7].mxu0  ;;  %2251 = vst [vmem:[#allocation8 + $0x8] sm:$0xff] %v2565_v33  ;;  %v2579_v41 = vadd.f32 %v2578_v34, %v2211_v32  ;;  %v2582_v43 = vadd.f32 %v2003_v39, %v351_v8 }
 0x218   :  { %v2222_v44 = vmax.f32 %v2577_v37, 0.0  ;;  %v2581_v48 = vadd.f32 %v2580_v38, %v2213_v36 }
 0x219   :  { %v2223_v49 = vmax.f32 %v2579_v41, 0.0  ;;  %v2583_v50 = vadd.f32 %v2582_v43, %v2215_v40 }
 0x21a   :  { %v2224_v51 = vmax.f32 %v2581_v48, 0.0 }
 0x21b   :  { %v2566_v52 = vpack.c.bf16 %v2223_v49, %v2222_v44  ;;  %v2225_v53 = vmax.f32 %v2583_v50, 0.0 }
 0x21d   :  { %2252 = vst [vmem:[#allocation8 + $0x10] sm:$0xff] %v2566_v52  ;;  %v2567_v54 = vpack.c.bf16 %v2225_v53, %v2224_v51 }
 0x21f   :  { %2253 = vst [vmem:[#allocation8 + $0x18] sm:$0xff] %v2567_v54 }
 0x220   :  { %3101 = shalt.err (!%p3098_p0)
}
 0x221   :  { %s3102_s29 = scalar_lea.hbm %s3251_s3, 512 }
 0x222   :  { %p3103_p1 = scmp.ne.s32.totalorder %s3251_s3, %s3102_s29  ;;  %p3106_p2 = scmp.lt.u32.totalorder %s3102_s29, %s3251_s3 }
 0x224   :  { %p3108_p3 = pnand %p3106_p2, %p3103_p1 }
 0x226   :  { %3111 = shalt.err (!%p3108_p3)
}
 0x227   :  { %2265 = dma.vmem_to_hbm [thread:$0]  %s2260_s25, 512, %s3251_s3, [#allocation4], %s3119_s22, %s3119_s22, %s3120_s23  }
 0x228   :  { %3116 = dma.done.wait [#allocation4], 512  }
 0x229   :  { %3117 = vsyncadd [#allocation4], 4294966784 }
 0x22a   :  { %2269 = vsyncpa [#allocation3], 1 }
 0x22b   :  { %2270 = vsyncpa [#allocation6], 1 }
 0x22c   :  { %2271 = vsyncpa [#allocation4], 1 }

// kernel: dann_forward.3
= control target key start
LH: loop header
LB: loop body
LE: loop exit
PB: predicated region body
PF: predicated region fallthrough
CT: control target
= control target key end

     0   :  { %s19786_s0 = inlined_call_operand.hbm [shape: bf16[16,1], index: 0, kind: input, shape index: {}]   ;;  %s19787_s1 = inlined_call_operand.hbm [shape: bf16[16,1], index: 1, kind: input, shape index: {}]   ;;  %s19788_s2 = inlined_call_operand.hbm [shape: bf16[2,16,256], index: 2, kind: input, shape index: {}]   ;;  %s19789_s3 = inlined_call_operand.hbm [shape: bf16[9,256,512], index: 3, kind: input, shape index: {}]   ;;  %s19790_s4 = inlined_call_operand.hbm [shape: f32[1,512], index: 4, kind: input, shape index: {}]   ;;  %s19791_s5 = inlined_call_operand.hbm [shape: bf16[9,256,256], index: 5, kind: input, shape index: {}]   ;;  %s19792_s6 = inlined_call_operand.hbm [shape: f32[1,256], index: 6, kind: input, shape index: {}]   ;;  %s19793_s7 = inlined_call_operand.hbm [shape: bf16[9,256,256], index: 7, kind: input, shape index: {}]   ;;  %s19794_s8 = inlined_call_operand.hbm [shape: f32[1,256], index: 8, kind: input, shape index: {}]   ;;  %s19795_s9 = inlined_call_operand.hbm [shape: bf16[9,512,128], index: 9, kind: input, shape index: {}]   ;;  %s19796_s10 = inlined_call_operand.hbm [shape: f32[1,128], index: 10, kind: input, shape index: {}]   ;;  %s19797_s11 = inlined_call_operand.hbm [shape: f32[2,16,128], index: 11, kind: output, shape index: {}]  }
   0x1   :  { %19807 = sst [smem:[#allocation34_spill]] %s19786_s0 }
   0x2   :  { %19808 = sst [smem:[#allocation35_spill]] %s19787_s1 }
   0x3   :  { %19809 = sst [smem:[#allocation36_spill]] %s19788_s2 }
   0x4   :  { %19810 = sst [smem:[#allocation37_spill]] %s19797_s11 }
   0x5   :  { %16 = vsyncpa [#allocation6], 0 }
   0x6   :  { %17 = vsyncpa [#allocation9], 0 }
   0x7   :  { %18 = vsyncpa [#allocation13], 0 }
   0x8   :  { %19 = vsyncpa [#allocation16], 0 }
   0x9   :  { %20 = vsyncpa [#allocation19], 0 }
   0xa   :  { %21 = vsyncpa [#allocation22], 0 }
   0xb   :  { %22 = vsyncpa [#allocation7], 0 }
   0xc   :  { %24 = vsyncpa [#allocation7 + $0x1], 0  ;;  %s18926_s17 = smov 0   ;;  %s18928_s18 = smov 0  }
   0xd   :  { %s18930_s19 = smov 0   ;;  %s18932_s20 = smov 0  }
   0xe LB: > { %s18843_s21 = smov [#allocation5]   ;;  %s18947_s23 = sadd.s32 4294967295, %s18841_s20   ;;  %s18841_s20 = sphi %s18932_s20, %s19850_s20   ;;  %s18837_s19 = sphi %s18930_s19, %s19849_s19   ;;  %s18833_s18 = sphi %s18928_s18, %s19848_s18   ;;  %s18829_s17 = sphi %s18926_s17, %s19847_s17  }
   0xf   : > { %s309_s22 = sshll.u32 %s18843_s21, 4  ;;  %p14243_p0 = scmp.ge.s32.totalorder %s18841_s20, 1  ;;  %s18952_s22 = int_to_ptr.vmem [resolvable:$true] %s309_s22 }
  0x10   : > { %p19802_p1 = scmp.eq.s32.totalorder %s18947_s23, 0  ;;  %p297_p2 = scmp.lt.s32.totalorder %s18841_s20, 3 }
  0x11   : > { %s18844_s25 = smov [#allocation8]   ;;  %s18845_s28 = smov [#allocation12]  }
  0x12   : > { %p18954_p3 = pnand %p14243_p0, %p297_p2  ;;  %s322_s26 = sshll.u32 %s18844_s25, 4  ;;  %s18967_s26 = int_to_ptr.vmem [resolvable:$true] %s322_s26 }
  0x13   : > { %s349_s29 = sshll.u32 %s18845_s28, 4  ;;  %s19814_s0 = sld [smem:[#allocation34_spill]]  ;;  %s18969_s29 = int_to_ptr.vmem [resolvable:$true] %s349_s29 }
  0x14   : > { %s19811_s24 = scalar_select %p18954_p3, 1, 0 }
  0x15   : > { %p16289_p5 = pneg %p18954_p3 }
  0x16   : > { %19812 = sst [smem:[#allocation33_spill]] %s19811_s24 }
  0x17   : > { %p18963_p6 = pnand %p16289_p5, %p19802_p1 }
  0x19   : > { %s18437_s13 = scalar_lea.hbm %s19814_s0, 128  ;;  %p18979_p8 = pneg %p18963_p6 }
  0x1a   : > { %p18438_p7 = scmp.ne.s32.totalorder %s19814_s0, %s18437_s13  ;;  %p18444_p11 = scmp.lt.u32.totalorder %s18437_s13, %s19814_s0 }
  0x1c   : > { %p18440_p9 = pnand %p18979_p8, %p18438_p7 }
  0x1e   : > { %p18441_p10 = pneg %p18440_p9 }
  0x20   : > { %p18446_p12 = pnand %p18444_p11, %p18441_p10 }
  0x22   : > { %18449 = shalt.err (!%p18446_p12)
}
  0x23   : > { %s18450_s28 = scalar_lea.vmem %s18952_s22, 128  ;;  %p18458_p5 = scmp.lt.s32.totalorder %s18952_s22, %s18952_s22 }
  0x24   : > { %p18451_p13 = scmp.ne.s32.totalorder %s18952_s22, %s18450_s28  ;;  %p18459_p4 = scmp.lt.s32.totalorder %s18450_s28, %s18450_s28 }
  0x26   : > { %p18453_p0 = pnand %p18451_p13, %p18979_p8  ;;  %p18460_p7 = por %p18459_p4, %p18458_p5 }
  0x28   : > { %p18454_p2 = pneg %p18453_p0 }
  0x2a   : > { %p18461_p9 = pnand %p18460_p7, %p18454_p2 }
  0x2c   : > { %18464 = shalt.err (!%p18461_p9)
}
  0x2d   : > { %s19801_s30 = smov 64   ;;  %s19804_s12 = smov 4  }
  0x2e   : > { %16292 = dma.hbm_to_vmem [thread:$0]  (!%p18963_p6), %s19814_s0, 128, %s18952_s22, [#allocation6], %s19801_s30, %s19801_s30, %s19804_s12  }
  0x2f   : > { %s19816_s1 = sld [smem:[#allocation35_spill]] }
  0x35   : > { %s18465_s25 = scalar_lea.hbm %s19816_s1, 128 }
  0x36   : > { %p18466_p4 = scmp.ne.s32.totalorder %s19816_s1, %s18465_s25  ;;  %p18472_p12 = scmp.lt.u32.totalorder %s18465_s25, %s19816_s1 }
  0x38   : > { %p18468_p10 = pnand %p18466_p4, %p18979_p8 }
  0x3a   : > { %p18469_p11 = pneg %p18468_p10 }
  0x3c   : > { %p18474_p13 = pnand %p18472_p12, %p18469_p11 }
  0x3e   : > { %18477 = shalt.err (!%p18474_p13)
}
  0x3f   : > { %s18478_s22 = scalar_lea.vmem %s18967_s26, 128  ;;  %p18486_p7 = scmp.lt.s32.totalorder %s18967_s26, %s18967_s26 }
  0x40   : > { %p18479_p0 = scmp.ne.s32.totalorder %s18967_s26, %s18478_s22  ;;  %p18487_p9 = scmp.lt.s32.totalorder %s18478_s22, %s18478_s22 }
  0x42   : > { %p18481_p2 = pnand %p18479_p0, %p18979_p8  ;;  %p18488_p4 = por %p18487_p9, %p18486_p7 }
  0x44   : > { %p18482_p5 = pneg %p18481_p2 }
  0x46   : > { %p18489_p10 = pnand %p18488_p4, %p18482_p5 }
  0x48   : > { %18492 = shalt.err (!%p18489_p10)
}
  0x49   : > { %16295 = dma.hbm_to_vmem [thread:$0]  (!%p18963_p6), %s19816_s1, 128, %s18967_s26, [#allocation9], %s19801_s30, %s19801_s30, %s19804_s12  }
  0x4a   : > { %s18493_s14 = scalar_lea.hbm %s19790_s4, 64 }
  0x4b   : > { %p18494_p11 = scmp.ne.s32.totalorder %s19790_s4, %s18493_s14  ;;  %p18500_p0 = scmp.lt.u32.totalorder %s18493_s14, %s19790_s4 }
  0x4d   : > { %p18496_p12 = pnand %p18494_p11, %p18979_p8 }
  0x4f   : > { %p18497_p13 = pneg %p18496_p12 }
  0x51   : > { %p18502_p2 = pnand %p18500_p0, %p18497_p13 }
  0x53   : > { %18505 = shalt.err (!%p18502_p2)
}
  0x54   : > { %s18506_s26 = scalar_lea.vmem %s18969_s29, 64  ;;  %p18514_p4 = scmp.lt.s32.totalorder %s18969_s29, %s18969_s29 }
  0x55   : > { %p18507_p5 = scmp.ne.s32.totalorder %s18969_s29, %s18506_s26  ;;  %p18515_p10 = scmp.lt.s32.totalorder %s18506_s26, %s18506_s26 }
  0x57   : > { %p18509_p7 = pnand %p18507_p5, %p18979_p8  ;;  %p18516_p11 = por %p18515_p10, %p18514_p4 }
  0x59   : > { %p18510_p9 = pneg %p18509_p7 }
  0x5b   : > { %p18517_p12 = pnand %p18516_p11, %p18510_p9 }
  0x5d   : > { %18520 = shalt.err (!%p18517_p12)
}
  0x5e   : > { %16301 = dma.hbm_to_vmem [thread:$0]  (!%p18963_p6), %s19790_s4, 64, %s18969_s29, [#allocation13]  }
  0x5f   : > { %s18848_s11 = smov [#allocation15]   ;;  %s18849_s13 = smov [#allocation18]  }
  0x60   : > { %s373_s24 = sshll.u32 %s18848_s11, 4  ;;  %s397_s14 = sshll.u32 %s18849_s13, 4  ;;  %s374_s24 = int_to_ptr.vmem [resolvable:$true] %s373_s24  ;;  %s398_s14 = int_to_ptr.vmem [resolvable:$true] %s397_s14 }
  0x61   : > { %s18521_s25 = scalar_lea.hbm %s19792_s6, 32 }
  0x62   : > { %p18522_p13 = scmp.ne.s32.totalorder %s19792_s6, %s18521_s25  ;;  %p18528_p5 = scmp.lt.u32.totalorder %s18521_s25, %s19792_s6 }
  0x64   : > { %p18524_p0 = pnand %p18522_p13, %p18979_p8 }
  0x66   : > { %p18525_p2 = pneg %p18524_p0 }
  0x68   : > { %p18530_p7 = pnand %p18528_p5, %p18525_p2 }
  0x6a   : > { %18533 = shalt.err (!%p18530_p7)
}
  0x6b   : > { %s18534_s29 = scalar_lea.vmem %s374_s24, 32  ;;  %p18542_p11 = scmp.lt.s32.totalorder %s374_s24, %s374_s24 }
  0x6c   : > { %p18535_p9 = scmp.ne.s32.totalorder %s374_s24, %s18534_s29  ;;  %p18543_p12 = scmp.lt.s32.totalorder %s18534_s29, %s18534_s29 }
  0x6e   : > { %p18537_p4 = pnand %p18535_p9, %p18979_p8  ;;  %p18544_p1 = por %p18543_p12, %p18542_p11 }
  0x70   : > { %p18538_p10 = pneg %p18537_p4 }
  0x72   : > { %p18545_p3 = pnand %p18544_p1, %p18538_p10 }
  0x74   : > { %18548 = shalt.err (!%p18545_p3)
}
  0x75   : > { %16307 = dma.hbm_to_vmem [thread:$0]  (!%p18963_p6), %s19792_s6, 32, %s374_s24, [#allocation16]  }
  0x76   : > { %s18549_s15 = scalar_lea.hbm %s19794_s8, 32 }
  0x77   : > { %p18550_p13 = scmp.ne.s32.totalorder %s19794_s8, %s18549_s15  ;;  %p18556_p3 = scmp.lt.u32.totalorder %s18549_s15, %s19794_s8 }
  0x79   : > { %p18552_p0 = pnand %p18550_p13, %p18979_p8 }
  0x7b   : > { %p18553_p1 = pneg %p18552_p0 }
  0x7d   : > { %p18558_p2 = pnand %p18556_p3, %p18553_p1 }
  0x7f   : > { %18561 = shalt.err (!%p18558_p2)
}
  0x80   : > { %s18562_s22 = scalar_lea.vmem %s398_s14, 32  ;;  %p18570_p4 = scmp.lt.s32.totalorder %s398_s14, %s398_s14 }
  0x81   : > { %p18563_p5 = scmp.ne.s32.totalorder %s398_s14, %s18562_s22  ;;  %p18571_p10 = scmp.lt.s32.totalorder %s18562_s22, %s18562_s22 }
  0x83   : > { %p18565_p7 = pnand %p18563_p5, %p18979_p8  ;;  %p18572_p11 = por %p18571_p10, %p18570_p4 }
  0x85   : > { %p18566_p9 = pneg %p18565_p7 }
  0x87   : > { %p18573_p12 = pnand %p18572_p11, %p18566_p9 }
  0x89   : > { %18576 = shalt.err (!%p18573_p12)
}
  0x8a   : > { %16313 = dma.hbm_to_vmem [thread:$0]  (!%p18963_p6), %s19794_s8, 32, %s398_s14, [#allocation19]  }
  0x8b   : > { %s18850_s2 = smov [#allocation11]   ;;  %s18577_s15 = scalar_lea.hbm %s19789_s3, 73728 }
  0x8c   : > { %s335_s11 = sshll.u32 %s18850_s2, 4  ;;  %p18578_p13 = scmp.ne.s32.totalorder %s19789_s3, %s18577_s15  ;;  %s336_s11 = int_to_ptr.vmem [resolvable:$true] %s335_s11 }
  0x8d   : > { %p18584_p3 = scmp.lt.u32.totalorder %s18577_s15, %s19789_s3 }
  0x8e   : > { %p18580_p0 = pnand %p18578_p13, %p18979_p8 }
  0x90   : > { %p18581_p1 = pneg %p18580_p0 }
  0x92   : > { %p18586_p2 = pnand %p18584_p3, %p18581_p1 }
  0x94   : > { %18589 = shalt.err (!%p18586_p2)
}
  0x95   : > { %s18590_s14 = scalar_lea.vmem %s336_s11, 73728  ;;  %p18598_p4 = scmp.lt.s32.totalorder %s336_s11, %s336_s11 }
  0x96   : > { %p18591_p5 = scmp.ne.s32.totalorder %s336_s11, %s18590_s14  ;;  %p18599_p10 = scmp.lt.s32.totalorder %s18590_s14, %s18590_s14 }
  0x98   : > { %p18593_p7 = pnand %p18591_p5, %p18979_p8  ;;  %p18600_p11 = por %p18599_p10, %p18598_p4 }
  0x9a   : > { %p18594_p9 = pneg %p18593_p7 }
  0x9c   : > { %p18601_p12 = pnand %p18600_p11, %p18594_p9 }
  0x9e   : > { %18604 = shalt.err (!%p18601_p12)
}
  0x9f   : > { %s18851_s22 = smov 256   ;;  %s18852_s24 = smov 16  }
  0xa0   : > { %16298 = dma.hbm_to_vmem [thread:$0]  (!%p18963_p6), %s19789_s3, 73728, %s336_s11, [#allocation9], %s18851_s22, %s18851_s22, %s18852_s24  }
  0xa1   : > { %s18853_s30 = smov [#allocation14]   ;;  %s18605_s25 = scalar_lea.hbm %s19791_s5, 36864 }
  0xa2   : > { %s359_s13 = sshll.u32 %s18853_s30, 4  ;;  %p18606_p13 = scmp.ne.s32.totalorder %s19791_s5, %s18605_s25  ;;  %s360_s13 = int_to_ptr.vmem [resolvable:$true] %s359_s13 }
  0xa3   : > { %p18612_p3 = scmp.lt.u32.totalorder %s18605_s25, %s19791_s5 }
  0xa4   : > { %p18608_p0 = pnand %p18606_p13, %p18979_p8 }
  0xa6   : > { %p18609_p1 = pneg %p18608_p0 }
  0xa8   : > { %p18614_p2 = pnand %p18612_p3, %p18609_p1 }
  0xaa   : > { %18617 = shalt.err (!%p18614_p2)
}
  0xab   : > { %s18618_s11 = scalar_lea.vmem %s360_s13, 36864  ;;  %p18626_p4 = scmp.lt.s32.totalorder %s360_s13, %s360_s13 }
  0xac   : > { %p18619_p5 = scmp.ne.s32.totalorder %s360_s13, %s18618_s11  ;;  %p18627_p10 = scmp.lt.s32.totalorder %s18618_s11, %s18618_s11 }
  0xae   : > { %p18621_p7 = pnand %p18619_p5, %p18979_p8  ;;  %p18628_p11 = por %p18627_p10, %p18626_p4 }
  0xb0   : > { %p18622_p9 = pneg %p18621_p7 }
  0xb2   : > { %p18629_p12 = pnand %p18628_p11, %p18622_p9 }
  0xb4   : > { %18632 = shalt.err (!%p18629_p12)
}
  0xb5   : > { %s19805_s22 = smov 128   ;;  %s18855_s24 = smov 8  }
  0xb6   : > { %16304 = dma.hbm_to_vmem [thread:$0]  (!%p18963_p6), %s19791_s5, 36864, %s360_s13, [#allocation13], %s19805_s22, %s19805_s22, %s18855_s24  }
  0xb7   : > { %s18856_s2 = smov [#allocation17]   ;;  %s18857_s15 = smov [#allocation20]  }
  0xb8   : > { %s383_s30 = sshll.u32 %s18856_s2, 4  ;;  %s407_s21 = sshll.u32 %s18857_s15, 4  ;;  %s384_s30 = int_to_ptr.vmem [resolvable:$true] %s383_s30  ;;  %s408_s21 = int_to_ptr.vmem [resolvable:$true] %s407_s21 }
  0xb9   : > { %s18633_s26 = scalar_lea.hbm %s19793_s7, 36864 }
  0xba   : > { %p18634_p13 = scmp.ne.s32.totalorder %s19793_s7, %s18633_s26  ;;  %p18640_p3 = scmp.lt.u32.totalorder %s18633_s26, %s19793_s7 }
  0xbc   : > { %p18636_p0 = pnand %p18634_p13, %p18979_p8 }
  0xbe   : > { %p18637_p1 = pneg %p18636_p0 }
  0xc0   : > { %p18642_p2 = pnand %p18640_p3, %p18637_p1 }
  0xc2   : > { %18645 = shalt.err (!%p18642_p2)
}
  0xc3   : > { %s18646_s13 = scalar_lea.vmem %s384_s30, 36864  ;;  %p18654_p4 = scmp.lt.s32.totalorder %s384_s30, %s384_s30 }
  0xc4   : > { %p18647_p5 = scmp.ne.s32.totalorder %s384_s30, %s18646_s13  ;;  %p18655_p10 = scmp.lt.s32.totalorder %s18646_s13, %s18646_s13 }
  0xc6   : > { %p18649_p7 = pnand %p18647_p5, %p18979_p8  ;;  %p18656_p11 = por %p18655_p10, %p18654_p4 }
  0xc8   : > { %p18650_p9 = pneg %p18649_p7 }
  0xca   : > { %p18657_p12 = pnand %p18656_p11, %p18650_p9 }
  0xcc   : > { %18660 = shalt.err (!%p18657_p12)
}
  0xcd   : > { %16310 = dma.hbm_to_vmem [thread:$0]  (!%p18963_p6), %s19793_s7, 36864, %s384_s30, [#allocation16], %s19805_s22, %s19805_s22, %s18855_s24  }
  0xce   : > { %s18661_s2 = scalar_lea.hbm %s19795_s9, 36864 }
  0xcf   : > { %p18662_p13 = scmp.ne.s32.totalorder %s19795_s9, %s18661_s2  ;;  %p18668_p3 = scmp.lt.u32.totalorder %s18661_s2, %s19795_s9 }
  0xd1   : > { %p18664_p0 = pnand %p18662_p13, %p18979_p8 }
  0xd3   : > { %p18665_p1 = pneg %p18664_p0 }
  0xd5   : > { %p18670_p2 = pnand %p18668_p3, %p18665_p1 }
  0xd7   : > { %18673 = shalt.err (!%p18670_p2)
}
  0xd8   : > { %s18674_s14 = scalar_lea.vmem %s408_s21, 36864  ;;  %p18682_p4 = scmp.lt.s32.totalorder %s408_s21, %s408_s21 }
  0xd9   : > { %p18675_p5 = scmp.ne.s32.totalorder %s408_s21, %s18674_s14  ;;  %p18683_p10 = scmp.lt.s32.totalorder %s18674_s14, %s18674_s14 }
  0xdb   : > { %p18677_p7 = pnand %p18675_p5, %p18979_p8  ;;  %p18684_p11 = por %p18683_p10, %p18682_p4 }
  0xdd   : > { %p18678_p9 = pneg %p18677_p7 }
  0xdf   : > { %p18685_p12 = pnand %p18684_p11, %p18678_p9 }
  0xe1   : > { %18688 = shalt.err (!%p18685_p12)
}
  0xe2   : > { %s19817_s30 = smov 4   ;;  %s19818_s11 = smov 64  }
  0xe3   : > { %16316 = dma.hbm_to_vmem [thread:$0]  (!%p18963_p6), %s19795_s9, 36864, %s408_s21, [#allocation19], %s19818_s11, %s19818_s11, %s19817_s30  }
  0xe4   : > { %s18858_s1 = smov [#allocation21]   ;;  %s18689_s15 = scalar_lea.hbm %s19796_s10, 16 }
  0xe5   : > { %s421_s12 = sshll.u32 %s18858_s1, 4  ;;  %p18690_p13 = scmp.ne.s32.totalorder %s19796_s10, %s18689_s15  ;;  %s422_s12 = int_to_ptr.vmem [resolvable:$true] %s421_s12 }
  0xe6   : > { %p18696_p3 = scmp.lt.u32.totalorder %s18689_s15, %s19796_s10 }
  0xe7   : > { %p18692_p0 = pnand %p18690_p13, %p18979_p8 }
  0xe9   : > { %p18693_p1 = pneg %p18692_p0 }
  0xeb   : > { %p18698_p2 = pnand %p18696_p3, %p18693_p1 }
  0xed   : > { %18701 = shalt.err (!%p18698_p2)
}
  0xee   : > { %s18702_s21 = scalar_lea.vmem %s422_s12, 16  ;;  %s18709_s30 = scalar_lea.vmem %s422_s12, 32 }
  0xef   : > { %p18703_p5 = scmp.ne.s32.totalorder %s422_s12, %s18702_s21  ;;  %p18710_p4 = scmp.lt.s32.totalorder %s422_s12, %s422_s12 }
  0xf0   : > { %p18711_p10 = scmp.lt.s32.totalorder %s18709_s30, %s18702_s21 }
  0xf1   : > { %p18705_p7 = pnand %p18703_p5, %p18979_p8 }
  0xf2   : > { %p18712_p11 = por %p18711_p10, %p18710_p4 }
  0xf3   : > { %p18706_p9 = pneg %p18705_p7 }
  0xf5   : > { %p18713_p12 = pnand %p18712_p11, %p18706_p9 }
  0xf7   : > { %18716 = shalt.err (!%p18713_p12)
}
  0xf8   : > { %16319 = dma.hbm_to_vmem [thread:$0]  (!%p18963_p6), %s19796_s10, 16, %s422_s12, [#allocation22]  }
  0xf9   : > { %s14242_s16 = sadd.s32 4294967294, %s18841_s20   ;;  %s19189_s27 = sadd.s32 1, %s18841_s20  }
  0xfa   : > { %s76_s0 = ssub.s32 %s18841_s20, %s19189_s27  ;;  %s79_s1 = sadd.s32 1, %s18837_s19 }
  0xfb   : > { %p77_p8 = scmp.eq.s32.totalorder %s76_s0, 0  ;;  %p86_p13 = scmp.ne.s32.totalorder %s18837_s19, %s18833_s18 }
  0xfc   : > { %p87_p0 = scmp.eq.s32.totalorder %s18841_s20, 0  ;;  %p92_p1 = scmp.ne.s32.totalorder %s18833_s18, %s18829_s17 }
  0xfd   : > { %s19200_s29 = scalar_select %p77_p8, %s18837_s19, %s79_s1  }
  0xfe   : > { %p19202_p3 = por %p87_p0, %p86_p13  ;;  %p19820_p2 = scmp.eq.s32.totalorder %s18947_s23, 0 }
  0xff   : > { %p284_p5 = scmp.eq.s32.totalorder %s18947_s23, 1  ;;  %p290_p7 = scmp.eq.s32.totalorder %s14242_s16, 1 }
 0x100   : > { %p19208_p6 = por %p19820_p2, %p92_p1  ;;  %p16338_p9 = scmp.lt.s32.totalorder %s18841_s20, 2 }
 0x101   : > { %s432_s15 = sand.u32 1, %s18841_s20   ;;  %p19215_p4 = por %p284_p5, %p86_p13 }
 0x102   : > { %p19219_p10 = por %p290_p7, %p92_p1  ;;  %s434_s26 = sand.u32 1, %s18837_s19  }
 0x103   : > { %s19822_s25 = scalar_select %p19215_p4, 1, 0 }
 0x104   : > { %s19823_s28 = scalar_select %p19219_p10, 1, 0 }
 0x105   : > { %s14255_s14 = sshll.u32 %s434_s26, 4  ;;  %s15719_s21 = sshll.u32 %s18841_s20, 8 }
 0x106   : > { %s19824_s13 = sld [smem:[#allocation36_spill]]  ;;  %s436_s16 = scalar_lea.vmem [#allocation10], %s14255_s14 }
 0x107   : > { %s443_s1 = sshll.u32 %s436_s16, 4  ;;  %p19232_p11 = pnand %p16338_p9, %p19202_p3  ;;  %s19236_s1 = int_to_ptr.vmem [resolvable:$true] %s443_s1 }
 0x108   : > { %s19238_s26 = scalar_lea.sflag [#allocation6], %s432_s15 }
 0x109   : > { %p18719_p8 = pneg %p19232_p11 }
 0x10c   : > { %s19228_s0 = scalar_lea.hbm %s19824_s13, %s15719_s21  ;;  %s18722_s21 = scalar_lea.hbm %s19824_s13, 512 }
 0x10d   : > { %s18717_s30 = scalar_lea.hbm %s19228_s0, 256  ;;  %p18723_p1 = scmp.lt.u32.totalorder %s19228_s0, %s19824_s13 }
 0x10e   : > { %p18718_p12 = scmp.ne.s32.totalorder %s19228_s0, %s18717_s30  ;;  %p18724_p3 = scmp.lt.u32.totalorder %s18722_s21, %s18717_s30 }
 0x10f   : > { %p18726_p5 = scmp.lt.u32.totalorder %s18717_s30, %s19228_s0 }
 0x110   : > { %p18720_p13 = pnand %p18719_p8, %p18718_p12  ;;  %p18725_p2 = por %p18724_p3, %p18723_p1 }
 0x112   : > { %p18721_p0 = pneg %p18720_p13  ;;  %p18727_p7 = por %p18726_p5, %p18725_p2 }
 0x114   : > { %p18728_p9 = pnand %p18727_p7, %p18721_p0 }
 0x116   : > { %18731 = shalt.err (!%p18728_p9)
}
 0x117   : > { %s18732_s15 = scalar_lea.vmem %s19236_s1, 256  ;;  %s18859_s14 = smov [#allocation10]  }
 0x118   : > { %p18733_p12 = scmp.ne.s32.totalorder %s19236_s1, %s18732_s15  ;;  %s18737_s2 = sshll.u32 %s18859_s14, 4  ;;  %s18738_s2 = int_to_ptr.vmem [resolvable:$false] %s18737_s2 }
 0x119   : > { %s18739_s11 = scalar_lea.vmem %s18738_s2, 512  ;;  %p18740_p4 = scmp.lt.s32.totalorder %s19236_s1, %s18738_s2 }
 0x11a   : > { %p18735_p13 = pnand %p18733_p12, %p18719_p8  ;;  %p18741_p1 = scmp.lt.s32.totalorder %s18739_s11, %s18732_s15 }
 0x11c   : > { %p18736_p10 = pneg %p18735_p13  ;;  %p18742_p3 = por %p18741_p1, %p18740_p4 }
 0x11e   : > { %p18743_p2 = pnand %p18742_p3, %p18736_p10 }
 0x120   : > { %18746 = shalt.err (!%p18743_p2)
}
 0x121   : > { %s19826_s30 = smov 128   ;;  %s19827_s21 = sld [smem:[#allocation33_spill]] }
 0x122   : > { %16323 = dma.hbm_to_vmem [thread:$0]  (!%p19232_p11), %s19228_s0, 256, %s19236_s1, %s19238_s26, %s19826_s30, %s19826_s30, %s18855_s24  }
 0x127   : > { %p19828_p8 = scmp.ne.s32.totalorder %s19827_s21, 0 }
 0x128   : > { %p19829_p0 = scmp.eq.s32.totalorder (!%p19828_p8), %s18947_s23, 0 }
 0x129   : > { %455 = sbr.rel (%p19828_p8) target bundleno = 2397 (0x95d), region = 64 }
 0x130   : > { %18792 = dma.done.wait (%p19829_p0), [#allocation6], 128   ;;  %p19830_p5 = pmov %p19829_p0 }
 0x131   : > { %p19831_p4 = pmov %p19829_p0 }
 0x132   : > { %18794 = vsyncadd (%p19830_p5), [#allocation6], 4294967168 }
 0x133   : > { %18796 = dma.done.wait (%p19831_p4), [#allocation9], 128   ;;  %p19832_p10 = pmov %p19829_p0 }
 0x134   : > { %s465_s22 = sand.u32 1, %s18947_s23   ;;  %s467_s24 = sand.u32 1, %s18833_s18  }
 0x135   : > { %18798 = vsyncadd (%p19832_p10), [#allocation9], 4294967168  ;;  %s19283_s0 = sshll.u32 %s467_s24, 4  ;;  %s466_s1 = scalar_lea.sflag [#allocation6], %s465_s22 }
 0x136   : > { %s469_s26 = scalar_lea.vmem [#allocation10], %s19283_s0 }
 0x137   : > { %18800 = dma.done.wait (%p19208_p6), %s466_s1, 256  }
 0x138   : > { %18802 = vsyncadd (%p19208_p6), %s466_s1, 4294967040  ;;  %p19833_p11 = pmov %p19829_p0 }
 0x139   : > { %p19834_p7 = pmov %p19829_p0 }
 0x13a   : > { %18804 = dma.done.wait (%p19833_p11), [#allocation9], 73728  }
 0x13b   : > { %18806 = vsyncadd (%p19834_p7), [#allocation9], 4294893568  ;;  %p19835_p9 = pmov %p19829_p0 }
 0x13c   : > { %p19836_p12 = pmov %p19829_p0 }
 0x13d   : > { %18808 = dma.done.wait (%p19835_p9), [#allocation13], 36928  }
 0x13e   : > { %18810 = vsyncadd (%p19836_p12), [#allocation13], 4294930368  ;;  %p19837_p13 = pmov %p19829_p0 }
 0x13f   : > { %p19838_p1 = pmov %p19829_p0 }
 0x140   : > { %18812 = dma.done.wait (%p19837_p13), [#allocation16], 36896  }
 0x141   : > { %18814 = vsyncadd (%p19838_p1), [#allocation16], 4294930400  ;;  %p19839_p6 = pmov %p19829_p0 }
 0x142   : > { %p19840_p3 = pmov %p19829_p0 }
 0x143   : > { %18816 = dma.done.wait (%p19839_p6), [#allocation19], 36896  }
 0x144   : > { %18818 = vsyncadd (%p19840_p3), [#allocation19], 4294930400  ;;  %p19841_p2 = pmov %p19829_p0 }
 0x145   : > { %p19842_p8 = pmov %p19829_p0 }
 0x146   : > { %18820 = dma.done.wait (%p19841_p2), [#allocation22], 16  }
 0x147   : > { %18822 = vsyncadd (%p19842_p8), [#allocation22], 4294967280  ;;  %v18860_v0 = vmov 0   ;;  %v18861_v1 = vmov 0.0   ;;  %v541_v2 = vld [vmem:[#allocation5] sm:$0xf] }
 0x148   : > { %16403 = vset.pattern.permute.xlu0 %v18860_v0  ;;  %16404 = vset.pattern.permute.xlu1 %v18860_v0  ;;  %546 = vst [vmem:[#allocation2 + $0x8] sm:$0xff] %v18861_v1  ;;  %548 = vst [vmem:[#allocation2 + $0x18] sm:$0xff] %v18861_v1  ;;  %v542_v3 = vld [vmem:[#allocation5 + $0x4] sm:$0xf]  ;;  %v16407_v5 = vld [vmem:[#allocation11 + $0x20c] ss:$16 sps:$4 sm:$0xff]  }
 0x149   : > { %545 = vst [vmem:[#allocation2] sm:$0xff] %v18861_v1  ;;  %547 = vst [vmem:[#allocation2 + $0x10] sm:$0xff] %v18861_v1  ;;  %596 = vperm.xlu0 %16403, %v541_v2   ;;  %v16405_v4 = vld [vmem:[#allocation11 + $0x204] ss:$16 sps:$4 sm:$0xff]   ;;  %v16409_v6 = vld [vmem:[#allocation11 + $0x200] ss:$16 sps:$4 sm:$0xff]   ;;  %1132 = vmatprep.subr.bf16.mxu1 %v16407_v5 }
 0x14a   : > { %551 = vst [vmem:[#allocation2 + $0x30] sm:$0xff] %v18861_v1  ;;  %552 = vst [vmem:[#allocation2 + $0x38] sm:$0xff] %v18861_v1  ;;  %1089 = vmatprep.subr.bf16.mxu0 %v16405_v4  ;;  %v16410_v7 = vld [vmem:[#allocation11 + $0x208] ss:$16 sps:$4 sm:$0xff]   ;;  %v16411_v8 = vld [vmem:[#allocation11 + $0x224] ss:$16 sps:$4 sm:$0xff]  }
 0x14b   : > { %553 = vst [vmem:[#allocation2 + $0x40] sm:$0xff] %v18861_v1  ;;  %554 = vst [vmem:[#allocation2 + $0x48] sm:$0xff] %v18861_v1  ;;  %1090 = vmatpush1.bf16.msra.mxu0 %v16409_v6  ;;  %1133 = vmatpush1.bf16.msra.mxu1 %v16410_v7  ;;  %v16413_v9 = vld [vmem:[#allocation11 + $0x22c] ss:$16 sps:$4 sm:$0xff]   ;;  %v16415_v10 = vld [vmem:[#allocation11 + $0x220] ss:$16 sps:$4 sm:$0xff]  }
 0x14c   : > { %5307 = vst [vmem:[#allocation3] sm:$0xff] %v18861_v1  ;;  %5308 = vst [vmem:[#allocation3 + $0x8] sm:$0xff] %v18861_v1  ;;  %v16416_v11 = vld [vmem:[#allocation11 + $0x228] ss:$16 sps:$4 sm:$0xff]   ;;  %1091 = vmatprep.subr.bf16.mxu0 %v16411_v8  ;;  %v16417_v12 = vld [vmem:[#allocation11 + $0x244] ss:$16 sps:$4 sm:$0xff]   ;;  %1134 = vmatprep.subr.bf16.mxu1 %v16413_v9 }
 0x14d   : > { %5309 = vst [vmem:[#allocation3 + $0x10] sm:$0xff] %v18861_v1  ;;  %5310 = vst [vmem:[#allocation3 + $0x18] sm:$0xff] %v18861_v1  ;;  %608 = vperm.xlu0 %16403, %v542_v3   ;;  %v16419_v13 = vld [vmem:[#allocation11 + $0x24c] ss:$16 sps:$4 sm:$0xff]   ;;  %v16421_v14 = vld [vmem:[#allocation11 + $0x240] ss:$16 sps:$4 sm:$0xff]  }
 0x14e   : > { %5311 = vst [vmem:[#allocation3 + $0x20] sm:$0xff] %v18861_v1  ;;  %5312 = vst [vmem:[#allocation3 + $0x28] sm:$0xff] %v18861_v1  ;;  %v16422_v15 = vld [vmem:[#allocation11 + $0x248] ss:$16 sps:$4 sm:$0xff]   ;;  %v16423_v16 = vld [vmem:[#allocation11 + $0x264] ss:$16 sps:$4 sm:$0xff]  }
 0x14f   : > { %5313 = vst [vmem:[#allocation3 + $0x30] sm:$0xff] %v18861_v1  ;;  %5314 = vst [vmem:[#allocation3 + $0x38] sm:$0xff] %v18861_v1  ;;  %1092 = vmatpush1.bf16.msra.mxu0 %v16415_v10  ;;  %1135 = vmatpush1.bf16.msra.mxu1 %v16416_v11  ;;  %v16425_v17 = vld [vmem:[#allocation11 + $0x26c] ss:$16 sps:$4 sm:$0xff]   ;;  %v16427_v18 = vld [vmem:[#allocation11 + $0x260] ss:$16 sps:$4 sm:$0xff]  }
 0x150   : > { %5319 = vst [vmem:[#allocation3 + $0x60] sm:$0xff] %v18861_v1  ;;  %5320 = vst [vmem:[#allocation3 + $0x68] sm:$0xff] %v18861_v1  ;;  %1093 = vmatprep.subr.bf16.mxu0 %v16417_v12  ;;  %1136 = vmatprep.subr.bf16.mxu1 %v16419_v13  ;;  %v16428_v19 = vld [vmem:[#allocation11 + $0x268] ss:$16 sps:$4 sm:$0xff]   ;;  %v16429_v20 = vld [vmem:[#allocation11 + $0x284] ss:$16 sps:$4 sm:$0xff]  }
 0x151   : > { %5321 = vst [vmem:[#allocation3 + $0x70] sm:$0xff] %v18861_v1  ;;  %5322 = vst [vmem:[#allocation3 + $0x78] sm:$0xff] %v18861_v1  ;;  %v16431_v21 = vld [vmem:[#allocation11 + $0x28c] ss:$16 sps:$4 sm:$0xff]   ;;  %v16433_v22 = vld [vmem:[#allocation11 + $0x280] ss:$16 sps:$4 sm:$0xff]  }
 0x152   : > { %5323 = vst [vmem:[#allocation3 + $0x80] sm:$0xff] %v18861_v1  ;;  %5324 = vst [vmem:[#allocation3 + $0x88] sm:$0xff] %v18861_v1  ;;  %v16434_v23 = vld [vmem:[#allocation11 + $0x288] ss:$16 sps:$4 sm:$0xff]   ;;  %v16435_v24 = vld [vmem:[#allocation11 + $0x2a4] ss:$16 sps:$4 sm:$0xff]  }
 0x153   : > { %5325 = vst [vmem:[#allocation3 + $0x90] sm:$0xff] %v18861_v1  ;;  %5326 = vst [vmem:[#allocation3 + $0x98] sm:$0xff] %v18861_v1  ;;  %1094 = vmatpush1.bf16.msra.mxu0 %v16421_v14  ;;  %1137 = vmatpush1.bf16.msra.mxu1 %v16422_v15  ;;  %v16437_v25 = vld [vmem:[#allocation11 + $0x2ac] ss:$16 sps:$4 sm:$0xff]   ;;  %v16439_v26 = vld [vmem:[#allocation11 + $0x2a0] ss:$16 sps:$4 sm:$0xff]  }
 0x154   : > { %10317 = vst [vmem:[#allocation4] sm:$0xff] %v18861_v1  ;;  %10318 = vst [vmem:[#allocation4 + $0x8] sm:$0xff] %v18861_v1  ;;  %1095 = vmatprep.subr.bf16.mxu0 %v16423_v16  ;;  %1138 = vmatprep.subr.bf16.mxu1 %v16425_v17  ;;  %v16440_v27 = vld [vmem:[#allocation11 + $0x2a8] ss:$16 sps:$4 sm:$0xff]   ;;  %v16441_v28 = vld [vmem:[#allocation11 + $0x2c4] ss:$16 sps:$4 sm:$0xff]  }
 0x155   : > { %10319 = vst [vmem:[#allocation4 + $0x10] sm:$0xff] %v18861_v1  ;;  %10320 = vst [vmem:[#allocation4 + $0x18] sm:$0xff] %v18861_v1  ;;  %v16443_v29 = vld [vmem:[#allocation11 + $0x2cc] ss:$16 sps:$4 sm:$0xff]   ;;  %v16445_v30 = vld [vmem:[#allocation11 + $0x2c0] ss:$16 sps:$4 sm:$0xff]  }
 0x156   : > { %10321 = vst [vmem:[#allocation4 + $0x20] sm:$0xff] %v18861_v1  ;;  %10322 = vst [vmem:[#allocation4 + $0x28] sm:$0xff] %v18861_v1  ;;  %v16446_v31 = vld [vmem:[#allocation11 + $0x2c8] ss:$16 sps:$4 sm:$0xff]   ;;  %v16447_v33 = vld [vmem:[#allocation11 + $0x2e4] ss:$16 sps:$4 sm:$0xff]  }
 0x157   : > { %10323 = vst [vmem:[#allocation4 + $0x30] sm:$0xff] %v18861_v1  ;;  %10324 = vst [vmem:[#allocation4 + $0x38] sm:$0xff] %v18861_v1  ;;  %1096 = vmatpush1.bf16.msra.mxu0 %v16427_v18  ;;  %1139 = vmatpush1.bf16.msra.mxu1 %v16428_v19  ;;  %v543_v32 = vld [vmem:[#allocation8] sm:$0xf]  ;;  %v16449_v34 = vld [vmem:[#allocation11 + $0x2ec] ss:$16 sps:$4 sm:$0xff]  }
 0x158   : > { %10329 = vst [vmem:[#allocation4 + $0x60] sm:$0xff] %v18861_v1  ;;  %10330 = vst [vmem:[#allocation4 + $0x68] sm:$0xff] %v18861_v1  ;;  %1097 = vmatprep.subr.bf16.mxu0 %v16429_v20  ;;  %1140 = vmatprep.subr.bf16.mxu1 %v16431_v21  ;;  %v16451_v35 = vld [vmem:[#allocation11 + $0x2e0] ss:$16 sps:$4 sm:$0xff]   ;;  %v544_v36 = vld [vmem:[#allocation8 + $0x4] sm:$0xf] }
 0x159   : > { %10331 = vst [vmem:[#allocation4 + $0x70] sm:$0xff] %v18861_v1  ;;  %10332 = vst [vmem:[#allocation4 + $0x78] sm:$0xff] %v18861_v1  ;;  %1630 = vperm.xlu1 %16404, %v543_v32   ;;  %v16452_v37 = vld [vmem:[#allocation11 + $0x2e8] ss:$16 sps:$4 sm:$0xff]   ;;  %v16453_v38 = vld [vmem:[#allocation11 + $0x304] ss:$16 sps:$4 sm:$0xff]  }
 0x15a   : > { %10333 = vst [vmem:[#allocation4 + $0x80] sm:$0xff] %v18861_v1  ;;  %10334 = vst [vmem:[#allocation4 + $0x88] sm:$0xff] %v18861_v1  ;;  %v16455_v39 = vld [vmem:[#allocation11 + $0x30c] ss:$16 sps:$4 sm:$0xff]   ;;  %v16457_v40 = vld [vmem:[#allocation11 + $0x300] ss:$16 sps:$4 sm:$0xff]  }
 0x15b   : > { %10335 = vst [vmem:[#allocation4 + $0x90] sm:$0xff] %v18861_v1  ;;  %10336 = vst [vmem:[#allocation4 + $0x98] sm:$0xff] %v18861_v1  ;;  %1098 = vmatpush1.bf16.msra.mxu0 %v16433_v22  ;;  %1141 = vmatpush1.bf16.msra.mxu1 %v16434_v23  ;;  %v16458_v41 = vld [vmem:[#allocation11 + $0x308] ss:$16 sps:$4 sm:$0xff]   ;;  %v16459_v42 = vld [vmem:[#allocation11 + $0x324] ss:$16 sps:$4 sm:$0xff]  }
 0x15c   : > { %1099 = vmatprep.subr.bf16.mxu0 %v16435_v24  ;;  %1142 = vmatprep.subr.bf16.mxu1 %v16437_v25  ;;  %v16461_v43 = vld [vmem:[#allocation11 + $0x32c] ss:$16 sps:$4 sm:$0xff]   ;;  %v16463_v44 = vld [vmem:[#allocation11 + $0x320] ss:$16 sps:$4 sm:$0xff]   ;;  %v16464_v45 = vld [vmem:[#allocation11 + $0x328] ss:$16 sps:$4 sm:$0xff]  }
 0x15d   : > { %1642 = vperm.xlu1 %16404, %v544_v36   ;;  %v16465_v46 = vld [vmem:[#allocation11 + $0x344] ss:$16 sps:$4 sm:$0xff]   ;;  %v16467_v47 = vld [vmem:[#allocation11 + $0x34c] ss:$16 sps:$4 sm:$0xff]   ;;  %v16469_v48 = vld [vmem:[#allocation11 + $0x340] ss:$16 sps:$4 sm:$0xff]  }
 0x15e   : > { %v16470_v49 = vld [vmem:[#allocation11 + $0x348] ss:$16 sps:$4 sm:$0xff]   ;;  %v16471_v50 = vld [vmem:[#allocation11 + $0x364] ss:$16 sps:$4 sm:$0xff]   ;;  %v16473_v51 = vld [vmem:[#allocation11 + $0x36c] ss:$16 sps:$4 sm:$0xff]  }
 0x15f   : > { %1100 = vmatpush1.bf16.msra.mxu0 %v16439_v26  ;;  %1143 = vmatpush1.bf16.msra.mxu1 %v16440_v27  ;;  %v16475_v52 = vld [vmem:[#allocation11 + $0x360] ss:$16 sps:$4 sm:$0xff]   ;;  %v16476_v53 = vld [vmem:[#allocation11 + $0x368] ss:$16 sps:$4 sm:$0xff]   ;;  %v16477_v56 = vld [vmem:[#allocation11 + $0x384] ss:$16 sps:$4 sm:$0xff]  }
 0x160   : > { %1101 = vmatprep.subr.bf16.mxu0 %v16441_v28  ;;  %1144 = vmatprep.subr.bf16.mxu1 %v16443_v29  ;;  %v555_v54 = vld [vmem:[%s469_s26] sm:$0xff]  ;;  %v556_v55 = vld [vmem:[%s469_s26 + $0x8] sm:$0xff]  ;;  %vm565_vm0 = vcmask 1043456   ;;  %vm1175_vm1 = vsmask.f32 4352  ;;  %vm2785_vm4 = vcmask 1045504  }
 0x161   : > { %v557_v57 = vunpack.c.l.bf16 %v555_v54  ;;  %v558_v58 = vunpack.c.h.bf16 %v555_v54  ;;  %v559_v59 = vunpack.c.l.bf16 %v556_v55  ;;  %v560_v60 = vunpack.c.h.bf16 %v556_v55  ;;  %v16479_v61 = vld [vmem:[#allocation11 + $0x38c] ss:$16 sps:$4 sm:$0xff]   ;;  %v16481_v0 = vld [vmem:[#allocation11 + $0x380] ss:$16 sps:$4 sm:$0xff]   ;;  %v16482_v3 = vld [vmem:[#allocation11 + $0x388] ss:$16 sps:$4 sm:$0xff]  }
 0x162   : > { %v16483_v4 = vld [vmem:[#allocation11 + $0x3a4] ss:$16 sps:$4 sm:$0xff]   ;;  %v16485_v6 = vld [vmem:[#allocation11 + $0x3ac] ss:$16 sps:$4 sm:$0xff]   ;;  %v16487_v8 = vld [vmem:[#allocation11 + $0x3a0] ss:$16 sps:$4 sm:$0xff]  }
 0x163   : > { %1102 = vmatpush1.bf16.msra.mxu0 %v16445_v30  ;;  %1145 = vmatpush1.bf16.msra.mxu1 %v16446_v31  ;;  %v567_v62 = vrot.slane %v558_v58, 4  ;;  %v570_v63 = vrot.slane %v560_v60, 4  ;;  %v566_v1 = vrot.slane %v557_v57, 4  ;;  %v568_v2 = vrot.slane %v559_v59, 4  ;;  %v16488_v9 = vld [vmem:[#allocation11 + $0x3a8] ss:$16 sps:$4 sm:$0xff]  }
 0x164   : > { %1103 = vmatprep.subr.bf16.mxu0 %v16447_v33  ;;  %1146 = vmatprep.subr.bf16.mxu1 %v16449_v34  ;;  %v16489_v10 = vld [vmem:[#allocation11 + $0x3c4] ss:$16 sps:$4 sm:$0xff]   ;;  %v16491_v11 = vld [vmem:[#allocation11 + $0x3cc] ss:$16 sps:$4 sm:$0xff]   ;;  %v16493_v12 = vld [vmem:[#allocation11 + $0x3c0] ss:$16 sps:$4 sm:$0xff]  }
 0x165   : > { %v19315_v5 = vsel %vm565_vm0, %v567_v62, %v570_v63  ;;  %579 = vst [vmem:[#allocation2 + $0x18] sm:$0xf0] %v567_v62  ;;  %583 = vst [vmem:[#allocation2 + $0x38] sm:$0xf] %v570_v63  ;;  %v569_v7 = vsel %vm565_vm0, %v566_v1, %v568_v2  ;;  %v16494_v14 = vld [vmem:[#allocation11 + $0x3c8] ss:$16 sps:$4 sm:$0xff]  }
 0x166   : > { %581 = vst [vmem:[#allocation2 + $0x28] sm:$0xff] %v19315_v5  ;;  %578 = vst [vmem:[#allocation2 + $0x10] sm:$0xf0] %v566_v1  ;;  %v16495_v15 = vld [vmem:[#allocation11 + $0x3e4] ss:$16 sps:$4 sm:$0xff]   ;;  %s539_s12 = scalar_lea.vmem [#allocation23], %s19283_s0 }
 0x167   : > { %1104 = vmatpush1.bf16.msra.mxu0 %v16451_v35  ;;  %1147 = vmatpush1.bf16.msra.mxu1 %v16452_v37  ;;  %582 = vst [vmem:[#allocation2 + $0x30] sm:$0xf] %v568_v2  ;;  %580 = vst [vmem:[#allocation2 + $0x20] sm:$0xff] %v569_v7  ;;  %v16497_v17 = vld [vmem:[#allocation11 + $0x3ec] ss:$16 sps:$4 sm:$0xff]   ;;  %s14074_s16 = sshll.u32 %s539_s12, 4  ;;  %s19740_s16 = int_to_ptr.vmem [resolvable:$true] %s14074_s16 }
 0x168   : > { %1105 = vmatprep.subr.bf16.mxu0 %v16453_v38  ;;  %1148 = vmatprep.subr.bf16.mxu1 %v16455_v39  ;;  %v16499_v18 = vld [vmem:[#allocation11 + $0x3e0] ss:$16 sps:$4 sm:$0xff]   ;;  %v16500_v19 = vld [vmem:[#allocation11 + $0x3e8] ss:$16 sps:$4 sm:$0xff]   ;;  %v16503_v21 = vld [vmem:[#allocation11 + $0x4] ss:$16 sps:$4 sm:$0xff]  }
 0x169   : > { %v16506_v22 = vld [vmem:[#allocation11 + $0xc] ss:$16 sps:$4 sm:$0xff]   ;;  %v16501_v24 = vld [vmem:[#allocation11] ss:$16 sps:$4 sm:$0xff]   ;;  %v16504_v25 = vld [vmem:[#allocation11 + $0x8] ss:$16 sps:$4 sm:$0xff]  }
 0x16a   : > { %v16509_v26 = vld [vmem:[#allocation11 + $0x24] ss:$16 sps:$4 sm:$0xff]   ;;  %v16512_v27 = vld [vmem:[#allocation11 + $0x2c] ss:$16 sps:$4 sm:$0xff]   ;;  %v16507_v28 = vld [vmem:[#allocation11 + $0x20] ss:$16 sps:$4 sm:$0xff]  }
 0x16b   : > { %1106 = vmatpush1.bf16.msra.mxu0 %v16457_v40  ;;  %1149 = vmatpush1.bf16.msra.mxu1 %v16458_v41  ;;  %v16510_v29 = vld [vmem:[#allocation11 + $0x28] ss:$16 sps:$4 sm:$0xff]   ;;  %v16515_v30 = vld [vmem:[#allocation11 + $0x44] ss:$16 sps:$4 sm:$0xff]   ;;  %v16518_v31 = vld [vmem:[#allocation11 + $0x4c] ss:$16 sps:$4 sm:$0xff]  }
 0x16c   : > { %1107 = vmatprep.subr.bf16.mxu0 %v16459_v42  ;;  %1150 = vmatprep.subr.bf16.mxu1 %v16461_v43  ;;  %v19319_v13 = vld [vmem:[#allocation2 + $0x18] sm:$0xff]  ;;  %v16513_v32 = vld [vmem:[#allocation11 + $0x40] ss:$16 sps:$4 sm:$0xff]   ;;  %v16521_v34 = vld [vmem:[#allocation11 + $0x64] ss:$16 sps:$4 sm:$0xff]   ;;  %s15720_s15 = sshll.u32 %s18947_s23, 8 }
 0x16d   : > { %v703_v16 = vpack.c.bf16 %v19315_v5, %v19319_v13  ;;  %v19323_v20 = vld [vmem:[#allocation2 + $0x10] sm:$0xff]  ;;  %v16516_v33 = vld [vmem:[#allocation11 + $0x48] ss:$16 sps:$4 sm:$0xff]   ;;  %v16524_v35 = vld [vmem:[#allocation11 + $0x6c] ss:$16 sps:$4 sm:$0xff]   ;;  %s19843_s11 = sld [smem:[#allocation37_spill]] }
 0x16e   : > { %v702_v23 = vpack.c.bf16 %v569_v7, %v19323_v20  ;;  %v16519_v36 = vld [vmem:[#allocation11 + $0x60] ss:$16 sps:$4 sm:$0xff]   ;;  %v16522_v37 = vld [vmem:[#allocation11 + $0x68] ss:$16 sps:$4 sm:$0xff]   ;;  %v16527_v38 = vld [vmem:[#allocation11 + $0x84] ss:$16 sps:$4 sm:$0xff]  }
 0x16f   : > { %1108 = vmatpush1.bf16.msra.mxu0 %v16463_v44  ;;  %1151 = vmatpush1.bf16.msra.mxu1 %v16464_v45  ;;  %v16530_v39 = vld [vmem:[#allocation11 + $0x8c] ss:$16 sps:$4 sm:$0xff]   ;;  %v16525_v40 = vld [vmem:[#allocation11 + $0x80] ss:$16 sps:$4 sm:$0xff]   ;;  %v16528_v41 = vld [vmem:[#allocation11 + $0x88] ss:$16 sps:$4 sm:$0xff]  }
 0x170   : > { %1109 = vmatprep.subr.bf16.mxu0 %v16465_v46  ;;  %1152 = vmatprep.subr.bf16.mxu1 %v16467_v47  ;;  %v16533_v42 = vld [vmem:[#allocation11 + $0xa4] ss:$16 sps:$4 sm:$0xff]   ;;  %v16536_v43 = vld [vmem:[#allocation11 + $0xac] ss:$16 sps:$4 sm:$0xff]   ;;  %v16531_v44 = vld [vmem:[#allocation11 + $0xa0] ss:$16 sps:$4 sm:$0xff]  }
 0x171   : > { %1121 = vmatprep.mubr.bf16.mxu0 %v703_v16  ;;  %1164 = vmatprep.mubr.bf16.mxu1 %v703_v16  ;;  %v16534_v45 = vld [vmem:[#allocation11 + $0xa8] ss:$16 sps:$4 sm:$0xff]   ;;  %v16539_v46 = vld [vmem:[#allocation11 + $0xc4] ss:$16 sps:$4 sm:$0xff]   ;;  %v16542_v47 = vld [vmem:[#allocation11 + $0xcc] ss:$16 sps:$4 sm:$0xff]  }
 0x172   : > { %v16551_v54 = vld [vmem:[#allocation11 + $0x104] ss:$16 sps:$4 sm:$0xff]   ;;  %v16554_v55 = vld [vmem:[#allocation11 + $0x10c] ss:$16 sps:$4 sm:$0xff]   ;;  %v16552_v57 = vld [vmem:[#allocation11 + $0x108] ss:$16 sps:$4 sm:$0xff]  }
 0x173   : > { %1110 = vmatpush1.bf16.msra.mxu0 %v16469_v48  ;;  %1153 = vmatpush1.bf16.msra.mxu1 %v16470_v49  ;;  %v16537_v48 = vld [vmem:[#allocation11 + $0xc0] ss:$16 sps:$4 sm:$0xff]   ;;  %v16540_v49 = vld [vmem:[#allocation11 + $0xc8] ss:$16 sps:$4 sm:$0xff]   ;;  %v16557_v58 = vld [vmem:[#allocation11 + $0x124] ss:$16 sps:$4 sm:$0xff]   ;;  %s19738_s30 = scalar_lea.hbm %s19843_s11, %s15720_s15 }
 0x174   : > { %1111 = vmatprep.subr.bf16.mxu0 %v16471_v50  ;;  %1154 = vmatprep.subr.bf16.mxu1 %v16473_v51  ;;  %v16545_v50 = vld [vmem:[#allocation11 + $0xe4] ss:$16 sps:$4 sm:$0xff]   ;;  %v16548_v51 = vld [vmem:[#allocation11 + $0xec] ss:$16 sps:$4 sm:$0xff]   ;;  %v16555_v60 = vld [vmem:[#allocation11 + $0x120] ss:$16 sps:$4 sm:$0xff]  }
 0x175   : > { %v16560_v59 = vld [vmem:[#allocation11 + $0x12c] ss:$16 sps:$4 sm:$0xff]   ;;  %v16563_v62 = vld [vmem:[#allocation11 + $0x144] ss:$16 sps:$4 sm:$0xff]   ;;  %v16564_v1 = vld [vmem:[#allocation11 + $0x148] ss:$16 sps:$4 sm:$0xff]  }
 0x176   : > { %v16566_v63 = vld [vmem:[#allocation11 + $0x14c] ss:$16 sps:$4 sm:$0xff]   ;;  %v16569_v2 = vld [vmem:[#allocation11 + $0x164] ss:$16 sps:$4 sm:$0xff]   ;;  %vm1735_vm2 = vsmask.f32 7424 }
 0x177   : > { %1112 = vmatpush1.bf16.msra.mxu0 %v16475_v52  ;;  %1155 = vmatpush1.bf16.msra.mxu1 %v16476_v53  ;;  %v16543_v52 = vld [vmem:[#allocation11 + $0xe0] ss:$16 sps:$4 sm:$0xff]   ;;  %v16546_v53 = vld [vmem:[#allocation11 + $0xe8] ss:$16 sps:$4 sm:$0xff]   ;;  %v16575_v7 = vld [vmem:[#allocation11 + $0x184] ss:$16 sps:$4 sm:$0xff]  }
 0x178   : > { %1113 = vmatprep.subr.bf16.mxu0 %v16477_v56  ;;  %1156 = vmatprep.subr.bf16.mxu1 %v16479_v61  ;;  %v16549_v56 = vld [vmem:[#allocation11 + $0x100] ss:$16 sps:$4 sm:$0xff]   ;;  %v16558_v61 = vld [vmem:[#allocation11 + $0x128] ss:$16 sps:$4 sm:$0xff]   ;;  %v16587_v16 = vld [vmem:[#allocation11 + $0x1c4] ss:$16 sps:$4 sm:$0xff]  }
 0x179   : > { %vm2257_vm3 = vsmask.f32 6400  ;;  %vm3289_vm5 = vsmask.f32 5376  ;;  %s19744_s21 = scalar_lea.sflag [#allocation7], %s467_s24  ;;  %s18747_s22 = scalar_lea.vmem %s19740_s16, 256 }
 0x17a   : > { %p18748_p0 = scmp.ne.s32.totalorder %s19740_s16, %s18747_s22  ;;  %p19844_p5 = scmp.ne.s32.totalorder %s19822_s25, 0 }
 0x17b   : > { %1114 = vmatpush1.bf16.msra.mxu0 %v16481_v0  ;;  %1157 = vmatpush1.bf16.msra.mxu1 %v16482_v3  ;;  %v16561_v0 = vld [vmem:[#allocation11 + $0x140] ss:$16 sps:$4 sm:$0xff]   ;;  %v16572_v3 = vld [vmem:[#allocation11 + $0x16c] ss:$16 sps:$4 sm:$0xff]   ;;  %s18863_s23 = smov [#allocation23]  }
 0x17c   : > { %1115 = vmatprep.subr.bf16.mxu0 %v16483_v4  ;;  %1158 = vmatprep.subr.bf16.mxu1 %v16485_v6  ;;  %v16567_v4 = vld [vmem:[#allocation11 + $0x160] ss:$16 sps:$4 sm:$0xff]   ;;  %v16570_v6 = vld [vmem:[#allocation11 + $0x168] ss:$16 sps:$4 sm:$0xff]   ;;  %p18749_p4 = pnand %p18748_p0, %p19844_p5  ;;  %s18751_s0 = sshll.u32 %s18863_s23, 4  ;;  %s18752_s0 = int_to_ptr.vmem [resolvable:$false] %s18751_s0 }
 0x17d   : > { %s18753_s1 = scalar_lea.vmem %s18752_s0, 512  ;;  %p18754_p11 = scmp.lt.s32.totalorder %s19740_s16, %s18752_s0 }
 0x17e   : > { %p18750_p10 = pneg %p18749_p4  ;;  %p18755_p7 = scmp.lt.s32.totalorder %s18753_s1, %s18747_s22 }
 0x17f   : > { %1116 = vmatpush1.bf16.msra.mxu0 %v16487_v8  ;;  %1159 = vmatpush1.bf16.msra.mxu1 %v16488_v9  ;;  %v16578_v8 = vld [vmem:[#allocation11 + $0x18c] ss:$16 sps:$4 sm:$0xff]   ;;  %v16573_v9 = vld [vmem:[#allocation11 + $0x180] ss:$16 sps:$4 sm:$0xff]  }
 0x180   : > { %1117 = vmatprep.subr.bf16.mxu0 %v16489_v10  ;;  %1160 = vmatprep.subr.bf16.mxu1 %v16491_v11  ;;  %v16576_v10 = vld [vmem:[#allocation11 + $0x188] ss:$16 sps:$4 sm:$0xff]   ;;  %v16581_v11 = vld [vmem:[#allocation11 + $0x1a4] ss:$16 sps:$4 sm:$0xff]   ;;  %p18756_p9 = por %p18755_p7, %p18754_p11 }
 0x182   : > { %p18757_p12 = pnand %p18756_p9, %p18750_p10 }
 0x183   : > { %1118 = vmatpush1.bf16.msra.mxu0 %v16493_v12  ;;  %1161 = vmatpush1.bf16.msra.mxu1 %v16494_v14  ;;  %v16584_v12 = vld [vmem:[#allocation11 + $0x1ac] ss:$16 sps:$4 sm:$0xff]   ;;  %v16579_v14 = vld [vmem:[#allocation11 + $0x1a0] ss:$16 sps:$4 sm:$0xff]  }
 0x184   : > { %1119 = vmatprep.subr.bf16.mxu0 %v16495_v15  ;;  %1162 = vmatprep.subr.bf16.mxu1 %v16497_v17  ;;  %v16582_v15 = vld [vmem:[#allocation11 + $0x1a8] ss:$16 sps:$4 sm:$0xff]   ;;  %v16590_v17 = vld [vmem:[#allocation11 + $0x1cc] ss:$16 sps:$4 sm:$0xff]  }
 0x187   : > { %1120 = vmatpush1.bf16.msra.mxu0 %v16499_v18  ;;  %1163 = vmatpush1.bf16.msra.mxu1 %v16500_v19  ;;  %v16585_v18 = vld [vmem:[#allocation11 + $0x1c0] ss:$16 sps:$4 sm:$0xff]   ;;  %v18862_v19 = vmov 839922192  }
 0x188   : > { %1532 = vmatprep.subr.bf16.mxu0 %v16503_v21  ;;  %1575 = vmatprep.subr.bf16.mxu1 %v16506_v22  ;;  %v600_v21 = vunpack.c.l.s4 %v18862_v19  ;;  %v602_v22 = vlaneseq  ;;  %v16608_v19 = vld [vmem:[#allocation11 + $0x42c] ss:$16 sps:$4 sm:$0xff]  }
 0x18a   : > { %1122 = vmatmul.mubr.bf16.vlgmr.msra.gmra.mrb[0].mxu0 %v702_v23  ;;  %1165 = vmatmul.mubr.bf16.vlgmr.msra.gmra.mrb[0].mxu1 %v702_v23  ;;  %v16588_v23 = vld [vmem:[#allocation11 + $0x1c8] ss:$16 sps:$4 sm:$0xff]  }
 0x18b   : > { %1533 = vmatpush1.bf16.msra.mxu0 %v16501_v24  ;;  %1576 = vmatpush1.bf16.msra.mxu1 %v16504_v25  ;;  %v16593_v24 = vld [vmem:[#allocation11 + $0x1e4] ss:$16 sps:$4 sm:$0xff]   ;;  %v16596_v25 = vld [vmem:[#allocation11 + $0x1ec] ss:$16 sps:$4 sm:$0xff]  }
 0x18c   : > { %1534 = vmatprep.subr.bf16.mxu0 %v16509_v26  ;;  %1577 = vmatprep.subr.bf16.mxu1 %v16512_v27  ;;  %v16591_v26 = vld [vmem:[#allocation11 + $0x1e0] ss:$16 sps:$4 sm:$0xff]   ;;  %v601_v27 = vunpack.c.0.s8 %v600_v21 }
 0x18f   : > { %1535 = vmatpush1.bf16.msra.mxu0 %v16507_v28  ;;  %1578 = vmatpush1.bf16.msra.mxu1 %v16510_v29  ;;  %v19326_v28 = vshrl.u32 %v602_v22, 7  ;;  %v16594_v29 = vld [vmem:[#allocation11 + $0x1e8] ss:$16 sps:$4 sm:$0xff]   ;;  %v16603_v22 = vld [vmem:[#allocation11 + $0x420] ss:$16 sps:$4 sm:$0xff]  }
 0x190   : > { %1536 = vmatprep.subr.bf16.mxu0 %v16515_v30  ;;  %1579 = vmatprep.subr.bf16.mxu1 %v16518_v31  ;;  %v16599_v30 = vld [vmem:[#allocation11 + $0x404] ss:$16 sps:$4 sm:$0xff]   ;;  %v16602_v31 = vld [vmem:[#allocation11 + $0x40c] ss:$16 sps:$4 sm:$0xff]  }
 0x193   : > { %1537 = vmatpush1.bf16.msra.mxu0 %v16513_v32  ;;  %1580 = vmatpush1.bf16.msra.mxu1 %v16516_v33  ;;  %v19329_v33 = vsub.s32 %v601_v27, %v19326_v28  ;;  %v16609_v27 = vld [vmem:[#allocation11 + $0x440] ss:$16 sps:$4 sm:$0xff]  }
 0x194   : > { %1538 = vmatprep.subr.bf16.mxu0 %v16521_v34  ;;  %1581 = vmatprep.subr.bf16.mxu1 %v16524_v35  ;;  %v585_v35 = vld [vmem:[#allocation2 + $0x8] sm:$0x80] }
 0x197   : > { %1539 = vmatpush1.bf16.msra.mxu0 %v16519_v36  ;;  %1582 = vmatpush1.bf16.msra.mxu1 %v16522_v37 }
 0x198   : > { %1540 = vmatprep.subr.bf16.mxu0 %v16527_v38  ;;  %1583 = vmatprep.subr.bf16.mxu1 %v16530_v39  ;;  %v584_v38 = vld [vmem:[#allocation2] sm:$0x80]  ;;  %v589_v39 = vld [vmem:[#allocation2 + $0x28] sm:$0x7f] }
 0x19b   : > { %1541 = vmatpush1.bf16.msra.mxu0 %v16525_v40  ;;  %1584 = vmatpush1.bf16.msra.mxu1 %v16528_v41  ;;  %v588_v41 = vld [vmem:[#allocation2 + $0x20] sm:$0x7f] }
 0x19c   : > { %1542 = vmatprep.subr.bf16.mxu0 %v16533_v42  ;;  %1585 = vmatprep.subr.bf16.mxu1 %v16536_v43 }
 0x19f   : > { %1543 = vmatpush1.bf16.msra.mxu0 %v16531_v44  ;;  %1586 = vmatpush1.bf16.msra.mxu1 %v16534_v45  ;;  %v591_v44 = vpack.c.bf16 %v19319_v13, %v585_v35  ;;  %v590_v45 = vpack.c.bf16 %v19323_v20, %v584_v38  ;;  %v16620_v35 = vld [vmem:[#allocation11 + $0x46c] ss:$16 sps:$4 sm:$0xff]   ;;  %v16615_v38 = vld [vmem:[#allocation11 + $0x460] ss:$16 sps:$4 sm:$0xff]  }
 0x1a0   : > { %1544 = vmatprep.subr.bf16.mxu0 %v16539_v46  ;;  %1587 = vmatprep.subr.bf16.mxu1 %v16542_v47  ;;  %v593_v46 = vpack.c.bf16 %v589_v39, %v589_v39  ;;  %v592_v47 = vpack.c.bf16 %v588_v41, %v588_v41 }
 0x1a3   : > { %1545 = vmatpush1.bf16.msra.mxu0 %v16537_v48  ;;  %1588 = vmatpush1.bf16.msra.mxu1 %v16540_v49 }
 0x1a4   : > { %1546 = vmatprep.subr.bf16.mxu0 %v16545_v50  ;;  %1589 = vmatprep.subr.bf16.mxu1 %v16548_v51 }
 0x1a7   : > { %1547 = vmatpush1.bf16.msra.mxu0 %v16543_v52  ;;  %1590 = vmatpush1.bf16.msra.mxu1 %v16546_v53 }
 0x1a8   : > { %1548 = vmatprep.subr.bf16.mxu0 %v16551_v54  ;;  %1591 = vmatprep.subr.bf16.mxu1 %v16554_v55 }
 0x1ab   : > { %1549 = vmatpush1.bf16.msra.mxu0 %v16549_v56  ;;  %1592 = vmatpush1.bf16.msra.mxu1 %v16552_v57 }
 0x1ac   : > { %1550 = vmatprep.subr.bf16.mxu0 %v16557_v58  ;;  %1593 = vmatprep.subr.bf16.mxu1 %v16560_v59 }
 0x1af   : > { %1551 = vmatpush1.bf16.msra.mxu0 %v16555_v60  ;;  %1594 = vmatpush1.bf16.msra.mxu1 %v16558_v61 }
 0x1b0   : > { %1552 = vmatprep.subr.bf16.mxu0 %v16563_v62  ;;  %1595 = vmatprep.subr.bf16.mxu1 %v16566_v63 }
 0x1b3   : > { %1553 = vmatpush1.bf16.msra.mxu0 %v16561_v0  ;;  %1596 = vmatpush1.bf16.msra.mxu1 %v16564_v1 }
 0x1b4   : > { %1554 = vmatprep.subr.bf16.mxu0 %v16569_v2  ;;  %1597 = vmatprep.subr.bf16.mxu1 %v16572_v3 }
 0x1b7   : > { %1555 = vmatpush1.bf16.msra.mxu0 %v16567_v4  ;;  %1598 = vmatpush1.bf16.msra.mxu1 %v16570_v6 }
 0x1b8   : > { %1556 = vmatprep.subr.bf16.mxu0 %v16575_v7  ;;  %1599 = vmatprep.subr.bf16.mxu1 %v16578_v8 }
 0x1bb   : > { %1557 = vmatpush1.bf16.msra.mxu0 %v16573_v9  ;;  %1600 = vmatpush1.bf16.msra.mxu1 %v16576_v10 }
 0x1bc   : > { %1558 = vmatprep.subr.bf16.mxu0 %v16581_v11  ;;  %1601 = vmatprep.subr.bf16.mxu1 %v16584_v12  ;;  %v16597_v12 = vld [vmem:[#allocation11 + $0x400] ss:$16 sps:$4 sm:$0xff]  }
 0x1bf   : > { %1559 = vmatpush1.bf16.msra.mxu0 %v16579_v14  ;;  %1602 = vmatpush1.bf16.msra.mxu1 %v16582_v15  ;;  %v16600_v14 = vld [vmem:[#allocation11 + $0x408] ss:$16 sps:$4 sm:$0xff]  }
 0x1c0   : > { %1560 = vmatprep.subr.bf16.mxu0 %v16587_v16  ;;  %1603 = vmatprep.subr.bf16.mxu1 %v16590_v17  ;;  %v16605_v16 = vld [vmem:[#allocation11 + $0x424] ss:$16 sps:$4 sm:$0xff]  }
 0x1c3   : > { %1561 = vmatpush1.bf16.msra.mxu0 %v16585_v18  ;;  %1604 = vmatpush1.bf16.msra.mxu1 %v16588_v23  ;;  %v16606_v23 = vld [vmem:[#allocation11 + $0x428] ss:$16 sps:$4 sm:$0xff]  }
 0x1c4   : > { %1562 = vmatprep.subr.bf16.mxu0 %v16593_v24  ;;  %1605 = vmatprep.subr.bf16.mxu1 %v16596_v25  ;;  %v16611_v24 = vld [vmem:[#allocation11 + $0x444] ss:$16 sps:$4 sm:$0xff]   ;;  %v16614_v25 = vld [vmem:[#allocation11 + $0x44c] ss:$16 sps:$4 sm:$0xff]  }
 0x1c7   : > { %1563 = vmatpush1.bf16.msra.mxu0 %v16591_v26  ;;  %1606 = vmatpush1.bf16.msra.mxu1 %v16594_v29 }
 0x1c8   : > { %v597_v32 = vpop.permute.xlu0 %596  ;;  %2082 = vmatprep.subr.bf16.mxu0 %v16599_v30  ;;  %2125 = vmatprep.subr.bf16.mxu1 %v16602_v31  ;;  %v16612_v30 = vld [vmem:[#allocation11 + $0x448] ss:$16 sps:$4 sm:$0xff]   ;;  %v16617_v31 = vld [vmem:[#allocation11 + $0x464] ss:$16 sps:$4 sm:$0xff]  }
 0x1c9   : > { %v605_v36 = vrot.slane %v597_v32, %v19329_v33 }
 0x1cc   : > { %v609_v34 = vpop.permute.xlu0 %608 }
 0x1cd   : > { %v617_v37 = vrot.slane %v609_v34, %v19329_v33  ;;  %v1623_v34 = vld [vmem:[#allocation2 + $0x38] sm:$0x1] }
 0x1ce   : > { %v1627_v41 = vpack.c.bf16 %v1623_v34, %v1623_v34  ;;  %v19358_v34 = vld [vmem:[#allocation2 + $0x20] sm:$0xff] }
 0x1cf   : > { %v14271_v40 = vcombine.low %v605_v36, %v617_v37  ;;  %v1619_v37 = vld [vmem:[#allocation2 + $0x18] sm:$0xfe] }
 0x1d1   : > { %v624_v42 = vshrl.u32 %v14271_v40, 16  ;;  %v627_v43 = vshll.u32 %v14271_v40, 16 }
 0x1d3   : > { %v626_v48 = vrot.slane %v624_v42, 4  ;;  %v629_v49 = vrot.slane %v627_v43, 5  ;;  %v2184_v50 = vrot.slane %v624_v42, 6  ;;  %v2185_v51 = vrot.slane %v627_v43, 7  ;;  %v16618_v42 = vld [vmem:[#allocation11 + $0x468] ss:$16 sps:$4 sm:$0xff]  }
 0x1d4   : > { %v16623_v43 = vld [vmem:[#allocation11 + $0x484] ss:$16 sps:$4 sm:$0xff]  }
 0x1d5   : > { %v19335_v52 = vor.u32 %v629_v49, %v626_v48  ;;  %v19337_v53 = vor.u32 %v2185_v51, %v2184_v50  ;;  %v16621_v48 = vld [vmem:[#allocation11 + $0x480] ss:$16 sps:$4 sm:$0xff]  }
 0x1d7   : > { %v632_v54 = vmul.bf16 %v19335_v52, %v590_v45  ;;  %v633_v55 = vmul.bf16 %v19335_v52, %v591_v44  ;;  %v635_v56 = vmul.bf16 %v19335_v52, %v593_v46  ;;  %v634_v13 = vmul.bf16 %v19335_v52, %v592_v47  ;;  %v16626_v44 = vld [vmem:[#allocation11 + $0x48c] ss:$16 sps:$4 sm:$0xff]  }
 0x1d8   : > { %v1631_v21 = vpop.permute.xlu1 %1630  ;;  %v1625_v47 = vpack.c.bf16 %v19315_v5, %v1619_v37  ;;  %v16630_v5 = vld [vmem:[#allocation11 + $0x4a8] ss:$16 sps:$4 sm:$0xff]   ;;  %v1622_v37 = vld [vmem:[#allocation2 + $0x30] sm:$0x1] }
 0x1d9   : > { %v1177_v57 = vshrl.u32 %v632_v54, 16  ;;  %v1180_v20 = vshll.u32 %v632_v54, 16  ;;  %v1194_v58 = vshrl.u32 %v633_v55, 16  ;;  %v1197_v59 = vshll.u32 %v633_v55, 16  ;;  %v16624_v54 = vld [vmem:[#allocation11 + $0x488] ss:$16 sps:$4 sm:$0xff]  }
 0x1da   : > { %v1202_v60 = vshrl.u32 %v635_v56, 16  ;;  %v1205_v61 = vshll.u32 %v635_v56, 16  ;;  %v1185_v62 = vshrl.u32 %v634_v13, 16  ;;  %v1188_v63 = vshll.u32 %v634_v13, 16  ;;  %v16629_v55 = vld [vmem:[#allocation11 + $0x4a4] ss:$16 sps:$4 sm:$0xff]  }
 0x1db   : > { %v1196_v0 = vrot.slane %v1194_v58, 3  ;;  %v1199_v1 = vrot.slane %v1197_v59, 4  ;;  %v1179_v2 = vrot.slane %v1177_v57, 3  ;;  %v1182_v3 = vrot.slane %v1180_v20, 4  ;;  %v16632_v56 = vld [vmem:[#allocation11 + $0x4ac] ss:$16 sps:$4 sm:$0xff]  }
 0x1dc   : > { %v1204_v4 = vrot.slane %v1202_v60, 3  ;;  %v1207_v6 = vrot.slane %v1205_v61, 4  ;;  %v1187_v7 = vrot.slane %v1185_v62, 3  ;;  %v1190_v8 = vrot.slane %v1188_v63, 4  ;;  %v1643_v29 = vpop.permute.xlu1 %1642  ;;  %v16627_v20 = vld [vmem:[#allocation11 + $0x4a0] ss:$16 sps:$4 sm:$0xff]  }
 0x1dd   : > { %v1200_v9 = vor.u32 %v1199_v1, %v1196_v0  ;;  %v1183_v10 = vor.u32 %v1182_v3, %v1179_v2  ;;  %v1639_v26 = vrot.slane %v1631_v21, %v19329_v33  ;;  %v1651_v32 = vrot.slane %v1643_v29, %v19329_v33  ;;  %v16635_v60 = vld [vmem:[#allocation11 + $0x4c4] ss:$16 sps:$4 sm:$0xff]   ;;  %v16638_v61 = vld [vmem:[#allocation11 + $0x4cc] ss:$16 sps:$4 sm:$0xff]   ;;  %v16633_v0 = vld [vmem:[#allocation11 + $0x4c0] ss:$16 sps:$4 sm:$0xff]  }
 0x1de   : > { %v1208_v11 = vor.u32 %v1207_v6, %v1204_v4  ;;  %v1191_v15 = vor.u32 %v1190_v8, %v1187_v7  ;;  %v16636_v1 = vld [vmem:[#allocation11 + $0x4c8] ss:$16 sps:$4 sm:$0xff]   ;;  %v16641_v3 = vld [vmem:[#allocation11 + $0x4e4] ss:$16 sps:$4 sm:$0xff]   ;;  %v16644_v4 = vld [vmem:[#allocation11 + $0x4ec] ss:$16 sps:$4 sm:$0xff]  }
 0x1df   : > { %v14400_v36 = vcombine.low %v1639_v26, %v1651_v32  ;;  %v16639_v7 = vld [vmem:[#allocation11 + $0x4e0] ss:$16 sps:$4 sm:$0xff]   ;;  %v16642_v8 = vld [vmem:[#allocation11 + $0x4e8] ss:$16 sps:$4 sm:$0xff]   ;;  %v16674_v32 = vld [vmem:[#allocation11 + $0x58c] ss:$16 sps:$4 sm:$0xff]  }
 0x1e0   : > { %v1209_v17 = vsel %vm1175_vm1, %v1200_v9, %v1208_v11  ;;  %v1192_v18 = vsel %vm1175_vm1, %v1183_v10, %v1191_v15  ;;  %v16647_v9 = vld [vmem:[#allocation11 + $0x504] ss:$16 sps:$4 sm:$0xff]   ;;  %v16650_v10 = vld [vmem:[#allocation11 + $0x50c] ss:$16 sps:$4 sm:$0xff]   ;;  %v16645_v11 = vld [vmem:[#allocation11 + $0x500] ss:$16 sps:$4 sm:$0xff]  }
 0x1e1   : > { %1564 = vmatprep.mubr.bf16.mxu0 %v1209_v17  ;;  %1607 = vmatprep.mubr.bf16.mxu1 %v1209_v17  ;;  %v1658_v39 = vshrl.u32 %v14400_v36, 16  ;;  %v1661_v40 = vshll.u32 %v14400_v36, 16  ;;  %v16656_v15 = vld [vmem:[#allocation11 + $0x52c] ss:$16 sps:$4 sm:$0xff]   ;;  %v16654_v17 = vld [vmem:[#allocation11 + $0x528] ss:$16 sps:$4 sm:$0xff]  }
 0x1e2   : > { %1565 = vmatmul.mubr.bf16.vlgmr.msra.gmra.mrb[0].mxu0 %v1192_v18  ;;  %1608 = vmatmul.mubr.bf16.vlgmr.msra.gmra.mrb[0].mxu1 %v1192_v18  ;;  %v16659_v18 = vld [vmem:[#allocation11 + $0x544] ss:$16 sps:$4 sm:$0xff]   ;;  %v16657_v21 = vld [vmem:[#allocation11 + $0x540] ss:$16 sps:$4 sm:$0xff]   ;;  %v16666_v26 = vld [vmem:[#allocation11 + $0x568] ss:$16 sps:$4 sm:$0xff]  }
 0x1e3   : > { %2083 = vmatpush1.bf16.msra.mxu0 %v16597_v12  ;;  %2126 = vmatpush1.bf16.msra.mxu1 %v16600_v14  ;;  %v19347_v33 = vrot.slane %v1658_v39, 7  ;;  %v3216_v45 = vrot.slane %v1658_v39, 5  ;;  %v3217_v46 = vrot.slane %v1661_v40, 6  ;;  %v16648_v12 = vld [vmem:[#allocation11 + $0x508] ss:$16 sps:$4 sm:$0xff]  }
 0x1e4   : > { %2084 = vmatprep.subr.bf16.mxu0 %v16605_v16  ;;  %2127 = vmatprep.subr.bf16.mxu1 %v16608_v19  ;;  %v16653_v14 = vld [vmem:[#allocation11 + $0x524] ss:$16 sps:$4 sm:$0xff]   ;;  %v16651_v16 = vld [vmem:[#allocation11 + $0x520] ss:$16 sps:$4 sm:$0xff]   ;;  %v16662_v19 = vld [vmem:[#allocation11 + $0x54c] ss:$16 sps:$4 sm:$0xff]  }
 0x1e5   : > { %v19351_v49 = vor.u32 %v1661_v40, %v19347_v33  ;;  %v19353_v50 = vor.u32 %v3217_v46, %v3216_v45  ;;  %v1669_v51 = vmul.bf16 %v19347_v33, %v1627_v41  ;;  %v1618_v29 = vld [vmem:[#allocation2 + $0x10] sm:$0xfe]  ;;  %v16672_v41 = vld [vmem:[#allocation11 + $0x588] ss:$16 sps:$4 sm:$0xff]  }
 0x1e6   : > { %v16669_v36 = vld [vmem:[#allocation11 + $0x580] ss:$16 sps:$4 sm:$0xff]  }
 0x1e7   : > { %2085 = vmatpush1.bf16.msra.mxu0 %v16603_v22  ;;  %2128 = vmatpush1.bf16.msra.mxu1 %v16606_v23  ;;  %v1667_v13 = vmul.bf16 %v19351_v49, %v1625_v47  ;;  %v1756_v57 = vshll.u32 %v1669_v51, 16  ;;  %v16660_v22 = vld [vmem:[#allocation11 + $0x548] ss:$16 sps:$4 sm:$0xff]   ;;  %v16665_v23 = vld [vmem:[#allocation11 + $0x564] ss:$16 sps:$4 sm:$0xff]  }
 0x1e8   : > { %2086 = vmatprep.subr.bf16.mxu0 %v16611_v24  ;;  %2129 = vmatprep.subr.bf16.mxu1 %v16614_v25  ;;  %v16668_v24 = vld [vmem:[#allocation11 + $0x56c] ss:$16 sps:$4 sm:$0xff]   ;;  %v16663_v25 = vld [vmem:[#allocation11 + $0x560] ss:$16 sps:$4 sm:$0xff]   ;;  %v16678_v51 = vld [vmem:[#allocation11 + $0x5a8] ss:$16 sps:$4 sm:$0xff]  }
 0x1e9   : > { %v1749_v58 = vshrl.u32 %v1667_v13, 16  ;;  %v1751_v59 = vshll.u32 %v1667_v13, 16  ;;  %v1758_v63 = vrot.slane %v1756_v57, 1  ;;  %v16675_v46 = vld [vmem:[#allocation11 + $0x5a0] ss:$16 sps:$4 sm:$0xff]  }
 0x1eb   : > { %2087 = vmatpush1.bf16.msra.mxu0 %v16609_v27  ;;  %2130 = vmatpush1.bf16.msra.mxu1 %v16612_v30  ;;  %v1753_v62 = vrot.slane %v1751_v59, 1  ;;  %v16671_v27 = vld [vmem:[#allocation11 + $0x584] ss:$16 sps:$4 sm:$0xff]   ;;  %v2177_v30 = vld [vmem:[#allocation2 + $0x18] sm:$0xf8] }
 0x1ec   : > { %2088 = vmatprep.subr.bf16.mxu0 %v16617_v31  ;;  %2131 = vmatprep.subr.bf16.mxu1 %v16620_v35  ;;  %v2179_v31 = vld [vmem:[#allocation2 + $0x38] sm:$0x7]  ;;  %v1624_v35 = vpack.c.bf16 %v19358_v34, %v1618_v29 }
 0x1ed   : > { %v1754_v2 = vor.u32 %v1753_v62, %v1749_v58  ;;  %v2183_v40 = vpack.c.bf16 %v2179_v31, %v2179_v31  ;;  %v16692_v62 = vld [vmem:[#allocation11 + $0x5ec] ss:$16 sps:$4 sm:$0xff]   ;;  %v16708_v29 = vld [vmem:[#allocation11 + $0x648] ss:$16 sps:$4 sm:$0xff]  }
 0x1ee   : > { %v1666_v45 = vmul.bf16 %v19351_v49, %v1624_v35  ;;  %v16716_v31 = vld [vmem:[#allocation11 + $0x66c] ss:$16 sps:$4 sm:$0xff]   ;;  %v16714_v35 = vld [vmem:[#allocation11 + $0x668] ss:$16 sps:$4 sm:$0xff]  }
 0x1ef   : > { %2089 = vmatpush1.bf16.msra.mxu0 %v16615_v38  ;;  %2132 = vmatpush1.bf16.msra.mxu1 %v16618_v42  ;;  %v1759_v6 = vsel %vm1735_vm2, %v1754_v2, %v1758_v63  ;;  %v19361_v38 = vld [vmem:[#allocation2 + $0x28] sm:$0xff]  ;;  %v16677_v42 = vld [vmem:[#allocation11 + $0x5a4] ss:$16 sps:$4 sm:$0xff]   ;;  %v16687_v63 = vld [vmem:[#allocation11 + $0x5e0] ss:$16 sps:$4 sm:$0xff]  }
 0x1f0   : > { %2090 = vmatprep.subr.bf16.mxu0 %v16623_v43  ;;  %2133 = vmatprep.subr.bf16.mxu1 %v16626_v44  ;;  %v2181_v39 = vpack.c.bf16 %v19361_v38, %v2177_v30  ;;  %v16680_v43 = vld [vmem:[#allocation11 + $0x5ac] ss:$16 sps:$4 sm:$0xff]   ;;  %v1626_v44 = vpack.c.bf16 %v1622_v37, %v1622_v37  ;;  %v1739_v57 = vshll.u32 %v1666_v45, 16  ;;  %v16713_v30 = vld [vmem:[#allocation11 + $0x664] ss:$16 sps:$4 sm:$0xff]  }
 0x1f1   : > { %2114 = vmatprep.mubr.bf16.mxu0 %v1759_v6  ;;  %2157 = vmatprep.mubr.bf16.mxu1 %v1759_v6  ;;  %v16722_v37 = vld [vmem:[#allocation11 + $0x68c] ss:$16 sps:$4 sm:$0xff]  }
 0x1f2   : > { %v2189_v47 = vmul.bf16 %v19337_v53, %v2181_v39  ;;  %v1668_v13 = vmul.bf16 %v19347_v33, %v1626_v44  ;;  %v16717_v39 = vld [vmem:[#allocation11 + $0x680] ss:$16 sps:$4 sm:$0xff]   ;;  %v16726_v44 = vld [vmem:[#allocation11 + $0x6a8] ss:$16 sps:$4 sm:$0xff]  }
 0x1f3   : > { %2091 = vmatpush1.bf16.msra.mxu0 %v16621_v48  ;;  %2134 = vmatpush1.bf16.msra.mxu1 %v16624_v54  ;;  %v2191_v48 = vmul.bf16 %v19337_v53, %v2183_v40  ;;  %v16683_v54 = vld [vmem:[#allocation11 + $0x5c4] ss:$16 sps:$4 sm:$0xff]   ;;  %v16720_v40 = vld [vmem:[#allocation11 + $0x688] ss:$16 sps:$4 sm:$0xff]  }
 0x1f4   : > { %2092 = vmatprep.subr.bf16.mxu0 %v16629_v55  ;;  %2135 = vmatprep.subr.bf16.mxu1 %v16632_v56  ;;  %v16686_v55 = vld [vmem:[#allocation11 + $0x5cc] ss:$16 sps:$4 sm:$0xff]   ;;  %v16681_v56 = vld [vmem:[#allocation11 + $0x5c0] ss:$16 sps:$4 sm:$0xff]   ;;  %v1744_v2 = vshll.u32 %v1668_v13, 16 }
 0x1f5   : > { %v2284_v58 = vshrl.u32 %v2191_v48, 16  ;;  %v2287_v59 = vshll.u32 %v2191_v48, 16  ;;  %v16732_v48 = vld [vmem:[#allocation11 + $0x6c8] ss:$16 sps:$4 sm:$0xff]   ;;  %v16743_v13 = vld [vmem:[#allocation11 + $0x704] ss:$16 sps:$4 sm:$0xff]  }
 0x1f7   : > { %2093 = vmatpush1.bf16.msra.mxu0 %v16627_v20  ;;  %2136 = vmatpush1.bf16.msra.mxu1 %v16630_v5  ;;  %v2276_v20 = vshrl.u32 %v2189_v47, 16  ;;  %v2279_v5 = vshll.u32 %v2189_v47, 16  ;;  %v2286_v6 = vrot.slane %v2284_v58, 1  ;;  %v16729_v47 = vld [vmem:[#allocation11 + $0x6c0] ss:$16 sps:$4 sm:$0xff]  }
 0x1f8   : > { %2094 = vmatprep.subr.bf16.mxu0 %v16635_v60  ;;  %2137 = vmatprep.subr.bf16.mxu1 %v16638_v61  ;;  %v16684_v60 = vld [vmem:[#allocation11 + $0x5c8] ss:$16 sps:$4 sm:$0xff]   ;;  %v16689_v61 = vld [vmem:[#allocation11 + $0x5e4] ss:$16 sps:$4 sm:$0xff]  }
 0x1f9   : > { %v16749_v58 = vld [vmem:[#allocation11 + $0x724] ss:$16 sps:$4 sm:$0xff]  }
 0x1fb   : > { %2095 = vmatpush1.bf16.msra.mxu0 %v16633_v0  ;;  %2138 = vmatpush1.bf16.msra.mxu1 %v16636_v1  ;;  %v1737_v0 = vshrl.u32 %v1666_v45, 16  ;;  %v1741_v1 = vrot.slane %v1739_v57, 1  ;;  %v16731_v45 = vld [vmem:[#allocation11 + $0x6c4] ss:$16 sps:$4 sm:$0xff]   ;;  %v16746_v57 = vld [vmem:[#allocation11 + $0x70c] ss:$16 sps:$4 sm:$0xff]  }
 0x1fc   : > { %2096 = vmatprep.subr.bf16.mxu0 %v16641_v3  ;;  %2139 = vmatprep.subr.bf16.mxu1 %v16644_v4  ;;  %v2278_v3 = vrot.slane %v2276_v20, 1  ;;  %v2281_v4 = vrot.slane %v2279_v5, 2  ;;  %v16741_v20 = vld [vmem:[#allocation11 + $0x700] ss:$16 sps:$4 sm:$0xff]   ;;  %v16744_v5 = vld [vmem:[#allocation11 + $0x708] ss:$16 sps:$4 sm:$0xff]  }
 0x1ff   : > { %2097 = vmatpush1.bf16.msra.mxu0 %v16639_v7  ;;  %2140 = vmatpush1.bf16.msra.mxu1 %v16642_v8  ;;  %v2289_v7 = vrot.slane %v2287_v59, 2  ;;  %v16690_v8 = vld [vmem:[#allocation11 + $0x5e8] ss:$16 sps:$4 sm:$0xff]   ;;  %v16752_v59 = vld [vmem:[#allocation11 + $0x72c] ss:$16 sps:$4 sm:$0xff]  }
 0x200   : > { %2098 = vmatprep.subr.bf16.mxu0 %v16647_v9  ;;  %2141 = vmatprep.subr.bf16.mxu1 %v16650_v10  ;;  %v16695_v9 = vld [vmem:[#allocation11 + $0x604] ss:$16 sps:$4 sm:$0xff]   ;;  %v16698_v10 = vld [vmem:[#allocation11 + $0x60c] ss:$16 sps:$4 sm:$0xff]  }
 0x203   : > { %2099 = vmatpush1.bf16.msra.mxu0 %v16645_v11  ;;  %2142 = vmatpush1.bf16.msra.mxu1 %v16648_v12  ;;  %v1742_v11 = vor.u32 %v1741_v1, %v1737_v0  ;;  %v1746_v12 = vrot.slane %v1744_v2, 1  ;;  %v16753_v0 = vld [vmem:[#allocation11 + $0x740] ss:$16 sps:$4 sm:$0xff]   ;;  %v16756_v1 = vld [vmem:[#allocation11 + $0x748] ss:$16 sps:$4 sm:$0xff]  }
 0x204   : > { %2100 = vmatprep.subr.bf16.mxu0 %v16653_v14  ;;  %2143 = vmatprep.subr.bf16.mxu1 %v16656_v15  ;;  %v2282_v14 = vor.u32 %v2281_v4, %v2278_v3  ;;  %v2290_v15 = vor.u32 %v2289_v7, %v2286_v6  ;;  %v16761_v2 = vld [vmem:[#allocation11 + $0x764] ss:$16 sps:$4 sm:$0xff]   ;;  %v16764_v3 = vld [vmem:[#allocation11 + $0x76c] ss:$16 sps:$4 sm:$0xff]   ;;  %v16759_v6 = vld [vmem:[#allocation11 + $0x760] ss:$16 sps:$4 sm:$0xff]  }
 0x205   : > { %v2176_v4 = vld [vmem:[#allocation2 + $0x10] sm:$0xf8]  ;;  %v2178_v7 = vld [vmem:[#allocation2 + $0x30] sm:$0x7] }
 0x207   : > { %2101 = vmatpush1.bf16.msra.mxu0 %v16651_v16  ;;  %2144 = vmatpush1.bf16.msra.mxu1 %v16654_v17  ;;  %v16693_v16 = vld [vmem:[#allocation11 + $0x600] ss:$16 sps:$4 sm:$0xff]   ;;  %v16696_v17 = vld [vmem:[#allocation11 + $0x608] ss:$16 sps:$4 sm:$0xff]  }
 0x208   : > { %2102 = vmatprep.subr.bf16.mxu0 %v16659_v18  ;;  %2145 = vmatprep.subr.bf16.mxu1 %v16662_v19  ;;  %v16701_v18 = vld [vmem:[#allocation11 + $0x624] ss:$16 sps:$4 sm:$0xff]   ;;  %v1747_v19 = vsel %vm1735_vm2, %v1742_v11, %v1746_v12  ;;  %v16770_v11 = vld [vmem:[#allocation11 + $0x78c] ss:$16 sps:$4 sm:$0xff]   ;;  %v2180_v12 = vpack.c.bf16 %v19358_v34, %v2176_v4  ;;  %v16777_v34 = vld [vmem:[#allocation11 + $0x7c0] ss:$16 sps:$4 sm:$0xff]  }
 0x209   : > { %v16815_v4 = vld [vmem:[#allocation11 + $0x884] ss:$16 sps:$4 sm:$0xff]  }
 0x20b   : > { %2103 = vmatpush1.bf16.msra.mxu0 %v16657_v21  ;;  %2146 = vmatpush1.bf16.msra.mxu1 %v16660_v22  ;;  %v16704_v21 = vld [vmem:[#allocation11 + $0x62c] ss:$16 sps:$4 sm:$0xff]   ;;  %v2291_v22 = vsel %vm2257_vm3, %v2282_v14, %v2290_v15  ;;  %v2182_v14 = vpack.c.bf16 %v2178_v7, %v2178_v7  ;;  %v16768_v15 = vld [vmem:[#allocation11 + $0x788] ss:$16 sps:$4 sm:$0xff]  }
 0x20c   : > { %2104 = vmatprep.subr.bf16.mxu0 %v16665_v23  ;;  %2147 = vmatprep.subr.bf16.mxu1 %v16668_v24  ;;  %v16699_v23 = vld [vmem:[#allocation11 + $0x620] ss:$16 sps:$4 sm:$0xff]   ;;  %v16702_v24 = vld [vmem:[#allocation11 + $0x628] ss:$16 sps:$4 sm:$0xff]   ;;  %v16818_v7 = vld [vmem:[#allocation11 + $0x88c] ss:$16 sps:$4 sm:$0xff]  }
 0x20f   : > { %2105 = vmatpush1.bf16.msra.mxu0 %v16663_v25  ;;  %2148 = vmatpush1.bf16.msra.mxu1 %v16666_v26  ;;  %v16707_v25 = vld [vmem:[#allocation11 + $0x644] ss:$16 sps:$4 sm:$0xff]   ;;  %v16710_v26 = vld [vmem:[#allocation11 + $0x64c] ss:$16 sps:$4 sm:$0xff]  }
 0x210   : > { %2106 = vmatprep.subr.bf16.mxu0 %v16671_v27  ;;  %2149 = vmatprep.subr.bf16.mxu1 %v16674_v32  ;;  %v16705_v27 = vld [vmem:[#allocation11 + $0x640] ss:$16 sps:$4 sm:$0xff]  }
 0x211   : > { %v16711_v32 = vld [vmem:[#allocation11 + $0x660] ss:$16 sps:$4 sm:$0xff]  }
 0x213   : > { %2107 = vmatpush1.bf16.msra.mxu0 %v16669_v36  ;;  %2150 = vmatpush1.bf16.msra.mxu1 %v16672_v41  ;;  %v16719_v36 = vld [vmem:[#allocation11 + $0x684] ss:$16 sps:$4 sm:$0xff]  }
 0x214   : > { %2108 = vmatprep.subr.bf16.mxu0 %v16677_v42  ;;  %2151 = vmatprep.subr.bf16.mxu1 %v16680_v43  ;;  %v16725_v41 = vld [vmem:[#allocation11 + $0x6a4] ss:$16 sps:$4 sm:$0xff]   ;;  %v16728_v42 = vld [vmem:[#allocation11 + $0x6ac] ss:$16 sps:$4 sm:$0xff]   ;;  %v16723_v43 = vld [vmem:[#allocation11 + $0x6a0] ss:$16 sps:$4 sm:$0xff]  }
 0x217   : > { %2109 = vmatpush1.bf16.msra.mxu0 %v16675_v46  ;;  %2152 = vmatpush1.bf16.msra.mxu1 %v16678_v51  ;;  %v16734_v46 = vld [vmem:[#allocation11 + $0x6cc] ss:$16 sps:$4 sm:$0xff]   ;;  %v16737_v51 = vld [vmem:[#allocation11 + $0x6e4] ss:$16 sps:$4 sm:$0xff]  }
 0x218   : > { %2110 = vmatprep.subr.bf16.mxu0 %v16683_v54  ;;  %2153 = vmatprep.subr.bf16.mxu1 %v16686_v55  ;;  %v16740_v54 = vld [vmem:[#allocation11 + $0x6ec] ss:$16 sps:$4 sm:$0xff]   ;;  %v16735_v55 = vld [vmem:[#allocation11 + $0x6e0] ss:$16 sps:$4 sm:$0xff]  }
 0x21b   : > { %2111 = vmatpush1.bf16.msra.mxu0 %v16681_v56  ;;  %2154 = vmatpush1.bf16.msra.mxu1 %v16684_v60  ;;  %v16738_v56 = vld [vmem:[#allocation11 + $0x6e8] ss:$16 sps:$4 sm:$0xff]   ;;  %v16747_v60 = vld [vmem:[#allocation11 + $0x720] ss:$16 sps:$4 sm:$0xff]  }
 0x21c   : > { %2112 = vmatprep.subr.bf16.mxu0 %v16689_v61  ;;  %2155 = vmatprep.subr.bf16.mxu1 %v16692_v62  ;;  %v16750_v61 = vld [vmem:[#allocation11 + $0x728] ss:$16 sps:$4 sm:$0xff]   ;;  %v16755_v62 = vld [vmem:[#allocation11 + $0x744] ss:$16 sps:$4 sm:$0xff]  }
 0x21f   : > { %2113 = vmatpush1.bf16.msra.mxu0 %v16687_v63  ;;  %2156 = vmatpush1.bf16.msra.mxu1 %v16690_v8  ;;  %v16758_v63 = vld [vmem:[#allocation11 + $0x74c] ss:$16 sps:$4 sm:$0xff]   ;;  %v16762_v8 = vld [vmem:[#allocation11 + $0x768] ss:$16 sps:$4 sm:$0xff]  }
 0x220   : > { %2614 = vmatprep.subr.bf16.mxu0 %v16695_v9  ;;  %2657 = vmatprep.subr.bf16.mxu1 %v16698_v10  ;;  %v16767_v9 = vld [vmem:[#allocation11 + $0x784] ss:$16 sps:$4 sm:$0xff]   ;;  %v16765_v10 = vld [vmem:[#allocation11 + $0x780] ss:$16 sps:$4 sm:$0xff]  }
 0x222   : > { %2115 = vmatmul.mubr.bf16.vlgmr.msra.gmra.mrb[0].mxu0 %v1747_v19  ;;  %2158 = vmatmul.mubr.bf16.vlgmr.msra.gmra.mrb[0].mxu1 %v1747_v19  ;;  %v2190_v19 = vmul.bf16 %v19337_v53, %v2182_v14  ;;  %v16827_v14 = vld [vmem:[#allocation11 + $0x8c4] ss:$16 sps:$4 sm:$0xff]  }
 0x223   : > { %2615 = vmatpush1.bf16.msra.mxu0 %v16693_v16  ;;  %2646 = vmatprep.mubr.bf16.mxu0 %v2291_v22  ;;  %v16773_v16 = vld [vmem:[#allocation11 + $0x7a4] ss:$16 sps:$4 sm:$0xff]  }
 0x224   : > { %2658 = vmatpush1.bf16.msra.mxu1 %v16696_v17  ;;  %2689 = vmatprep.mubr.bf16.mxu1 %v2291_v22  ;;  %v16776_v17 = vld [vmem:[#allocation11 + $0x7ac] ss:$16 sps:$4 sm:$0xff]   ;;  %v16774_v22 = vld [vmem:[#allocation11 + $0x7a8] ss:$16 sps:$4 sm:$0xff]  }
 0x225   : > { %2616 = vmatprep.subr.bf16.mxu0 %v16701_v18  ;;  %2659 = vmatprep.subr.bf16.mxu1 %v16704_v21  ;;  %v2188_v18 = vmul.bf16 %v19337_v53, %v2180_v12  ;;  %v16771_v21 = vld [vmem:[#allocation11 + $0x7a0] ss:$16 sps:$4 sm:$0xff]   ;;  %v16822_v12 = vld [vmem:[#allocation11 + $0x8a8] ss:$16 sps:$4 sm:$0xff]  }
 0x227   : > { %2617 = vmatpush1.bf16.msra.mxu0 %v16699_v23  ;;  %v16779_v23 = vld [vmem:[#allocation11 + $0x7c4] ss:$16 sps:$4 sm:$0xff]  }
 0x228   : > { %2660 = vmatpush1.bf16.msra.mxu1 %v16702_v24  ;;  %2618 = vmatprep.subr.bf16.mxu0 %v16707_v25  ;;  %v16782_v24 = vld [vmem:[#allocation11 + $0x7cc] ss:$16 sps:$4 sm:$0xff]   ;;  %v2259_v25 = vshrl.u32 %v2188_v18, 16 }
 0x229   : > { %2661 = vmatprep.subr.bf16.mxu1 %v16710_v26  ;;  %v2262_v26 = vshll.u32 %v2188_v18, 16  ;;  %v16833_v18 = vld [vmem:[#allocation11 + $0x8e4] ss:$16 sps:$4 sm:$0xff]  }
 0x22b   : > { %2619 = vmatpush1.bf16.msra.mxu0 %v16705_v27  ;;  %v2267_v27 = vshrl.u32 %v2190_v19, 16 }
 0x22c   : > { %2662 = vmatpush1.bf16.msra.mxu1 %v16708_v29  ;;  %2620 = vmatprep.subr.bf16.mxu0 %v16713_v30  ;;  %v2270_v29 = vshll.u32 %v2190_v19, 16  ;;  %v2709_v30 = vld [vmem:[#allocation2 + $0x18] sm:$0xf0] }
 0x22d   : > { %2663 = vmatprep.subr.bf16.mxu1 %v16716_v31  ;;  %v2711_v31 = vld [vmem:[#allocation2 + $0x38] sm:$0xf]  ;;  %v16836_v19 = vld [vmem:[#allocation11 + $0x8ec] ss:$16 sps:$4 sm:$0xff]  }
 0x22f   : > { %2621 = vmatpush1.bf16.msra.mxu0 %v16711_v32  ;;  %v16780_v32 = vld [vmem:[#allocation11 + $0x7c8] ss:$16 sps:$4 sm:$0xff]  }
 0x230   : > { %2664 = vmatpush1.bf16.msra.mxu1 %v16714_v35  ;;  %2622 = vmatprep.subr.bf16.mxu0 %v16719_v36  ;;  %v16785_v35 = vld [vmem:[#allocation11 + $0x7e4] ss:$16 sps:$4 sm:$0xff]   ;;  %v16783_v36 = vld [vmem:[#allocation11 + $0x7e0] ss:$16 sps:$4 sm:$0xff]  }
 0x231   : > { %2665 = vmatprep.subr.bf16.mxu1 %v16722_v37  ;;  %v16788_v37 = vld [vmem:[#allocation11 + $0x7ec] ss:$16 sps:$4 sm:$0xff]  }
 0x233   : > { %2623 = vmatpush1.bf16.msra.mxu0 %v16717_v39  ;;  %v2261_v39 = vrot.slane %v2259_v25, 1  ;;  %v16840_v25 = vld [vmem:[#allocation11 + $0x908] ss:$16 sps:$4 sm:$0xff]  }
 0x234   : > { %2666 = vmatpush1.bf16.msra.mxu1 %v16720_v40  ;;  %2624 = vmatprep.subr.bf16.mxu0 %v16725_v41  ;;  %v2264_v40 = vrot.slane %v2262_v26, 2  ;;  %v2269_v41 = vrot.slane %v2267_v27, 1  ;;  %v16845_v26 = vld [vmem:[#allocation11 + $0x924] ss:$16 sps:$4 sm:$0xff]   ;;  %v16843_v27 = vld [vmem:[#allocation11 + $0x920] ss:$16 sps:$4 sm:$0xff]  }
 0x235   : > { %2667 = vmatprep.subr.bf16.mxu1 %v16728_v42  ;;  %v2272_v42 = vrot.slane %v2270_v29, 2  ;;  %v16848_v29 = vld [vmem:[#allocation11 + $0x92c] ss:$16 sps:$4 sm:$0xff]  }
 0x237   : > { %2625 = vmatpush1.bf16.msra.mxu0 %v16723_v43  ;;  %v2713_v43 = vpack.c.bf16 %v19361_v38, %v2709_v30  ;;  %v16846_v30 = vld [vmem:[#allocation11 + $0x928] ss:$16 sps:$4 sm:$0xff]  }
 0x238   : > { %2668 = vmatpush1.bf16.msra.mxu1 %v16726_v44  ;;  %2626 = vmatprep.subr.bf16.mxu0 %v16731_v45  ;;  %v2715_v44 = vpack.c.bf16 %v2711_v31, %v2711_v31  ;;  %v16786_v45 = vld [vmem:[#allocation11 + $0x7e8] ss:$16 sps:$4 sm:$0xff]   ;;  %v16851_v31 = vld [vmem:[#allocation11 + $0x944] ss:$16 sps:$4 sm:$0xff]  }
 0x239   : > { %2669 = vmatprep.subr.bf16.mxu1 %v16734_v46  ;;  %v16791_v46 = vld [vmem:[#allocation11 + $0x804] ss:$16 sps:$4 sm:$0xff]  }
 0x23b   : > { %2627 = vmatpush1.bf16.msra.mxu0 %v16729_v47  ;;  %v2265_v47 = vor.u32 %v2264_v40, %v2261_v39  ;;  %v16860_v39 = vld [vmem:[#allocation11 + $0x96c] ss:$16 sps:$4 sm:$0xff]   ;;  %v16855_v40 = vld [vmem:[#allocation11 + $0x960] ss:$16 sps:$4 sm:$0xff]  }
 0x23c   : > { %2670 = vmatpush1.bf16.msra.mxu1 %v16732_v48  ;;  %2628 = vmatprep.subr.bf16.mxu0 %v16737_v51  ;;  %v2273_v48 = vor.u32 %v2272_v42, %v2269_v41  ;;  %v16789_v51 = vld [vmem:[#allocation11 + $0x800] ss:$16 sps:$4 sm:$0xff]   ;;  %v3209_v41 = vld [vmem:[#allocation2 + $0x18] sm:$0xe0]  ;;  %v16858_v42 = vld [vmem:[#allocation11 + $0x968] ss:$16 sps:$4 sm:$0xff]  }
 0x23d   : > { %2671 = vmatprep.subr.bf16.mxu1 %v16740_v54  ;;  %v16794_v54 = vld [vmem:[#allocation11 + $0x80c] ss:$16 sps:$4 sm:$0xff]  }
 0x23e   : > { %v2274_v38 = vsel %vm2257_vm3, %v2265_v47, %v2273_v48  ;;  %v19376_v47 = vld [vmem:[#allocation2 + $0x28] sm:$0xff] }
 0x23f   : > { %2629 = vmatpush1.bf16.msra.mxu0 %v16735_v55  ;;  %v16792_v55 = vld [vmem:[#allocation11 + $0x808] ss:$16 sps:$4 sm:$0xff]   ;;  %v3213_v48 = vpack.c.bf16 %v19376_v47, %v3209_v41 }
 0x240   : > { %2672 = vmatpush1.bf16.msra.mxu1 %v16738_v56  ;;  %2630 = vmatprep.subr.bf16.mxu0 %v16743_v13  ;;  %v16797_v56 = vld [vmem:[#allocation11 + $0x824] ss:$16 sps:$4 sm:$0xff]   ;;  %v2789_v13 = vrot.slane %v2713_v43, 2  ;;  %v16906_v41 = vld [vmem:[#allocation11 + $0xa68] ss:$16 sps:$4 sm:$0xff]  }
 0x241   : > { %2673 = vmatprep.subr.bf16.mxu1 %v16746_v57  ;;  %v2790_v57 = vrot.slane %v2715_v44, 2  ;;  %v16863_v43 = vld [vmem:[#allocation11 + $0x984] ss:$16 sps:$4 sm:$0xff]   ;;  %v3211_v44 = vld [vmem:[#allocation2 + $0x38] sm:$0x1f] }
 0x243   : > { %2631 = vmatpush1.bf16.msra.mxu0 %v16741_v20  ;;  %v16800_v20 = vld [vmem:[#allocation11 + $0x82c] ss:$16 sps:$4 sm:$0xff]  }
 0x244   : > { %2674 = vmatpush1.bf16.msra.mxu1 %v16744_v5  ;;  %2632 = vmatprep.subr.bf16.mxu0 %v16749_v58  ;;  %v2791_v5 = vsel %vm2785_vm4, %v2789_v13, %v2790_v57  ;;  %v16795_v58 = vld [vmem:[#allocation11 + $0x820] ss:$16 sps:$4 sm:$0xff]   ;;  %v2708_v57 = vld [vmem:[#allocation2 + $0x10] sm:$0xf0] }
 0x245   : > { %2675 = vmatprep.subr.bf16.mxu1 %v16752_v59  ;;  %v16798_v59 = vld [vmem:[#allocation11 + $0x828] ss:$16 sps:$4 sm:$0xff]   ;;  %v16867_v13 = vld [vmem:[#allocation11 + $0x9a0] ss:$16 sps:$4 sm:$0xff]  }
 0x247   : > { %2633 = vmatpush1.bf16.msra.mxu0 %v16747_v60  ;;  %v16803_v60 = vld [vmem:[#allocation11 + $0x844] ss:$16 sps:$4 sm:$0xff]  }
 0x248   : > { %2676 = vmatpush1.bf16.msra.mxu1 %v16750_v61  ;;  %2634 = vmatprep.subr.bf16.mxu0 %v16755_v62  ;;  %v16806_v61 = vld [vmem:[#allocation11 + $0x84c] ss:$16 sps:$4 sm:$0xff]   ;;  %v16801_v62 = vld [vmem:[#allocation11 + $0x840] ss:$16 sps:$4 sm:$0xff]  }
 0x249   : > { %2677 = vmatprep.subr.bf16.mxu1 %v16758_v63  ;;  %v16804_v63 = vld [vmem:[#allocation11 + $0x848] ss:$16 sps:$4 sm:$0xff]  }
 0x24b   : > { %2635 = vmatpush1.bf16.msra.mxu0 %v16753_v0  ;;  %v16809_v0 = vld [vmem:[#allocation11 + $0x864] ss:$16 sps:$4 sm:$0xff]  }
 0x24c   : > { %2678 = vmatpush1.bf16.msra.mxu1 %v16756_v1  ;;  %2636 = vmatprep.subr.bf16.mxu0 %v16761_v2  ;;  %v16807_v1 = vld [vmem:[#allocation11 + $0x860] ss:$16 sps:$4 sm:$0xff]   ;;  %v16812_v2 = vld [vmem:[#allocation11 + $0x86c] ss:$16 sps:$4 sm:$0xff]  }
 0x24d   : > { %2679 = vmatprep.subr.bf16.mxu1 %v16764_v3  ;;  %v16810_v3 = vld [vmem:[#allocation11 + $0x868] ss:$16 sps:$4 sm:$0xff]  }
 0x24f   : > { %2637 = vmatpush1.bf16.msra.mxu0 %v16759_v6  ;;  %v16813_v6 = vld [vmem:[#allocation11 + $0x880] ss:$16 sps:$4 sm:$0xff]  }
 0x250   : > { %2680 = vmatpush1.bf16.msra.mxu1 %v16762_v8  ;;  %2638 = vmatprep.subr.bf16.mxu0 %v16767_v9  ;;  %v16816_v8 = vld [vmem:[#allocation11 + $0x888] ss:$16 sps:$4 sm:$0xff]   ;;  %v16821_v9 = vld [vmem:[#allocation11 + $0x8a4] ss:$16 sps:$4 sm:$0xff]  }
 0x251   : > { %2681 = vmatprep.subr.bf16.mxu1 %v16770_v11  ;;  %v16824_v11 = vld [vmem:[#allocation11 + $0x8ac] ss:$16 sps:$4 sm:$0xff]  }
 0x253   : > { %2639 = vmatpush1.bf16.msra.mxu0 %v16765_v10  ;;  %v16819_v10 = vld [vmem:[#allocation11 + $0x8a0] ss:$16 sps:$4 sm:$0xff]  }
 0x254   : > { %2682 = vmatpush1.bf16.msra.mxu1 %v16768_v15  ;;  %2640 = vmatprep.subr.bf16.mxu0 %v16773_v16  ;;  %v16830_v15 = vld [vmem:[#allocation11 + $0x8cc] ss:$16 sps:$4 sm:$0xff]   ;;  %v16825_v16 = vld [vmem:[#allocation11 + $0x8c0] ss:$16 sps:$4 sm:$0xff]  }
 0x255   : > { %2683 = vmatprep.subr.bf16.mxu1 %v16776_v17  ;;  %v16828_v17 = vld [vmem:[#allocation11 + $0x8c8] ss:$16 sps:$4 sm:$0xff]  }
 0x257   : > { %2641 = vmatpush1.bf16.msra.mxu0 %v16771_v21  ;;  %v16831_v21 = vld [vmem:[#allocation11 + $0x8e0] ss:$16 sps:$4 sm:$0xff]  }
 0x258   : > { %2684 = vmatpush1.bf16.msra.mxu1 %v16774_v22  ;;  %2642 = vmatprep.subr.bf16.mxu0 %v16779_v23  ;;  %v16834_v22 = vld [vmem:[#allocation11 + $0x8e8] ss:$16 sps:$4 sm:$0xff]   ;;  %v16839_v23 = vld [vmem:[#allocation11 + $0x904] ss:$16 sps:$4 sm:$0xff]  }
 0x259   : > { %2685 = vmatprep.subr.bf16.mxu1 %v16782_v24  ;;  %v16837_v24 = vld [vmem:[#allocation11 + $0x900] ss:$16 sps:$4 sm:$0xff]  }
 0x25b   : > { %2643 = vmatpush1.bf16.msra.mxu0 %v16777_v34  ;;  %v16842_v34 = vld [vmem:[#allocation11 + $0x90c] ss:$16 sps:$4 sm:$0xff]  }
 0x25c   : > { %2686 = vmatpush1.bf16.msra.mxu1 %v16780_v32  ;;  %2644 = vmatprep.subr.bf16.mxu0 %v16785_v35  ;;  %v16849_v32 = vld [vmem:[#allocation11 + $0x940] ss:$16 sps:$4 sm:$0xff]   ;;  %v16854_v35 = vld [vmem:[#allocation11 + $0x94c] ss:$16 sps:$4 sm:$0xff]  }
 0x25d   : > { %2687 = vmatprep.subr.bf16.mxu1 %v16788_v37  ;;  %v16857_v37 = vld [vmem:[#allocation11 + $0x964] ss:$16 sps:$4 sm:$0xff]  }
 0x25f   : > { %2645 = vmatpush1.bf16.msra.mxu0 %v16783_v36  ;;  %v16852_v36 = vld [vmem:[#allocation11 + $0x948] ss:$16 sps:$4 sm:$0xff]  }
 0x260   : > { %2688 = vmatpush1.bf16.msra.mxu1 %v16786_v45  ;;  %3114 = vmatprep.subr.bf16.mxu0 %v16791_v46  ;;  %v16861_v45 = vld [vmem:[#allocation11 + $0x980] ss:$16 sps:$4 sm:$0xff]   ;;  %v16866_v46 = vld [vmem:[#allocation11 + $0x98c] ss:$16 sps:$4 sm:$0xff]  }
 0x261   : > { %3157 = vmatprep.subr.bf16.mxu1 %v16794_v54  ;;  %v16864_v54 = vld [vmem:[#allocation11 + $0x988] ss:$16 sps:$4 sm:$0xff]  }
 0x262   : > { %2647 = vmatmul.mubr.bf16.vlgmr.msra.gmra.mrb[0].mxu0 %v2274_v38 }
 0x263   : > { %2690 = vmatmul.mubr.bf16.vlgmr.msra.gmra.mrb[0].mxu1 %v2274_v38  ;;  %3115 = vmatpush1.bf16.msra.mxu0 %v16789_v51  ;;  %v3215_v51 = vpack.c.bf16 %v3211_v44, %v3211_v44  ;;  %v3221_v38 = vmul.bf16 %v19353_v50, %v3213_v48  ;;  %v16914_v44 = vld [vmem:[#allocation11 + $0xa8c] ss:$16 sps:$4 sm:$0xff]   ;;  %v16915_v48 = vld [vmem:[#allocation11 + $0xaa0] ss:$16 sps:$4 sm:$0xff]  }
 0x264   : > { %3158 = vmatpush1.bf16.msra.mxu1 %v16792_v55  ;;  %3116 = vmatprep.subr.bf16.mxu0 %v16797_v56  ;;  %v16869_v55 = vld [vmem:[#allocation11 + $0x9a4] ss:$16 sps:$4 sm:$0xff]   ;;  %v16872_v56 = vld [vmem:[#allocation11 + $0x9ac] ss:$16 sps:$4 sm:$0xff]  }
 0x265   : > { %3159 = vmatprep.subr.bf16.mxu1 %v16800_v20  ;;  %3146 = vmatprep.mubr.bf16.mxu0 %v2791_v5  ;;  %v2710_v20 = vld [vmem:[#allocation2 + $0x30] sm:$0xf] }
 0x266   : > { %3189 = vmatprep.mubr.bf16.mxu1 %v2791_v5  ;;  %v3223_v5 = vmul.bf16 %v19353_v50, %v3215_v51  ;;  %v16920_v51 = vld [vmem:[#allocation11 + $0xaac] ss:$16 sps:$4 sm:$0xff]  }
 0x267   : > { %3117 = vmatpush1.bf16.msra.mxu0 %v16795_v58  ;;  %v16870_v58 = vld [vmem:[#allocation11 + $0x9a8] ss:$16 sps:$4 sm:$0xff]  }
 0x268   : > { %3160 = vmatpush1.bf16.msra.mxu1 %v16798_v59  ;;  %3118 = vmatprep.subr.bf16.mxu0 %v16803_v60  ;;  %v16875_v59 = vld [vmem:[#allocation11 + $0x9c4] ss:$16 sps:$4 sm:$0xff]   ;;  %v16873_v60 = vld [vmem:[#allocation11 + $0x9c0] ss:$16 sps:$4 sm:$0xff]  }
 0x269   : > { %3161 = vmatprep.subr.bf16.mxu1 %v16806_v61  ;;  %v16878_v61 = vld [vmem:[#allocation11 + $0x9cc] ss:$16 sps:$4 sm:$0xff]  }
 0x26b   : > { %3119 = vmatpush1.bf16.msra.mxu0 %v16801_v62  ;;  %v19381_v62 = vld [vmem:[#allocation2 + $0x20] sm:$0xff] }
 0x26c   : > { %3162 = vmatpush1.bf16.msra.mxu1 %v16804_v63  ;;  %3120 = vmatprep.subr.bf16.mxu0 %v16809_v0  ;;  %v2712_v63 = vpack.c.bf16 %v19381_v62, %v2708_v57  ;;  %v2714_v0 = vpack.c.bf16 %v2710_v20, %v2710_v20  ;;  %v16924_v57 = vld [vmem:[#allocation11 + $0xac8] ss:$16 sps:$4 sm:$0xff]   ;;  %v16929_v20 = vld [vmem:[#allocation11 + $0xae4] ss:$16 sps:$4 sm:$0xff]  }
 0x26d   : > { %3163 = vmatprep.subr.bf16.mxu1 %v16812_v2  ;;  %v3311_v2 = vshll.u32 %v3221_v38, 16 }
 0x26f   : > { %3121 = vmatpush1.bf16.msra.mxu0 %v16807_v1  ;;  %v3308_v1 = vshrl.u32 %v3221_v38, 16  ;;  %v16932_v38 = vld [vmem:[#allocation11 + $0xaec] ss:$16 sps:$4 sm:$0xff]  }
 0x270   : > { %3164 = vmatpush1.bf16.msra.mxu1 %v16810_v3  ;;  %3122 = vmatprep.subr.bf16.mxu0 %v16815_v4  ;;  %v3316_v3 = vshrl.u32 %v3223_v5, 16  ;;  %v3319_v4 = vshll.u32 %v3223_v5, 16  ;;  %v16927_v5 = vld [vmem:[#allocation11 + $0xae0] ss:$16 sps:$4 sm:$0xff]  }
 0x271   : > { %3165 = vmatprep.subr.bf16.mxu1 %v16818_v7  ;;  %v16881_v7 = vld [vmem:[#allocation11 + $0x9e4] ss:$16 sps:$4 sm:$0xff]  }
 0x273   : > { %3123 = vmatpush1.bf16.msra.mxu0 %v16813_v6  ;;  %v16876_v6 = vld [vmem:[#allocation11 + $0x9c8] ss:$16 sps:$4 sm:$0xff]  }
 0x274   : > { %3166 = vmatpush1.bf16.msra.mxu1 %v16816_v8  ;;  %3124 = vmatprep.subr.bf16.mxu0 %v16821_v9  ;;  %v16879_v8 = vld [vmem:[#allocation11 + $0x9e0] ss:$16 sps:$4 sm:$0xff]   ;;  %v16884_v9 = vld [vmem:[#allocation11 + $0x9ec] ss:$16 sps:$4 sm:$0xff]  }
 0x275   : > { %3167 = vmatprep.subr.bf16.mxu1 %v16824_v11  ;;  %v2787_v11 = vrot.slane %v2714_v0, 2  ;;  %v16941_v0 = vld [vmem:[#allocation11 + $0xb24] ss:$16 sps:$4 sm:$0xff]  }
 0x277   : > { %3125 = vmatpush1.bf16.msra.mxu0 %v16819_v10  ;;  %v2786_v10 = vrot.slane %v2712_v63, 2  ;;  %v16936_v63 = vld [vmem:[#allocation11 + $0xb08] ss:$16 sps:$4 sm:$0xff]  }
 0x278   : > { %3168 = vmatpush1.bf16.msra.mxu1 %v16822_v12  ;;  %3126 = vmatprep.subr.bf16.mxu0 %v16827_v14  ;;  %v3310_v12 = vrot.slane %v3308_v1, 2  ;;  %v3313_v14 = vrot.slane %v3311_v2, 3  ;;  %v16939_v1 = vld [vmem:[#allocation11 + $0xb20] ss:$16 sps:$4 sm:$0xff]   ;;  %v16944_v2 = vld [vmem:[#allocation11 + $0xb2c] ss:$16 sps:$4 sm:$0xff]  }
 0x279   : > { %3169 = vmatprep.subr.bf16.mxu1 %v16830_v15  ;;  %v3318_v15 = vrot.slane %v3316_v3, 2  ;;  %v16942_v3 = vld [vmem:[#allocation11 + $0xb28] ss:$16 sps:$4 sm:$0xff]  }
 0x27b   : > { %3127 = vmatpush1.bf16.msra.mxu0 %v16825_v16  ;;  %v3321_v16 = vrot.slane %v3319_v4, 3  ;;  %v16947_v4 = vld [vmem:[#allocation11 + $0xb44] ss:$16 sps:$4 sm:$0xff]  }
 0x27c   : > { %3170 = vmatpush1.bf16.msra.mxu1 %v16828_v17  ;;  %3128 = vmatprep.subr.bf16.mxu0 %v16833_v18  ;;  %v16882_v17 = vld [vmem:[#allocation11 + $0x9e8] ss:$16 sps:$4 sm:$0xff]   ;;  %v16887_v18 = vld [vmem:[#allocation11 + $0xa04] ss:$16 sps:$4 sm:$0xff]  }
 0x27d   : > { %3171 = vmatprep.subr.bf16.mxu1 %v16836_v19  ;;  %v16885_v19 = vld [vmem:[#allocation11 + $0xa00] ss:$16 sps:$4 sm:$0xff]  }
 0x27f   : > { %3129 = vmatpush1.bf16.msra.mxu0 %v16831_v21  ;;  %v16890_v21 = vld [vmem:[#allocation11 + $0xa0c] ss:$16 sps:$4 sm:$0xff]  }
 0x280   : > { %3172 = vmatpush1.bf16.msra.mxu1 %v16834_v22  ;;  %3130 = vmatprep.subr.bf16.mxu0 %v16839_v23  ;;  %v16888_v22 = vld [vmem:[#allocation11 + $0xa08] ss:$16 sps:$4 sm:$0xff]   ;;  %v2788_v23 = vsel %vm2785_vm4, %v2786_v10, %v2787_v11  ;;  %v16956_v10 = vld [vmem:[#allocation11 + $0xb6c] ss:$16 sps:$4 sm:$0xff]   ;;  %v3208_v11 = vld [vmem:[#allocation2 + $0x10] sm:$0xe0] }
 0x281   : > { %3173 = vmatprep.subr.bf16.mxu1 %v16842_v34  ;;  %v3322_v34 = vor.u32 %v3321_v16, %v3318_v15  ;;  %v3741_v15 = vld [vmem:[#allocation2 + $0x18] sm:$0x80]  ;;  %v16954_v16 = vld [vmem:[#allocation11 + $0xb68] ss:$16 sps:$4 sm:$0xff]  }
 0x283   : > { %3131 = vmatpush1.bf16.msra.mxu0 %v16837_v24  ;;  %v3314_v24 = vor.u32 %v3313_v14, %v3310_v12  ;;  %v3210_v12 = vld [vmem:[#allocation2 + $0x30] sm:$0x1f] }
 0x284   : > { %3174 = vmatpush1.bf16.msra.mxu1 %v16840_v25  ;;  %3132 = vmatprep.subr.bf16.mxu0 %v16845_v26  ;;  %v16893_v25 = vld [vmem:[#allocation11 + $0xa24] ss:$16 sps:$4 sm:$0xff]   ;;  %v16896_v26 = vld [vmem:[#allocation11 + $0xa2c] ss:$16 sps:$4 sm:$0xff]   ;;  %v16951_v14 = vld [vmem:[#allocation11 + $0xb60] ss:$16 sps:$4 sm:$0xff]  }
 0x285   : > { %3175 = vmatprep.subr.bf16.mxu1 %v16848_v29  ;;  %v16891_v29 = vld [vmem:[#allocation11 + $0xa20] ss:$16 sps:$4 sm:$0xff]  }
 0x287   : > { %3133 = vmatpush1.bf16.msra.mxu0 %v16843_v27  ;;  %v3323_v27 = vsel %vm3289_vm5, %v3314_v24, %v3322_v34  ;;  %v3745_v24 = vpack.c.bf16 %v19376_v47, %v3741_v15  ;;  %v16966_v47 = vld [vmem:[#allocation11 + $0xba8] ss:$16 sps:$4 sm:$0xff]   ;;  %v16998_v15 = vld [vmem:[#allocation11 + $0xc4c] ss:$16 sps:$4 sm:$0xff]  }
 0x288   : > { %3176 = vmatpush1.bf16.msra.mxu1 %v16846_v30  ;;  %3134 = vmatprep.subr.bf16.mxu0 %v16851_v31  ;;  %v16894_v30 = vld [vmem:[#allocation11 + $0xa28] ss:$16 sps:$4 sm:$0xff]   ;;  %v16899_v31 = vld [vmem:[#allocation11 + $0xa44] ss:$16 sps:$4 sm:$0xff]  }
 0x289   : > { %3177 = vmatprep.subr.bf16.mxu1 %v16854_v35  ;;  %v16902_v35 = vld [vmem:[#allocation11 + $0xa4c] ss:$16 sps:$4 sm:$0xff]  }
 0x28b   : > { %3135 = vmatpush1.bf16.msra.mxu0 %v16849_v32  ;;  %v16897_v32 = vld [vmem:[#allocation11 + $0xa40] ss:$16 sps:$4 sm:$0xff]  }
 0x28c   : > { %3178 = vmatpush1.bf16.msra.mxu1 %v16852_v36  ;;  %3136 = vmatprep.subr.bf16.mxu0 %v16857_v37  ;;  %v16900_v36 = vld [vmem:[#allocation11 + $0xa48] ss:$16 sps:$4 sm:$0xff]   ;;  %v16905_v37 = vld [vmem:[#allocation11 + $0xa64] ss:$16 sps:$4 sm:$0xff]  }
 0x28d   : > { %3179 = vmatprep.subr.bf16.mxu1 %v16860_v39  ;;  %v16903_v39 = vld [vmem:[#allocation11 + $0xa60] ss:$16 sps:$4 sm:$0xff]  }
 0x28f   : > { %3137 = vmatpush1.bf16.msra.mxu0 %v16855_v40  ;;  %v16908_v40 = vld [vmem:[#allocation11 + $0xa6c] ss:$16 sps:$4 sm:$0xff]  }
 0x290   : > { %3180 = vmatpush1.bf16.msra.mxu1 %v16858_v42  ;;  %3138 = vmatprep.subr.bf16.mxu0 %v16863_v43  ;;  %v16911_v42 = vld [vmem:[#allocation11 + $0xa84] ss:$16 sps:$4 sm:$0xff]   ;;  %v16909_v43 = vld [vmem:[#allocation11 + $0xa80] ss:$16 sps:$4 sm:$0xff]  }
 0x291   : > { %3181 = vmatprep.subr.bf16.mxu1 %v16866_v46  ;;  %v16917_v46 = vld [vmem:[#allocation11 + $0xaa4] ss:$16 sps:$4 sm:$0xff]  }
 0x293   : > { %3139 = vmatpush1.bf16.msra.mxu0 %v16861_v45  ;;  %v16912_v45 = vld [vmem:[#allocation11 + $0xa88] ss:$16 sps:$4 sm:$0xff]  }
 0x294   : > { %3182 = vmatpush1.bf16.msra.mxu1 %v16864_v54  ;;  %3140 = vmatprep.subr.bf16.mxu0 %v16869_v55  ;;  %v16918_v54 = vld [vmem:[#allocation11 + $0xaa8] ss:$16 sps:$4 sm:$0xff]   ;;  %v16923_v55 = vld [vmem:[#allocation11 + $0xac4] ss:$16 sps:$4 sm:$0xff]  }
 0x295   : > { %3183 = vmatprep.subr.bf16.mxu1 %v16872_v56  ;;  %v16921_v56 = vld [vmem:[#allocation11 + $0xac0] ss:$16 sps:$4 sm:$0xff]  }
 0x297   : > { %3141 = vmatpush1.bf16.msra.mxu0 %v16867_v13  ;;  %v16926_v13 = vld [vmem:[#allocation11 + $0xacc] ss:$16 sps:$4 sm:$0xff]  }
 0x298   : > { %3184 = vmatpush1.bf16.msra.mxu1 %v16870_v58  ;;  %3142 = vmatprep.subr.bf16.mxu0 %v16875_v59  ;;  %v16930_v58 = vld [vmem:[#allocation11 + $0xae8] ss:$16 sps:$4 sm:$0xff]   ;;  %v16935_v59 = vld [vmem:[#allocation11 + $0xb04] ss:$16 sps:$4 sm:$0xff]  }
 0x299   : > { %3185 = vmatprep.subr.bf16.mxu1 %v16878_v61  ;;  %v16938_v61 = vld [vmem:[#allocation11 + $0xb0c] ss:$16 sps:$4 sm:$0xff]  }
 0x29b   : > { %3143 = vmatpush1.bf16.msra.mxu0 %v16873_v60  ;;  %v16933_v60 = vld [vmem:[#allocation11 + $0xb00] ss:$16 sps:$4 sm:$0xff]  }
 0x29c   : > { %3186 = vmatpush1.bf16.msra.mxu1 %v16876_v6  ;;  %3144 = vmatprep.subr.bf16.mxu0 %v16881_v7  ;;  %v16945_v6 = vld [vmem:[#allocation11 + $0xb40] ss:$16 sps:$4 sm:$0xff]   ;;  %v16950_v7 = vld [vmem:[#allocation11 + $0xb4c] ss:$16 sps:$4 sm:$0xff]  }
 0x29d   : > { %3187 = vmatprep.subr.bf16.mxu1 %v16884_v9  ;;  %v16953_v9 = vld [vmem:[#allocation11 + $0xb64] ss:$16 sps:$4 sm:$0xff]  }
 0x29f   : > { %3145 = vmatpush1.bf16.msra.mxu0 %v16879_v8  ;;  %v16948_v8 = vld [vmem:[#allocation11 + $0xb48] ss:$16 sps:$4 sm:$0xff]  }
 0x2a0   : > { %3188 = vmatpush1.bf16.msra.mxu1 %v16882_v17  ;;  %3646 = vmatprep.subr.bf16.mxu0 %v16887_v18  ;;  %v16959_v17 = vld [vmem:[#allocation11 + $0xb84] ss:$16 sps:$4 sm:$0xff]   ;;  %v3212_v18 = vpack.c.bf16 %v19381_v62, %v3208_v11  ;;  %v16987_v11 = vld [vmem:[#allocation11 + $0xc20] ss:$16 sps:$4 sm:$0xff]  }
 0x2a1   : > { %3689 = vmatprep.subr.bf16.mxu1 %v16890_v21  ;;  %v16957_v21 = vld [vmem:[#allocation11 + $0xb80] ss:$16 sps:$4 sm:$0xff]  }
 0x2a2   : > { %3147 = vmatmul.mubr.bf16.vlgmr.msra.gmra.mrb[0].mxu0 %v2788_v23 }
 0x2a3   : > { %3190 = vmatmul.mubr.bf16.vlgmr.msra.gmra.mrb[0].mxu1 %v2788_v23  ;;  %3647 = vmatpush1.bf16.msra.mxu0 %v16885_v19  ;;  %v3743_v19 = vld [vmem:[#allocation2 + $0x38] sm:$0x7f]  ;;  %v3214_v23 = vpack.c.bf16 %v3210_v12, %v3210_v12 }
 0x2a4   : > { %3678 = vmatprep.mubr.bf16.mxu0 %v3323_v27  ;;  %3690 = vmatpush1.bf16.msra.mxu1 %v16888_v22  ;;  %v16962_v22 = vld [vmem:[#allocation11 + $0xb8c] ss:$16 sps:$4 sm:$0xff]   ;;  %v3747_v34 = vpack.c.bf16 %v3743_v19, %v3743_v19  ;;  %v16990_v12 = vld [vmem:[#allocation11 + $0xc28] ss:$16 sps:$4 sm:$0xff]   ;;  %v16999_v19 = vld [vmem:[#allocation11 + $0xc60] ss:$16 sps:$4 sm:$0xff]  }
 0x2a5   : > { %3721 = vmatprep.mubr.bf16.mxu1 %v3323_v27  ;;  %3648 = vmatprep.subr.bf16.mxu0 %v16893_v25  ;;  %v16960_v25 = vld [vmem:[#allocation11 + $0xb88] ss:$16 sps:$4 sm:$0xff]   ;;  %v3220_v27 = vmul.bf16 %v19353_v50, %v3212_v18  ;;  %v3222_v62 = vmul.bf16 %v19353_v50, %v3214_v23  ;;  %v17001_v18 = vld [vmem:[#allocation11 + $0xc64] ss:$16 sps:$4 sm:$0xff]  }
 0x2a6   : > { %3691 = vmatprep.subr.bf16.mxu1 %v16896_v26  ;;  %v16965_v26 = vld [vmem:[#allocation11 + $0xba4] ss:$16 sps:$4 sm:$0xff]  }
 0x2a7   : > { %3649 = vmatpush1.bf16.msra.mxu0 %v16891_v29  ;;  %v16963_v29 = vld [vmem:[#allocation11 + $0xba0] ss:$16 sps:$4 sm:$0xff]   ;;  %v17007_v23 = vld [vmem:[#allocation11 + $0xc84] ss:$16 sps:$4 sm:$0xff]  }
 0x2a8   : > { %3692 = vmatpush1.bf16.msra.mxu1 %v16894_v30  ;;  %3650 = vmatprep.subr.bf16.mxu0 %v16899_v31  ;;  %v16968_v30 = vld [vmem:[#allocation11 + $0xbac] ss:$16 sps:$4 sm:$0xff]   ;;  %v3749_v31 = vmul.bf16 %v3745_v24, %v19335_v52  ;;  %v17005_v24 = vld [vmem:[#allocation11 + $0xc80] ss:$16 sps:$4 sm:$0xff]  }
 0x2a9   : > { %3693 = vmatprep.subr.bf16.mxu1 %v16902_v35  ;;  %v16971_v35 = vld [vmem:[#allocation11 + $0xbc4] ss:$16 sps:$4 sm:$0xff]  }
 0x2ab   : > { %3651 = vmatpush1.bf16.msra.mxu0 %v16897_v32  ;;  %v3751_v32 = vmul.bf16 %v3747_v34, %v19335_v52  ;;  %v17010_v34 = vld [vmem:[#allocation11 + $0xc8c] ss:$16 sps:$4 sm:$0xff]  }
 0x2ac   : > { %3694 = vmatpush1.bf16.msra.mxu1 %v16900_v36  ;;  %3652 = vmatprep.subr.bf16.mxu0 %v16905_v37  ;;  %v3291_v36 = vshrl.u32 %v3220_v27, 16  ;;  %v3294_v37 = vshll.u32 %v3220_v27, 16  ;;  %v17011_v27 = vld [vmem:[#allocation11 + $0xca0] ss:$16 sps:$4 sm:$0xff]  }
 0x2ad   : > { %3695 = vmatprep.subr.bf16.mxu1 %v16908_v40  ;;  %v16974_v40 = vld [vmem:[#allocation11 + $0xbcc] ss:$16 sps:$4 sm:$0xff]  }
 0x2af   : > { %3653 = vmatpush1.bf16.msra.mxu0 %v16903_v39  ;;  %v16969_v39 = vld [vmem:[#allocation11 + $0xbc0] ss:$16 sps:$4 sm:$0xff]  }
 0x2b0   : > { %3696 = vmatpush1.bf16.msra.mxu1 %v16906_v41  ;;  %3654 = vmatprep.subr.bf16.mxu0 %v16911_v42  ;;  %v3299_v41 = vshrl.u32 %v3222_v62, 16  ;;  %v3302_v42 = vshll.u32 %v3222_v62, 16  ;;  %v17019_v62 = vld [vmem:[#allocation11 + $0xcc4] ss:$16 sps:$4 sm:$0xff]  }
 0x2b1   : > { %3697 = vmatprep.subr.bf16.mxu1 %v16914_v44  ;;  %v3838_v44 = vshll.u32 %v3749_v31, 16 }
 0x2b3   : > { %3655 = vmatpush1.bf16.msra.mxu0 %v16909_v43  ;;  %v3835_v43 = vshrl.u32 %v3749_v31, 16  ;;  %v17017_v31 = vld [vmem:[#allocation11 + $0xcc0] ss:$16 sps:$4 sm:$0xff]  }
 0x2b4   : > { %3698 = vmatpush1.bf16.msra.mxu1 %v16912_v45  ;;  %3656 = vmatprep.subr.bf16.mxu0 %v16917_v46  ;;  %v3843_v45 = vshrl.u32 %v3751_v32, 16  ;;  %v3846_v46 = vshll.u32 %v3751_v32, 16  ;;  %v17022_v32 = vld [vmem:[#allocation11 + $0xccc] ss:$16 sps:$4 sm:$0xff]  }
 0x2b5   : > { %3699 = vmatprep.subr.bf16.mxu1 %v16920_v51  ;;  %v16977_v51 = vld [vmem:[#allocation11 + $0xbe4] ss:$16 sps:$4 sm:$0xff]  }
 0x2b7   : > { %3657 = vmatpush1.bf16.msra.mxu0 %v16915_v48  ;;  %v16972_v48 = vld [vmem:[#allocation11 + $0xbc8] ss:$16 sps:$4 sm:$0xff]  }
 0x2b8   : > { %3700 = vmatpush1.bf16.msra.mxu1 %v16918_v54  ;;  %3658 = vmatprep.subr.bf16.mxu0 %v16923_v55  ;;  %v3293_v54 = vrot.slane %v3291_v36, 2  ;;  %v3296_v55 = vrot.slane %v3294_v37, 3  ;;  %v17023_v36 = vld [vmem:[#allocation11 + $0xce0] ss:$16 sps:$4 sm:$0xff]   ;;  %v17028_v37 = vld [vmem:[#allocation11 + $0xcec] ss:$16 sps:$4 sm:$0xff]  }
 0x2b9   : > { %3701 = vmatprep.subr.bf16.mxu1 %v16926_v13  ;;  %v16980_v13 = vld [vmem:[#allocation11 + $0xbec] ss:$16 sps:$4 sm:$0xff]  }
 0x2bb   : > { %3659 = vmatpush1.bf16.msra.mxu0 %v16921_v56  ;;  %v16975_v56 = vld [vmem:[#allocation11 + $0xbe0] ss:$16 sps:$4 sm:$0xff]  }
 0x2bc   : > { %3702 = vmatpush1.bf16.msra.mxu1 %v16924_v57  ;;  %3660 = vmatprep.subr.bf16.mxu0 %v16929_v20  ;;  %v3301_v57 = vrot.slane %v3299_v41, 2  ;;  %v3304_v20 = vrot.slane %v3302_v42, 3  ;;  %v17029_v41 = vld [vmem:[#allocation11 + $0xd00] ss:$16 sps:$4 sm:$0xff]   ;;  %v17034_v42 = vld [vmem:[#allocation11 + $0xd0c] ss:$16 sps:$4 sm:$0xff]  }
 0x2bd   : > { %3703 = vmatprep.subr.bf16.mxu1 %v16932_v38  ;;  %v3837_v38 = vrot.slane %v3835_v43, 3  ;;  %v17032_v43 = vld [vmem:[#allocation11 + $0xd08] ss:$16 sps:$4 sm:$0xff]  }
 0x2bf   : > { %3661 = vmatpush1.bf16.msra.mxu0 %v16927_v5  ;;  %v3840_v5 = vrot.slane %v3838_v44, 4  ;;  %v17037_v44 = vld [vmem:[#allocation11 + $0xd24] ss:$16 sps:$4 sm:$0xff]  }
 0x2c0   : > { %3704 = vmatpush1.bf16.msra.mxu1 %v16930_v58  ;;  %3662 = vmatprep.subr.bf16.mxu0 %v16935_v59  ;;  %v3845_v58 = vrot.slane %v3843_v45, 3  ;;  %v3848_v59 = vrot.slane %v3846_v46, 4  ;;  %v17035_v45 = vld [vmem:[#allocation11 + $0xd20] ss:$16 sps:$4 sm:$0xff]   ;;  %v17040_v46 = vld [vmem:[#allocation11 + $0xd2c] ss:$16 sps:$4 sm:$0xff]  }
 0x2c1   : > { %3705 = vmatprep.subr.bf16.mxu1 %v16938_v61  ;;  %v16983_v61 = vld [vmem:[#allocation11 + $0xc04] ss:$16 sps:$4 sm:$0xff]  }
 0x2c3   : > { %3663 = vmatpush1.bf16.msra.mxu0 %v16933_v60  ;;  %v16978_v60 = vld [vmem:[#allocation11 + $0xbe8] ss:$16 sps:$4 sm:$0xff]  }
 0x2c4   : > { %3706 = vmatpush1.bf16.msra.mxu1 %v16936_v63  ;;  %3664 = vmatprep.subr.bf16.mxu0 %v16941_v0  ;;  %v3297_v63 = vor.u32 %v3296_v55, %v3293_v54  ;;  %v3305_v0 = vor.u32 %v3304_v20, %v3301_v57  ;;  %v17041_v54 = vld [vmem:[#allocation11 + $0xd40] ss:$16 sps:$4 sm:$0xff]   ;;  %v17046_v55 = vld [vmem:[#allocation11 + $0xd4c] ss:$16 sps:$4 sm:$0xff]   ;;  %v17049_v57 = vld [vmem:[#allocation11 + $0xd64] ss:$16 sps:$4 sm:$0xff]  }
 0x2c5   : > { %3707 = vmatprep.subr.bf16.mxu1 %v16944_v2  ;;  %v16986_v2 = vld [vmem:[#allocation11 + $0xc0c] ss:$16 sps:$4 sm:$0xff]   ;;  %v3742_v20 = vld [vmem:[#allocation2 + $0x30] sm:$0x7f] }
 0x2c7   : > { %3665 = vmatpush1.bf16.msra.mxu0 %v16939_v1  ;;  %v16981_v1 = vld [vmem:[#allocation11 + $0xc00] ss:$16 sps:$4 sm:$0xff]  }
 0x2c8   : > { %3708 = vmatpush1.bf16.msra.mxu1 %v16942_v3  ;;  %3666 = vmatprep.subr.bf16.mxu0 %v16947_v4  ;;  %v16984_v3 = vld [vmem:[#allocation11 + $0xc08] ss:$16 sps:$4 sm:$0xff]   ;;  %v3841_v4 = vor.u32 %v3840_v5, %v3837_v38  ;;  %v17047_v38 = vld [vmem:[#allocation11 + $0xd60] ss:$16 sps:$4 sm:$0xff]   ;;  %v17052_v5 = vld [vmem:[#allocation11 + $0xd6c] ss:$16 sps:$4 sm:$0xff]  }
 0x2c9   : > { %3709 = vmatprep.subr.bf16.mxu1 %v16950_v7  ;;  %v16989_v7 = vld [vmem:[#allocation11 + $0xc24] ss:$16 sps:$4 sm:$0xff]  }
 0x2cb   : > { %3667 = vmatpush1.bf16.msra.mxu0 %v16945_v6  ;;  %v3849_v6 = vor.u32 %v3848_v59, %v3845_v58  ;;  %v17050_v58 = vld [vmem:[#allocation11 + $0xd68] ss:$16 sps:$4 sm:$0xff]   ;;  %v17055_v59 = vld [vmem:[#allocation11 + $0xd84] ss:$16 sps:$4 sm:$0xff]  }
 0x2cc   : > { %3710 = vmatpush1.bf16.msra.mxu1 %v16948_v8  ;;  %3668 = vmatprep.subr.bf16.mxu0 %v16953_v9  ;;  %v16992_v8 = vld [vmem:[#allocation11 + $0xc2c] ss:$16 sps:$4 sm:$0xff]   ;;  %v3306_v9 = vsel %vm3289_vm5, %v3297_v63, %v3305_v0  ;;  %v17053_v63 = vld [vmem:[#allocation11 + $0xd80] ss:$16 sps:$4 sm:$0xff]  }
 0x2cd   : > { %3711 = vmatprep.subr.bf16.mxu1 %v16956_v10  ;;  %v3850_v10 = vsel %vm1175_vm1, %v3841_v4, %v3849_v6  ;;  %v17058_v0 = vld [vmem:[#allocation11 + $0xd8c] ss:$16 sps:$4 sm:$0xff]   ;;  %v17059_v6 = vld [vmem:[#allocation11 + $0xda0] ss:$16 sps:$4 sm:$0xff]  }
 0x2cf   : > { %3669 = vmatpush1.bf16.msra.mxu0 %v16951_v14  ;;  %v16995_v14 = vld [vmem:[#allocation11 + $0xc44] ss:$16 sps:$4 sm:$0xff]  }
 0x2d0   : > { %3712 = vmatpush1.bf16.msra.mxu1 %v16954_v16  ;;  %3670 = vmatprep.subr.bf16.mxu0 %v16959_v17  ;;  %v16993_v16 = vld [vmem:[#allocation11 + $0xc40] ss:$16 sps:$4 sm:$0xff]   ;;  %v16996_v17 = vld [vmem:[#allocation11 + $0xc48] ss:$16 sps:$4 sm:$0xff]  }
 0x2d1   : > { %3713 = vmatprep.subr.bf16.mxu1 %v16962_v22  ;;  %v17002_v22 = vld [vmem:[#allocation11 + $0xc68] ss:$16 sps:$4 sm:$0xff]  }
 0x2d3   : > { %3671 = vmatpush1.bf16.msra.mxu0 %v16957_v21  ;;  %v17004_v21 = vld [vmem:[#allocation11 + $0xc6c] ss:$16 sps:$4 sm:$0xff]  }
 0x2d4   : > { %3714 = vmatpush1.bf16.msra.mxu1 %v16960_v25  ;;  %3672 = vmatprep.subr.bf16.mxu0 %v16965_v26  ;;  %v17008_v25 = vld [vmem:[#allocation11 + $0xc88] ss:$16 sps:$4 sm:$0xff]   ;;  %v17013_v26 = vld [vmem:[#allocation11 + $0xca4] ss:$16 sps:$4 sm:$0xff]  }
 0x2d5   : > { %3715 = vmatprep.subr.bf16.mxu1 %v16968_v30  ;;  %v17014_v30 = vld [vmem:[#allocation11 + $0xca8] ss:$16 sps:$4 sm:$0xff]  }
 0x2d7   : > { %3673 = vmatpush1.bf16.msra.mxu0 %v16963_v29  ;;  %v17016_v29 = vld [vmem:[#allocation11 + $0xcac] ss:$16 sps:$4 sm:$0xff]  }
 0x2d8   : > { %3716 = vmatpush1.bf16.msra.mxu1 %v16966_v47  ;;  %3674 = vmatprep.subr.bf16.mxu0 %v16971_v35  ;;  %v17020_v47 = vld [vmem:[#allocation11 + $0xcc8] ss:$16 sps:$4 sm:$0xff]   ;;  %v17025_v35 = vld [vmem:[#allocation11 + $0xce4] ss:$16 sps:$4 sm:$0xff]  }
 0x2d9   : > { %3717 = vmatprep.subr.bf16.mxu1 %v16974_v40  ;;  %v17031_v40 = vld [vmem:[#allocation11 + $0xd04] ss:$16 sps:$4 sm:$0xff]  }
 0x2db   : > { %3675 = vmatpush1.bf16.msra.mxu0 %v16969_v39  ;;  %v17026_v39 = vld [vmem:[#allocation11 + $0xce8] ss:$16 sps:$4 sm:$0xff]  }
 0x2dc   : > { %3718 = vmatpush1.bf16.msra.mxu1 %v16972_v48  ;;  %3676 = vmatprep.subr.bf16.mxu0 %v16977_v51  ;;  %v17038_v48 = vld [vmem:[#allocation11 + $0xd28] ss:$16 sps:$4 sm:$0xff]   ;;  %v17043_v51 = vld [vmem:[#allocation11 + $0xd44] ss:$16 sps:$4 sm:$0xff]  }
 0x2dd   : > { %3719 = vmatprep.subr.bf16.mxu1 %v16980_v13  ;;  %v17044_v13 = vld [vmem:[#allocation11 + $0xd48] ss:$16 sps:$4 sm:$0xff]  }
 0x2df   : > { %3677 = vmatpush1.bf16.msra.mxu0 %v16975_v56  ;;  %v3740_v56 = vld [vmem:[#allocation2 + $0x10] sm:$0x80] }
 0x2e0   : > { %3720 = vmatpush1.bf16.msra.mxu1 %v16978_v60  ;;  %4173 = vmatprep.subr.bf16.mxu0 %v16983_v61  ;;  %v19394_v60 = vld [vmem:[#allocation2 + $0x20] sm:$0xff] }
 0x2e1   : > { %4216 = vmatprep.subr.bf16.mxu1 %v16986_v2  ;;  %v3744_v61 = vpack.c.bf16 %v19394_v60, %v3740_v56  ;;  %v17056_v2 = vld [vmem:[#allocation11 + $0xd88] ss:$16 sps:$4 sm:$0xff]   ;;  %v17103_v56 = vld [vmem:[#allocation11 + $0xe84] ss:$16 sps:$4 sm:$0xff]  }
 0x2e2   : > { %3679 = vmatmul.mubr.bf16.vlgmr.msra.gmra.mrb[0].mxu0 %v3306_v9 }
 0x2e3   : > { %3722 = vmatmul.mubr.bf16.vlgmr.msra.gmra.mrb[0].mxu1 %v3306_v9  ;;  %4174 = vmatpush1.bf16.msra.mxu0 %v16981_v1  ;;  %v3746_v1 = vpack.c.bf16 %v3742_v20, %v3742_v20  ;;  %v3748_v4 = vmul.bf16 %v3744_v61, %v19335_v52  ;;  %v17062_v9 = vld [vmem:[#allocation11 + $0xda8] ss:$16 sps:$4 sm:$0xff]   ;;  %v17115_v61 = vld [vmem:[#allocation11 + $0xec4] ss:$16 sps:$4 sm:$0xff]  }
 0x2e4   : > { %4205 = vmatprep.mubr.bf16.mxu0 %v3850_v10  ;;  %4217 = vmatpush1.bf16.msra.mxu1 %v16984_v3  ;;  %v17061_v3 = vld [vmem:[#allocation11 + $0xda4] ss:$16 sps:$4 sm:$0xff]   ;;  %v17104_v20 = vld [vmem:[#allocation11 + $0xe88] ss:$16 sps:$4 sm:$0xff]  }
 0x2e5   : > { %4248 = vmatprep.mubr.bf16.mxu1 %v3850_v10  ;;  %4175 = vmatprep.subr.bf16.mxu0 %v16989_v7  ;;  %v17064_v7 = vld [vmem:[#allocation11 + $0xdac] ss:$16 sps:$4 sm:$0xff]   ;;  %v17067_v10 = vld [vmem:[#allocation11 + $0xdc4] ss:$16 sps:$4 sm:$0xff]  }
 0x2e6   : > { %4218 = vmatprep.subr.bf16.mxu1 %v16992_v8  ;;  %v3750_v8 = vmul.bf16 %v3746_v1, %v19335_v52  ;;  %v17116_v1 = vld [vmem:[#allocation11 + $0xec8] ss:$16 sps:$4 sm:$0xff]  }
 0x2e7   : > { %4176 = vmatpush1.bf16.msra.mxu0 %v16987_v11  ;;  %v3818_v11 = vshrl.u32 %v3748_v4, 16 }
 0x2e8   : > { %4219 = vmatpush1.bf16.msra.mxu1 %v16990_v12  ;;  %4177 = vmatprep.subr.bf16.mxu0 %v16995_v14  ;;  %v3821_v12 = vshll.u32 %v3748_v4, 16  ;;  %v17065_v14 = vld [vmem:[#allocation11 + $0xdc0] ss:$16 sps:$4 sm:$0xff]   ;;  %v17124_v4 = vld [vmem:[#allocation11 + $0xeec] ss:$16 sps:$4 sm:$0xff]  }
 0x2e9   : > { %4220 = vmatprep.subr.bf16.mxu1 %v16998_v15  ;;  %v17070_v15 = vld [vmem:[#allocation11 + $0xdcc] ss:$16 sps:$4 sm:$0xff]  }
 0x2eb   : > { %4178 = vmatpush1.bf16.msra.mxu0 %v16993_v16  ;;  %v3826_v16 = vshrl.u32 %v3750_v8, 16 }
 0x2ec   : > { %4221 = vmatpush1.bf16.msra.mxu1 %v16996_v17  ;;  %4179 = vmatprep.subr.bf16.mxu0 %v17001_v18  ;;  %v3829_v17 = vshll.u32 %v3750_v8, 16  ;;  %v17068_v18 = vld [vmem:[#allocation11 + $0xdc8] ss:$16 sps:$4 sm:$0xff]   ;;  %v17125_v8 = vld [vmem:[#allocation11 + $0xf00] ss:$16 sps:$4 sm:$0xff]  }
 0x2ed   : > { %4222 = vmatprep.subr.bf16.mxu1 %v17004_v21  ;;  %v3820_v21 = vrot.slane %v3818_v11, 3  ;;  %v17133_v11 = vld [vmem:[#allocation11 + $0xf24] ss:$16 sps:$4 sm:$0xff]  }
 0x2ef   : > { %4180 = vmatpush1.bf16.msra.mxu0 %v16999_v19  ;;  %v17073_v19 = vld [vmem:[#allocation11 + $0xde4] ss:$16 sps:$4 sm:$0xff]  }
 0x2f0   : > { %4223 = vmatpush1.bf16.msra.mxu1 %v17002_v22  ;;  %4181 = vmatprep.subr.bf16.mxu0 %v17007_v23  ;;  %v3823_v22 = vrot.slane %v3821_v12, 4  ;;  %v17071_v23 = vld [vmem:[#allocation11 + $0xde0] ss:$16 sps:$4 sm:$0xff]  }
 0x2f1   : > { %4224 = vmatprep.subr.bf16.mxu1 %v17010_v34  ;;  %v3828_v34 = vrot.slane %v3826_v16, 3  ;;  %v17131_v12 = vld [vmem:[#allocation11 + $0xf20] ss:$16 sps:$4 sm:$0xff]   ;;  %v17139_v16 = vld [vmem:[#allocation11 + $0xf44] ss:$16 sps:$4 sm:$0xff]  }
 0x2f3   : > { %4182 = vmatpush1.bf16.msra.mxu0 %v17005_v24  ;;  %v17076_v24 = vld [vmem:[#allocation11 + $0xdec] ss:$16 sps:$4 sm:$0xff]  }
 0x2f4   : > { %4225 = vmatpush1.bf16.msra.mxu1 %v17008_v25  ;;  %4183 = vmatprep.subr.bf16.mxu0 %v17013_v26  ;;  %v3831_v25 = vrot.slane %v3829_v17, 4  ;;  %v17074_v26 = vld [vmem:[#allocation11 + $0xde8] ss:$16 sps:$4 sm:$0xff]   ;;  %v17137_v17 = vld [vmem:[#allocation11 + $0xf40] ss:$16 sps:$4 sm:$0xff]  }
 0x2f5   : > { %4226 = vmatprep.subr.bf16.mxu1 %v17016_v29  ;;  %v3824_v29 = vor.u32 %v3823_v22, %v3820_v21  ;;  %v17145_v21 = vld [vmem:[#allocation11 + $0xf64] ss:$16 sps:$4 sm:$0xff]   ;;  %v17143_v22 = vld [vmem:[#allocation11 + $0xf60] ss:$16 sps:$4 sm:$0xff]  }
 0x2f7   : > { %4184 = vmatpush1.bf16.msra.mxu0 %v17011_v27  ;;  %v17079_v27 = vld [vmem:[#allocation11 + $0xe04] ss:$16 sps:$4 sm:$0xff]  }
 0x2f8   : > { %4227 = vmatpush1.bf16.msra.mxu1 %v17014_v30  ;;  %4185 = vmatprep.subr.bf16.mxu0 %v17019_v62  ;;  %v3832_v30 = vor.u32 %v3831_v25, %v3828_v34  ;;  %v17077_v62 = vld [vmem:[#allocation11 + $0xe00] ss:$16 sps:$4 sm:$0xff]   ;;  %v17151_v34 = vld [vmem:[#allocation11 + $0xf84] ss:$16 sps:$4 sm:$0xff]   ;;  %v4751_v25 = vld [vmem:[#allocation2 + $0x28] sm:$0xfe] }
 0x2f9   : > { %4228 = vmatprep.subr.bf16.mxu1 %v17022_v32  ;;  %v17080_v32 = vld [vmem:[#allocation11 + $0xe08] ss:$16 sps:$4 sm:$0xff]  }
 0x2fb   : > { %4186 = vmatpush1.bf16.msra.mxu0 %v17017_v31  ;;  %v17082_v31 = vld [vmem:[#allocation11 + $0xe0c] ss:$16 sps:$4 sm:$0xff]  }
 0x2fc   : > { %4229 = vmatpush1.bf16.msra.mxu1 %v17020_v47  ;;  %4187 = vmatprep.subr.bf16.mxu0 %v17025_v35  ;;  %v17085_v47 = vld [vmem:[#allocation11 + $0xe24] ss:$16 sps:$4 sm:$0xff]   ;;  %v19399_v35 = vld [vmem:[#allocation2 + $0x38] sm:$0xff] }
 0x2fd   : > { %4230 = vmatprep.subr.bf16.mxu1 %v17028_v37  ;;  %v3833_v37 = vsel %vm1175_vm1, %v3824_v29, %v3832_v30  ;;  %v17152_v29 = vld [vmem:[#allocation11 + $0xf88] ss:$16 sps:$4 sm:$0xff]   ;;  %v17157_v30 = vld [vmem:[#allocation11 + $0xfa4] ss:$16 sps:$4 sm:$0xff]  }
 0x2ff   : > { %4188 = vmatpush1.bf16.msra.mxu0 %v17023_v36  ;;  %v17088_v36 = vld [vmem:[#allocation11 + $0xe2c] ss:$16 sps:$4 sm:$0xff]  }
 0x300   : > { %4231 = vmatpush1.bf16.msra.mxu1 %v17026_v39  ;;  %4189 = vmatprep.subr.bf16.mxu0 %v17031_v40  ;;  %v18426_v39 = vld [vmem:[#allocation2 + $0x28] sm:$0xff] }
 0x301   : > { %4232 = vmatprep.subr.bf16.mxu1 %v17034_v42  ;;  %v4270_v40 = vpack.c.bf16 %v19399_v35, %v18426_v39  ;;  %v17086_v42 = vld [vmem:[#allocation11 + $0xe28] ss:$16 sps:$4 sm:$0xff]   ;;  %v17166_v39 = vld [vmem:[#allocation11 + $0xfcc] ss:$16 sps:$4 sm:$0xff]  }
 0x303   : > { %4190 = vmatpush1.bf16.msra.mxu0 %v17029_v41  ;;  %v17083_v41 = vld [vmem:[#allocation11 + $0xe20] ss:$16 sps:$4 sm:$0xff]  }
 0x304   : > { %4233 = vmatpush1.bf16.msra.mxu1 %v17032_v43  ;;  %4191 = vmatprep.subr.bf16.mxu0 %v17037_v44  ;;  %v17091_v43 = vld [vmem:[#allocation11 + $0xe44] ss:$16 sps:$4 sm:$0xff]   ;;  %v17089_v44 = vld [vmem:[#allocation11 + $0xe40] ss:$16 sps:$4 sm:$0xff]  }
 0x305   : > { %4234 = vmatprep.subr.bf16.mxu1 %v17040_v46  ;;  %v17092_v46 = vld [vmem:[#allocation11 + $0xe48] ss:$16 sps:$4 sm:$0xff]  }
 0x307   : > { %4192 = vmatpush1.bf16.msra.mxu0 %v17035_v45  ;;  %v17094_v45 = vld [vmem:[#allocation11 + $0xe4c] ss:$16 sps:$4 sm:$0xff]  }
 0x308   : > { %4235 = vmatpush1.bf16.msra.mxu1 %v17038_v48  ;;  %4193 = vmatprep.subr.bf16.mxu0 %v17043_v51  ;;  %v17097_v48 = vld [vmem:[#allocation11 + $0xe64] ss:$16 sps:$4 sm:$0xff]   ;;  %v17095_v51 = vld [vmem:[#allocation11 + $0xe60] ss:$16 sps:$4 sm:$0xff]  }
 0x309   : > { %4236 = vmatprep.subr.bf16.mxu1 %v17046_v55  ;;  %v17098_v55 = vld [vmem:[#allocation11 + $0xe68] ss:$16 sps:$4 sm:$0xff]  }
 0x30b   : > { %4194 = vmatpush1.bf16.msra.mxu0 %v17041_v54  ;;  %v17100_v54 = vld [vmem:[#allocation11 + $0xe6c] ss:$16 sps:$4 sm:$0xff]  }
 0x30c   : > { %4237 = vmatpush1.bf16.msra.mxu1 %v17044_v13  ;;  %4195 = vmatprep.subr.bf16.mxu0 %v17049_v57  ;;  %v17101_v13 = vld [vmem:[#allocation11 + $0xe80] ss:$16 sps:$4 sm:$0xff]   ;;  %v17106_v57 = vld [vmem:[#allocation11 + $0xe8c] ss:$16 sps:$4 sm:$0xff]  }
 0x30d   : > { %4238 = vmatprep.subr.bf16.mxu1 %v17052_v5  ;;  %v17107_v5 = vld [vmem:[#allocation11 + $0xea0] ss:$16 sps:$4 sm:$0xff]  }
 0x30f   : > { %4196 = vmatpush1.bf16.msra.mxu0 %v17047_v38  ;;  %v17109_v38 = vld [vmem:[#allocation11 + $0xea4] ss:$16 sps:$4 sm:$0xff]  }
 0x310   : > { %4239 = vmatpush1.bf16.msra.mxu1 %v17050_v58  ;;  %4197 = vmatprep.subr.bf16.mxu0 %v17055_v59  ;;  %v17112_v58 = vld [vmem:[#allocation11 + $0xeac] ss:$16 sps:$4 sm:$0xff]   ;;  %v17110_v59 = vld [vmem:[#allocation11 + $0xea8] ss:$16 sps:$4 sm:$0xff]  }
 0x311   : > { %4240 = vmatprep.subr.bf16.mxu1 %v17058_v0  ;;  %v17118_v0 = vld [vmem:[#allocation11 + $0xecc] ss:$16 sps:$4 sm:$0xff]  }
 0x313   : > { %4198 = vmatpush1.bf16.msra.mxu0 %v17053_v63  ;;  %v17113_v63 = vld [vmem:[#allocation11 + $0xec0] ss:$16 sps:$4 sm:$0xff]  }
 0x314   : > { %4241 = vmatpush1.bf16.msra.mxu1 %v17056_v2  ;;  %4199 = vmatprep.subr.bf16.mxu0 %v17061_v3  ;;  %v17121_v2 = vld [vmem:[#allocation11 + $0xee4] ss:$16 sps:$4 sm:$0xff]   ;;  %v17119_v3 = vld [vmem:[#allocation11 + $0xee0] ss:$16 sps:$4 sm:$0xff]  }
 0x315   : > { %4242 = vmatprep.subr.bf16.mxu1 %v17064_v7  ;;  %v17127_v7 = vld [vmem:[#allocation11 + $0xf04] ss:$16 sps:$4 sm:$0xff]  }
 0x317   : > { %4200 = vmatpush1.bf16.msra.mxu0 %v17059_v6  ;;  %v17122_v6 = vld [vmem:[#allocation11 + $0xee8] ss:$16 sps:$4 sm:$0xff]  }
 0x318   : > { %4243 = vmatpush1.bf16.msra.mxu1 %v17062_v9  ;;  %4201 = vmatprep.subr.bf16.mxu0 %v17067_v10  ;;  %v17130_v9 = vld [vmem:[#allocation11 + $0xf0c] ss:$16 sps:$4 sm:$0xff]   ;;  %v17128_v10 = vld [vmem:[#allocation11 + $0xf08] ss:$16 sps:$4 sm:$0xff]  }
 0x319   : > { %4244 = vmatprep.subr.bf16.mxu1 %v17070_v15  ;;  %v17134_v15 = vld [vmem:[#allocation11 + $0xf28] ss:$16 sps:$4 sm:$0xff]  }
 0x31b   : > { %4202 = vmatpush1.bf16.msra.mxu0 %v17065_v14  ;;  %v17136_v14 = vld [vmem:[#allocation11 + $0xf2c] ss:$16 sps:$4 sm:$0xff]  }
 0x31c   : > { %4245 = vmatpush1.bf16.msra.mxu1 %v17068_v18  ;;  %4203 = vmatprep.subr.bf16.mxu0 %v17073_v19  ;;  %v17142_v18 = vld [vmem:[#allocation11 + $0xf4c] ss:$16 sps:$4 sm:$0xff]   ;;  %v17140_v19 = vld [vmem:[#allocation11 + $0xf48] ss:$16 sps:$4 sm:$0xff]  }
 0x31d   : > { %4246 = vmatprep.subr.bf16.mxu1 %v17076_v24  ;;  %v17146_v24 = vld [vmem:[#allocation11 + $0xf68] ss:$16 sps:$4 sm:$0xff]  }
 0x31f   : > { %4204 = vmatpush1.bf16.msra.mxu0 %v17071_v23  ;;  %v17148_v23 = vld [vmem:[#allocation11 + $0xf6c] ss:$16 sps:$4 sm:$0xff]  }
 0x320   : > { %4247 = vmatpush1.bf16.msra.mxu1 %v17074_v26  ;;  %4656 = vmatprep.subr.bf16.mxu0 %v17079_v27  ;;  %v17154_v26 = vld [vmem:[#allocation11 + $0xf8c] ss:$16 sps:$4 sm:$0xff]   ;;  %v17149_v27 = vld [vmem:[#allocation11 + $0xf80] ss:$16 sps:$4 sm:$0xff]  }
 0x321   : > { %4699 = vmatprep.subr.bf16.mxu1 %v17082_v31  ;;  %v17160_v31 = vld [vmem:[#allocation11 + $0xfac] ss:$16 sps:$4 sm:$0xff]  }
 0x322   : > { %4206 = vmatmul.mubr.bf16.vlgmr.msra.gmra.mrb[0].mxu0 %v3833_v37 }
 0x323   : > { %4249 = vmatmul.mubr.bf16.vlgmr.msra.gmra.mrb[0].mxu1 %v3833_v37  ;;  %4657 = vmatpush1.bf16.msra.mxu0 %v17077_v62  ;;  %v4755_v62 = vld [vmem:[#allocation2 + $0x48] sm:$0x1]  ;;  %v17163_v37 = vld [vmem:[#allocation11 + $0xfc4] ss:$16 sps:$4 sm:$0xff]  }
 0x324   : > { %4700 = vmatpush1.bf16.msra.mxu1 %v17080_v32  ;;  %4658 = vmatprep.subr.bf16.mxu0 %v17085_v47  ;;  %v4757_v32 = vpack.c.bf16 %v19399_v35, %v4751_v25  ;;  %v17155_v47 = vld [vmem:[#allocation11 + $0xfa0] ss:$16 sps:$4 sm:$0xff]   ;;  %v17217_v25 = vld [vmem:[#allocation11 + $0x10e4] ss:$16 sps:$4 sm:$0xff]  }
 0x325   : > { %4701 = vmatprep.subr.bf16.mxu1 %v17088_v36  ;;  %4688 = vmatprep.mubr.bf16.mxu0 %v4270_v40  ;;  %v17158_v36 = vld [vmem:[#allocation11 + $0xfa8] ss:$16 sps:$4 sm:$0xff]  }
 0x326   : > { %4731 = vmatprep.mubr.bf16.mxu1 %v4270_v40  ;;  %v4759_v40 = vpack.c.bf16 %v4755_v62, %v4755_v62  ;;  %v17226_v62 = vld [vmem:[#allocation11 + $0x110c] ss:$16 sps:$4 sm:$0xff]  }
 0x327   : > { %4659 = vmatpush1.bf16.msra.mxu0 %v17083_v41  ;;  %v4761_v41 = vmul.bf16 %v4757_v32, %v19351_v49  ;;  %v17224_v32 = vld [vmem:[#allocation11 + $0x1108] ss:$16 sps:$4 sm:$0xff]  }
 0x328   : > { %4702 = vmatpush1.bf16.msra.mxu1 %v17086_v42  ;;  %4660 = vmatprep.subr.bf16.mxu0 %v17091_v43  ;;  %v17161_v42 = vld [vmem:[#allocation11 + $0xfc0] ss:$16 sps:$4 sm:$0xff]   ;;  %v17164_v43 = vld [vmem:[#allocation11 + $0xfc8] ss:$16 sps:$4 sm:$0xff]   ;;  %v4763_v35 = vmul.bf16 %v4759_v40, %v19347_v33  ;;  %v17235_v40 = vld [vmem:[#allocation11 + $0x1144] ss:$16 sps:$4 sm:$0xff]  }
 0x329   : > { %4703 = vmatprep.subr.bf16.mxu1 %v17094_v45  ;;  %v17172_v45 = vld [vmem:[#allocation11 + $0xfec] ss:$16 sps:$4 sm:$0xff]  }
 0x32b   : > { %4661 = vmatpush1.bf16.msra.mxu0 %v17089_v44  ;;  %v17169_v44 = vld [vmem:[#allocation11 + $0xfe4] ss:$16 sps:$4 sm:$0xff]  }
 0x32c   : > { %4704 = vmatpush1.bf16.msra.mxu1 %v17092_v46  ;;  %4662 = vmatprep.subr.bf16.mxu0 %v17097_v48  ;;  %v4844_v46 = vshll.u32 %v4761_v41, 16  ;;  %v17167_v48 = vld [vmem:[#allocation11 + $0xfe0] ss:$16 sps:$4 sm:$0xff]  }
 0x32d   : > { %4705 = vmatprep.subr.bf16.mxu1 %v17100_v54  ;;  %v17175_v54 = vld [vmem:[#allocation11 + $0x1004] ss:$16 sps:$4 sm:$0xff]  }
 0x32f   : > { %4663 = vmatpush1.bf16.msra.mxu0 %v17095_v51  ;;  %v17170_v51 = vld [vmem:[#allocation11 + $0xfe8] ss:$16 sps:$4 sm:$0xff]  }
 0x330   : > { %4706 = vmatpush1.bf16.msra.mxu1 %v17098_v55  ;;  %4664 = vmatprep.subr.bf16.mxu0 %v17103_v56  ;;  %v19406_v55 = vld [vmem:[#allocation2 + $0x30] sm:$0xff]  ;;  %v17178_v56 = vld [vmem:[#allocation11 + $0x100c] ss:$16 sps:$4 sm:$0xff]  }
 0x331   : > { %4707 = vmatprep.subr.bf16.mxu1 %v17106_v57  ;;  %v4846_v57 = vrot.slane %v4844_v46, 1  ;;  %v17239_v46 = vld [vmem:[#allocation11 + $0x1160] ss:$16 sps:$4 sm:$0xff]  }
 0x333   : > { %4665 = vmatpush1.bf16.msra.mxu0 %v17101_v13  ;;  %v4842_v13 = vshrl.u32 %v4761_v41, 16  ;;  %v17238_v41 = vld [vmem:[#allocation11 + $0x114c] ss:$16 sps:$4 sm:$0xff]  }
 0x334   : > { %4708 = vmatpush1.bf16.msra.mxu1 %v17104_v20  ;;  %4666 = vmatprep.subr.bf16.mxu0 %v17109_v38  ;;  %v4849_v20 = vshll.u32 %v4763_v35, 16  ;;  %v17173_v38 = vld [vmem:[#allocation11 + $0x1000] ss:$16 sps:$4 sm:$0xff]  }
 0x335   : > { %4709 = vmatprep.subr.bf16.mxu1 %v17112_v58  ;;  %v17176_v58 = vld [vmem:[#allocation11 + $0x1008] ss:$16 sps:$4 sm:$0xff]   ;;  %v4750_v35 = vld [vmem:[#allocation2 + $0x20] sm:$0xfe] }
 0x337   : > { %4667 = vmatpush1.bf16.msra.mxu0 %v17107_v5  ;;  %v4269_v5 = vpack.c.bf16 %v19406_v55, %v19394_v60  ;;  %v17185_v60 = vld [vmem:[#allocation11 + $0x1040] ss:$16 sps:$4 sm:$0xff]  }
 0x338   : > { %4710 = vmatpush1.bf16.msra.mxu1 %v17110_v59  ;;  %4668 = vmatprep.subr.bf16.mxu0 %v17115_v61  ;;  %v4847_v59 = vor.u32 %v4846_v57, %v4842_v13  ;;  %v4851_v61 = vrot.slane %v4849_v20, 1  ;;  %v17245_v13 = vld [vmem:[#allocation11 + $0x1180] ss:$16 sps:$4 sm:$0xff]   ;;  %v4756_v57 = vpack.c.bf16 %v19406_v55, %v4750_v35  ;;  %v17248_v20 = vld [vmem:[#allocation11 + $0x1188] ss:$16 sps:$4 sm:$0xff]  }
 0x339   : > { %4711 = vmatprep.subr.bf16.mxu1 %v17118_v0  ;;  %v17184_v0 = vld [vmem:[#allocation11 + $0x102c] ss:$16 sps:$4 sm:$0xff]  }
 0x33a   : > { %v17308_v35 = vld [vmem:[#allocation17 + $0x160] ss:$8 sps:$4 sm:$0xff]  }
 0x33b   : > { %4669 = vmatpush1.bf16.msra.mxu0 %v17113_v63  ;;  %v17181_v63 = vld [vmem:[#allocation11 + $0x1024] ss:$16 sps:$4 sm:$0xff]  }
 0x33c   : > { %4712 = vmatpush1.bf16.msra.mxu1 %v17116_v1  ;;  %4670 = vmatprep.subr.bf16.mxu0 %v17121_v2  ;;  %v17179_v1 = vld [vmem:[#allocation11 + $0x1020] ss:$16 sps:$4 sm:$0xff]   ;;  %v17182_v2 = vld [vmem:[#allocation11 + $0x1028] ss:$16 sps:$4 sm:$0xff]  }
 0x33d   : > { %4713 = vmatprep.subr.bf16.mxu1 %v17124_v4  ;;  %v4852_v4 = vsel %vm1735_vm2, %v4847_v59, %v4851_v61  ;;  %v4760_v61 = vmul.bf16 %v4756_v57, %v19351_v49  ;;  %v17317_v57 = vld [vmem:[#allocation14 + $0x180] ss:$8 sps:$4 sm:$0xff]  }
 0x33f   : > { %4671 = vmatpush1.bf16.msra.mxu0 %v17119_v3  ;;  %v17187_v3 = vld [vmem:[#allocation11 + $0x1044] ss:$16 sps:$4 sm:$0xff]  }
 0x340   : > { %4714 = vmatpush1.bf16.msra.mxu1 %v17122_v6  ;;  %4672 = vmatprep.subr.bf16.mxu0 %v17127_v7  ;;  %v17190_v6 = vld [vmem:[#allocation11 + $0x104c] ss:$16 sps:$4 sm:$0xff]   ;;  %v17188_v7 = vld [vmem:[#allocation11 + $0x1048] ss:$16 sps:$4 sm:$0xff]  }
 0x341   : > { %4715 = vmatprep.subr.bf16.mxu1 %v17130_v9  ;;  %v17196_v9 = vld [vmem:[#allocation11 + $0x106c] ss:$16 sps:$4 sm:$0xff]  }
 0x343   : > { %4673 = vmatpush1.bf16.msra.mxu0 %v17125_v8  ;;  %v17193_v8 = vld [vmem:[#allocation11 + $0x1064] ss:$16 sps:$4 sm:$0xff]  }
 0x344   : > { %4716 = vmatpush1.bf16.msra.mxu1 %v17128_v10  ;;  %4674 = vmatprep.subr.bf16.mxu0 %v17133_v11  ;;  %v17191_v10 = vld [vmem:[#allocation11 + $0x1060] ss:$16 sps:$4 sm:$0xff]   ;;  %v17194_v11 = vld [vmem:[#allocation11 + $0x1068] ss:$16 sps:$4 sm:$0xff]  }
 0x345   : > { %4717 = vmatprep.subr.bf16.mxu1 %v17136_v14  ;;  %v17202_v14 = vld [vmem:[#allocation11 + $0x108c] ss:$16 sps:$4 sm:$0xff]  }
 0x347   : > { %4675 = vmatpush1.bf16.msra.mxu0 %v17131_v12  ;;  %v17199_v12 = vld [vmem:[#allocation11 + $0x1084] ss:$16 sps:$4 sm:$0xff]  }
 0x348   : > { %4718 = vmatpush1.bf16.msra.mxu1 %v17134_v15  ;;  %4676 = vmatprep.subr.bf16.mxu0 %v17139_v16  ;;  %v17197_v15 = vld [vmem:[#allocation11 + $0x1080] ss:$16 sps:$4 sm:$0xff]   ;;  %v17200_v16 = vld [vmem:[#allocation11 + $0x1088] ss:$16 sps:$4 sm:$0xff]  }
 0x349   : > { %4719 = vmatprep.subr.bf16.mxu1 %v17142_v18  ;;  %v17208_v18 = vld [vmem:[#allocation11 + $0x10ac] ss:$16 sps:$4 sm:$0xff]  }
 0x34b   : > { %4677 = vmatpush1.bf16.msra.mxu0 %v17137_v17  ;;  %v17205_v17 = vld [vmem:[#allocation11 + $0x10a4] ss:$16 sps:$4 sm:$0xff]  }
 0x34c   : > { %4720 = vmatpush1.bf16.msra.mxu1 %v17140_v19  ;;  %4678 = vmatprep.subr.bf16.mxu0 %v17145_v21  ;;  %v17203_v19 = vld [vmem:[#allocation11 + $0x10a0] ss:$16 sps:$4 sm:$0xff]   ;;  %v17206_v21 = vld [vmem:[#allocation11 + $0x10a8] ss:$16 sps:$4 sm:$0xff]  }
 0x34d   : > { %4721 = vmatprep.subr.bf16.mxu1 %v17148_v23  ;;  %v17214_v23 = vld [vmem:[#allocation11 + $0x10cc] ss:$16 sps:$4 sm:$0xff]  }
 0x34f   : > { %4679 = vmatpush1.bf16.msra.mxu0 %v17143_v22  ;;  %v17211_v22 = vld [vmem:[#allocation11 + $0x10c4] ss:$16 sps:$4 sm:$0xff]  }
 0x350   : > { %4722 = vmatpush1.bf16.msra.mxu1 %v17146_v24  ;;  %4680 = vmatprep.subr.bf16.mxu0 %v17151_v34  ;;  %v17209_v24 = vld [vmem:[#allocation11 + $0x10c0] ss:$16 sps:$4 sm:$0xff]   ;;  %v17212_v34 = vld [vmem:[#allocation11 + $0x10c8] ss:$16 sps:$4 sm:$0xff]  }
 0x351   : > { %4723 = vmatprep.subr.bf16.mxu1 %v17154_v26  ;;  %v17220_v26 = vld [vmem:[#allocation11 + $0x10ec] ss:$16 sps:$4 sm:$0xff]  }
 0x353   : > { %4681 = vmatpush1.bf16.msra.mxu0 %v17149_v27  ;;  %v17215_v27 = vld [vmem:[#allocation11 + $0x10e0] ss:$16 sps:$4 sm:$0xff]  }
 0x354   : > { %4724 = vmatpush1.bf16.msra.mxu1 %v17152_v29  ;;  %4682 = vmatprep.subr.bf16.mxu0 %v17157_v30  ;;  %v17218_v29 = vld [vmem:[#allocation11 + $0x10e8] ss:$16 sps:$4 sm:$0xff]   ;;  %v17223_v30 = vld [vmem:[#allocation11 + $0x1104] ss:$16 sps:$4 sm:$0xff]  }
 0x355   : > { %4725 = vmatprep.subr.bf16.mxu1 %v17160_v31  ;;  %v17221_v31 = vld [vmem:[#allocation11 + $0x1100] ss:$16 sps:$4 sm:$0xff]  }
 0x357   : > { %4683 = vmatpush1.bf16.msra.mxu0 %v17155_v47  ;;  %v17229_v47 = vld [vmem:[#allocation11 + $0x1124] ss:$16 sps:$4 sm:$0xff]  }
 0x358   : > { %4726 = vmatpush1.bf16.msra.mxu1 %v17158_v36  ;;  %4684 = vmatprep.subr.bf16.mxu0 %v17163_v37  ;;  %v17232_v36 = vld [vmem:[#allocation11 + $0x112c] ss:$16 sps:$4 sm:$0xff]   ;;  %v17227_v37 = vld [vmem:[#allocation11 + $0x1120] ss:$16 sps:$4 sm:$0xff]  }
 0x359   : > { %4727 = vmatprep.subr.bf16.mxu1 %v17166_v39  ;;  %v17230_v39 = vld [vmem:[#allocation11 + $0x1128] ss:$16 sps:$4 sm:$0xff]  }
 0x35b   : > { %4685 = vmatpush1.bf16.msra.mxu0 %v17161_v42  ;;  %v17233_v42 = vld [vmem:[#allocation11 + $0x1140] ss:$16 sps:$4 sm:$0xff]  }
 0x35c   : > { %4728 = vmatpush1.bf16.msra.mxu1 %v17164_v43  ;;  %4686 = vmatprep.subr.bf16.mxu0 %v17169_v44  ;;  %v17236_v43 = vld [vmem:[#allocation11 + $0x1148] ss:$16 sps:$4 sm:$0xff]   ;;  %v17241_v44 = vld [vmem:[#allocation11 + $0x1164] ss:$16 sps:$4 sm:$0xff]  }
 0x35d   : > { %4729 = vmatprep.subr.bf16.mxu1 %v17172_v45  ;;  %v17244_v45 = vld [vmem:[#allocation11 + $0x116c] ss:$16 sps:$4 sm:$0xff]  }
 0x35f   : > { %4687 = vmatpush1.bf16.msra.mxu0 %v17167_v48  ;;  %v17242_v48 = vld [vmem:[#allocation11 + $0x1168] ss:$16 sps:$4 sm:$0xff]  }
 0x360   : > { %4730 = vmatpush1.bf16.msra.mxu1 %v17170_v51  ;;  %5175 = vmatprep.subr.bf16.mxu0 %v17175_v54  ;;  %v17247_v51 = vld [vmem:[#allocation11 + $0x1184] ss:$16 sps:$4 sm:$0xff]   ;;  %v17250_v54 = vld [vmem:[#allocation11 + $0x118c] ss:$16 sps:$4 sm:$0xff]  }
 0x361   : > { %5218 = vmatprep.subr.bf16.mxu1 %v17178_v56  ;;  %v4754_v56 = vld [vmem:[#allocation2 + $0x40] sm:$0x1] }
 0x362   : > { %4689 = vmatmul.mubr.bf16.vlgmr.msra.gmra.mrb[0].mxu0 %v4269_v5  ;;  %v4758_v59 = vpack.c.bf16 %v4754_v56, %v4754_v56  ;;  %v17319_v56 = vld [vmem:[#allocation14 + $0x184] ss:$8 sps:$4 sm:$0xff]  }
 0x363   : > { %4732 = vmatmul.mubr.bf16.vlgmr.msra.gmra.mrb[0].mxu1 %v4269_v5  ;;  %5176 = vmatpush1.bf16.msra.mxu0 %v17173_v38  ;;  %v17253_v38 = vld [vmem:[#allocation11 + $0x11a4] ss:$16 sps:$4 sm:$0xff]   ;;  %v17256_v5 = vld [vmem:[#allocation11 + $0x11ac] ss:$16 sps:$4 sm:$0xff]  }
 0x364   : > { %5207 = vmatprep.mubr.bf16.mxu0 %v4852_v4  ;;  %5219 = vmatpush1.bf16.msra.mxu1 %v17176_v58  ;;  %v17251_v58 = vld [vmem:[#allocation11 + $0x11a0] ss:$16 sps:$4 sm:$0xff]   ;;  %v4762_v55 = vmul.bf16 %v4758_v59, %v19347_v33 }
 0x365   : > { %5250 = vmatprep.mubr.bf16.mxu1 %v4852_v4  ;;  %5177 = vmatprep.subr.bf16.mxu0 %v17181_v63  ;;  %v17254_v63 = vld [vmem:[#allocation11 + $0x11a8] ss:$16 sps:$4 sm:$0xff]  }
 0x366   : > { %5220 = vmatprep.subr.bf16.mxu1 %v17184_v0  ;;  %v17259_v0 = vld [vmem:[#allocation11 + $0x11c4] ss:$16 sps:$4 sm:$0xff]   ;;  %v17260_v4 = vld [vmem:[#allocation11 + $0x11c8] ss:$16 sps:$4 sm:$0xff]  }
 0x367   : > { %5178 = vmatpush1.bf16.msra.mxu0 %v17179_v1  ;;  %v17262_v1 = vld [vmem:[#allocation11 + $0x11cc] ss:$16 sps:$4 sm:$0xff]  }
 0x368   : > { %5221 = vmatpush1.bf16.msra.mxu1 %v17182_v2  ;;  %5179 = vmatprep.subr.bf16.mxu0 %v17187_v3  ;;  %v17257_v2 = vld [vmem:[#allocation11 + $0x11c0] ss:$16 sps:$4 sm:$0xff]   ;;  %v4832_v3 = vshll.u32 %v4760_v61, 16 }
 0x369   : > { %5222 = vmatprep.subr.bf16.mxu1 %v17190_v6  ;;  %v17265_v6 = vld [vmem:[#allocation11 + $0x11e4] ss:$16 sps:$4 sm:$0xff]  }
 0x36a   : > { %v17326_v59 = vld [vmem:[#allocation17 + $0x190] ss:$8 sps:$4 sm:$0xff]  }
 0x36b   : > { %5180 = vmatpush1.bf16.msra.mxu0 %v17185_v60  ;;  %v17268_v60 = vld [vmem:[#allocation11 + $0x11ec] ss:$16 sps:$4 sm:$0xff]  }
 0x36c   : > { %5223 = vmatpush1.bf16.msra.mxu1 %v17188_v7  ;;  %5181 = vmatprep.subr.bf16.mxu0 %v17193_v8  ;;  %v17263_v7 = vld [vmem:[#allocation11 + $0x11e0] ss:$16 sps:$4 sm:$0xff]   ;;  %v4830_v8 = vshrl.u32 %v4760_v61, 16 }
 0x36d   : > { %5224 = vmatprep.subr.bf16.mxu1 %v17196_v9  ;;  %v4834_v9 = vrot.slane %v4832_v3, 1  ;;  %v17331_v61 = vld [vmem:[#allocation14 + $0x1a4] ss:$8 sps:$4 sm:$0xff]   ;;  %v17338_v3 = vld [vmem:[#allocation17 + $0x1b0] ss:$8 sps:$4 sm:$0xff]  }
 0x36f   : > { %5182 = vmatpush1.bf16.msra.mxu0 %v17191_v10  ;;  %v4837_v10 = vshll.u32 %v4762_v55, 16  ;;  %v17337_v55 = vld [vmem:[#allocation14 + $0x1b4] ss:$8 sps:$4 sm:$0xff]  }
 0x370   : > { %5225 = vmatpush1.bf16.msra.mxu1 %v17194_v11  ;;  %5183 = vmatprep.subr.bf16.mxu0 %v17199_v12  ;;  %v17266_v11 = vld [vmem:[#allocation11 + $0x11e8] ss:$16 sps:$4 sm:$0xff]  }
 0x371   : > { %5226 = vmatprep.subr.bf16.mxu1 %v17202_v14  ;;  %v17271_v12 = vld [vmem:[#allocation14 + $0x104] ss:$8 sps:$4 sm:$0xff]  }
 0x372   : > { %v17274_v14 = vld [vmem:[#allocation17 + $0x104] ss:$8 sps:$4 sm:$0xff]  }
 0x373   : > { %5184 = vmatpush1.bf16.msra.mxu0 %v17197_v15  ;;  %v4835_v15 = vor.u32 %v4834_v9, %v4830_v8  ;;  %v17346_v8 = vld [vmem:[#allocation17 + $0x1c4] ss:$8 sps:$4 sm:$0xff]   ;;  %v17349_v9 = vld [vmem:[#allocation14 + $0x1d4] ss:$8 sps:$4 sm:$0xff]  }
 0x374   : > { %5227 = vmatpush1.bf16.msra.mxu1 %v17200_v16  ;;  %5185 = vmatprep.subr.bf16.mxu0 %v17205_v17  ;;  %v4839_v16 = vrot.slane %v4837_v10, 1  ;;  %v17269_v17 = vld [vmem:[#allocation14 + $0x100] ss:$8 sps:$4 sm:$0xff]  }
 0x375   : > { %5228 = vmatprep.subr.bf16.mxu1 %v17208_v18  ;;  %v17272_v18 = vld [vmem:[#allocation17 + $0x100] ss:$8 sps:$4 sm:$0xff]   ;;  %v17352_v10 = vld [vmem:[#allocation17 + $0x1d4] ss:$8 sps:$4 sm:$0xff]  }
 0x377   : > { %5186 = vmatpush1.bf16.msra.mxu0 %v17203_v19  ;;  %v17277_v19 = vld [vmem:[#allocation14 + $0x114] ss:$8 sps:$4 sm:$0xff]  }
 0x378   : > { %5229 = vmatpush1.bf16.msra.mxu1 %v17206_v21  ;;  %5187 = vmatprep.subr.bf16.mxu0 %v17211_v22  ;;  %v17280_v21 = vld [vmem:[#allocation17 + $0x114] ss:$8 sps:$4 sm:$0xff]   ;;  %v4840_v22 = vsel %vm1735_vm2, %v4835_v15, %v4839_v16  ;;  %v17358_v15 = vld [vmem:[#allocation17 + $0x1e4] ss:$8 sps:$4 sm:$0xff]  }
 0x379   : > { %5230 = vmatprep.subr.bf16.mxu1 %v17214_v23  ;;  %v17275_v23 = vld [vmem:[#allocation14 + $0x110] ss:$8 sps:$4 sm:$0xff]   ;;  %v17353_v16 = vld [vmem:[#allocation14 + $0x1e0] ss:$8 sps:$4 sm:$0xff]  }
 0x37b   : > { %5188 = vmatpush1.bf16.msra.mxu0 %v17209_v24  ;;  %v17278_v24 = vld [vmem:[#allocation17 + $0x110] ss:$8 sps:$4 sm:$0xff]  }
 0x37c   : > { %5231 = vmatpush1.bf16.msra.mxu1 %v17212_v34  ;;  %5189 = vmatprep.subr.bf16.mxu0 %v17217_v25  ;;  %v17283_v34 = vld [vmem:[#allocation14 + $0x124] ss:$8 sps:$4 sm:$0xff]  }
 0x37d   : > { %5232 = vmatprep.subr.bf16.mxu1 %v17220_v26  ;;  %v17286_v25 = vld [vmem:[#allocation17 + $0x124] ss:$8 sps:$4 sm:$0xff]  }
 0x37e   : > { %v17281_v26 = vld [vmem:[#allocation14 + $0x120] ss:$8 sps:$4 sm:$0xff]  }
 0x37f   : > { %5190 = vmatpush1.bf16.msra.mxu0 %v17215_v27  ;;  %v17284_v27 = vld [vmem:[#allocation17 + $0x120] ss:$8 sps:$4 sm:$0xff]  }
 0x380   : > { %5233 = vmatpush1.bf16.msra.mxu1 %v17218_v29  ;;  %5191 = vmatprep.subr.bf16.mxu0 %v17223_v30  ;;  %v17289_v29 = vld [vmem:[#allocation14 + $0x134] ss:$8 sps:$4 sm:$0xff]  }
 0x381   : > { %5234 = vmatprep.subr.bf16.mxu1 %v17226_v62  ;;  %v17292_v30 = vld [vmem:[#allocation17 + $0x134] ss:$8 sps:$4 sm:$0xff]  }
 0x382   : > { %v17287_v62 = vld [vmem:[#allocation14 + $0x130] ss:$8 sps:$4 sm:$0xff]  }
 0x383   : > { %5192 = vmatpush1.bf16.msra.mxu0 %v17221_v31  ;;  %v17290_v31 = vld [vmem:[#allocation17 + $0x130] ss:$8 sps:$4 sm:$0xff]  }
 0x384   : > { %5235 = vmatpush1.bf16.msra.mxu1 %v17224_v32  ;;  %5193 = vmatprep.subr.bf16.mxu0 %v17229_v47  ;;  %v17295_v32 = vld [vmem:[#allocation14 + $0x144] ss:$8 sps:$4 sm:$0xff]  }
 0x385   : > { %5236 = vmatprep.subr.bf16.mxu1 %v17232_v36  ;;  %v17298_v47 = vld [vmem:[#allocation17 + $0x144] ss:$8 sps:$4 sm:$0xff]  }
 0x386   : > { %v17293_v36 = vld [vmem:[#allocation14 + $0x140] ss:$8 sps:$4 sm:$0xff]  }
 0x387   : > { %5194 = vmatpush1.bf16.msra.mxu0 %v17227_v37  ;;  %v17296_v37 = vld [vmem:[#allocation17 + $0x140] ss:$8 sps:$4 sm:$0xff]  }
 0x388   : > { %5237 = vmatpush1.bf16.msra.mxu1 %v17230_v39  ;;  %5195 = vmatprep.subr.bf16.mxu0 %v17235_v40  ;;  %v17301_v39 = vld [vmem:[#allocation14 + $0x154] ss:$8 sps:$4 sm:$0xff]   ;;  %v17299_v40 = vld [vmem:[#allocation14 + $0x150] ss:$8 sps:$4 sm:$0xff]  }
 0x389   : > { %5238 = vmatprep.subr.bf16.mxu1 %v17238_v41  ;;  %v17304_v41 = vld [vmem:[#allocation17 + $0x154] ss:$8 sps:$4 sm:$0xff]  }
 0x38b   : > { %5196 = vmatpush1.bf16.msra.mxu0 %v17233_v42  ;;  %v17302_v42 = vld [vmem:[#allocation17 + $0x150] ss:$8 sps:$4 sm:$0xff]  }
 0x38c   : > { %5239 = vmatpush1.bf16.msra.mxu1 %v17236_v43  ;;  %5197 = vmatprep.subr.bf16.mxu0 %v17241_v44  ;;  %v17307_v43 = vld [vmem:[#allocation14 + $0x164] ss:$8 sps:$4 sm:$0xff]  }
 0x38d   : > { %5240 = vmatprep.subr.bf16.mxu1 %v17244_v45  ;;  %v17310_v44 = vld [vmem:[#allocation17 + $0x164] ss:$8 sps:$4 sm:$0xff]  }
 0x38e   : > { %v17305_v45 = vld [vmem:[#allocation14 + $0x160] ss:$8 sps:$4 sm:$0xff]  }
 0x38f   : > { %5198 = vmatpush1.bf16.msra.mxu0 %v17239_v46  ;;  %v17313_v46 = vld [vmem:[#allocation14 + $0x174] ss:$8 sps:$4 sm:$0xff]  }
 0x390   : > { %5241 = vmatpush1.bf16.msra.mxu1 %v17242_v48  ;;  %5199 = vmatprep.subr.bf16.mxu0 %v17247_v51  ;;  %v17316_v48 = vld [vmem:[#allocation17 + $0x174] ss:$8 sps:$4 sm:$0xff]  }
 0x391   : > { %5242 = vmatprep.subr.bf16.mxu1 %v17250_v54  ;;  %v17311_v51 = vld [vmem:[#allocation14 + $0x170] ss:$8 sps:$4 sm:$0xff]  }
 0x392   : > { %v17314_v54 = vld [vmem:[#allocation17 + $0x170] ss:$8 sps:$4 sm:$0xff]  }
 0x393   : > { %5200 = vmatpush1.bf16.msra.mxu0 %v17245_v13  ;;  %v17322_v13 = vld [vmem:[#allocation17 + $0x184] ss:$8 sps:$4 sm:$0xff]  }
 0x394   : > { %5243 = vmatpush1.bf16.msra.mxu1 %v17248_v20  ;;  %5201 = vmatprep.subr.bf16.mxu0 %v17253_v38  ;;  %v17320_v20 = vld [vmem:[#allocation17 + $0x180] ss:$8 sps:$4 sm:$0xff]   ;;  %v17325_v38 = vld [vmem:[#allocation14 + $0x194] ss:$8 sps:$4 sm:$0xff]  }
 0x395   : > { %5244 = vmatprep.subr.bf16.mxu1 %v17256_v5  ;;  %v17328_v5 = vld [vmem:[#allocation17 + $0x194] ss:$8 sps:$4 sm:$0xff]  }
 0x397   : > { %5202 = vmatpush1.bf16.msra.mxu0 %v17251_v58  ;;  %v17323_v58 = vld [vmem:[#allocation14 + $0x190] ss:$8 sps:$4 sm:$0xff]  }
 0x398   : > { %5245 = vmatpush1.bf16.msra.mxu1 %v17254_v63  ;;  %5203 = vmatprep.subr.bf16.mxu0 %v17259_v0  ;;  %v17334_v63 = vld [vmem:[#allocation17 + $0x1a4] ss:$8 sps:$4 sm:$0xff]  }
 0x399   : > { %5246 = vmatprep.subr.bf16.mxu1 %v17262_v1  ;;  %v17329_v0 = vld [vmem:[#allocation14 + $0x1a0] ss:$8 sps:$4 sm:$0xff]  }
 0x39a   : > { %v17332_v1 = vld [vmem:[#allocation17 + $0x1a0] ss:$8 sps:$4 sm:$0xff]  }
 0x39b   : > { %5204 = vmatpush1.bf16.msra.mxu0 %v17257_v2  ;;  %v17335_v2 = vld [vmem:[#allocation14 + $0x1b0] ss:$8 sps:$4 sm:$0xff]  }
 0x39c   : > { %5247 = vmatpush1.bf16.msra.mxu1 %v17260_v4  ;;  %5205 = vmatprep.subr.bf16.mxu0 %v17265_v6  ;;  %v17340_v4 = vld [vmem:[#allocation17 + $0x1b4] ss:$8 sps:$4 sm:$0xff]  }
 0x39d   : > { %5248 = vmatprep.subr.bf16.mxu1 %v17268_v60  ;;  %v17341_v6 = vld [vmem:[#allocation14 + $0x1c0] ss:$8 sps:$4 sm:$0xff]   ;;  %v17343_v60 = vld [vmem:[#allocation14 + $0x1c4] ss:$8 sps:$4 sm:$0xff]  }
 0x39f   : > { %5206 = vmatpush1.bf16.msra.mxu0 %v17263_v7  ;;  %v17344_v7 = vld [vmem:[#allocation17 + $0x1c0] ss:$8 sps:$4 sm:$0xff]  }
 0x3a0   : > { %5249 = vmatpush1.bf16.msra.mxu1 %v17266_v11  ;;  %5664 = vmatprep.subr.bf16.mxu0 %v17271_v12  ;;  %v17347_v11 = vld [vmem:[#allocation14 + $0x1d0] ss:$8 sps:$4 sm:$0xff]  }
 0x3a1   : > { %6139 = vmatprep.subr.bf16.mxu1 %v17274_v14  ;;  %v17350_v12 = vld [vmem:[#allocation17 + $0x1d0] ss:$8 sps:$4 sm:$0xff]   ;;  %v17355_v14 = vld [vmem:[#allocation14 + $0x1e4] ss:$8 sps:$4 sm:$0xff]  }
 0x3a2   : > { %5208 = vmatmul.mubr.bf16.vlgmr.msra.gmra.mrb[0].mxu0 %v4840_v22 }
 0x3a3   : > { %5251 = vmatmul.mubr.bf16.vlgmr.msra.gmra.mrb[0].mxu1 %v4840_v22  ;;  %5665 = vmatpush1.bf16.msra.mxu0 %v17269_v17  ;;  %v17356_v17 = vld [vmem:[#allocation17 + $0x1e0] ss:$8 sps:$4 sm:$0xff]   ;;  %v17362_v22 = vld [vmem:[#allocation17 + $0x1f0] ss:$8 sps:$4 sm:$0xff]  }
 0x3a4   : > { %6140 = vmatpush1.bf16.msra.mxu1 %v17272_v18  ;;  %5666 = vmatprep.subr.bf16.mxu0 %v17277_v19  ;;  %v17361_v18 = vld [vmem:[#allocation14 + $0x1f4] ss:$8 sps:$4 sm:$0xff]   ;;  %v17359_v19 = vld [vmem:[#allocation14 + $0x1f0] ss:$8 sps:$4 sm:$0xff]  }
 0x3a5   : > { %6141 = vmatprep.subr.bf16.mxu1 %v17280_v21  ;;  %v17364_v21 = vld [vmem:[#allocation17 + $0x1f4] ss:$8 sps:$4 sm:$0xff]  }
 0x3a7   : > { %5667 = vmatpush1.bf16.msra.mxu0 %v17275_v23  ;;  %v17367_v23 = vld [vmem:[#allocation14 + $0x4] ss:$8 sps:$4 sm:$0xff]  }
 0x3a8   : > { %6142 = vmatpush1.bf16.msra.mxu1 %v17278_v24  ;;  %5668 = vmatprep.subr.bf16.mxu0 %v17283_v34  ;;  %v17370_v24 = vld [vmem:[#allocation17 + $0x4] ss:$8 sps:$4 sm:$0xff]   ;;  %v5269_v34 = vld [vmem:[#allocation12] sm:$0xf] }
 0x3a9   : > { %6143 = vmatprep.subr.bf16.mxu1 %v17286_v25  ;;  %v19416_v25 = vsub.s32 0, %v19326_v28 }
 0x3ab   : > { %5669 = vmatpush1.bf16.msra.mxu0 %v17281_v26  ;;  %v5281_v26 = vsub.s32 2, %v19326_v28 }
 0x3ac   : > { %6144 = vmatpush1.bf16.msra.mxu1 %v17284_v27  ;;  %5670 = vmatprep.subr.bf16.mxu0 %v17289_v29  ;;  %v19420_v27 = vsub.s32 1, %v19326_v28  ;;  %v5285_v29 = vsub.s32 3, %v19326_v28 }
 0x3ad   : > { %6145 = vmatprep.subr.bf16.mxu1 %v17292_v30  ;;  %v5274_v30 = vrot.slane %v5269_v34, %v19416_v25 }
 0x3af   : > { %5671 = vmatpush1.bf16.msra.mxu0 %v17287_v62  ;;  %v5282_v62 = vrot.slane %v5269_v34, %v5281_v26 }
 0x3b0   : > { %6146 = vmatpush1.bf16.msra.mxu1 %v17290_v31  ;;  %5672 = vmatprep.subr.bf16.mxu0 %v17295_v32  ;;  %v5278_v31 = vrot.slane %v5269_v34, %v19420_v27  ;;  %v5286_v32 = vrot.slane %v5269_v34, %v5285_v29  ;;  %v17376_v29 = vld [vmem:[#allocation17 + $0x14] ss:$8 sps:$4 sm:$0xff]  }
 0x3b1   : > { %6147 = vmatprep.subr.bf16.mxu1 %v17298_v47 }
 0x3b3   : > { %5673 = vmatpush1.bf16.msra.mxu0 %v17293_v36 }
 0x3b4   : > { %6148 = vmatpush1.bf16.msra.mxu1 %v17296_v37  ;;  %5674 = vmatprep.subr.bf16.mxu0 %v17301_v39 }
 0x3b5   : > { %6149 = vmatprep.subr.bf16.mxu1 %v17304_v41 }
 0x3b7   : > { %5675 = vmatpush1.bf16.msra.mxu0 %v17299_v40 }
 0x3b8   : > { %6150 = vmatpush1.bf16.msra.mxu1 %v17302_v42  ;;  %5676 = vmatprep.subr.bf16.mxu0 %v17307_v43 }
 0x3b9   : > { %6151 = vmatprep.subr.bf16.mxu1 %v17310_v44 }
 0x3bb   : > { %5677 = vmatpush1.bf16.msra.mxu0 %v17305_v45 }
 0x3bc   : > { %6152 = vmatpush1.bf16.msra.mxu1 %v17308_v35  ;;  %5678 = vmatprep.subr.bf16.mxu0 %v17313_v46 }
 0x3bd   : > { %6153 = vmatprep.subr.bf16.mxu1 %v17316_v48 }
 0x3bf   : > { %5679 = vmatpush1.bf16.msra.mxu0 %v17311_v51 }
 0x3c0   : > { %6154 = vmatpush1.bf16.msra.mxu1 %v17314_v54  ;;  %5680 = vmatprep.subr.bf16.mxu0 %v17319_v56 }
 0x3c1   : > { %6155 = vmatprep.subr.bf16.mxu1 %v17322_v13 }
 0x3c3   : > { %5681 = vmatpush1.bf16.msra.mxu0 %v17317_v57 }
 0x3c4   : > { %6156 = vmatpush1.bf16.msra.mxu1 %v17320_v20  ;;  %5682 = vmatprep.subr.bf16.mxu0 %v17325_v38 }
 0x3c5   : > { %6157 = vmatprep.subr.bf16.mxu1 %v17328_v5 }
 0x3c7   : > { %5683 = vmatpush1.bf16.msra.mxu0 %v17323_v58 }
 0x3c8   : > { %6158 = vmatpush1.bf16.msra.mxu1 %v17326_v59  ;;  %5684 = vmatprep.subr.bf16.mxu0 %v17331_v61 }
 0x3c9   : > { %6159 = vmatprep.subr.bf16.mxu1 %v17334_v63 }
 0x3cb   : > { %5685 = vmatpush1.bf16.msra.mxu0 %v17329_v0 }
 0x3cc   : > { %6160 = vmatpush1.bf16.msra.mxu1 %v17332_v1  ;;  %5686 = vmatprep.subr.bf16.mxu0 %v17337_v55 }
 0x3cd   : > { %6161 = vmatprep.subr.bf16.mxu1 %v17340_v4 }
 0x3cf   : > { %5687 = vmatpush1.bf16.msra.mxu0 %v17335_v2 }
 0x3d0   : > { %6162 = vmatpush1.bf16.msra.mxu1 %v17338_v3  ;;  %5688 = vmatprep.subr.bf16.mxu0 %v17343_v60 }
 0x3d1   : > { %6163 = vmatprep.subr.bf16.mxu1 %v17346_v8 }
 0x3d3   : > { %5689 = vmatpush1.bf16.msra.mxu0 %v17341_v6 }
 0x3d4   : > { %6164 = vmatpush1.bf16.msra.mxu1 %v17344_v7  ;;  %5690 = vmatprep.subr.bf16.mxu0 %v17349_v9  ;;  %v5372_v9 = vld [vmem:[#allocation3 + $0x8] sm:$0x80] }
 0x3d5   : > { %6165 = vmatprep.subr.bf16.mxu1 %v17352_v10  ;;  %v5374_v10 = vld [vmem:[#allocation3 + $0x18] sm:$0x80] }
 0x3d7   : > { %5691 = vmatpush1.bf16.msra.mxu0 %v17347_v11 }
 0x3d8   : > { %6166 = vmatpush1.bf16.msra.mxu1 %v17350_v12  ;;  %5692 = vmatprep.subr.bf16.mxu0 %v17355_v14 }
 0x3d9   : > { %6167 = vmatprep.subr.bf16.mxu1 %v17358_v15 }
 0x3db   : > { %5693 = vmatpush1.bf16.msra.mxu0 %v17353_v16 }
 0x3dc   : > { %6168 = vmatpush1.bf16.msra.mxu1 %v17356_v17  ;;  %5694 = vmatprep.subr.bf16.mxu0 %v17361_v18  ;;  %v17365_v17 = vld [vmem:[#allocation14] ss:$8 sps:$4 sm:$0xff]  }
 0x3dd   : > { %6169 = vmatprep.subr.bf16.mxu1 %v17364_v21 }
 0x3df   : > { %5695 = vmatpush1.bf16.msra.mxu0 %v17359_v19 }
 0x3e0   : > { %6170 = vmatpush1.bf16.msra.mxu1 %v17362_v22  ;;  %5903 = vmatprep.subr.bf16.mxu0 %v17367_v23  ;;  %v17368_v22 = vld [vmem:[#allocation17] ss:$8 sps:$4 sm:$0xff]  }
 0x3e1   : > { %6378 = vmatprep.subr.bf16.mxu1 %v17370_v24  ;;  %v17373_v24 = vld [vmem:[#allocation14 + $0x14] ss:$8 sps:$4 sm:$0xff]  }
 0x475   : > { %v5209_v47 = vpop.f32.mrb[0].mxu0 }
 0x476   : > { %v5291_v36 = vadd.f32 %v5274_v30, %v5209_v47  ;;  %v5252_v37 = vpop.f32.mrb[0].mxu1  ;;  %v5211_v39 = vpop.f32.mrb[1].mxu0  ;;  %v17371_v47 = vld [vmem:[#allocation14 + $0x10] ss:$8 sps:$4 sm:$0xff]  }
 0x477   : > { %v5293_v40 = vadd.f32 %v5282_v62, %v5252_v37  ;;  %v5292_v41 = vadd.f32 %v5278_v31, %v5211_v39  ;;  %v5254_v42 = vpop.f32.mrb[1].mxu1  ;;  %v5213_v43 = vpop.f32.mrb[2].mxu0 }
 0x478   : > { %v5299_v44 = vmax.f32 %v5291_v36, 0.0  ;;  %v5294_v45 = vadd.f32 %v5286_v32, %v5254_v42  ;;  %v5295_v35 = vadd.f32 %v5274_v30, %v5213_v43  ;;  %v5256_v46 = vpop.f32.mrb[2].mxu1  ;;  %v5215_v48 = vpop.f32.mrb[3].mxu0 }
 0x479   : > { %v5301_v28 = vmax.f32 %v5293_v40, 0.0  ;;  %v5300_v51 = vmax.f32 %v5292_v41, 0.0  ;;  %v5297_v54 = vadd.f32 %v5282_v62, %v5256_v46  ;;  %v5296_v56 = vadd.f32 %v5278_v31, %v5215_v48  ;;  %v5258_v13 = vpop.f32.mrb[3].mxu1  ;;  %v17374_v40 = vld [vmem:[#allocation17 + $0x10] ss:$8 sps:$4 sm:$0xff]  }
 0x47a   : > { %v5335_v57 = vrot.slane %v5299_v44, 4  ;;  %v5302_v20 = vmax.f32 %v5294_v45, 0.0  ;;  %v5303_v38 = vmax.f32 %v5295_v35, 0.0  ;;  %v5298_v5 = vadd.f32 %v5286_v32, %v5258_v13  ;;  %v17379_v41 = vld [vmem:[#allocation14 + $0x24] ss:$8 sps:$4 sm:$0xff]  }
 0x47b   : > { %v5337_v58 = vrot.slane %v5301_v28, 4  ;;  %v5336_v59 = vrot.slane %v5300_v51, 4  ;;  %v5305_v61 = vmax.f32 %v5297_v54, 0.0  ;;  %v5304_v63 = vmax.f32 %v5296_v56, 0.0  ;;  %v17382_v45 = vld [vmem:[#allocation17 + $0x24] ss:$8 sps:$4 sm:$0xff]  }
 0x47c   : > { %5359 = vst [vmem:[#allocation3 + $0x20] sm:$0xf0] %v5335_v57  ;;  %v5338_v0 = vrot.slane %v5302_v20, 4  ;;  %v5339_v1 = vrot.slane %v5303_v38, 4  ;;  %v5306_v2 = vmax.f32 %v5298_v5, 0.0 }
 0x47d   : > { %5361 = vst [vmem:[#allocation3 + $0x30] sm:$0xf0] %v5337_v58  ;;  %5360 = vst [vmem:[#allocation3 + $0x28] sm:$0xf0] %v5336_v59  ;;  %v5343_v55 = vrot.slane %v5305_v61, 4  ;;  %v5341_v3 = vrot.slane %v5304_v63, 4 }
 0x47e   : > { %5362 = vst [vmem:[#allocation3 + $0x38] sm:$0xf0] %v5338_v0  ;;  %v5340_v4 = vsel %vm565_vm0, %v5335_v57, %v5339_v1  ;;  %5367 = vst [vmem:[#allocation3 + $0x60] sm:$0xf] %v5339_v1  ;;  %v5345_v6 = vrot.slane %v5306_v2, 4 }
 0x47f   : > { %5363 = vst [vmem:[#allocation3 + $0x40] sm:$0xff] %v5340_v4  ;;  %v5344_v60 = vsel %vm565_vm0, %v5337_v58, %v5343_v55  ;;  %5369 = vst [vmem:[#allocation3 + $0x70] sm:$0xf] %v5343_v55  ;;  %v19428_v7 = vsel %vm565_vm0, %v5336_v59, %v5341_v3  ;;  %v17377_v54 = vld [vmem:[#allocation14 + $0x20] ss:$8 sps:$4 sm:$0xff]  }
 0x480   : > { %5368 = vst [vmem:[#allocation3 + $0x68] sm:$0xf] %v5341_v3  ;;  %5365 = vst [vmem:[#allocation3 + $0x50] sm:$0xff] %v5344_v60  ;;  %v19432_v8 = vsel %vm565_vm0, %v5338_v0, %v5345_v6  ;;  %v17380_v38 = vld [vmem:[#allocation17 + $0x20] ss:$8 sps:$4 sm:$0xff]  }
 0x481   : > { %5364 = vst [vmem:[#allocation3 + $0x48] sm:$0xff] %v19428_v7  ;;  %5370 = vst [vmem:[#allocation3 + $0x78] sm:$0xf] %v5345_v6  ;;  %v17385_v59 = vld [vmem:[#allocation14 + $0x34] ss:$8 sps:$4 sm:$0xff]  }
 0x482   : > { %5366 = vst [vmem:[#allocation3 + $0x58] sm:$0xff] %v19432_v8  ;;  %v17388_v0 = vld [vmem:[#allocation17 + $0x34] ss:$8 sps:$4 sm:$0xff]  }
 0x483   : > { %v19435_v11 = vld [vmem:[#allocation3 + $0x20] sm:$0xff] }
 0x484   : > { %v5376_v12 = vld [vmem:[#allocation3 + $0x28] sm:$0xff]  ;;  %v19437_v14 = vld [vmem:[#allocation3 + $0x30] sm:$0xff]  ;;  %v5467_v23 = vpack.c.bf16 %v5340_v4, %v19435_v11 }
 0x485   : > { %v5384_v15 = vpack.c.bf16 %v5376_v12, %v5372_v9  ;;  %v5468_v16 = vpack.c.bf16 %v19428_v7, %v5376_v12  ;;  %v5378_v18 = vld [vmem:[#allocation3 + $0x38] sm:$0xff]  ;;  %v5469_v26 = vpack.c.bf16 %v5344_v60, %v19437_v14  ;;  %v17383_v4 = vld [vmem:[#allocation14 + $0x30] ss:$8 sps:$4 sm:$0xff]  }
 0x486   : > { %v5386_v19 = vpack.c.bf16 %v5378_v18, %v5374_v10  ;;  %v5470_v21 = vpack.c.bf16 %v19432_v8, %v5378_v18  ;;  %v17386_v60 = vld [vmem:[#allocation17 + $0x30] ss:$8 sps:$4 sm:$0xff]   ;;  %v17391_v9 = vld [vmem:[#allocation14 + $0x44] ss:$8 sps:$4 sm:$0xff]   ;;  %v17400_v18 = vld [vmem:[#allocation17 + $0x54] ss:$8 sps:$4 sm:$0xff]  }
 0x487   : > { %v5392_v34 = vmul.bf16 %v5384_v15, %v19335_v52  ;;  %5696 = vmatprep.mubr.bf16.mxu0 %v5468_v16  ;;  %v17394_v12 = vld [vmem:[#allocation17 + $0x44] ss:$8 sps:$4 sm:$0xff]   ;;  %v17392_v16 = vld [vmem:[#allocation17 + $0x40] ss:$8 sps:$4 sm:$0xff]  }
 0x488   : > { %v5380_v30 = vld [vmem:[#allocation3 + $0x48] sm:$0x7f]  ;;  %v5394_v62 = vmul.bf16 %v5386_v19, %v19335_v52  ;;  %6171 = vmatprep.mubr.bf16.mxu1 %v5470_v21  ;;  %5697 = vmatmul.mubr.bf16.vlgmr.msra.gmra.mrb[4].mxu0 %v5467_v23  ;;  %v17389_v15 = vld [vmem:[#allocation14 + $0x40] ss:$8 sps:$4 sm:$0xff]  }
 0x489   : > { %v5388_v31 = vpack.c.bf16 %v5380_v30, %v5380_v30  ;;  %v5382_v32 = vld [vmem:[#allocation3 + $0x58] sm:$0x7f]  ;;  %5904 = vmatpush1.bf16.msra.mxu0 %v17365_v17  ;;  %6172 = vmatmul.mubr.bf16.vlgmr.msra.gmra.mrb[4].mxu1 %v5469_v26  ;;  %v5725_v36 = vshrl.u32 %v5392_v34, 16  ;;  %v5728_v37 = vshll.u32 %v5392_v34, 16  ;;  %v17397_v17 = vld [vmem:[#allocation14 + $0x54] ss:$8 sps:$4 sm:$0xff]  }
 0x48a   : > { %v5390_v39 = vpack.c.bf16 %v5382_v32, %v5382_v32  ;;  %6379 = vmatpush1.bf16.msra.mxu1 %v17368_v22  ;;  %5905 = vmatprep.subr.bf16.mxu0 %v17373_v24  ;;  %v6200_v43 = vshrl.u32 %v5394_v62, 16  ;;  %v6203_v44 = vshll.u32 %v5394_v62, 16  ;;  %v17395_v19 = vld [vmem:[#allocation14 + $0x50] ss:$8 sps:$4 sm:$0xff]   ;;  %v17403_v22 = vld [vmem:[#allocation14 + $0x64] ss:$8 sps:$4 sm:$0xff]  }
 0x48b   : > { %v5396_v42 = vmul.bf16 %v5388_v31, %v19335_v52  ;;  %6380 = vmatprep.subr.bf16.mxu1 %v17376_v29  ;;  %v5727_v46 = vrot.slane %v5725_v36, 3  ;;  %v5730_v48 = vrot.slane %v5728_v37, 4  ;;  %v17398_v21 = vld [vmem:[#allocation17 + $0x50] ss:$8 sps:$4 sm:$0xff]   ;;  %v17406_v23 = vld [vmem:[#allocation17 + $0x64] ss:$8 sps:$4 sm:$0xff]  }
 0x48c   : > { %v5398_v35 = vmul.bf16 %v5390_v39, %v19335_v52  ;;  %v6202_v56 = vrot.slane %v6200_v43, 3  ;;  %v6205_v13 = vrot.slane %v6203_v44, 4  ;;  %v17401_v24 = vld [vmem:[#allocation14 + $0x60] ss:$8 sps:$4 sm:$0xff]   ;;  %v17409_v26 = vld [vmem:[#allocation14 + $0x74] ss:$8 sps:$4 sm:$0xff]  }
 0x48d   : > { %v5733_v28 = vshrl.u32 %v5396_v42, 16  ;;  %v5736_v51 = vshll.u32 %v5396_v42, 16  ;;  %5906 = vmatpush1.bf16.msra.mxu0 %v17371_v47  ;;  %v5731_v1 = vor.u32 %v5730_v48, %v5727_v46  ;;  %v17404_v34 = vld [vmem:[#allocation17 + $0x60] ss:$8 sps:$4 sm:$0xff]   ;;  %v17412_v29 = vld [vmem:[#allocation17 + $0x74] ss:$8 sps:$4 sm:$0xff]  }
 0x48e   : > { %v6208_v57 = vshrl.u32 %v5398_v35, 16  ;;  %v6211_v20 = vshll.u32 %v5398_v35, 16  ;;  %6381 = vmatpush1.bf16.msra.mxu1 %v17374_v40  ;;  %5907 = vmatprep.subr.bf16.mxu0 %v17379_v41  ;;  %v6206_v55 = vor.u32 %v6205_v13, %v6202_v56  ;;  %v17407_v30 = vld [vmem:[#allocation14 + $0x70] ss:$8 sps:$4 sm:$0xff]   ;;  %v17415_v31 = vld [vmem:[#allocation14 + $0x84] ss:$8 sps:$4 sm:$0xff]  }
 0x48f   : > { %v5735_v5 = vrot.slane %v5733_v28, 3  ;;  %v5738_v58 = vrot.slane %v5736_v51, 4  ;;  %6382 = vmatprep.subr.bf16.mxu1 %v17382_v45  ;;  %v17410_v62 = vld [vmem:[#allocation17 + $0x70] ss:$8 sps:$4 sm:$0xff]   ;;  %v17418_v32 = vld [vmem:[#allocation17 + $0x84] ss:$8 sps:$4 sm:$0xff]  }
 0x490   : > { %v6210_v61 = vrot.slane %v6208_v57, 3  ;;  %v6213_v63 = vrot.slane %v6211_v20, 4  ;;  %v17413_v47 = vld [vmem:[#allocation14 + $0x80] ss:$8 sps:$4 sm:$0xff]   ;;  %v17421_v37 = vld [vmem:[#allocation14 + $0x94] ss:$8 sps:$4 sm:$0xff]  }
 0x491   : > { %v5739_v2 = vor.u32 %v5738_v58, %v5735_v5  ;;  %5908 = vmatpush1.bf16.msra.mxu0 %v17377_v54  ;;  %v17416_v36 = vld [vmem:[#allocation17 + $0x80] ss:$8 sps:$4 sm:$0xff]   ;;  %v17419_v39 = vld [vmem:[#allocation14 + $0x90] ss:$8 sps:$4 sm:$0xff]   ;;  %v17433_v35 = vld [vmem:[#allocation14 + $0xb4] ss:$8 sps:$4 sm:$0xff]  }
 0x492   : > { %v6214_v3 = vor.u32 %v6213_v63, %v6210_v61  ;;  %6383 = vmatpush1.bf16.msra.mxu1 %v17380_v38  ;;  %5909 = vmatprep.subr.bf16.mxu0 %v17385_v59  ;;  %v17424_v40 = vld [vmem:[#allocation17 + $0x94] ss:$8 sps:$4 sm:$0xff]   ;;  %v17422_v41 = vld [vmem:[#allocation17 + $0x90] ss:$8 sps:$4 sm:$0xff]   ;;  %v17427_v42 = vld [vmem:[#allocation14 + $0xa4] ss:$8 sps:$4 sm:$0xff]  }
 0x493   : > { %v5740_v6 = vsel %vm1175_vm1, %v5731_v1, %v5739_v2  ;;  %6384 = vmatprep.subr.bf16.mxu1 %v17388_v0  ;;  %v17425_v43 = vld [vmem:[#allocation14 + $0xa0] ss:$8 sps:$4 sm:$0xff]   ;;  %v5379_v48 = vld [vmem:[#allocation3 + $0x40] sm:$0x7f]  ;;  %v5371_v28 = vld [vmem:[#allocation3] sm:$0x80] }
 0x494   : > { %5935 = vmatprep.mubr.bf16.mxu0 %v5740_v6  ;;  %v6215_v10 = vsel %vm1175_vm1, %v6206_v55, %v6214_v3  ;;  %v17430_v44 = vld [vmem:[#allocation17 + $0xa4] ss:$8 sps:$4 sm:$0xff]   ;;  %v17428_v45 = vld [vmem:[#allocation17 + $0xa0] ss:$8 sps:$4 sm:$0xff]   ;;  %v17436_v46 = vld [vmem:[#allocation17 + $0xb4] ss:$8 sps:$4 sm:$0xff]   ;;  %v5387_v5 = vpack.c.bf16 %v5379_v48, %v5379_v48  ;;  %v5383_v61 = vpack.c.bf16 %v19435_v11, %v5371_v28 }
 0x495   : > { %6410 = vmatprep.mubr.bf16.mxu1 %v6215_v10  ;;  %5910 = vmatpush1.bf16.msra.mxu0 %v17383_v4  ;;  %v17431_v51 = vld [vmem:[#allocation14 + $0xb0] ss:$8 sps:$4 sm:$0xff]   ;;  %v5381_v54 = vld [vmem:[#allocation3 + $0x50] sm:$0x7f]  ;;  %v17439_v13 = vld [vmem:[#allocation14 + $0xc4] ss:$8 sps:$4 sm:$0xff]  }
 0x496   : > { %6385 = vmatpush1.bf16.msra.mxu1 %v17386_v60  ;;  %5911 = vmatprep.subr.bf16.mxu0 %v17391_v9  ;;  %v17434_v56 = vld [vmem:[#allocation17 + $0xb0] ss:$8 sps:$4 sm:$0xff]   ;;  %v5373_v20 = vld [vmem:[#allocation3 + $0x10] sm:$0x80]  ;;  %v17442_v38 = vld [vmem:[#allocation17 + $0xc4] ss:$8 sps:$4 sm:$0xff]   ;;  %v5389_v59 = vpack.c.bf16 %v5381_v54, %v5381_v54  ;;  %v5395_v60 = vmul.bf16 %v5387_v5, %v19335_v52  ;;  %v5391_v10 = vmul.bf16 %v5383_v61, %v19335_v52 }
 0x497   : > { %6386 = vmatprep.subr.bf16.mxu1 %v17394_v12  ;;  %v6422_v57 = vld [vmem:[#allocation3 + $0x28] sm:$0xfe]  ;;  %v6424_v58 = vld [vmem:[#allocation3 + $0x38] sm:$0xfe]  ;;  %v5385_v1 = vpack.c.bf16 %v19437_v14, %v5373_v20  ;;  %v6430_v3 = vld [vmem:[#allocation3 + $0x68] sm:$0x1] }
 0x498   : > { %v17437_v63 = vld [vmem:[#allocation14 + $0xc0] ss:$8 sps:$4 sm:$0xff]   ;;  %v6434_v0 = vpack.c.bf16 %v19428_v7, %v6422_v57  ;;  %v17445_v55 = vld [vmem:[#allocation14 + $0xd4] ss:$8 sps:$4 sm:$0xff]   ;;  %v6436_v4 = vpack.c.bf16 %v19432_v8, %v6424_v58  ;;  %v6432_v9 = vld [vmem:[#allocation3 + $0x78] sm:$0x1]  ;;  %v5397_v11 = vmul.bf16 %v5389_v59, %v19335_v52 }
 0x499   : > { %5912 = vmatpush1.bf16.msra.mxu0 %v17389_v15  ;;  %v17440_v2 = vld [vmem:[#allocation17 + $0xc0] ss:$8 sps:$4 sm:$0xff]   ;;  %v17448_v6 = vld [vmem:[#allocation17 + $0xd4] ss:$8 sps:$4 sm:$0xff]   ;;  %v6438_v15 = vpack.c.bf16 %v6430_v3, %v6430_v3  ;;  %v17458_v48 = vld [vmem:[#allocation17 + $0xf0] ss:$8 sps:$4 sm:$0xff]  }
 0x49a   : > { %6387 = vmatpush1.bf16.msra.mxu1 %v17392_v16  ;;  %5913 = vmatprep.subr.bf16.mxu0 %v17397_v17  ;;  %v17443_v12 = vld [vmem:[#allocation14 + $0xd0] ss:$8 sps:$4 sm:$0xff]   ;;  %v6442_v14 = vmul.bf16 %v6434_v0, %v19351_v49  ;;  %v5393_v16 = vmul.bf16 %v5385_v1, %v19335_v52  ;;  %v17463_v20 = vld [vmem:[#allocation14 + $0x204] ss:$8 sps:$4 sm:$0xff]  }
 0x49b   : > { %6388 = vmatprep.subr.bf16.mxu1 %v17400_v18  ;;  %v17446_v17 = vld [vmem:[#allocation17 + $0xd0] ss:$8 sps:$4 sm:$0xff]   ;;  %v17451_v18 = vld [vmem:[#allocation14 + $0xe4] ss:$8 sps:$4 sm:$0xff]  }
 0x49c   : > { %v17466_v59 = vld [vmem:[#allocation17 + $0x204] ss:$8 sps:$4 sm:$0xff]   ;;  %v6495_v61 = vshrl.u32 %v6442_v14, 16 }
 0x49d   : > { %5914 = vmatpush1.bf16.msra.mxu0 %v17395_v19  ;;  %v6440_v19 = vpack.c.bf16 %v6432_v9, %v6432_v9 }
 0x49e   : > { %6389 = vmatpush1.bf16.msra.mxu1 %v17398_v21  ;;  %5915 = vmatprep.subr.bf16.mxu0 %v17403_v22  ;;  %v6444_v21 = vmul.bf16 %v6436_v4, %v19351_v49  ;;  %v17454_v22 = vld [vmem:[#allocation17 + $0xe4] ss:$8 sps:$4 sm:$0xff]  }
 0x49f   : > { %6390 = vmatprep.subr.bf16.mxu1 %v17406_v23  ;;  %v5716_v23 = vshrl.u32 %v5395_v60, 16 }
 0x4a0   : > { %v6761_v0 = vshrl.u32 %v6444_v21, 16 }
 0x4a1   : > { %5916 = vmatpush1.bf16.msra.mxu0 %v17401_v24  ;;  %v5719_v24 = vshll.u32 %v5395_v60, 16 }
 0x4a2   : > { %6391 = vmatpush1.bf16.msra.mxu1 %v17404_v34  ;;  %5917 = vmatprep.subr.bf16.mxu0 %v17409_v26  ;;  %v17449_v34 = vld [vmem:[#allocation14 + $0xe0] ss:$8 sps:$4 sm:$0xff]   ;;  %v6191_v26 = vshrl.u32 %v5397_v11, 16 }
 0x4a3   : > { %6392 = vmatprep.subr.bf16.mxu1 %v17412_v29  ;;  %v6194_v29 = vshll.u32 %v5397_v11, 16 }
 0x4a5   : > { %5918 = vmatpush1.bf16.msra.mxu0 %v17407_v30  ;;  %v17452_v30 = vld [vmem:[#allocation17 + $0xe0] ss:$8 sps:$4 sm:$0xff]  }
 0x4a6   : > { %6393 = vmatpush1.bf16.msra.mxu1 %v17410_v62  ;;  %5919 = vmatprep.subr.bf16.mxu0 %v17415_v31  ;;  %v5708_v62 = vshrl.u32 %v5391_v10, 16  ;;  %v5711_v31 = vshll.u32 %v5391_v10, 16  ;;  %v17469_v10 = vld [vmem:[#allocation14 + $0x214] ss:$8 sps:$4 sm:$0xff]  }
 0x4a7   : > { %6394 = vmatprep.subr.bf16.mxu1 %v17418_v32  ;;  %v6446_v32 = vmul.bf16 %v6438_v15, %v19347_v33  ;;  %v17472_v15 = vld [vmem:[#allocation17 + $0x214] ss:$8 sps:$4 sm:$0xff]  }
 0x4a8   : > { %v5710_v28 = vrot.slane %v5708_v62, 3  ;;  %v17490_v62 = vld [vmem:[#allocation17 + $0x244] ss:$8 sps:$4 sm:$0xff]  }
 0x4a9   : > { %5920 = vmatpush1.bf16.msra.mxu0 %v17413_v47  ;;  %v6497_v47 = vshll.u32 %v6442_v14, 16 }
 0x4aa   : > { %6395 = vmatpush1.bf16.msra.mxu1 %v17416_v36  ;;  %5921 = vmatprep.subr.bf16.mxu0 %v17421_v37  ;;  %v17457_v36 = vld [vmem:[#allocation14 + $0xf4] ss:$8 sps:$4 sm:$0xff]   ;;  %v6183_v37 = vshrl.u32 %v5393_v16, 16 }
 0x4ab   : > { %6396 = vmatprep.subr.bf16.mxu1 %v17424_v40  ;;  %v6448_v40 = vmul.bf16 %v6440_v19, %v19347_v33  ;;  %v6499_v54 = vrot.slane %v6497_v47, 1  ;;  %v17475_v19 = vld [vmem:[#allocation14 + $0x224] ss:$8 sps:$4 sm:$0xff]   ;;  %v17493_v47 = vld [vmem:[#allocation14 + $0x254] ss:$8 sps:$4 sm:$0xff]  }
 0x4ad   : > { %5922 = vmatpush1.bf16.msra.mxu0 %v17419_v39  ;;  %v6186_v39 = vshll.u32 %v5393_v16, 16  ;;  %v6768_v5 = vshll.u32 %v6448_v40, 16  ;;  %v17467_v16 = vld [vmem:[#allocation14 + $0x210] ss:$8 sps:$4 sm:$0xff]   ;;  %v17499_v40 = vld [vmem:[#allocation14 + $0x264] ss:$8 sps:$4 sm:$0xff]  }
 0x4ae   : > { %6397 = vmatpush1.bf16.msra.mxu1 %v17422_v41  ;;  %5923 = vmatprep.subr.bf16.mxu0 %v17427_v42  ;;  %v6763_v41 = vshll.u32 %v6444_v21, 16  ;;  %v17460_v42 = vld [vmem:[#allocation17 + $0xf4] ss:$8 sps:$4 sm:$0xff]   ;;  %v17478_v21 = vld [vmem:[#allocation17 + $0x224] ss:$8 sps:$4 sm:$0xff]  }
 0x4af   : > { %6398 = vmatprep.subr.bf16.mxu1 %v17430_v44  ;;  %v5721_v44 = vrot.slane %v5719_v24, 4  ;;  %v6188_v57 = vrot.slane %v6186_v39, 4  ;;  %v6770_v9 = vrot.slane %v6768_v5, 1  ;;  %v17481_v24 = vld [vmem:[#allocation14 + $0x234] ss:$8 sps:$4 sm:$0xff]  }
 0x4b0   : > { %v17494_v39 = vld [vmem:[#allocation17 + $0x250] ss:$8 sps:$4 sm:$0xff]   ;;  %v17526_v5 = vld [vmem:[#allocation17 + $0x2a4] ss:$8 sps:$4 sm:$0xff]  }
 0x4b1   : > { %5924 = vmatpush1.bf16.msra.mxu0 %v17425_v43  ;;  %v5718_v43 = vrot.slane %v5716_v23, 3  ;;  %v17476_v23 = vld [vmem:[#allocation17 + $0x220] ss:$8 sps:$4 sm:$0xff]  }
 0x4b2   : > { %6399 = vmatpush1.bf16.msra.mxu1 %v17428_v45  ;;  %5925 = vmatprep.subr.bf16.mxu0 %v17433_v35  ;;  %v17455_v45 = vld [vmem:[#allocation14 + $0xf0] ss:$8 sps:$4 sm:$0xff]   ;;  %v6193_v35 = vrot.slane %v6191_v26, 3 }
 0x4b3   : > { %6400 = vmatprep.subr.bf16.mxu1 %v17436_v46  ;;  %v6196_v46 = vrot.slane %v6194_v29, 4  ;;  %v5722_v58 = vor.u32 %v5721_v44, %v5718_v43  ;;  %v17479_v26 = vld [vmem:[#allocation14 + $0x230] ss:$8 sps:$4 sm:$0xff]   ;;  %v17500_v43 = vld [vmem:[#allocation17 + $0x260] ss:$8 sps:$4 sm:$0xff]  }
 0x4b4   : > { %v17482_v29 = vld [vmem:[#allocation17 + $0x230] ss:$8 sps:$4 sm:$0xff]  }
 0x4b5   : > { %5926 = vmatpush1.bf16.msra.mxu0 %v17431_v51  ;;  %v5713_v51 = vrot.slane %v5711_v31, 4  ;;  %v17485_v31 = vld [vmem:[#allocation14 + $0x240] ss:$8 sps:$4 sm:$0xff]   ;;  %v17505_v44 = vld [vmem:[#allocation14 + $0x274] ss:$8 sps:$4 sm:$0xff]  }
 0x4b6   : > { %6401 = vmatpush1.bf16.msra.mxu1 %v17434_v56  ;;  %5927 = vmatprep.subr.bf16.mxu0 %v17439_v13  ;;  %v6502_v56 = vshll.u32 %v6446_v32, 16  ;;  %v6185_v13 = vrot.slane %v6183_v37, 3  ;;  %v17488_v32 = vld [vmem:[#allocation17 + $0x240] ss:$8 sps:$4 sm:$0xff]   ;;  %v17491_v37 = vld [vmem:[#allocation14 + $0x250] ss:$8 sps:$4 sm:$0xff]  }
 0x4b7   : > { %6402 = vmatprep.subr.bf16.mxu1 %v17442_v38  ;;  %v6765_v38 = vrot.slane %v6763_v41, 1  ;;  %v5714_v1 = vor.u32 %v5713_v51, %v5710_v28  ;;  %v17502_v41 = vld [vmem:[#allocation17 + $0x264] ss:$8 sps:$4 sm:$0xff]  }
 0x4b8   : > { %v6504_v3 = vrot.slane %v6502_v56, 1  ;;  %v6189_v4 = vor.u32 %v6188_v57, %v6185_v13  ;;  %v17514_v28 = vld [vmem:[#allocation17 + $0x284] ss:$8 sps:$4 sm:$0xff]   ;;  %v17517_v56 = vld [vmem:[#allocation14 + $0x294] ss:$8 sps:$4 sm:$0xff]  }
 0x4b9   : > { %5928 = vmatpush1.bf16.msra.mxu0 %v17437_v63  ;;  %v6197_v63 = vor.u32 %v6196_v46, %v6193_v35  ;;  %v6766_v60 = vor.u32 %v6765_v38, %v6761_v0  ;;  %v5723_v11 = vsel %vm1175_vm1, %v5714_v1, %v5722_v58  ;;  %v17503_v35 = vld [vmem:[#allocation14 + $0x270] ss:$8 sps:$4 sm:$0xff]   ;;  %v17509_v51 = vld [vmem:[#allocation14 + $0x280] ss:$8 sps:$4 sm:$0xff]   ;;  %v17523_v38 = vld [vmem:[#allocation14 + $0x2a4] ss:$8 sps:$4 sm:$0xff]  }
 0x4ba   : > { %6403 = vmatpush1.bf16.msra.mxu1 %v17440_v2  ;;  %5929 = vmatprep.subr.bf16.mxu0 %v17445_v55  ;;  %v17461_v2 = vld [vmem:[#allocation14 + $0x200] ss:$8 sps:$4 sm:$0xff]   ;;  %v6500_v55 = vor.u32 %v6499_v54, %v6495_v61  ;;  %v17506_v46 = vld [vmem:[#allocation17 + $0x270] ss:$8 sps:$4 sm:$0xff]  }
 0x4bb   : > { %6404 = vmatprep.subr.bf16.mxu1 %v17448_v6  ;;  %v17464_v6 = vld [vmem:[#allocation17 + $0x200] ss:$8 sps:$4 sm:$0xff]   ;;  %v17515_v13 = vld [vmem:[#allocation14 + $0x290] ss:$8 sps:$4 sm:$0xff]  }
 0x4bc   : > { %v6505_v14 = vsel %vm1735_vm2, %v6500_v55, %v6504_v3  ;;  %v17512_v54 = vld [vmem:[#allocation17 + $0x280] ss:$8 sps:$4 sm:$0xff]   ;;  %v17520_v57 = vld [vmem:[#allocation17 + $0x294] ss:$8 sps:$4 sm:$0xff]  }
 0x4bd   : > { %5930 = vmatpush1.bf16.msra.mxu0 %v17443_v12  ;;  %v6198_v12 = vsel %vm1175_vm1, %v6189_v4, %v6197_v63  ;;  %v19465_v58 = vld [vmem:[#allocation3 + $0x40] sm:$0xff]  ;;  %v6423_v63 = vld [vmem:[#allocation3 + $0x30] sm:$0xfe] }
 0x4be   : > { %6405 = vmatpush1.bf16.msra.mxu1 %v17446_v17  ;;  %5931 = vmatprep.subr.bf16.mxu0 %v17451_v18  ;;  %v6771_v17 = vsel %vm1735_vm2, %v6766_v60, %v6770_v9  ;;  %v17470_v18 = vld [vmem:[#allocation17 + $0x210] ss:$8 sps:$4 sm:$0xff]   ;;  %v17524_v1 = vld [vmem:[#allocation17 + $0x2a0] ss:$8 sps:$4 sm:$0xff]   ;;  %v17532_v55 = vld [vmem:[#allocation17 + $0x2b4] ss:$8 sps:$4 sm:$0xff]  }
 0x4bf   : > { %6406 = vmatprep.subr.bf16.mxu1 %v17454_v22  ;;  %v17473_v22 = vld [vmem:[#allocation14 + $0x220] ss:$8 sps:$4 sm:$0xff]   ;;  %v6421_v61 = vld [vmem:[#allocation3 + $0x20] sm:$0xfe]  ;;  %v6986_v60 = vld [vmem:[#allocation3 + $0x68] sm:$0x7] }
 0x4c0   : > { %v19467_v0 = vld [vmem:[#allocation3 + $0x50] sm:$0xff]  ;;  %v6433_v3 = vpack.c.bf16 %v19465_v58, %v6421_v61 }
 0x4c1   : > { %5932 = vmatpush1.bf16.msra.mxu0 %v17449_v34  ;;  %v17484_v34 = vld [vmem:[#allocation17 + $0x234] ss:$8 sps:$4 sm:$0xff]   ;;  %v6435_v4 = vpack.c.bf16 %v19467_v0, %v6423_v63  ;;  %v17530_v9 = vld [vmem:[#allocation17 + $0x2b0] ss:$8 sps:$4 sm:$0xff]  }
 0x4c2   : > { %6407 = vmatpush1.bf16.msra.mxu1 %v17452_v30  ;;  %5933 = vmatprep.subr.bf16.mxu0 %v17457_v36  ;;  %v17487_v30 = vld [vmem:[#allocation14 + $0x244] ss:$8 sps:$4 sm:$0xff]   ;;  %v17496_v36 = vld [vmem:[#allocation17 + $0x254] ss:$8 sps:$4 sm:$0xff]   ;;  %v17554_v63 = vld [vmem:[#allocation17 + $0x2f0] ss:$8 sps:$4 sm:$0xff]  }
 0x4c3   : > { %6408 = vmatprep.subr.bf16.mxu1 %v17460_v42  ;;  %v17497_v42 = vld [vmem:[#allocation14 + $0x260] ss:$8 sps:$4 sm:$0xff]  }
 0x4c5   : > { %5934 = vmatpush1.bf16.msra.mxu0 %v17455_v45  ;;  %v17508_v45 = vld [vmem:[#allocation17 + $0x274] ss:$8 sps:$4 sm:$0xff]  }
 0x4c6   : > { %6409 = vmatpush1.bf16.msra.mxu1 %v17458_v48  ;;  %6668 = vmatprep.subr.bf16.mxu0 %v17463_v20  ;;  %v17511_v48 = vld [vmem:[#allocation14 + $0x284] ss:$8 sps:$4 sm:$0xff]   ;;  %v17518_v20 = vld [vmem:[#allocation17 + $0x290] ss:$8 sps:$4 sm:$0xff]  }
 0x4c7   : > { %6934 = vmatprep.subr.bf16.mxu1 %v17466_v59  ;;  %v17521_v59 = vld [vmem:[#allocation14 + $0x2a0] ss:$8 sps:$4 sm:$0xff]  }
 0x4c8   : > { %5936 = vmatmul.mubr.bf16.vlgmr.msra.gmra.mrb[4].mxu0 %v5723_v11  ;;  %v17535_v11 = vld [vmem:[#allocation14 + $0x2c4] ss:$8 sps:$4 sm:$0xff]  }
 0x4c9   : > { %6411 = vmatmul.mubr.bf16.vlgmr.msra.gmra.mrb[4].mxu1 %v6198_v12  ;;  %6669 = vmatpush1.bf16.msra.mxu0 %v17461_v2  ;;  %v17529_v2 = vld [vmem:[#allocation14 + $0x2b4] ss:$8 sps:$4 sm:$0xff]   ;;  %v19472_v12 = vmul.bf16 %v6433_v3, %v19351_v49 }
 0x4ca   : > { %6700 = vmatprep.mubr.bf16.mxu0 %v6505_v14  ;;  %6935 = vmatpush1.bf16.msra.mxu1 %v17464_v6  ;;  %v17527_v6 = vld [vmem:[#allocation14 + $0x2b0] ss:$8 sps:$4 sm:$0xff]  }
 0x4cb   : > { %6966 = vmatprep.mubr.bf16.mxu1 %v6771_v17  ;;  %6670 = vmatprep.subr.bf16.mxu0 %v17469_v10  ;;  %v17538_v10 = vld [vmem:[#allocation17 + $0x2c4] ss:$8 sps:$4 sm:$0xff]   ;;  %v6982_v14 = vld [vmem:[#allocation3 + $0x28] sm:$0xf8] }
 0x4cc   : > { %6936 = vmatprep.subr.bf16.mxu1 %v17472_v15  ;;  %v19475_v15 = vmul.bf16 %v6435_v4, %v19351_v49  ;;  %v17533_v17 = vld [vmem:[#allocation14 + $0x2c0] ss:$8 sps:$4 sm:$0xff]  }
 0x4cd   : > { %6671 = vmatpush1.bf16.msra.mxu0 %v17467_v16  ;;  %v6984_v16 = vld [vmem:[#allocation3 + $0x38] sm:$0xf8] }
 0x4ce   : > { %6937 = vmatpush1.bf16.msra.mxu1 %v17470_v18  ;;  %6672 = vmatprep.subr.bf16.mxu0 %v17475_v19  ;;  %v6994_v18 = vpack.c.bf16 %v6986_v60, %v6986_v60  ;;  %v6988_v19 = vld [vmem:[#allocation3 + $0x78] sm:$0x7]  ;;  %v6749_v4 = vshrl.u32 %v19475_v15, 16 }
 0x4cf   : > { %6938 = vmatprep.subr.bf16.mxu1 %v17478_v21  ;;  %v17536_v21 = vld [vmem:[#allocation17 + $0x2c0] ss:$8 sps:$4 sm:$0xff]  }
 0x4d0   : > { %v17559_v60 = vld [vmem:[#allocation14 + $0x304] ss:$8 sps:$4 sm:$0xff]  }
 0x4d1   : > { %6673 = vmatpush1.bf16.msra.mxu0 %v17473_v22  ;;  %v17541_v22 = vld [vmem:[#allocation14 + $0x2d4] ss:$8 sps:$4 sm:$0xff]  }
 0x4d2   : > { %6939 = vmatpush1.bf16.msra.mxu1 %v17476_v23  ;;  %6674 = vmatprep.subr.bf16.mxu0 %v17481_v24  ;;  %v6429_v23 = vld [vmem:[#allocation3 + $0x60] sm:$0x1]  ;;  %v6485_v24 = vshll.u32 %v19472_v12, 16 }
 0x4d3   : > { %6940 = vmatprep.subr.bf16.mxu1 %v17484_v34  ;;  %v6431_v34 = vld [vmem:[#allocation3 + $0x70] sm:$0x1] }
 0x4d5   : > { %6675 = vmatpush1.bf16.msra.mxu0 %v17479_v26  ;;  %v6751_v26 = vshll.u32 %v19475_v15, 16  ;;  %v17560_v15 = vld [vmem:[#allocation17 + $0x300] ss:$8 sps:$4 sm:$0xff]  }
 0x4d6   : > { %6941 = vmatpush1.bf16.msra.mxu1 %v17482_v29  ;;  %6676 = vmatprep.subr.bf16.mxu0 %v17487_v30  ;;  %v6990_v29 = vpack.c.bf16 %v19428_v7, %v6982_v14  ;;  %v6996_v30 = vpack.c.bf16 %v6988_v19, %v6988_v19  ;;  %v17562_v14 = vld [vmem:[#allocation17 + $0x304] ss:$8 sps:$4 sm:$0xff]  }
 0x4d7   : > { %6942 = vmatprep.subr.bf16.mxu1 %v17490_v62  ;;  %v17539_v62 = vld [vmem:[#allocation14 + $0x2d0] ss:$8 sps:$4 sm:$0xff]  }
 0x4d8   : > { %v6998_v7 = vmul.bf16 %v6990_v29, %v19337_v53 }
 0x4d9   : > { %6677 = vmatpush1.bf16.msra.mxu0 %v17485_v31  ;;  %v17544_v31 = vld [vmem:[#allocation17 + $0x2d4] ss:$8 sps:$4 sm:$0xff]  }
 0x4da   : > { %6943 = vmatpush1.bf16.msra.mxu1 %v17488_v32  ;;  %6678 = vmatprep.subr.bf16.mxu0 %v17493_v47  ;;  %v7002_v32 = vmul.bf16 %v6994_v18, %v19337_v53  ;;  %v6992_v47 = vpack.c.bf16 %v19432_v8, %v6984_v16 }
 0x4db   : > { %6944 = vmatprep.subr.bf16.mxu1 %v17496_v36  ;;  %v17542_v36 = vld [vmem:[#allocation17 + $0x2d0] ss:$8 sps:$4 sm:$0xff]  }
 0x4dc   : > { %v7000_v8 = vmul.bf16 %v6992_v47, %v19337_v53 }
 0x4dd   : > { %6679 = vmatpush1.bf16.msra.mxu0 %v17491_v37  ;;  %v6437_v37 = vpack.c.bf16 %v6429_v23, %v6429_v23 }
 0x4de   : > { %6945 = vmatpush1.bf16.msra.mxu1 %v17494_v39  ;;  %6680 = vmatprep.subr.bf16.mxu0 %v17499_v40  ;;  %v6439_v39 = vpack.c.bf16 %v6431_v34, %v6431_v34  ;;  %v17547_v40 = vld [vmem:[#allocation14 + $0x2e4] ss:$8 sps:$4 sm:$0xff]   ;;  %v7335_v61 = vshll.u32 %v7000_v8, 16 }
 0x4df   : > { %6946 = vmatprep.subr.bf16.mxu1 %v17502_v41  ;;  %v17550_v41 = vld [vmem:[#allocation17 + $0x2e4] ss:$8 sps:$4 sm:$0xff]  }
 0x4e1   : > { %6681 = vmatpush1.bf16.msra.mxu0 %v17497_v42  ;;  %v6487_v42 = vrot.slane %v6485_v24, 1 }
 0x4e2   : > { %6947 = vmatpush1.bf16.msra.mxu1 %v17500_v43  ;;  %6682 = vmatprep.subr.bf16.mxu0 %v17505_v44  ;;  %v6753_v43 = vrot.slane %v6751_v26, 1  ;;  %v7004_v44 = vmul.bf16 %v6996_v30, %v19337_v53  ;;  %v17565_v30 = vld [vmem:[#allocation14 + $0x314] ss:$8 sps:$4 sm:$0xff]  }
 0x4e3   : > { %6948 = vmatprep.subr.bf16.mxu1 %v17508_v45  ;;  %v17545_v45 = vld [vmem:[#allocation14 + $0x2e0] ss:$8 sps:$4 sm:$0xff]  }
 0x4e4   : > { %v6754_v18 = vor.u32 %v6753_v43, %v6749_v4  ;;  %v17572_v43 = vld [vmem:[#allocation17 + $0x320] ss:$8 sps:$4 sm:$0xff]  }
 0x4e5   : > { %6683 = vmatpush1.bf16.msra.mxu0 %v17503_v35  ;;  %v7064_v35 = vshrl.u32 %v7002_v32, 16  ;;  %v17608_v4 = vld [vmem:[#allocation17 + $0x380] ss:$8 sps:$4 sm:$0xff]  }
 0x4e6   : > { %6949 = vmatpush1.bf16.msra.mxu1 %v17506_v46  ;;  %6684 = vmatprep.subr.bf16.mxu0 %v17511_v48  ;;  %v7067_v46 = vshll.u32 %v7002_v32, 16  ;;  %v17548_v48 = vld [vmem:[#allocation17 + $0x2e0] ss:$8 sps:$4 sm:$0xff]   ;;  %v17568_v32 = vld [vmem:[#allocation17 + $0x314] ss:$8 sps:$4 sm:$0xff]  }
 0x4e7   : > { %6950 = vmatprep.subr.bf16.mxu1 %v17514_v28  ;;  %v17553_v28 = vld [vmem:[#allocation14 + $0x2f4] ss:$8 sps:$4 sm:$0xff]  }
 0x4e8   : > { %v7069_v3 = vrot.slane %v7067_v46, 2  ;;  %v17583_v46 = vld [vmem:[#allocation14 + $0x344] ss:$8 sps:$4 sm:$0xff]  }
 0x4e9   : > { %6685 = vmatpush1.bf16.msra.mxu0 %v17509_v51  ;;  %v6445_v51 = vmul.bf16 %v6437_v37, %v19347_v33 }
 0x4ea   : > { %6951 = vmatpush1.bf16.msra.mxu1 %v17512_v54  ;;  %6686 = vmatprep.subr.bf16.mxu0 %v17517_v56  ;;  %v6447_v54 = vmul.bf16 %v6439_v39, %v19347_v33  ;;  %v17556_v56 = vld [vmem:[#allocation17 + $0x2f4] ss:$8 sps:$4 sm:$0xff]   ;;  %v17566_v39 = vld [vmem:[#allocation17 + $0x310] ss:$8 sps:$4 sm:$0xff]  }
 0x4eb   : > { %6952 = vmatprep.subr.bf16.mxu1 %v17520_v57  ;;  %v7059_v57 = vshll.u32 %v6998_v7, 16 }
 0x4ed   : > { %6687 = vmatpush1.bf16.msra.mxu0 %v17515_v13  ;;  %v7056_v13 = vshrl.u32 %v6998_v7, 16  ;;  %v17577_v7 = vld [vmem:[#allocation14 + $0x334] ss:$8 sps:$4 sm:$0xff]  }
 0x4ee   : > { %6953 = vmatpush1.bf16.msra.mxu1 %v17518_v20  ;;  %6688 = vmatprep.subr.bf16.mxu0 %v17523_v38  ;;  %v7340_v20 = vshrl.u32 %v7004_v44, 16  ;;  %v7343_v38 = vshll.u32 %v7004_v44, 16  ;;  %v17580_v44 = vld [vmem:[#allocation17 + $0x334] ss:$8 sps:$4 sm:$0xff]  }
 0x4ef   : > { %6954 = vmatprep.subr.bf16.mxu1 %v17526_v5  ;;  %v17551_v5 = vld [vmem:[#allocation14 + $0x2f0] ss:$8 sps:$4 sm:$0xff]   ;;  %v7058_v16 = vrot.slane %v7056_v13, 1 }
 0x4f0   : > { %v17590_v13 = vld [vmem:[#allocation17 + $0x350] ss:$8 sps:$4 sm:$0xff]  }
 0x4f1   : > { %6689 = vmatpush1.bf16.msra.mxu0 %v17521_v59  ;;  %v7332_v59 = vshrl.u32 %v7000_v8, 16  ;;  %v17586_v8 = vld [vmem:[#allocation17 + $0x344] ss:$8 sps:$4 sm:$0xff]  }
 0x4f2   : > { %6955 = vmatpush1.bf16.msra.mxu1 %v17524_v1  ;;  %6690 = vmatprep.subr.bf16.mxu0 %v17529_v2  ;;  %v6483_v1 = vshrl.u32 %v19472_v12, 16  ;;  %v6490_v2 = vshll.u32 %v6445_v51, 16  ;;  %v17589_v51 = vld [vmem:[#allocation14 + $0x354] ss:$8 sps:$4 sm:$0xff]  }
 0x4f3   : > { %6956 = vmatprep.subr.bf16.mxu1 %v17532_v55  ;;  %v7066_v55 = vrot.slane %v7064_v35, 1  ;;  %v7334_v19 = vrot.slane %v7332_v59, 1  ;;  %v17578_v35 = vld [vmem:[#allocation17 + $0x330] ss:$8 sps:$4 sm:$0xff]  }
 0x4f4   : > { %v6492_v12 = vrot.slane %v6490_v2, 1  ;;  %v17601_v59 = vld [vmem:[#allocation14 + $0x374] ss:$8 sps:$4 sm:$0xff]   ;;  %v17607_v2 = vld [vmem:[#allocation14 + $0x384] ss:$8 sps:$4 sm:$0xff]  }
 0x4f5   : > { %6691 = vmatpush1.bf16.msra.mxu0 %v17527_v6  ;;  %v6756_v6 = vshll.u32 %v6447_v54, 16  ;;  %v7070_v23 = vor.u32 %v7069_v3, %v7066_v55  ;;  %v17592_v54 = vld [vmem:[#allocation17 + $0x354] ss:$8 sps:$4 sm:$0xff]   ;;  %v17610_v55 = vld [vmem:[#allocation17 + $0x384] ss:$8 sps:$4 sm:$0xff]  }
 0x4f6   : > { %6957 = vmatpush1.bf16.msra.mxu1 %v17530_v9  ;;  %6692 = vmatprep.subr.bf16.mxu0 %v17535_v11  ;;  %v7342_v9 = vrot.slane %v7340_v20, 1  ;;  %v7345_v11 = vrot.slane %v7343_v38, 2  ;;  %v17598_v20 = vld [vmem:[#allocation17 + $0x364] ss:$8 sps:$4 sm:$0xff]  }
 0x4f7   : > { %6958 = vmatprep.subr.bf16.mxu1 %v17538_v10  ;;  %v6488_v10 = vor.u32 %v6487_v42, %v6483_v1  ;;  %v6758_v24 = vrot.slane %v6756_v6, 1  ;;  %v17569_v42 = vld [vmem:[#allocation14 + $0x320] ss:$8 sps:$4 sm:$0xff]   ;;  %v17602_v1 = vld [vmem:[#allocation17 + $0x370] ss:$8 sps:$4 sm:$0xff]  }
 0x4f8   : > { %v7346_v34 = vor.u32 %v7345_v11, %v7342_v9  ;;  %v17593_v38 = vld [vmem:[#allocation14 + $0x360] ss:$8 sps:$4 sm:$0xff]   ;;  %v17613_v6 = vld [vmem:[#allocation14 + $0x394] ss:$8 sps:$4 sm:$0xff]   ;;  %v17611_v9 = vld [vmem:[#allocation14 + $0x390] ss:$8 sps:$4 sm:$0xff]  }
 0x4f9   : > { %6693 = vmatpush1.bf16.msra.mxu0 %v17533_v17  ;;  %v7061_v17 = vrot.slane %v7059_v57, 2  ;;  %v6493_v26 = vsel %vm1735_vm2, %v6488_v10, %v6492_v12  ;;  %v17595_v57 = vld [vmem:[#allocation14 + $0x364] ss:$8 sps:$4 sm:$0xff]   ;;  %v17605_v3 = vld [vmem:[#allocation14 + $0x380] ss:$8 sps:$4 sm:$0xff]  }
 0x4fa   : > { %6959 = vmatpush1.bf16.msra.mxu1 %v17536_v21  ;;  %6694 = vmatprep.subr.bf16.mxu0 %v17541_v22  ;;  %v7337_v21 = vrot.slane %v7335_v61, 2  ;;  %v17557_v22 = vld [vmem:[#allocation14 + $0x300] ss:$8 sps:$4 sm:$0xff]   ;;  %v17614_v11 = vld [vmem:[#allocation17 + $0x390] ss:$8 sps:$4 sm:$0xff]  }
 0x4fb   : > { %6960 = vmatprep.subr.bf16.mxu1 %v17544_v31  ;;  %v7062_v29 = vor.u32 %v7061_v17, %v7058_v16  ;;  %v17604_v61 = vld [vmem:[#allocation17 + $0x374] ss:$8 sps:$4 sm:$0xff]   ;;  %v17619_v10 = vld [vmem:[#allocation14 + $0x3a4] ss:$8 sps:$4 sm:$0xff]  }
 0x4fc   : > { %v7338_v31 = vor.u32 %v7337_v21, %v7334_v19  ;;  %v17617_v16 = vld [vmem:[#allocation14 + $0x3a0] ss:$8 sps:$4 sm:$0xff]   ;;  %v6985_v21 = vld [vmem:[#allocation3 + $0x60] sm:$0x7]  ;;  %v17623_v12 = vld [vmem:[#allocation14 + $0x3b0] ss:$8 sps:$4 sm:$0xff]  }
 0x4fd   : > { %6695 = vmatpush1.bf16.msra.mxu0 %v17539_v62  ;;  %v6759_v62 = vsel %vm1735_vm2, %v6754_v18, %v6758_v24  ;;  %v7071_v47 = vsel %vm2257_vm3, %v7062_v29, %v7070_v23  ;;  %v17620_v17 = vld [vmem:[#allocation17 + $0x3a0] ss:$8 sps:$4 sm:$0xff]   ;;  %v17625_v18 = vld [vmem:[#allocation14 + $0x3b4] ss:$8 sps:$4 sm:$0xff]   ;;  %v6993_v29 = vpack.c.bf16 %v6985_v21, %v6985_v21  ;;  %v17658_v21 = vld [vmem:[#allocation17 + $0x404] ss:$8 sps:$4 sm:$0xff]  }
 0x4fe   : > { %6961 = vmatpush1.bf16.msra.mxu1 %v17542_v36  ;;  %6696 = vmatprep.subr.bf16.mxu0 %v17547_v40  ;;  %v17563_v36 = vld [vmem:[#allocation14 + $0x310] ss:$8 sps:$4 sm:$0xff]   ;;  %v7347_v37 = vsel %vm2257_vm3, %v7338_v31, %v7346_v34  ;;  %v17571_v40 = vld [vmem:[#allocation14 + $0x324] ss:$8 sps:$4 sm:$0xff]  }
 0x4ff   : > { %6962 = vmatprep.subr.bf16.mxu1 %v17550_v41  ;;  %v17574_v41 = vld [vmem:[#allocation17 + $0x324] ss:$8 sps:$4 sm:$0xff]   ;;  %v17628_v19 = vld [vmem:[#allocation17 + $0x3b4] ss:$8 sps:$4 sm:$0xff]   ;;  %v17626_v23 = vld [vmem:[#allocation17 + $0x3b0] ss:$8 sps:$4 sm:$0xff]  }
 0x500   : > { %v17631_v24 = vld [vmem:[#allocation14 + $0x3c4] ss:$8 sps:$4 sm:$0xff]  }
 0x501   : > { %6697 = vmatpush1.bf16.msra.mxu0 %v17545_v45  ;;  %v17575_v45 = vld [vmem:[#allocation14 + $0x330] ss:$8 sps:$4 sm:$0xff]  }
 0x502   : > { %6963 = vmatpush1.bf16.msra.mxu1 %v17548_v48  ;;  %6698 = vmatprep.subr.bf16.mxu0 %v17553_v28  ;;  %v17581_v48 = vld [vmem:[#allocation14 + $0x340] ss:$8 sps:$4 sm:$0xff]  }
 0x503   : > { %6964 = vmatprep.subr.bf16.mxu1 %v17556_v56  ;;  %v17584_v28 = vld [vmem:[#allocation17 + $0x340] ss:$8 sps:$4 sm:$0xff]   ;;  %v17587_v56 = vld [vmem:[#allocation14 + $0x350] ss:$8 sps:$4 sm:$0xff]  }
 0x504   : > { %v17634_v34 = vld [vmem:[#allocation17 + $0x3c4] ss:$8 sps:$4 sm:$0xff]  }
 0x505   : > { %6699 = vmatpush1.bf16.msra.mxu0 %v17551_v5  ;;  %v17596_v5 = vld [vmem:[#allocation17 + $0x360] ss:$8 sps:$4 sm:$0xff]  }
 0x506   : > { %6965 = vmatpush1.bf16.msra.mxu1 %v17554_v63  ;;  %7234 = vmatprep.subr.bf16.mxu0 %v17559_v60  ;;  %v17599_v63 = vld [vmem:[#allocation14 + $0x370] ss:$8 sps:$4 sm:$0xff]  }
 0x507   : > { %7510 = vmatprep.subr.bf16.mxu1 %v17562_v14  ;;  %v17616_v60 = vld [vmem:[#allocation17 + $0x394] ss:$8 sps:$4 sm:$0xff]   ;;  %v17622_v14 = vld [vmem:[#allocation17 + $0x3a4] ss:$8 sps:$4 sm:$0xff]  }
 0x508   : > { %6701 = vmatmul.mubr.bf16.vlgmr.msra.gmra.mrb[4].mxu0 %v6493_v26 }
 0x509   : > { %6967 = vmatmul.mubr.bf16.vlgmr.msra.gmra.mrb[4].mxu1 %v6759_v62  ;;  %7235 = vmatpush1.bf16.msra.mxu0 %v17557_v22  ;;  %v6987_v22 = vld [vmem:[#allocation3 + $0x70] sm:$0x7] }
 0x50a   : > { %7266 = vmatprep.mubr.bf16.mxu0 %v7071_v47  ;;  %7511 = vmatpush1.bf16.msra.mxu1 %v17560_v15  ;;  %v6981_v15 = vld [vmem:[#allocation3 + $0x20] sm:$0xf8]  ;;  %v6995_v31 = vpack.c.bf16 %v6987_v22, %v6987_v22  ;;  %v17632_v47 = vld [vmem:[#allocation17 + $0x3c0] ss:$8 sps:$4 sm:$0xff]  }
 0x50b   : > { %7542 = vmatprep.mubr.bf16.mxu1 %v7347_v37  ;;  %7236 = vmatprep.subr.bf16.mxu0 %v17565_v30  ;;  %v6989_v26 = vpack.c.bf16 %v19465_v58, %v6981_v15  ;;  %v6983_v30 = vld [vmem:[#allocation3 + $0x30] sm:$0xf8]  ;;  %v19502_v15 = vld [vmem:[#allocation3 + $0x58] sm:$0xff] }
 0x50c   : > { %7512 = vmatprep.subr.bf16.mxu1 %v17568_v32  ;;  %v6991_v62 = vpack.c.bf16 %v19467_v0, %v6983_v30  ;;  %v17629_v32 = vld [vmem:[#allocation14 + $0x3c0] ss:$8 sps:$4 sm:$0xff]  }
 0x50d   : > { %7237 = vmatpush1.bf16.msra.mxu0 %v17563_v36  ;;  %v17637_v36 = vld [vmem:[#allocation14 + $0x3d4] ss:$8 sps:$4 sm:$0xff]   ;;  %v17656_v30 = vld [vmem:[#allocation17 + $0x400] ss:$8 sps:$4 sm:$0xff]  }
 0x50e   : > { %7513 = vmatpush1.bf16.msra.mxu1 %v17566_v39  ;;  %7238 = vmatprep.subr.bf16.mxu0 %v17571_v40  ;;  %v17640_v37 = vld [vmem:[#allocation17 + $0x3d4] ss:$8 sps:$4 sm:$0xff]   ;;  %v6997_v39 = vmul.bf16 %v6989_v26, %v19337_v53  ;;  %v7001_v40 = vmul.bf16 %v6993_v29, %v19337_v53 }
 0x50f   : > { %7514 = vmatprep.subr.bf16.mxu1 %v17574_v41  ;;  %v6999_v41 = vmul.bf16 %v6991_v62, %v19337_v53  ;;  %v17653_v26 = vld [vmem:[#allocation14 + $0x400] ss:$8 sps:$4 sm:$0xff]  }
 0x511   : > { %7239 = vmatpush1.bf16.msra.mxu0 %v17569_v42  ;;  %v7003_v42 = vmul.bf16 %v6995_v31, %v19337_v53 }
 0x512   : > { %7515 = vmatpush1.bf16.msra.mxu1 %v17572_v43  ;;  %7240 = vmatprep.subr.bf16.mxu0 %v17577_v7  ;;  %v17635_v43 = vld [vmem:[#allocation14 + $0x3d0] ss:$8 sps:$4 sm:$0xff]  }
 0x513   : > { %7516 = vmatprep.subr.bf16.mxu1 %v17580_v44  ;;  %v17638_v7 = vld [vmem:[#allocation17 + $0x3d0] ss:$8 sps:$4 sm:$0xff]   ;;  %v17643_v44 = vld [vmem:[#allocation14 + $0x3e4] ss:$8 sps:$4 sm:$0xff]  }
 0x515   : > { %7241 = vmatpush1.bf16.msra.mxu0 %v17575_v45  ;;  %v17646_v45 = vld [vmem:[#allocation17 + $0x3e4] ss:$8 sps:$4 sm:$0xff]  }
 0x516   : > { %7517 = vmatpush1.bf16.msra.mxu1 %v17578_v35  ;;  %7242 = vmatprep.subr.bf16.mxu0 %v17583_v46  ;;  %v7039_v35 = vshrl.u32 %v6997_v39, 16  ;;  %v7042_v46 = vshll.u32 %v6997_v39, 16  ;;  %v17664_v39 = vld [vmem:[#allocation17 + $0x414] ss:$8 sps:$4 sm:$0xff]  }
 0x517   : > { %7518 = vmatprep.subr.bf16.mxu1 %v17586_v8  ;;  %v7047_v8 = vshrl.u32 %v7001_v40, 16 }
 0x519   : > { %7243 = vmatpush1.bf16.msra.mxu0 %v17581_v48  ;;  %v7050_v48 = vshll.u32 %v7001_v40, 16 }
 0x51a   : > { %7519 = vmatpush1.bf16.msra.mxu1 %v17584_v28  ;;  %7244 = vmatprep.subr.bf16.mxu0 %v17589_v51  ;;  %v7315_v28 = vshrl.u32 %v6999_v41, 16  ;;  %v7318_v51 = vshll.u32 %v6999_v41, 16  ;;  %v17659_v41 = vld [vmem:[#allocation14 + $0x410] ss:$8 sps:$4 sm:$0xff]  }
 0x51b   : > { %7520 = vmatprep.subr.bf16.mxu1 %v17592_v54  ;;  %v7323_v54 = vshrl.u32 %v7003_v42, 16 }
 0x51d   : > { %7245 = vmatpush1.bf16.msra.mxu0 %v17587_v56  ;;  %v7326_v56 = vshll.u32 %v7003_v42, 16 }
 0x51e   : > { %7521 = vmatpush1.bf16.msra.mxu1 %v17590_v13  ;;  %7246 = vmatprep.subr.bf16.mxu0 %v17595_v57  ;;  %v17641_v13 = vld [vmem:[#allocation14 + $0x3e0] ss:$8 sps:$4 sm:$0xff]   ;;  %v7562_v57 = vld [vmem:[#allocation3 + $0x68] sm:$0xf] }
 0x51f   : > { %7522 = vmatprep.subr.bf16.mxu1 %v17598_v20  ;;  %v17644_v20 = vld [vmem:[#allocation17 + $0x3e0] ss:$8 sps:$4 sm:$0xff]  }
 0x521   : > { %7247 = vmatpush1.bf16.msra.mxu0 %v17593_v38  ;;  %v17649_v38 = vld [vmem:[#allocation14 + $0x3f4] ss:$8 sps:$4 sm:$0xff]  }
 0x522   : > { %7523 = vmatpush1.bf16.msra.mxu1 %v17596_v5  ;;  %7248 = vmatprep.subr.bf16.mxu0 %v17601_v59  ;;  %v7564_v5 = vld [vmem:[#allocation3 + $0x78] sm:$0xf]  ;;  %v17652_v59 = vld [vmem:[#allocation17 + $0x3f4] ss:$8 sps:$4 sm:$0xff]  }
 0x523   : > { %7524 = vmatprep.subr.bf16.mxu1 %v17604_v61  ;;  %v7041_v61 = vrot.slane %v7039_v35, 1  ;;  %v17668_v35 = vld [vmem:[#allocation17 + $0x420] ss:$8 sps:$4 sm:$0xff]  }
 0x525   : > { %7249 = vmatpush1.bf16.msra.mxu0 %v17599_v63  ;;  %v7044_v63 = vrot.slane %v7042_v46, 2  ;;  %v17673_v46 = vld [vmem:[#allocation14 + $0x434] ss:$8 sps:$4 sm:$0xff]  }
 0x526   : > { %7525 = vmatpush1.bf16.msra.mxu1 %v17602_v1  ;;  %7250 = vmatprep.subr.bf16.mxu0 %v17607_v2  ;;  %v7049_v1 = vrot.slane %v7047_v8, 1  ;;  %v7052_v2 = vrot.slane %v7050_v48, 2  ;;  %v17676_v8 = vld [vmem:[#allocation17 + $0x434] ss:$8 sps:$4 sm:$0xff]  }
 0x527   : > { %7526 = vmatprep.subr.bf16.mxu1 %v17610_v55  ;;  %v7317_v55 = vrot.slane %v7315_v28, 1  ;;  %v17671_v48 = vld [vmem:[#allocation14 + $0x430] ss:$8 sps:$4 sm:$0xff]  }
 0x528   : > { %v17674_v28 = vld [vmem:[#allocation17 + $0x430] ss:$8 sps:$4 sm:$0xff]  }
 0x529   : > { %7251 = vmatpush1.bf16.msra.mxu0 %v17605_v3  ;;  %v7320_v3 = vrot.slane %v7318_v51, 2  ;;  %v17679_v51 = vld [vmem:[#allocation14 + $0x444] ss:$8 sps:$4 sm:$0xff]  }
 0x52a   : > { %7527 = vmatpush1.bf16.msra.mxu1 %v17608_v4  ;;  %7252 = vmatprep.subr.bf16.mxu0 %v17613_v6  ;;  %v7325_v4 = vrot.slane %v7323_v54, 1  ;;  %v7328_v6 = vrot.slane %v7326_v56, 2  ;;  %v17682_v54 = vld [vmem:[#allocation17 + $0x444] ss:$8 sps:$4 sm:$0xff]  }
 0x52b   : > { %7528 = vmatprep.subr.bf16.mxu1 %v17616_v60  ;;  %v7558_v60 = vld [vmem:[#allocation3 + $0x28] sm:$0xf0]  ;;  %v17677_v56 = vld [vmem:[#allocation14 + $0x440] ss:$8 sps:$4 sm:$0xff]  }
 0x52d   : > { %7253 = vmatpush1.bf16.msra.mxu0 %v17611_v9  ;;  %v17647_v9 = vld [vmem:[#allocation14 + $0x3f0] ss:$8 sps:$4 sm:$0xff]  }
 0x52e   : > { %7529 = vmatpush1.bf16.msra.mxu1 %v17614_v11  ;;  %7254 = vmatprep.subr.bf16.mxu0 %v17619_v10  ;;  %v7570_v11 = vpack.c.bf16 %v7562_v57, %v7562_v57  ;;  %v7560_v10 = vld [vmem:[#allocation3 + $0x38] sm:$0xf0]  ;;  %v17685_v57 = vld [vmem:[#allocation14 + $0x454] ss:$8 sps:$4 sm:$0xff]  }
 0x52f   : > { %7530 = vmatprep.subr.bf16.mxu1 %v17622_v14  ;;  %v17650_v14 = vld [vmem:[#allocation17 + $0x3f0] ss:$8 sps:$4 sm:$0xff]  }
 0x530   : > { %v7614_v29 = vrot.slane %v7570_v11, 2  ;;  %v17704_v11 = vld [vmem:[#allocation17 + $0x480] ss:$8 sps:$4 sm:$0xff]  }
 0x531   : > { %7255 = vmatpush1.bf16.msra.mxu0 %v17617_v16  ;;  %v17655_v16 = vld [vmem:[#allocation14 + $0x404] ss:$8 sps:$4 sm:$0xff]  }
 0x532   : > { %7531 = vmatpush1.bf16.msra.mxu1 %v17620_v17  ;;  %7256 = vmatprep.subr.bf16.mxu0 %v17625_v18  ;;  %v7572_v17 = vpack.c.bf16 %v7564_v5, %v7564_v5  ;;  %v7045_v18 = vor.u32 %v7044_v63, %v7041_v61  ;;  %v17686_v5 = vld [vmem:[#allocation17 + $0x450] ss:$8 sps:$4 sm:$0xff]   ;;  %v17694_v61 = vld [vmem:[#allocation17 + $0x464] ss:$8 sps:$4 sm:$0xff]  }
 0x533   : > { %7532 = vmatprep.subr.bf16.mxu1 %v17628_v19  ;;  %v7053_v19 = vor.u32 %v7052_v2, %v7049_v1  ;;  %v17689_v63 = vld [vmem:[#allocation14 + $0x460] ss:$8 sps:$4 sm:$0xff]   ;;  %v17697_v2 = vld [vmem:[#allocation14 + $0x474] ss:$8 sps:$4 sm:$0xff]  }
 0x534   : > { %v7866_v62 = vrot.slane %v7572_v17, 2  ;;  %v17692_v1 = vld [vmem:[#allocation17 + $0x460] ss:$8 sps:$4 sm:$0xff]   ;;  %v17710_v17 = vld [vmem:[#allocation17 + $0x490] ss:$8 sps:$4 sm:$0xff]  }
 0x535   : > { %7257 = vmatpush1.bf16.msra.mxu0 %v17623_v12  ;;  %v19499_v12 = vld [vmem:[#allocation3 + $0x48] sm:$0xff]  ;;  %v7054_v31 = vsel %vm2257_vm3, %v7045_v18, %v7053_v19  ;;  %v17715_v18 = vld [vmem:[#allocation14 + $0x4a4] ss:$8 sps:$4 sm:$0xff]  }
 0x536   : > { %7533 = vmatpush1.bf16.msra.mxu1 %v17626_v23  ;;  %7258 = vmatprep.subr.bf16.mxu0 %v17631_v24  ;;  %v7566_v22 = vpack.c.bf16 %v19499_v12, %v7558_v60  ;;  %v7321_v23 = vor.u32 %v7320_v3, %v7317_v55  ;;  %v7329_v24 = vor.u32 %v7328_v6, %v7325_v4  ;;  %v17700_v55 = vld [vmem:[#allocation17 + $0x474] ss:$8 sps:$4 sm:$0xff]   ;;  %v17698_v4 = vld [vmem:[#allocation17 + $0x470] ss:$8 sps:$4 sm:$0xff]   ;;  %v17703_v6 = vld [vmem:[#allocation14 + $0x484] ss:$8 sps:$4 sm:$0xff]  }
 0x537   : > { %7534 = vmatprep.subr.bf16.mxu1 %v17634_v34  ;;  %v7568_v34 = vpack.c.bf16 %v19502_v15, %v7560_v10  ;;  %v17695_v3 = vld [vmem:[#allocation14 + $0x470] ss:$8 sps:$4 sm:$0xff]   ;;  %v17709_v10 = vld [vmem:[#allocation14 + $0x494] ss:$8 sps:$4 sm:$0xff]  }
 0x538   : > { %v17706_v60 = vld [vmem:[#allocation17 + $0x484] ss:$8 sps:$4 sm:$0xff]  }
 0x539   : > { %7259 = vmatpush1.bf16.msra.mxu0 %v17629_v32  ;;  %v7613_v32 = vrot.slane %v7566_v22, 2  ;;  %v17718_v19 = vld [vmem:[#allocation17 + $0x4a4] ss:$8 sps:$4 sm:$0xff]   ;;  %v17716_v22 = vld [vmem:[#allocation17 + $0x4a0] ss:$8 sps:$4 sm:$0xff]  }
 0x53a   : > { %7535 = vmatpush1.bf16.msra.mxu1 %v17632_v47  ;;  %7260 = vmatprep.subr.bf16.mxu0 %v17637_v36  ;;  %v17661_v47 = vld [vmem:[#allocation14 + $0x414] ss:$8 sps:$4 sm:$0xff]   ;;  %v7330_v36 = vsel %vm2257_vm3, %v7321_v23, %v7329_v24 }
 0x53b   : > { %7536 = vmatprep.subr.bf16.mxu1 %v17640_v37  ;;  %v7865_v37 = vrot.slane %v7568_v34, 2  ;;  %v7615_v40 = vsel %vm2785_vm4, %v7613_v32, %v7614_v29  ;;  %v17721_v23 = vld [vmem:[#allocation14 + $0x4b4] ss:$8 sps:$4 sm:$0xff]   ;;  %v17719_v34 = vld [vmem:[#allocation14 + $0x4b0] ss:$8 sps:$4 sm:$0xff]  }
 0x53c   : > { %v17724_v24 = vld [vmem:[#allocation17 + $0x4b4] ss:$8 sps:$4 sm:$0xff]   ;;  %v17727_v29 = vld [vmem:[#allocation14 + $0x4c4] ss:$8 sps:$4 sm:$0xff]  }
 0x53d   : > { %7261 = vmatpush1.bf16.msra.mxu0 %v17635_v43  ;;  %v7867_v42 = vsel %vm2785_vm4, %v7865_v37, %v7866_v62  ;;  %v17662_v43 = vld [vmem:[#allocation17 + $0x410] ss:$8 sps:$4 sm:$0xff]   ;;  %v17730_v62 = vld [vmem:[#allocation17 + $0x4c4] ss:$8 sps:$4 sm:$0xff]  }
 0x53e   : > { %7537 = vmatpush1.bf16.msra.mxu1 %v17638_v7  ;;  %7262 = vmatprep.subr.bf16.mxu0 %v17643_v44  ;;  %v17667_v7 = vld [vmem:[#allocation14 + $0x424] ss:$8 sps:$4 sm:$0xff]   ;;  %v8078_v32 = vld [vmem:[#allocation3 + $0x28] sm:$0xe0]  ;;  %v8080_v37 = vld [vmem:[#allocation3 + $0x38] sm:$0xe0] }
 0x53f   : > { %7538 = vmatprep.subr.bf16.mxu1 %v17646_v45  ;;  %v17670_v44 = vld [vmem:[#allocation17 + $0x424] ss:$8 sps:$4 sm:$0xff]  }
 0x540   : > { %v17665_v45 = vld [vmem:[#allocation14 + $0x420] ss:$8 sps:$4 sm:$0xff]  }
 0x541   : > { %7263 = vmatpush1.bf16.msra.mxu0 %v17641_v13  ;;  %v17680_v13 = vld [vmem:[#allocation17 + $0x440] ss:$8 sps:$4 sm:$0xff]  }
 0x542   : > { %7539 = vmatpush1.bf16.msra.mxu1 %v17644_v20  ;;  %7264 = vmatprep.subr.bf16.mxu0 %v17649_v38  ;;  %v17688_v20 = vld [vmem:[#allocation17 + $0x454] ss:$8 sps:$4 sm:$0xff]  }
 0x543   : > { %7540 = vmatprep.subr.bf16.mxu1 %v17652_v59  ;;  %v17683_v38 = vld [vmem:[#allocation14 + $0x450] ss:$8 sps:$4 sm:$0xff]   ;;  %v17691_v59 = vld [vmem:[#allocation14 + $0x464] ss:$8 sps:$4 sm:$0xff]  }
 0x545   : > { %7265 = vmatpush1.bf16.msra.mxu0 %v17647_v9  ;;  %v17701_v9 = vld [vmem:[#allocation14 + $0x480] ss:$8 sps:$4 sm:$0xff]  }
 0x546   : > { %7541 = vmatpush1.bf16.msra.mxu1 %v17650_v14  ;;  %7778 = vmatprep.subr.bf16.mxu0 %v17655_v16  ;;  %v17712_v14 = vld [vmem:[#allocation17 + $0x494] ss:$8 sps:$4 sm:$0xff]  }
 0x547   : > { %8030 = vmatprep.subr.bf16.mxu1 %v17658_v21  ;;  %v17707_v16 = vld [vmem:[#allocation14 + $0x490] ss:$8 sps:$4 sm:$0xff]   ;;  %v17713_v21 = vld [vmem:[#allocation14 + $0x4a0] ss:$8 sps:$4 sm:$0xff]  }
 0x548   : > { %7267 = vmatmul.mubr.bf16.vlgmr.msra.gmra.mrb[4].mxu0 %v7054_v31  ;;  %v8084_v31 = vld [vmem:[#allocation3 + $0x78] sm:$0x1f] }
 0x549   : > { %7543 = vmatmul.mubr.bf16.vlgmr.msra.gmra.mrb[4].mxu1 %v7330_v36  ;;  %7779 = vmatpush1.bf16.msra.mxu0 %v17653_v26  ;;  %v17722_v26 = vld [vmem:[#allocation17 + $0x4b0] ss:$8 sps:$4 sm:$0xff]  }
 0x54a   : > { %7810 = vmatprep.mubr.bf16.mxu0 %v7615_v40  ;;  %8031 = vmatpush1.bf16.msra.mxu1 %v17656_v30  ;;  %v8082_v30 = vld [vmem:[#allocation3 + $0x68] sm:$0x1f] }
 0x54b   : > { %8062 = vmatprep.mubr.bf16.mxu1 %v7867_v42  ;;  %7780 = vmatprep.subr.bf16.mxu0 %v17661_v47  ;;  %v17725_v47 = vld [vmem:[#allocation14 + $0x4c0] ss:$8 sps:$4 sm:$0xff]   ;;  %v8090_v36 = vpack.c.bf16 %v8082_v30, %v8082_v30  ;;  %v17733_v40 = vld [vmem:[#allocation14 + $0x4d4] ss:$8 sps:$4 sm:$0xff]  }
 0x54c   : > { %8032 = vmatprep.subr.bf16.mxu1 %v17664_v39  ;;  %v17728_v39 = vld [vmem:[#allocation17 + $0x4c0] ss:$8 sps:$4 sm:$0xff]   ;;  %v17736_v42 = vld [vmem:[#allocation17 + $0x4d4] ss:$8 sps:$4 sm:$0xff]  }
 0x54d   : > { %7781 = vmatpush1.bf16.msra.mxu0 %v17659_v41  ;;  %v8092_v41 = vpack.c.bf16 %v8084_v31, %v8084_v31  ;;  %v17749_v31 = vld [vmem:[#allocation14 + $0x500] ss:$8 sps:$4 sm:$0xff]  }
 0x54e   : > { %8033 = vmatpush1.bf16.msra.mxu1 %v17662_v43  ;;  %7782 = vmatprep.subr.bf16.mxu0 %v17667_v7  ;;  %v8086_v43 = vpack.c.bf16 %v19499_v12, %v8078_v32  ;;  %v8088_v7 = vpack.c.bf16 %v19502_v15, %v8080_v37 }
 0x54f   : > { %8034 = vmatprep.subr.bf16.mxu1 %v17670_v44  ;;  %v17731_v44 = vld [vmem:[#allocation14 + $0x4d0] ss:$8 sps:$4 sm:$0xff]  }
 0x551   : > { %7783 = vmatpush1.bf16.msra.mxu0 %v17665_v45  ;;  %v8098_v45 = vmul.bf16 %v8090_v36, %v19353_v50 }
 0x552   : > { %8035 = vmatpush1.bf16.msra.mxu1 %v17668_v35  ;;  %7784 = vmatprep.subr.bf16.mxu0 %v17673_v46  ;;  %v17734_v35 = vld [vmem:[#allocation17 + $0x4d0] ss:$8 sps:$4 sm:$0xff]   ;;  %v17739_v46 = vld [vmem:[#allocation14 + $0x4e4] ss:$8 sps:$4 sm:$0xff]  }
 0x553   : > { %8036 = vmatprep.subr.bf16.mxu1 %v17676_v8  ;;  %v8100_v8 = vmul.bf16 %v8092_v41, %v19353_v50 }
 0x555   : > { %7785 = vmatpush1.bf16.msra.mxu0 %v17671_v48  ;;  %v17742_v48 = vld [vmem:[#allocation17 + $0x4e4] ss:$8 sps:$4 sm:$0xff]  }
 0x556   : > { %8037 = vmatpush1.bf16.msra.mxu1 %v17674_v28  ;;  %7786 = vmatprep.subr.bf16.mxu0 %v17679_v51  ;;  %v8094_v28 = vmul.bf16 %v8086_v43, %v19353_v50  ;;  %v7557_v51 = vld [vmem:[#allocation3 + $0x20] sm:$0xf0]  ;;  %v17760_v43 = vld [vmem:[#allocation17 + $0x514] ss:$8 sps:$4 sm:$0xff]  }
 0x557   : > { %8038 = vmatprep.subr.bf16.mxu1 %v17682_v54  ;;  %v7561_v54 = vld [vmem:[#allocation3 + $0x60] sm:$0xf] }
 0x559   : > { %7787 = vmatpush1.bf16.msra.mxu0 %v17677_v56  ;;  %v8096_v56 = vmul.bf16 %v8088_v7, %v19353_v50 }
 0x55a   : > { %8039 = vmatpush1.bf16.msra.mxu1 %v17680_v13  ;;  %7788 = vmatprep.subr.bf16.mxu0 %v17685_v57  ;;  %v17737_v13 = vld [vmem:[#allocation14 + $0x4e0] ss:$8 sps:$4 sm:$0xff]   ;;  %v7563_v57 = vld [vmem:[#allocation3 + $0x70] sm:$0xf] }
 0x55b   : > { %8040 = vmatprep.subr.bf16.mxu1 %v17688_v20  ;;  %v8160_v20 = vshrl.u32 %v8098_v45, 16 }
 0x55d   : > { %7789 = vmatpush1.bf16.msra.mxu0 %v17683_v38  ;;  %v8163_v38 = vshll.u32 %v8098_v45, 16 }
 0x55e   : > { %8041 = vmatpush1.bf16.msra.mxu1 %v17686_v5  ;;  %7790 = vmatprep.subr.bf16.mxu0 %v17691_v59  ;;  %v17740_v5 = vld [vmem:[#allocation17 + $0x4e0] ss:$8 sps:$4 sm:$0xff]   ;;  %v17745_v59 = vld [vmem:[#allocation14 + $0x4f4] ss:$8 sps:$4 sm:$0xff]  }
 0x55f   : > { %8042 = vmatprep.subr.bf16.mxu1 %v17694_v61  ;;  %v8436_v61 = vshrl.u32 %v8100_v8, 16 }
 0x561   : > { %7791 = vmatpush1.bf16.msra.mxu0 %v17689_v63  ;;  %v8439_v63 = vshll.u32 %v8100_v8, 16  ;;  %v17766_v8 = vld [vmem:[#allocation17 + $0x524] ss:$8 sps:$4 sm:$0xff]  }
 0x562   : > { %8043 = vmatpush1.bf16.msra.mxu1 %v17692_v1  ;;  %7792 = vmatprep.subr.bf16.mxu0 %v17697_v2  ;;  %v17748_v1 = vld [vmem:[#allocation17 + $0x4f4] ss:$8 sps:$4 sm:$0xff]   ;;  %v7565_v2 = vpack.c.bf16 %v19465_v58, %v7557_v51 }
 0x563   : > { %8044 = vmatprep.subr.bf16.mxu1 %v17700_v55  ;;  %v7569_v55 = vpack.c.bf16 %v7561_v54, %v7561_v54  ;;  %v17769_v51 = vld [vmem:[#allocation14 + $0x534] ss:$8 sps:$4 sm:$0xff]  }
 0x564   : > { %v7610_v58 = vrot.slane %v7565_v2, 2  ;;  %v17772_v54 = vld [vmem:[#allocation17 + $0x534] ss:$8 sps:$4 sm:$0xff]   ;;  %v17787_v2 = vld [vmem:[#allocation14 + $0x564] ss:$8 sps:$4 sm:$0xff]  }
 0x565   : > { %7793 = vmatpush1.bf16.msra.mxu0 %v17695_v3  ;;  %v7559_v3 = vld [vmem:[#allocation3 + $0x30] sm:$0xf0] }
 0x566   : > { %8045 = vmatpush1.bf16.msra.mxu1 %v17698_v4  ;;  %7794 = vmatprep.subr.bf16.mxu0 %v17703_v6  ;;  %v8152_v4 = vshrl.u32 %v8094_v28, 16  ;;  %v8155_v6 = vshll.u32 %v8094_v28, 16  ;;  %v17764_v28 = vld [vmem:[#allocation17 + $0x520] ss:$8 sps:$4 sm:$0xff]  }
 0x567   : > { %8046 = vmatprep.subr.bf16.mxu1 %v17706_v60  ;;  %v7567_v60 = vpack.c.bf16 %v19467_v0, %v7559_v3  ;;  %v17785_v3 = vld [vmem:[#allocation14 + $0x560] ss:$8 sps:$4 sm:$0xff]  }
 0x569   : > { %7795 = vmatpush1.bf16.msra.mxu0 %v17701_v9  ;;  %v7571_v9 = vpack.c.bf16 %v7563_v57, %v7563_v57  ;;  %v7862_v0 = vrot.slane %v7567_v60, 2  ;;  %v17775_v57 = vld [vmem:[#allocation14 + $0x544] ss:$8 sps:$4 sm:$0xff]   ;;  %v17796_v60 = vld [vmem:[#allocation17 + $0x574] ss:$8 sps:$4 sm:$0xff]  }
 0x56a   : > { %8047 = vmatpush1.bf16.msra.mxu1 %v17704_v11  ;;  %7796 = vmatprep.subr.bf16.mxu0 %v17709_v10  ;;  %v8428_v11 = vshrl.u32 %v8096_v56, 16  ;;  %v8431_v10 = vshll.u32 %v8096_v56, 16  ;;  %v17767_v56 = vld [vmem:[#allocation14 + $0x530] ss:$8 sps:$4 sm:$0xff]  }
 0x56b   : > { %8048 = vmatprep.subr.bf16.mxu1 %v17712_v14  ;;  %v17743_v14 = vld [vmem:[#allocation14 + $0x4f0] ss:$8 sps:$4 sm:$0xff]  }
 0x56c   : > { %v8430_v30 = vrot.slane %v8428_v11, 2  ;;  %v17794_v11 = vld [vmem:[#allocation17 + $0x570] ss:$8 sps:$4 sm:$0xff]  }
 0x56d   : > { %7797 = vmatpush1.bf16.msra.mxu0 %v17707_v16  ;;  %v8162_v16 = vrot.slane %v8160_v20, 2  ;;  %v17778_v20 = vld [vmem:[#allocation17 + $0x544] ss:$8 sps:$4 sm:$0xff]  }
 0x56e   : > { %8049 = vmatpush1.bf16.msra.mxu1 %v17710_v17  ;;  %7798 = vmatprep.subr.bf16.mxu0 %v17715_v18  ;;  %v8165_v17 = vrot.slane %v8163_v38, 3  ;;  %v17746_v18 = vld [vmem:[#allocation17 + $0x4f0] ss:$8 sps:$4 sm:$0xff]   ;;  %v17773_v38 = vld [vmem:[#allocation14 + $0x540] ss:$8 sps:$4 sm:$0xff]  }
 0x56f   : > { %8050 = vmatprep.subr.bf16.mxu1 %v17718_v19  ;;  %v17751_v19 = vld [vmem:[#allocation14 + $0x504] ss:$8 sps:$4 sm:$0xff]  }
 0x570   : > { %v8166_v32 = vor.u32 %v8165_v17, %v8162_v16  ;;  %v17797_v16 = vld [vmem:[#allocation14 + $0x580] ss:$8 sps:$4 sm:$0xff]  }
 0x571   : > { %7799 = vmatpush1.bf16.msra.mxu0 %v17713_v21  ;;  %v8438_v21 = vrot.slane %v8436_v61, 2  ;;  %v17784_v61 = vld [vmem:[#allocation17 + $0x554] ss:$8 sps:$4 sm:$0xff]   ;;  %v17800_v17 = vld [vmem:[#allocation17 + $0x580] ss:$8 sps:$4 sm:$0xff]  }
 0x572   : > { %8051 = vmatpush1.bf16.msra.mxu1 %v17716_v22  ;;  %7800 = vmatprep.subr.bf16.mxu0 %v17721_v23  ;;  %v8441_v22 = vrot.slane %v8439_v63, 3  ;;  %v7611_v23 = vrot.slane %v7569_v55, 2  ;;  %v17779_v63 = vld [vmem:[#allocation14 + $0x550] ss:$8 sps:$4 sm:$0xff]  }
 0x573   : > { %8052 = vmatprep.subr.bf16.mxu1 %v17724_v24  ;;  %v17754_v24 = vld [vmem:[#allocation17 + $0x504] ss:$8 sps:$4 sm:$0xff]  }
 0x574   : > { %v8442_v36 = vor.u32 %v8441_v22, %v8438_v21  ;;  %v7612_v37 = vsel %vm2785_vm4, %v7610_v58, %v7611_v23  ;;  %v17790_v55 = vld [vmem:[#allocation17 + $0x564] ss:$8 sps:$4 sm:$0xff]   ;;  %v17806_v22 = vld [vmem:[#allocation17 + $0x590] ss:$8 sps:$4 sm:$0xff]  }
 0x575   : > { %7801 = vmatpush1.bf16.msra.mxu0 %v17719_v34  ;;  %v8154_v34 = vrot.slane %v8152_v4, 2  ;;  %v17788_v4 = vld [vmem:[#allocation17 + $0x560] ss:$8 sps:$4 sm:$0xff]   ;;  %v17803_v21 = vld [vmem:[#allocation14 + $0x590] ss:$8 sps:$4 sm:$0xff]  }
 0x576   : > { %8053 = vmatpush1.bf16.msra.mxu1 %v17722_v26  ;;  %7802 = vmatprep.subr.bf16.mxu0 %v17727_v29  ;;  %v8157_v26 = vrot.slane %v8155_v6, 3  ;;  %v7863_v29 = vrot.slane %v7571_v9, 2  ;;  %v17793_v6 = vld [vmem:[#allocation14 + $0x574] ss:$8 sps:$4 sm:$0xff]   ;;  %v17791_v9 = vld [vmem:[#allocation14 + $0x570] ss:$8 sps:$4 sm:$0xff]  }
 0x577   : > { %8054 = vmatprep.subr.bf16.mxu1 %v17730_v62  ;;  %v8433_v62 = vrot.slane %v8431_v10, 3  ;;  %v17799_v10 = vld [vmem:[#allocation14 + $0x584] ss:$8 sps:$4 sm:$0xff]  }
 0x578   : > { %v7864_v41 = vsel %vm2785_vm4, %v7862_v0, %v7863_v29  ;;  %v17811_v58 = vld [vmem:[#allocation14 + $0x5a4] ss:$8 sps:$4 sm:$0xff]   ;;  %v17817_v0 = vld [vmem:[#allocation14 + $0x5b4] ss:$8 sps:$4 sm:$0xff]  }
 0x579   : > { %7803 = vmatpush1.bf16.msra.mxu0 %v17725_v47  ;;  %v17752_v47 = vld [vmem:[#allocation17 + $0x500] ss:$8 sps:$4 sm:$0xff]   ;;  %v17814_v23 = vld [vmem:[#allocation17 + $0x5a4] ss:$8 sps:$4 sm:$0xff]  }
 0x57a   : > { %8055 = vmatpush1.bf16.msra.mxu1 %v17728_v39  ;;  %7804 = vmatprep.subr.bf16.mxu0 %v17733_v40  ;;  %v8158_v39 = vor.u32 %v8157_v26, %v8154_v34  ;;  %v17757_v40 = vld [vmem:[#allocation14 + $0x514] ss:$8 sps:$4 sm:$0xff]   ;;  %v8077_v34 = vld [vmem:[#allocation3 + $0x20] sm:$0xe0]  ;;  %v17812_v26 = vld [vmem:[#allocation17 + $0x5a0] ss:$8 sps:$4 sm:$0xff]  }
 0x57b   : > { %8056 = vmatprep.subr.bf16.mxu1 %v17736_v42  ;;  %v8434_v42 = vor.u32 %v8433_v62, %v8430_v30  ;;  %v8081_v29 = vld [vmem:[#allocation3 + $0x60] sm:$0x1f]  ;;  %v17820_v30 = vld [vmem:[#allocation17 + $0x5b4] ss:$8 sps:$4 sm:$0xff]  }
 0x57c   : > { %v8167_v7 = vsel %vm3289_vm5, %v8158_v39, %v8166_v32  ;;  %v19521_v62 = vld [vmem:[#allocation3 + $0x40] sm:$0xff] }
 0x57d   : > { %7805 = vmatpush1.bf16.msra.mxu0 %v17731_v44  ;;  %v17755_v44 = vld [vmem:[#allocation14 + $0x510] ss:$8 sps:$4 sm:$0xff]   ;;  %v8443_v45 = vsel %vm3289_vm5, %v8434_v42, %v8442_v36  ;;  %v8079_v36 = vld [vmem:[#allocation3 + $0x30] sm:$0xe0] }
 0x57e   : > { %8057 = vmatpush1.bf16.msra.mxu1 %v17734_v35  ;;  %7806 = vmatprep.subr.bf16.mxu0 %v17739_v46  ;;  %v17758_v35 = vld [vmem:[#allocation17 + $0x510] ss:$8 sps:$4 sm:$0xff]   ;;  %v17763_v46 = vld [vmem:[#allocation14 + $0x524] ss:$8 sps:$4 sm:$0xff]  }
 0x57f   : > { %8058 = vmatprep.subr.bf16.mxu1 %v17742_v48  ;;  %v17761_v48 = vld [vmem:[#allocation14 + $0x520] ss:$8 sps:$4 sm:$0xff]   ;;  %v17815_v32 = vld [vmem:[#allocation14 + $0x5b0] ss:$8 sps:$4 sm:$0xff]  }
 0x580   : > { %v17818_v39 = vld [vmem:[#allocation17 + $0x5b0] ss:$8 sps:$4 sm:$0xff]   ;;  %v17826_v42 = vld [vmem:[#allocation17 + $0x5c4] ss:$8 sps:$4 sm:$0xff]  }
 0x581   : > { %7807 = vmatpush1.bf16.msra.mxu0 %v17737_v13  ;;  %v17770_v13 = vld [vmem:[#allocation17 + $0x530] ss:$8 sps:$4 sm:$0xff]  }
 0x582   : > { %8059 = vmatpush1.bf16.msra.mxu1 %v17740_v5  ;;  %7808 = vmatprep.subr.bf16.mxu0 %v17745_v59  ;;  %v17776_v5 = vld [vmem:[#allocation17 + $0x540] ss:$8 sps:$4 sm:$0xff]   ;;  %v17781_v59 = vld [vmem:[#allocation14 + $0x554] ss:$8 sps:$4 sm:$0xff]  }
 0x583   : > { %8060 = vmatprep.subr.bf16.mxu1 %v17748_v1  ;;  %v17782_v1 = vld [vmem:[#allocation17 + $0x550] ss:$8 sps:$4 sm:$0xff]  }
 0x585   : > { %7809 = vmatpush1.bf16.msra.mxu0 %v17743_v14  ;;  %v17802_v14 = vld [vmem:[#allocation17 + $0x584] ss:$8 sps:$4 sm:$0xff]  }
 0x586   : > { %8061 = vmatpush1.bf16.msra.mxu1 %v17746_v18  ;;  %8330 = vmatprep.subr.bf16.mxu0 %v17751_v19  ;;  %v17805_v18 = vld [vmem:[#allocation14 + $0x594] ss:$8 sps:$4 sm:$0xff]  }
 0x587   : > { %8606 = vmatprep.subr.bf16.mxu1 %v17754_v24  ;;  %v17808_v19 = vld [vmem:[#allocation17 + $0x594] ss:$8 sps:$4 sm:$0xff]  }
 0x588   : > { %7811 = vmatmul.mubr.bf16.vlgmr.msra.gmra.mrb[4].mxu0 %v7612_v37  ;;  %v17809_v24 = vld [vmem:[#allocation14 + $0x5a0] ss:$8 sps:$4 sm:$0xff]  }
 0x589   : > { %8063 = vmatmul.mubr.bf16.vlgmr.msra.gmra.mrb[4].mxu1 %v7864_v41  ;;  %8331 = vmatpush1.bf16.msra.mxu0 %v17749_v31  ;;  %v8085_v31 = vpack.c.bf16 %v19521_v62, %v8077_v34  ;;  %v8083_v37 = vld [vmem:[#allocation3 + $0x70] sm:$0x1f]  ;;  %v8658_v41 = vld [vmem:[#allocation3 + $0x68] sm:$0x7f] }
 0x58a   : > { %8362 = vmatprep.mubr.bf16.mxu0 %v8167_v7  ;;  %8607 = vmatpush1.bf16.msra.mxu1 %v17752_v47  ;;  %v8089_v47 = vpack.c.bf16 %v8081_v29, %v8081_v29  ;;  %v19525_v7 = vld [vmem:[#allocation3 + $0x50] sm:$0xff] }
 0x58b   : > { %8638 = vmatprep.mubr.bf16.mxu1 %v8443_v45  ;;  %8332 = vmatprep.subr.bf16.mxu0 %v17757_v40  ;;  %v17823_v40 = vld [vmem:[#allocation14 + $0x5c4] ss:$8 sps:$4 sm:$0xff]   ;;  %v17841_v34 = vld [vmem:[#allocation14 + $0x5f4] ss:$8 sps:$4 sm:$0xff]  }
 0x58c   : > { %8608 = vmatprep.subr.bf16.mxu1 %v17760_v43  ;;  %v8093_v43 = vmul.bf16 %v8085_v31, %v19353_v50  ;;  %v8660_v45 = vld [vmem:[#allocation3 + $0x78] sm:$0x7f]  ;;  %v17844_v29 = vld [vmem:[#allocation17 + $0x5f4] ss:$8 sps:$4 sm:$0xff]  }
 0x58d   : > { %8333 = vmatpush1.bf16.msra.mxu0 %v17755_v44  ;;  %v8087_v44 = vpack.c.bf16 %v19525_v7, %v8079_v36 }
 0x58e   : > { %8609 = vmatpush1.bf16.msra.mxu1 %v17758_v35  ;;  %8334 = vmatprep.subr.bf16.mxu0 %v17763_v46  ;;  %v8091_v35 = vpack.c.bf16 %v8083_v37, %v8083_v37  ;;  %v8654_v46 = vld [vmem:[#allocation3 + $0x28] sm:$0x80] }
 0x58f   : > { %8610 = vmatprep.subr.bf16.mxu1 %v17766_v8  ;;  %v17821_v8 = vld [vmem:[#allocation14 + $0x5c0] ss:$8 sps:$4 sm:$0xff]  }
 0x591   : > { %8335 = vmatpush1.bf16.msra.mxu0 %v17761_v48  ;;  %v8097_v48 = vmul.bf16 %v8089_v47, %v19353_v50 }
 0x592   : > { %8611 = vmatpush1.bf16.msra.mxu1 %v17764_v28  ;;  %8336 = vmatprep.subr.bf16.mxu0 %v17769_v51  ;;  %v8666_v28 = vpack.c.bf16 %v8658_v41, %v8658_v41  ;;  %v8656_v51 = vld [vmem:[#allocation3 + $0x38] sm:$0x80]  ;;  %v17839_v41 = vld [vmem:[#allocation14 + $0x5f0] ss:$8 sps:$4 sm:$0xff]  }
 0x593   : > { %8612 = vmatprep.subr.bf16.mxu1 %v17772_v54  ;;  %v17824_v54 = vld [vmem:[#allocation17 + $0x5c0] ss:$8 sps:$4 sm:$0xff]  }
 0x595   : > { %8337 = vmatpush1.bf16.msra.mxu0 %v17767_v56  ;;  %v17829_v56 = vld [vmem:[#allocation14 + $0x5d4] ss:$8 sps:$4 sm:$0xff]  }
 0x596   : > { %8613 = vmatpush1.bf16.msra.mxu1 %v17770_v13  ;;  %8338 = vmatprep.subr.bf16.mxu0 %v17775_v57  ;;  %v8668_v13 = vpack.c.bf16 %v8660_v45, %v8660_v45  ;;  %v17832_v57 = vld [vmem:[#allocation17 + $0x5d4] ss:$8 sps:$4 sm:$0xff]   ;;  %v17847_v45 = vld [vmem:[#allocation14 + $0x604] ss:$8 sps:$4 sm:$0xff]  }
 0x597   : > { %8614 = vmatprep.subr.bf16.mxu1 %v17778_v20  ;;  %v8135_v20 = vshrl.u32 %v8093_v43, 16 }
 0x599   : > { %8339 = vmatpush1.bf16.msra.mxu0 %v17773_v38  ;;  %v8095_v38 = vmul.bf16 %v8087_v44, %v19353_v50  ;;  %v17842_v44 = vld [vmem:[#allocation17 + $0x5f0] ss:$8 sps:$4 sm:$0xff]  }
 0x59a   : > { %8615 = vmatpush1.bf16.msra.mxu1 %v17776_v5  ;;  %8340 = vmatprep.subr.bf16.mxu0 %v17781_v59  ;;  %v8662_v5 = vpack.c.bf16 %v19499_v12, %v8654_v46  ;;  %v8138_v59 = vshll.u32 %v8093_v43, 16  ;;  %v8137_v12 = vrot.slane %v8135_v20, 2 }
 0x59b   : > { %8616 = vmatprep.subr.bf16.mxu1 %v17784_v61  ;;  %v8099_v61 = vmul.bf16 %v8091_v35, %v19353_v50 }
 0x59d   : > { %8341 = vmatpush1.bf16.msra.mxu0 %v17779_v63  ;;  %v8664_v63 = vpack.c.bf16 %v19502_v15, %v8656_v51  ;;  %v8140_v15 = vrot.slane %v8138_v59, 3  ;;  %v17848_v59 = vld [vmem:[#allocation17 + $0x600] ss:$8 sps:$4 sm:$0xff]  }
 0x59e   : > { %8617 = vmatpush1.bf16.msra.mxu1 %v17782_v1  ;;  %8342 = vmatprep.subr.bf16.mxu0 %v17787_v2  ;;  %v17827_v1 = vld [vmem:[#allocation14 + $0x5d0] ss:$8 sps:$4 sm:$0xff]   ;;  %v8143_v2 = vshrl.u32 %v8097_v48, 16 }
 0x59f   : > { %8618 = vmatprep.subr.bf16.mxu1 %v17790_v55  ;;  %v8146_v55 = vshll.u32 %v8097_v48, 16 }
 0x5a1   : > { %8343 = vmatpush1.bf16.msra.mxu0 %v17785_v3  ;;  %v8674_v3 = vmul.bf16 %v8666_v28, %v19335_v52  ;;  %v17850_v28 = vld [vmem:[#allocation17 + $0x604] ss:$8 sps:$4 sm:$0xff]  }
 0x5a2   : > { %8619 = vmatpush1.bf16.msra.mxu1 %v17788_v4  ;;  %8344 = vmatprep.subr.bf16.mxu0 %v17793_v6  ;;  %v17830_v4 = vld [vmem:[#allocation17 + $0x5d0] ss:$8 sps:$4 sm:$0xff]   ;;  %v17835_v6 = vld [vmem:[#allocation14 + $0x5e4] ss:$8 sps:$4 sm:$0xff]  }
 0x5a3   : > { %8620 = vmatprep.subr.bf16.mxu1 %v17796_v60  ;;  %v8676_v60 = vmul.bf16 %v8668_v13, %v19335_v52 }
 0x5a5   : > { %8345 = vmatpush1.bf16.msra.mxu0 %v17791_v9  ;;  %v17838_v9 = vld [vmem:[#allocation17 + $0x5e4] ss:$8 sps:$4 sm:$0xff]  }
 0x5a6   : > { %8621 = vmatpush1.bf16.msra.mxu1 %v17794_v11  ;;  %8346 = vmatprep.subr.bf16.mxu0 %v17799_v10  ;;  %v8411_v11 = vshrl.u32 %v8095_v38, 16  ;;  %v8414_v10 = vshll.u32 %v8095_v38, 16  ;;  %v17845_v38 = vld [vmem:[#allocation14 + $0x600] ss:$8 sps:$4 sm:$0xff]  }
 0x5a7   : > { %8622 = vmatprep.subr.bf16.mxu1 %v17802_v14  ;;  %v8670_v14 = vmul.bf16 %v8662_v5, %v19335_v52 }
 0x5a8   : > { %v8416_v31 = vrot.slane %v8414_v10, 3  ;;  %v17862_v10 = vld [vmem:[#allocation17 + $0x624] ss:$8 sps:$4 sm:$0xff]  }
 0x5a9   : > { %8347 = vmatpush1.bf16.msra.mxu0 %v17797_v16  ;;  %v8419_v16 = vshrl.u32 %v8099_v61, 16  ;;  %v8731_v47 = vshll.u32 %v8670_v14, 16 }
 0x5aa   : > { %8623 = vmatpush1.bf16.msra.mxu1 %v17800_v17  ;;  %8348 = vmatprep.subr.bf16.mxu0 %v17805_v18  ;;  %v8422_v17 = vshll.u32 %v8099_v61, 16  ;;  %v8672_v18 = vmul.bf16 %v8664_v63, %v19335_v52 }
 0x5ab   : > { %8624 = vmatprep.subr.bf16.mxu1 %v17808_v19  ;;  %v17833_v19 = vld [vmem:[#allocation14 + $0x5e0] ss:$8 sps:$4 sm:$0xff]   ;;  %v8421_v36 = vrot.slane %v8419_v16, 2  ;;  %v17865_v16 = vld [vmem:[#allocation14 + $0x634] ss:$8 sps:$4 sm:$0xff]  }
 0x5ac   : > { %v8424_v37 = vrot.slane %v8422_v17, 3  ;;  %v17868_v17 = vld [vmem:[#allocation17 + $0x634] ss:$8 sps:$4 sm:$0xff]  }
 0x5ad   : > { %8349 = vmatpush1.bf16.msra.mxu0 %v17803_v21  ;;  %v8145_v21 = vrot.slane %v8143_v2, 2  ;;  %v17853_v2 = vld [vmem:[#allocation14 + $0x614] ss:$8 sps:$4 sm:$0xff]  }
 0x5ae   : > { %8625 = vmatpush1.bf16.msra.mxu1 %v17806_v22  ;;  %8350 = vmatprep.subr.bf16.mxu0 %v17811_v58  ;;  %v8148_v22 = vrot.slane %v8146_v55, 3  ;;  %v8736_v58 = vshrl.u32 %v8674_v3, 16  ;;  %v8425_v13 = vor.u32 %v8424_v37, %v8421_v36  ;;  %v17892_v36 = vld [vmem:[#allocation17 + $0x674] ss:$8 sps:$4 sm:$0xff]  }
 0x5af   : > { %8626 = vmatprep.subr.bf16.mxu1 %v17814_v23  ;;  %v8739_v23 = vshll.u32 %v8674_v3, 16  ;;  %v17887_v37 = vld [vmem:[#allocation14 + $0x670] ss:$8 sps:$4 sm:$0xff]  }
 0x5b0   : > { %v8149_v48 = vor.u32 %v8148_v22, %v8145_v21  ;;  %v17871_v21 = vld [vmem:[#allocation14 + $0x644] ss:$8 sps:$4 sm:$0xff]  }
 0x5b1   : > { %8351 = vmatpush1.bf16.msra.mxu0 %v17809_v24  ;;  %v17836_v24 = vld [vmem:[#allocation17 + $0x5e0] ss:$8 sps:$4 sm:$0xff]   ;;  %v8741_v43 = vrot.slane %v8739_v23, 4  ;;  %v17874_v22 = vld [vmem:[#allocation17 + $0x644] ss:$8 sps:$4 sm:$0xff]  }
 0x5b2   : > { %8627 = vmatpush1.bf16.msra.mxu1 %v17812_v26  ;;  %8352 = vmatprep.subr.bf16.mxu0 %v17817_v0  ;;  %v9012_v26 = vshrl.u32 %v8676_v60, 16  ;;  %v9015_v0 = vshll.u32 %v8676_v60, 16  ;;  %v17851_v60 = vld [vmem:[#allocation14 + $0x610] ss:$8 sps:$4 sm:$0xff]   ;;  %v17872_v23 = vld [vmem:[#allocation17 + $0x640] ss:$8 sps:$4 sm:$0xff]  }
 0x5b3   : > { %8628 = vmatprep.subr.bf16.mxu1 %v17820_v30  ;;  %v8413_v30 = vrot.slane %v8411_v11, 2  ;;  %v17859_v11 = vld [vmem:[#allocation14 + $0x624] ss:$8 sps:$4 sm:$0xff]  }
 0x5b4   : > { %v9014_v35 = vrot.slane %v9012_v26, 3  ;;  %v9017_v46 = vrot.slane %v9015_v0, 4  ;;  %v17875_v26 = vld [vmem:[#allocation14 + $0x650] ss:$8 sps:$4 sm:$0xff]  }
 0x5b5   : > { %8353 = vmatpush1.bf16.msra.mxu0 %v17815_v32  ;;  %v8728_v32 = vshrl.u32 %v8670_v14, 16  ;;  %v17857_v14 = vld [vmem:[#allocation14 + $0x620] ss:$8 sps:$4 sm:$0xff]   ;;  %v17878_v0 = vld [vmem:[#allocation17 + $0x650] ss:$8 sps:$4 sm:$0xff]  }
 0x5b6   : > { %8629 = vmatpush1.bf16.msra.mxu1 %v17818_v39  ;;  %8354 = vmatprep.subr.bf16.mxu0 %v17823_v40  ;;  %v9004_v39 = vshrl.u32 %v8672_v18, 16  ;;  %v9007_v40 = vshll.u32 %v8672_v18, 16  ;;  %v9018_v61 = vor.u32 %v9017_v46, %v9014_v35  ;;  %v17863_v18 = vld [vmem:[#allocation14 + $0x630] ss:$8 sps:$4 sm:$0xff]  }
 0x5b7   : > { %8630 = vmatprep.subr.bf16.mxu1 %v17826_v42  ;;  %v8738_v42 = vrot.slane %v8736_v58, 3  ;;  %v8730_v51 = vrot.slane %v8728_v32, 3  ;;  %v17869_v58 = vld [vmem:[#allocation14 + $0x640] ss:$8 sps:$4 sm:$0xff]   ;;  %v17899_v35 = vld [vmem:[#allocation14 + $0x690] ss:$8 sps:$4 sm:$0xff]  }
 0x5b8   : > { %v9009_v20 = vrot.slane %v9007_v40, 4  ;;  %v17884_v32 = vld [vmem:[#allocation17 + $0x660] ss:$8 sps:$4 sm:$0xff]   ;;  %v17902_v46 = vld [vmem:[#allocation17 + $0x690] ss:$8 sps:$4 sm:$0xff]  }
 0x5b9   : > { %8355 = vmatpush1.bf16.msra.mxu0 %v17821_v8  ;;  %v8141_v8 = vor.u32 %v8140_v15, %v8137_v12  ;;  %v8742_v5 = vor.u32 %v8741_v43, %v8738_v42  ;;  %v17854_v12 = vld [vmem:[#allocation17 + $0x610] ss:$8 sps:$4 sm:$0xff]   ;;  %v17860_v15 = vld [vmem:[#allocation17 + $0x620] ss:$8 sps:$4 sm:$0xff]  }
 0x5ba   : > { %8631 = vmatpush1.bf16.msra.mxu1 %v17824_v54  ;;  %8356 = vmatprep.subr.bf16.mxu0 %v17829_v56  ;;  %v8733_v54 = vrot.slane %v8731_v47, 4  ;;  %v8417_v56 = vor.u32 %v8416_v31, %v8413_v30  ;;  %v17886_v30 = vld [vmem:[#allocation17 + $0x664] ss:$8 sps:$4 sm:$0xff]   ;;  %v17889_v47 = vld [vmem:[#allocation14 + $0x674] ss:$8 sps:$4 sm:$0xff]  }
 0x5bb   : > { %8632 = vmatprep.subr.bf16.mxu1 %v17832_v57  ;;  %v9006_v57 = vrot.slane %v9004_v39, 3  ;;  %v8150_v63 = vsel %vm3289_vm5, %v8141_v8, %v8149_v48  ;;  %v17881_v31 = vld [vmem:[#allocation14 + $0x660] ss:$8 sps:$4 sm:$0xff]   ;;  %v17890_v39 = vld [vmem:[#allocation17 + $0x670] ss:$8 sps:$4 sm:$0xff]  }
 0x5bc   : > { %v8426_v55 = vsel %vm3289_vm5, %v8417_v56, %v8425_v13  ;;  %v17895_v40 = vld [vmem:[#allocation14 + $0x684] ss:$8 sps:$4 sm:$0xff]   ;;  %v17893_v42 = vld [vmem:[#allocation14 + $0x680] ss:$8 sps:$4 sm:$0xff]  }
 0x5bd   : > { %8357 = vmatpush1.bf16.msra.mxu0 %v17827_v1  ;;  %v8734_v1 = vor.u32 %v8733_v54, %v8730_v51  ;;  %v9010_v3 = vor.u32 %v9009_v20, %v9006_v57  ;;  %v17896_v43 = vld [vmem:[#allocation17 + $0x680] ss:$8 sps:$4 sm:$0xff]   ;;  %v17910_v48 = vld [vmem:[#allocation17 + $0x6a4] ss:$8 sps:$4 sm:$0xff]   ;;  %v17913_v54 = vld [vmem:[#allocation14 + $0x6b4] ss:$8 sps:$4 sm:$0xff]  }
 0x5be   : > { %8633 = vmatpush1.bf16.msra.mxu1 %v17830_v4  ;;  %8358 = vmatprep.subr.bf16.mxu0 %v17835_v6  ;;  %v17856_v4 = vld [vmem:[#allocation17 + $0x614] ss:$8 sps:$4 sm:$0xff]   ;;  %v17907_v8 = vld [vmem:[#allocation14 + $0x6a4] ss:$8 sps:$4 sm:$0xff]  }
 0x5bf   : > { %8634 = vmatprep.subr.bf16.mxu1 %v17838_v9  ;;  %v8743_v6 = vsel %vm1175_vm1, %v8734_v1, %v8742_v5  ;;  %v9019_v9 = vsel %vm1175_vm1, %v9010_v3, %v9018_v61  ;;  %v17908_v51 = vld [vmem:[#allocation17 + $0x6a0] ss:$8 sps:$4 sm:$0xff]   ;;  %v17916_v56 = vld [vmem:[#allocation17 + $0x6b4] ss:$8 sps:$4 sm:$0xff]   ;;  %v17922_v61 = vld [vmem:[#allocation17 + $0x6c4] ss:$8 sps:$4 sm:$0xff]  }
 0x5c0   : > { %v8657_v13 = vld [vmem:[#allocation3 + $0x60] sm:$0x7f]  ;;  %v8659_v20 = vld [vmem:[#allocation3 + $0x70] sm:$0x7f] }
 0x5c1   : > { %8359 = vmatpush1.bf16.msra.mxu0 %v17833_v19  ;;  %v17866_v19 = vld [vmem:[#allocation17 + $0x630] ss:$8 sps:$4 sm:$0xff]   ;;  %v17919_v5 = vld [vmem:[#allocation14 + $0x6c4] ss:$8 sps:$4 sm:$0xff]   ;;  %v8665_v1 = vpack.c.bf16 %v8657_v13, %v8657_v13  ;;  %v8667_v3 = vpack.c.bf16 %v8659_v20, %v8659_v20 }
 0x5c2   : > { %8635 = vmatpush1.bf16.msra.mxu1 %v17836_v24  ;;  %8360 = vmatprep.subr.bf16.mxu0 %v17841_v34  ;;  %v17877_v24 = vld [vmem:[#allocation14 + $0x654] ss:$8 sps:$4 sm:$0xff]   ;;  %v17911_v57 = vld [vmem:[#allocation14 + $0x6b0] ss:$8 sps:$4 sm:$0xff]   ;;  %v19549_v13 = vld [vmem:[#allocation3 + $0x78] sm:$0xff] }
 0x5c3   : > { %8636 = vmatprep.subr.bf16.mxu1 %v17844_v29  ;;  %v17880_v34 = vld [vmem:[#allocation17 + $0x654] ss:$8 sps:$4 sm:$0xff]   ;;  %v17883_v29 = vld [vmem:[#allocation14 + $0x664] ss:$8 sps:$4 sm:$0xff]  }
 0x5c4   : > { %v17949_v20 = vld [vmem:[#allocation14 + $0x714] ss:$8 sps:$4 sm:$0xff]  }
 0x5c5   : > { %8361 = vmatpush1.bf16.msra.mxu0 %v17839_v41  ;;  %v17898_v41 = vld [vmem:[#allocation17 + $0x684] ss:$8 sps:$4 sm:$0xff]  }
 0x5c6   : > { %8637 = vmatpush1.bf16.msra.mxu1 %v17842_v44  ;;  %8906 = vmatprep.subr.bf16.mxu0 %v17847_v45  ;;  %v17901_v44 = vld [vmem:[#allocation14 + $0x694] ss:$8 sps:$4 sm:$0xff]  }
 0x5c7   : > { %9182 = vmatprep.subr.bf16.mxu1 %v17850_v28  ;;  %v17904_v45 = vld [vmem:[#allocation17 + $0x694] ss:$8 sps:$4 sm:$0xff]  }
 0x5c8   : > { %8363 = vmatmul.mubr.bf16.vlgmr.msra.gmra.mrb[4].mxu0 %v8150_v63  ;;  %v17905_v28 = vld [vmem:[#allocation14 + $0x6a0] ss:$8 sps:$4 sm:$0xff]  }
 0x5c9   : > { %8639 = vmatmul.mubr.bf16.vlgmr.msra.gmra.mrb[4].mxu1 %v8426_v55  ;;  %8907 = vmatpush1.bf16.msra.mxu0 %v17845_v38  ;;  %v17914_v38 = vld [vmem:[#allocation17 + $0x6b0] ss:$8 sps:$4 sm:$0xff]  }
 0x5ca   : > { %8938 = vmatprep.mubr.bf16.mxu0 %v8743_v6  ;;  %9183 = vmatpush1.bf16.msra.mxu1 %v17848_v59  ;;  %v8653_v59 = vld [vmem:[#allocation3 + $0x20] sm:$0x80]  ;;  %v17920_v6 = vld [vmem:[#allocation17 + $0x6c0] ss:$8 sps:$4 sm:$0xff]  }
 0x5cb   : > { %9214 = vmatprep.mubr.bf16.mxu1 %v9019_v9  ;;  %8908 = vmatprep.subr.bf16.mxu0 %v17853_v2  ;;  %v8661_v63 = vpack.c.bf16 %v19521_v62, %v8653_v59  ;;  %v8655_v2 = vld [vmem:[#allocation3 + $0x30] sm:$0x80]  ;;  %v17928_v9 = vld [vmem:[#allocation17 + $0x6d4] ss:$8 sps:$4 sm:$0xff]  }
 0x5cc   : > { %9184 = vmatprep.subr.bf16.mxu1 %v17856_v4  ;;  %v8663_v55 = vpack.c.bf16 %v19525_v7, %v8655_v2  ;;  %v17917_v4 = vld [vmem:[#allocation14 + $0x6c0] ss:$8 sps:$4 sm:$0xff]   ;;  %v17947_v2 = vld [vmem:[#allocation14 + $0x710] ss:$8 sps:$4 sm:$0xff]  }
 0x5cd   : > { %8909 = vmatpush1.bf16.msra.mxu0 %v17851_v60  ;;  %v17925_v60 = vld [vmem:[#allocation14 + $0x6d4] ss:$8 sps:$4 sm:$0xff]  }
 0x5ce   : > { %9185 = vmatpush1.bf16.msra.mxu1 %v17854_v12  ;;  %8910 = vmatprep.subr.bf16.mxu0 %v17859_v11  ;;  %v8669_v12 = vmul.bf16 %v8661_v63, %v19335_v52  ;;  %v8673_v11 = vmul.bf16 %v8665_v1, %v19335_v52  ;;  %v18432_v63 = vld [vmem:[#allocation3 + $0x58] sm:$0xff] }
 0x5cf   : > { %9186 = vmatprep.subr.bf16.mxu1 %v17862_v10  ;;  %v8671_v10 = vmul.bf16 %v8663_v55, %v19335_v52  ;;  %v9236_v1 = vpack.c.bf16 %v19549_v13, %v18432_v63  ;;  %v17950_v55 = vld [vmem:[#allocation17 + $0x710] ss:$8 sps:$4 sm:$0xff]   ;;  %v18024_v63 = vld [vmem:[#allocation17 + $0x7d4] ss:$8 sps:$4 sm:$0xff]  }
 0x5d1   : > { %8911 = vmatpush1.bf16.msra.mxu0 %v17857_v14  ;;  %v8675_v14 = vmul.bf16 %v8667_v3, %v19335_v52  ;;  %v17955_v3 = vld [vmem:[#allocation14 + $0x724] ss:$8 sps:$4 sm:$0xff]  }
 0x5d2   : > { %9187 = vmatpush1.bf16.msra.mxu1 %v17860_v15  ;;  %8912 = vmatprep.subr.bf16.mxu0 %v17865_v16  ;;  %v17923_v15 = vld [vmem:[#allocation14 + $0x6d0] ss:$8 sps:$4 sm:$0xff]  }
 0x5d3   : > { %9188 = vmatprep.subr.bf16.mxu1 %v17868_v17  ;;  %v17926_v16 = vld [vmem:[#allocation17 + $0x6d0] ss:$8 sps:$4 sm:$0xff]   ;;  %v17931_v17 = vld [vmem:[#allocation14 + $0x6e4] ss:$8 sps:$4 sm:$0xff]  }
 0x5d5   : > { %8913 = vmatpush1.bf16.msra.mxu0 %v17863_v18  ;;  %v17934_v18 = vld [vmem:[#allocation17 + $0x6e4] ss:$8 sps:$4 sm:$0xff]  }
 0x5d6   : > { %9189 = vmatpush1.bf16.msra.mxu1 %v17866_v19  ;;  %8914 = vmatprep.subr.bf16.mxu0 %v17871_v21  ;;  %v8711_v19 = vshrl.u32 %v8669_v12, 16  ;;  %v8714_v21 = vshll.u32 %v8669_v12, 16  ;;  %v17964_v12 = vld [vmem:[#allocation17 + $0x734] ss:$8 sps:$4 sm:$0xff]  }
 0x5d7   : > { %9190 = vmatprep.subr.bf16.mxu1 %v17874_v22  ;;  %v8719_v22 = vshrl.u32 %v8673_v11, 16 }
 0x5d9   : > { %8915 = vmatpush1.bf16.msra.mxu0 %v17869_v58  ;;  %v8722_v58 = vshll.u32 %v8673_v11, 16  ;;  %v17959_v11 = vld [vmem:[#allocation14 + $0x730] ss:$8 sps:$4 sm:$0xff]  }
 0x5da   : > { %9191 = vmatpush1.bf16.msra.mxu1 %v17872_v23  ;;  %8916 = vmatprep.subr.bf16.mxu0 %v17877_v24  ;;  %v8987_v23 = vshrl.u32 %v8671_v10, 16  ;;  %v8990_v24 = vshll.u32 %v8671_v10, 16  ;;  %v17962_v10 = vld [vmem:[#allocation17 + $0x730] ss:$8 sps:$4 sm:$0xff]  }
 0x5db   : > { %9192 = vmatprep.subr.bf16.mxu1 %v17880_v34  ;;  %v8995_v34 = vshrl.u32 %v8675_v14, 16 }
 0x5dd   : > { %8917 = vmatpush1.bf16.msra.mxu0 %v17875_v26  ;;  %v8998_v26 = vshll.u32 %v8675_v14, 16  ;;  %v17967_v14 = vld [vmem:[#allocation14 + $0x744] ss:$8 sps:$4 sm:$0xff]  }
 0x5de   : > { %9193 = vmatpush1.bf16.msra.mxu1 %v17878_v0  ;;  %8918 = vmatprep.subr.bf16.mxu0 %v17883_v29  ;;  %v17929_v0 = vld [vmem:[#allocation14 + $0x6e0] ss:$8 sps:$4 sm:$0xff]  }
 0x5df   : > { %9194 = vmatprep.subr.bf16.mxu1 %v17886_v30  ;;  %v17932_v29 = vld [vmem:[#allocation17 + $0x6e0] ss:$8 sps:$4 sm:$0xff]   ;;  %v17937_v30 = vld [vmem:[#allocation14 + $0x6f4] ss:$8 sps:$4 sm:$0xff]  }
 0x5e1   : > { %8919 = vmatpush1.bf16.msra.mxu0 %v17881_v31  ;;  %v17940_v31 = vld [vmem:[#allocation17 + $0x6f4] ss:$8 sps:$4 sm:$0xff]  }
 0x5e2   : > { %9195 = vmatpush1.bf16.msra.mxu1 %v17884_v32  ;;  %8920 = vmatprep.subr.bf16.mxu0 %v17889_v47  ;;  %v8713_v32 = vrot.slane %v8711_v19, 3  ;;  %v8716_v47 = vrot.slane %v8714_v21, 4  ;;  %v17976_v19 = vld [vmem:[#allocation17 + $0x754] ss:$8 sps:$4 sm:$0xff]  }
 0x5e3   : > { %9196 = vmatprep.subr.bf16.mxu1 %v17892_v36  ;;  %v8721_v36 = vrot.slane %v8719_v22, 3  ;;  %v17971_v21 = vld [vmem:[#allocation14 + $0x750] ss:$8 sps:$4 sm:$0xff]  }
 0x5e4   : > { %v17974_v22 = vld [vmem:[#allocation17 + $0x750] ss:$8 sps:$4 sm:$0xff]  }
 0x5e5   : > { %8921 = vmatpush1.bf16.msra.mxu0 %v17887_v37  ;;  %v8724_v37 = vrot.slane %v8722_v58, 4  ;;  %v17979_v58 = vld [vmem:[#allocation14 + $0x764] ss:$8 sps:$4 sm:$0xff]  }
 0x5e6   : > { %9197 = vmatpush1.bf16.msra.mxu1 %v17890_v39  ;;  %8922 = vmatprep.subr.bf16.mxu0 %v17895_v40  ;;  %v8989_v39 = vrot.slane %v8987_v23, 3  ;;  %v8992_v40 = vrot.slane %v8990_v24, 4  ;;  %v17982_v23 = vld [vmem:[#allocation17 + $0x764] ss:$8 sps:$4 sm:$0xff]  }
 0x5e7   : > { %9198 = vmatprep.subr.bf16.mxu1 %v17898_v41  ;;  %v8997_v41 = vrot.slane %v8995_v34, 3  ;;  %v17977_v24 = vld [vmem:[#allocation14 + $0x760] ss:$8 sps:$4 sm:$0xff]  }
 0x5e8   : > { %v17980_v34 = vld [vmem:[#allocation17 + $0x760] ss:$8 sps:$4 sm:$0xff]  }
 0x5e9   : > { %8923 = vmatpush1.bf16.msra.mxu0 %v17893_v42  ;;  %v9000_v42 = vrot.slane %v8998_v26, 4  ;;  %v17985_v26 = vld [vmem:[#allocation14 + $0x774] ss:$8 sps:$4 sm:$0xff]  }
 0x5ea   : > { %9199 = vmatpush1.bf16.msra.mxu1 %v17896_v43  ;;  %8924 = vmatprep.subr.bf16.mxu0 %v17901_v44  ;;  %v17935_v43 = vld [vmem:[#allocation14 + $0x6f0] ss:$8 sps:$4 sm:$0xff]  }
 0x5eb   : > { %9200 = vmatprep.subr.bf16.mxu1 %v17904_v45  ;;  %v17938_v44 = vld [vmem:[#allocation17 + $0x6f0] ss:$8 sps:$4 sm:$0xff]   ;;  %v17943_v45 = vld [vmem:[#allocation14 + $0x704] ss:$8 sps:$4 sm:$0xff]  }
 0x5ed   : > { %8925 = vmatpush1.bf16.msra.mxu0 %v17899_v35  ;;  %v8717_v35 = vor.u32 %v8716_v47, %v8713_v32  ;;  %v17994_v32 = vld [vmem:[#allocation17 + $0x784] ss:$8 sps:$4 sm:$0xff]  }
 0x5ee   : > { %9201 = vmatpush1.bf16.msra.mxu1 %v17902_v46  ;;  %8926 = vmatprep.subr.bf16.mxu0 %v17907_v8  ;;  %v8725_v46 = vor.u32 %v8724_v37, %v8721_v36  ;;  %v17946_v8 = vld [vmem:[#allocation17 + $0x704] ss:$8 sps:$4 sm:$0xff]   ;;  %v17992_v36 = vld [vmem:[#allocation17 + $0x780] ss:$8 sps:$4 sm:$0xff]   ;;  %v17997_v37 = vld [vmem:[#allocation14 + $0x794] ss:$8 sps:$4 sm:$0xff]  }
 0x5ef   : > { %9202 = vmatprep.subr.bf16.mxu1 %v17910_v48  ;;  %v8993_v48 = vor.u32 %v8992_v40, %v8989_v39  ;;  %v17989_v47 = vld [vmem:[#allocation14 + $0x780] ss:$8 sps:$4 sm:$0xff]   ;;  %v17995_v40 = vld [vmem:[#allocation14 + $0x790] ss:$8 sps:$4 sm:$0xff]  }
 0x5f0   : > { %v18000_v39 = vld [vmem:[#allocation17 + $0x794] ss:$8 sps:$4 sm:$0xff]  }
 0x5f1   : > { %8927 = vmatpush1.bf16.msra.mxu0 %v17905_v28  ;;  %v9001_v28 = vor.u32 %v9000_v42, %v8997_v41  ;;  %v17998_v41 = vld [vmem:[#allocation17 + $0x790] ss:$8 sps:$4 sm:$0xff]   ;;  %v18003_v42 = vld [vmem:[#allocation14 + $0x7a4] ss:$8 sps:$4 sm:$0xff]  }
 0x5f2   : > { %9203 = vmatpush1.bf16.msra.mxu1 %v17908_v51  ;;  %8928 = vmatprep.subr.bf16.mxu0 %v17913_v54  ;;  %v17941_v51 = vld [vmem:[#allocation14 + $0x700] ss:$8 sps:$4 sm:$0xff]   ;;  %v19547_v54 = vld [vmem:[#allocation3 + $0x68] sm:$0xff] }
 0x5f3   : > { %9204 = vmatprep.subr.bf16.mxu1 %v17916_v56  ;;  %v17944_v56 = vld [vmem:[#allocation17 + $0x700] ss:$8 sps:$4 sm:$0xff]  }
 0x5f5   : > { %8929 = vmatpush1.bf16.msra.mxu0 %v17911_v57  ;;  %v8726_v57 = vsel %vm1175_vm1, %v8717_v35, %v8725_v46  ;;  %v18009_v35 = vld [vmem:[#allocation14 + $0x7b4] ss:$8 sps:$4 sm:$0xff]  }
 0x5f6   : > { %9205 = vmatpush1.bf16.msra.mxu1 %v17914_v38  ;;  %8930 = vmatprep.subr.bf16.mxu0 %v17919_v5  ;;  %v9002_v38 = vsel %vm1175_vm1, %v8993_v48, %v9001_v28  ;;  %v18431_v5 = vld [vmem:[#allocation3 + $0x48] sm:$0xff]  ;;  %v18015_v28 = vld [vmem:[#allocation14 + $0x7c4] ss:$8 sps:$4 sm:$0xff]  }
 0x5f7   : > { %9206 = vmatprep.subr.bf16.mxu1 %v17922_v61  ;;  %v9234_v59 = vpack.c.bf16 %v19547_v54, %v18431_v5  ;;  %v17952_v61 = vld [vmem:[#allocation17 + $0x714] ss:$8 sps:$4 sm:$0xff]   ;;  %v18010_v48 = vld [vmem:[#allocation17 + $0x7b0] ss:$8 sps:$4 sm:$0xff]   ;;  %v18016_v5 = vld [vmem:[#allocation17 + $0x7c0] ss:$8 sps:$4 sm:$0xff]  }
 0x5f8   : > { %v18012_v46 = vld [vmem:[#allocation17 + $0x7b4] ss:$8 sps:$4 sm:$0xff]  }
 0x5f9   : > { %8931 = vmatpush1.bf16.msra.mxu0 %v17917_v4  ;;  %v17958_v4 = vld [vmem:[#allocation17 + $0x724] ss:$8 sps:$4 sm:$0xff]  }
 0x5fa   : > { %9207 = vmatpush1.bf16.msra.mxu1 %v17920_v6  ;;  %8932 = vmatprep.subr.bf16.mxu0 %v17925_v60  ;;  %v17953_v6 = vld [vmem:[#allocation14 + $0x720] ss:$8 sps:$4 sm:$0xff]  }
 0x5fb   : > { %9208 = vmatprep.subr.bf16.mxu1 %v17928_v9  ;;  %v17956_v60 = vld [vmem:[#allocation17 + $0x720] ss:$8 sps:$4 sm:$0xff]   ;;  %v17961_v9 = vld [vmem:[#allocation14 + $0x734] ss:$8 sps:$4 sm:$0xff]  }
 0x5fd   : > { %8933 = vmatpush1.bf16.msra.mxu0 %v17923_v15  ;;  %v17970_v15 = vld [vmem:[#allocation17 + $0x744] ss:$8 sps:$4 sm:$0xff]  }
 0x5fe   : > { %9209 = vmatpush1.bf16.msra.mxu1 %v17926_v16  ;;  %8934 = vmatprep.subr.bf16.mxu0 %v17931_v17  ;;  %v17965_v16 = vld [vmem:[#allocation14 + $0x740] ss:$8 sps:$4 sm:$0xff]  }
 0x5ff   : > { %9210 = vmatprep.subr.bf16.mxu1 %v17934_v18  ;;  %v17968_v17 = vld [vmem:[#allocation17 + $0x740] ss:$8 sps:$4 sm:$0xff]   ;;  %v17973_v18 = vld [vmem:[#allocation14 + $0x754] ss:$8 sps:$4 sm:$0xff]  }
 0x601   : > { %8935 = vmatpush1.bf16.msra.mxu0 %v17929_v0  ;;  %v17988_v0 = vld [vmem:[#allocation17 + $0x774] ss:$8 sps:$4 sm:$0xff]  }
 0x602   : > { %9211 = vmatpush1.bf16.msra.mxu1 %v17932_v29  ;;  %8936 = vmatprep.subr.bf16.mxu0 %v17937_v30  ;;  %v17983_v29 = vld [vmem:[#allocation14 + $0x770] ss:$8 sps:$4 sm:$0xff]  }
 0x603   : > { %9212 = vmatprep.subr.bf16.mxu1 %v17940_v31  ;;  %v17986_v30 = vld [vmem:[#allocation17 + $0x770] ss:$8 sps:$4 sm:$0xff]   ;;  %v17991_v31 = vld [vmem:[#allocation14 + $0x784] ss:$8 sps:$4 sm:$0xff]  }
 0x605   : > { %8937 = vmatpush1.bf16.msra.mxu0 %v17935_v43  ;;  %v18006_v43 = vld [vmem:[#allocation17 + $0x7a4] ss:$8 sps:$4 sm:$0xff]  }
 0x606   : > { %9213 = vmatpush1.bf16.msra.mxu1 %v17938_v44  ;;  %9430 = vmatprep.subr.bf16.mxu0 %v17943_v45  ;;  %v18001_v44 = vld [vmem:[#allocation14 + $0x7a0] ss:$8 sps:$4 sm:$0xff]  }
 0x607   : > { %9670 = vmatprep.subr.bf16.mxu1 %v17946_v8  ;;  %v18004_v45 = vld [vmem:[#allocation17 + $0x7a0] ss:$8 sps:$4 sm:$0xff]   ;;  %v18007_v8 = vld [vmem:[#allocation14 + $0x7b0] ss:$8 sps:$4 sm:$0xff]  }
 0x608   : > { %8939 = vmatmul.mubr.bf16.vlgmr.msra.gmra.mrb[4].mxu0 %v8726_v57  ;;  %v9720_v57 = vld [vmem:[#allocation3 + $0x58] sm:$0xfe] }
 0x609   : > { %9215 = vmatmul.mubr.bf16.vlgmr.msra.gmra.mrb[4].mxu1 %v9002_v38  ;;  %9431 = vmatpush1.bf16.msra.mxu0 %v17941_v51  ;;  %v9718_v51 = vld [vmem:[#allocation3 + $0x48] sm:$0xfe] }
 0x60a   : > { %9462 = vmatprep.mubr.bf16.mxu0 %v9234_v59  ;;  %9671 = vmatpush1.bf16.msra.mxu1 %v17944_v56  ;;  %v18018_v56 = vld [vmem:[#allocation17 + $0x7c4] ss:$8 sps:$4 sm:$0xff]   ;;  %v9730_v38 = vpack.c.bf16 %v19547_v54, %v9718_v51  ;;  %v18021_v59 = vld [vmem:[#allocation14 + $0x7d4] ss:$8 sps:$4 sm:$0xff]  }
 0x60b   : > { %9702 = vmatprep.mubr.bf16.mxu1 %v9236_v1  ;;  %9432 = vmatprep.subr.bf16.mxu0 %v17949_v20  ;;  %v18013_v20 = vld [vmem:[#allocation14 + $0x7c0] ss:$8 sps:$4 sm:$0xff]   ;;  %v9726_v1 = vld [vmem:[#allocation3 + $0x88] sm:$0x1] }
 0x60c   : > { %9672 = vmatprep.subr.bf16.mxu1 %v17952_v61  ;;  %v9732_v61 = vpack.c.bf16 %v19549_v13, %v9720_v57  ;;  %v18025_v13 = vld [vmem:[#allocation14 + $0x7e0] ss:$8 sps:$4 sm:$0xff]   ;;  %v18057_v51 = vld [vmem:[#allocation14 + $0x834] ss:$8 sps:$4 sm:$0xff]   ;;  %v18055_v57 = vld [vmem:[#allocation14 + $0x830] ss:$8 sps:$4 sm:$0xff]  }
 0x60d   : > { %9433 = vmatpush1.bf16.msra.mxu0 %v17947_v2  ;;  %v18019_v2 = vld [vmem:[#allocation14 + $0x7d0] ss:$8 sps:$4 sm:$0xff]  }
 0x60e   : > { %9673 = vmatpush1.bf16.msra.mxu1 %v17950_v55  ;;  %9434 = vmatprep.subr.bf16.mxu0 %v17955_v3  ;;  %v9738_v55 = vmul.bf16 %v9730_v38, %v19351_v49  ;;  %v9728_v3 = vld [vmem:[#allocation3 + $0x98] sm:$0x1]  ;;  %v9740_v54 = vmul.bf16 %v9732_v61, %v19351_v49 }
 0x60f   : > { %9674 = vmatprep.subr.bf16.mxu1 %v17958_v4  ;;  %v18022_v4 = vld [vmem:[#allocation17 + $0x7d0] ss:$8 sps:$4 sm:$0xff]   ;;  %v18063_v38 = vld [vmem:[#allocation14 + $0x844] ss:$8 sps:$4 sm:$0xff]  }
 0x610   : > { %v18064_v61 = vld [vmem:[#allocation17 + $0x840] ss:$8 sps:$4 sm:$0xff]  }
 0x611   : > { %9435 = vmatpush1.bf16.msra.mxu0 %v17953_v6  ;;  %v18027_v6 = vld [vmem:[#allocation14 + $0x7e4] ss:$8 sps:$4 sm:$0xff]  }
 0x612   : > { %9675 = vmatpush1.bf16.msra.mxu1 %v17956_v60  ;;  %9436 = vmatprep.subr.bf16.mxu0 %v17961_v9  ;;  %v18030_v60 = vld [vmem:[#allocation17 + $0x7e4] ss:$8 sps:$4 sm:$0xff]   ;;  %v9734_v9 = vpack.c.bf16 %v9726_v1, %v9726_v1  ;;  %v18072_v1 = vld [vmem:[#allocation17 + $0x854] ss:$8 sps:$4 sm:$0xff]  }
 0x613   : > { %9676 = vmatprep.subr.bf16.mxu1 %v17964_v12  ;;  %v9736_v12 = vpack.c.bf16 %v9728_v3, %v9728_v3  ;;  %v18075_v3 = vld [vmem:[#allocation14 + $0x864] ss:$8 sps:$4 sm:$0xff]  }
 0x615   : > { %9437 = vmatpush1.bf16.msra.mxu0 %v17959_v11  ;;  %v9793_v11 = vshll.u32 %v9738_v55, 16 }
 0x616   : > { %9677 = vmatpush1.bf16.msra.mxu1 %v17962_v10  ;;  %9438 = vmatprep.subr.bf16.mxu0 %v17967_v14  ;;  %v18028_v10 = vld [vmem:[#allocation17 + $0x7e0] ss:$8 sps:$4 sm:$0xff]   ;;  %v18033_v14 = vld [vmem:[#allocation14 + $0x7f4] ss:$8 sps:$4 sm:$0xff]  }
 0x617   : > { %9678 = vmatprep.subr.bf16.mxu1 %v17970_v15  ;;  %v10059_v15 = vshll.u32 %v9740_v54, 16 }
 0x619   : > { %9439 = vmatpush1.bf16.msra.mxu0 %v17965_v16  ;;  %v18036_v16 = vld [vmem:[#allocation17 + $0x7f4] ss:$8 sps:$4 sm:$0xff]  }
 0x61a   : > { %9679 = vmatpush1.bf16.msra.mxu1 %v17968_v17  ;;  %9440 = vmatprep.subr.bf16.mxu0 %v17973_v18  ;;  %v9742_v17 = vmul.bf16 %v9734_v9, %v19347_v33  ;;  %v9744_v18 = vmul.bf16 %v9736_v12, %v19347_v33  ;;  %v18084_v9 = vld [vmem:[#allocation17 + $0x874] ss:$8 sps:$4 sm:$0xff]  }
 0x61b   : > { %9680 = vmatprep.subr.bf16.mxu1 %v17976_v19  ;;  %v18031_v19 = vld [vmem:[#allocation14 + $0x7f0] ss:$8 sps:$4 sm:$0xff]  }
 0x61c   : > { %v18079_v12 = vld [vmem:[#allocation14 + $0x870] ss:$8 sps:$4 sm:$0xff]  }
 0x61d   : > { %9441 = vmatpush1.bf16.msra.mxu0 %v17971_v21  ;;  %v9795_v21 = vrot.slane %v9793_v11, 1  ;;  %v18087_v11 = vld [vmem:[#allocation14 + $0x884] ss:$8 sps:$4 sm:$0xff]  }
 0x61e   : > { %9681 = vmatpush1.bf16.msra.mxu1 %v17974_v22  ;;  %9442 = vmatprep.subr.bf16.mxu0 %v17979_v58  ;;  %v18034_v22 = vld [vmem:[#allocation17 + $0x7f0] ss:$8 sps:$4 sm:$0xff]   ;;  %v18039_v58 = vld [vmem:[#allocation14 + $0x804] ss:$8 sps:$4 sm:$0xff]  }
 0x61f   : > { %9682 = vmatprep.subr.bf16.mxu1 %v17982_v23  ;;  %v10061_v23 = vrot.slane %v10059_v15, 1  ;;  %v18088_v15 = vld [vmem:[#allocation17 + $0x880] ss:$8 sps:$4 sm:$0xff]  }
 0x621   : > { %9443 = vmatpush1.bf16.msra.mxu0 %v17977_v24  ;;  %v19561_v24 = vld [vmem:[#allocation3 + $0x60] sm:$0xff] }
 0x622   : > { %9683 = vmatpush1.bf16.msra.mxu1 %v17980_v34  ;;  %9444 = vmatprep.subr.bf16.mxu0 %v17985_v26  ;;  %v18042_v34 = vld [vmem:[#allocation17 + $0x804] ss:$8 sps:$4 sm:$0xff]   ;;  %v9791_v26 = vshrl.u32 %v9738_v55, 16  ;;  %v18070_v55 = vld [vmem:[#allocation17 + $0x850] ss:$8 sps:$4 sm:$0xff]  }
 0x623   : > { %9684 = vmatprep.subr.bf16.mxu1 %v17988_v0  ;;  %v9798_v0 = vshll.u32 %v9742_v17, 16  ;;  %v18096_v17 = vld [vmem:[#allocation17 + $0x894] ss:$8 sps:$4 sm:$0xff]  }
 0x625   : > { %9445 = vmatpush1.bf16.msra.mxu0 %v17983_v29  ;;  %v19563_v29 = vld [vmem:[#allocation3 + $0x70] sm:$0xff] }
 0x626   : > { %9685 = vmatpush1.bf16.msra.mxu1 %v17986_v30  ;;  %9446 = vmatprep.subr.bf16.mxu0 %v17991_v31  ;;  %v10057_v30 = vshrl.u32 %v9740_v54, 16  ;;  %v10064_v31 = vshll.u32 %v9744_v18, 16  ;;  %v18076_v54 = vld [vmem:[#allocation17 + $0x860] ss:$8 sps:$4 sm:$0xff]   ;;  %v18091_v18 = vld [vmem:[#allocation14 + $0x890] ss:$8 sps:$4 sm:$0xff]  }
 0x627   : > { %9686 = vmatprep.subr.bf16.mxu1 %v17994_v32  ;;  %v18037_v32 = vld [vmem:[#allocation14 + $0x800] ss:$8 sps:$4 sm:$0xff]  }
 0x629   : > { %9447 = vmatpush1.bf16.msra.mxu0 %v17989_v47  ;;  %v9796_v47 = vor.u32 %v9795_v21, %v9791_v26  ;;  %v18099_v21 = vld [vmem:[#allocation14 + $0x8a4] ss:$8 sps:$4 sm:$0xff]   ;;  %v18108_v26 = vld [vmem:[#allocation17 + $0x8b4] ss:$8 sps:$4 sm:$0xff]  }
 0x62a   : > { %9687 = vmatpush1.bf16.msra.mxu1 %v17992_v36  ;;  %9448 = vmatprep.subr.bf16.mxu0 %v17997_v37  ;;  %v9233_v36 = vpack.c.bf16 %v19561_v24, %v19521_v62  ;;  %v18040_v37 = vld [vmem:[#allocation17 + $0x800] ss:$8 sps:$4 sm:$0xff]  }
 0x62b   : > { %9688 = vmatprep.subr.bf16.mxu1 %v18000_v39  ;;  %v10062_v39 = vor.u32 %v10061_v23, %v10057_v30  ;;  %v18100_v23 = vld [vmem:[#allocation17 + $0x8a0] ss:$8 sps:$4 sm:$0xff]   ;;  %v18103_v30 = vld [vmem:[#allocation14 + $0x8b0] ss:$8 sps:$4 sm:$0xff]  }
 0x62d   : > { %9449 = vmatpush1.bf16.msra.mxu0 %v17995_v40  ;;  %v9235_v40 = vpack.c.bf16 %v19563_v29, %v19525_v7  ;;  %v18054_v7 = vld [vmem:[#allocation17 + $0x824] ss:$8 sps:$4 sm:$0xff]  }
 0x62e   : > { %9689 = vmatpush1.bf16.msra.mxu1 %v17998_v41  ;;  %9450 = vmatprep.subr.bf16.mxu0 %v18003_v42  ;;  %v9800_v41 = vrot.slane %v9798_v0, 1  ;;  %v18045_v42 = vld [vmem:[#allocation14 + $0x814] ss:$8 sps:$4 sm:$0xff]   ;;  %v9717_v0 = vld [vmem:[#allocation3 + $0x40] sm:$0xfe] }
 0x62f   : > { %9690 = vmatprep.subr.bf16.mxu1 %v18006_v43  ;;  %v10066_v43 = vrot.slane %v10064_v31, 1  ;;  %v9719_v31 = vld [vmem:[#allocation3 + $0x50] sm:$0xfe] }
 0x631   : > { %9451 = vmatpush1.bf16.msra.mxu0 %v18001_v44  ;;  %v18048_v44 = vld [vmem:[#allocation17 + $0x814] ss:$8 sps:$4 sm:$0xff]   ;;  %v10067_v62 = vsel %vm1735_vm2, %v10062_v39, %v10066_v43  ;;  %v9731_v39 = vpack.c.bf16 %v19563_v29, %v9719_v31  ;;  %v9725_v43 = vld [vmem:[#allocation3 + $0x80] sm:$0x1] }
 0x632   : > { %9691 = vmatpush1.bf16.msra.mxu1 %v18004_v45  ;;  %9452 = vmatprep.subr.bf16.mxu0 %v18009_v35  ;;  %v9801_v45 = vsel %vm1735_vm2, %v9796_v47, %v9800_v41  ;;  %v18043_v35 = vld [vmem:[#allocation14 + $0x810] ss:$8 sps:$4 sm:$0xff]   ;;  %v18111_v47 = vld [vmem:[#allocation14 + $0x8c4] ss:$8 sps:$4 sm:$0xff]   ;;  %v18148_v31 = vld [vmem:[#allocation20 + $0x198] sm:$0xff]  }
 0x633   : > { %9692 = vmatprep.subr.bf16.mxu1 %v18012_v46  ;;  %v18046_v46 = vld [vmem:[#allocation17 + $0x810] ss:$8 sps:$4 sm:$0xff]   ;;  %v18112_v41 = vld [vmem:[#allocation17 + $0x8c0] ss:$8 sps:$4 sm:$0xff]  }
 0x634   : > { %v18123_v29 = vld [vmem:[#allocation14 + $0x8e4] ss:$8 sps:$4 sm:$0xff]  }
 0x635   : > { %9453 = vmatpush1.bf16.msra.mxu0 %v18007_v8  ;;  %v18051_v8 = vld [vmem:[#allocation14 + $0x824] ss:$8 sps:$4 sm:$0xff]  }
 0x636   : > { %9693 = vmatpush1.bf16.msra.mxu1 %v18010_v48  ;;  %9454 = vmatprep.subr.bf16.mxu0 %v18015_v28  ;;  %v18049_v48 = vld [vmem:[#allocation14 + $0x820] ss:$8 sps:$4 sm:$0xff]  }
 0x637   : > { %9694 = vmatprep.subr.bf16.mxu1 %v18018_v56  ;;  %v18052_v28 = vld [vmem:[#allocation17 + $0x820] ss:$8 sps:$4 sm:$0xff]   ;;  %v18060_v56 = vld [vmem:[#allocation17 + $0x834] ss:$8 sps:$4 sm:$0xff]  }
 0x639   : > { %9455 = vmatpush1.bf16.msra.mxu0 %v18013_v20  ;;  %v18058_v20 = vld [vmem:[#allocation17 + $0x830] ss:$8 sps:$4 sm:$0xff]  }
 0x63a   : > { %9695 = vmatpush1.bf16.msra.mxu1 %v18016_v5  ;;  %9456 = vmatprep.subr.bf16.mxu0 %v18021_v59  ;;  %v18066_v5 = vld [vmem:[#allocation17 + $0x844] ss:$8 sps:$4 sm:$0xff]  }
 0x63b   : > { %9696 = vmatprep.subr.bf16.mxu1 %v18024_v63  ;;  %v18061_v59 = vld [vmem:[#allocation14 + $0x840] ss:$8 sps:$4 sm:$0xff]   ;;  %v18069_v63 = vld [vmem:[#allocation14 + $0x854] ss:$8 sps:$4 sm:$0xff]  }
 0x63d   : > { %9457 = vmatpush1.bf16.msra.mxu0 %v18019_v2  ;;  %v18067_v2 = vld [vmem:[#allocation14 + $0x850] ss:$8 sps:$4 sm:$0xff]  }
 0x63e   : > { %9697 = vmatpush1.bf16.msra.mxu1 %v18022_v4  ;;  %9458 = vmatprep.subr.bf16.mxu0 %v18027_v6  ;;  %v18078_v4 = vld [vmem:[#allocation17 + $0x864] ss:$8 sps:$4 sm:$0xff]  }
 0x63f   : > { %9698 = vmatprep.subr.bf16.mxu1 %v18030_v60  ;;  %v18073_v6 = vld [vmem:[#allocation14 + $0x860] ss:$8 sps:$4 sm:$0xff]   ;;  %v18081_v60 = vld [vmem:[#allocation14 + $0x874] ss:$8 sps:$4 sm:$0xff]  }
 0x641   : > { %9459 = vmatpush1.bf16.msra.mxu0 %v18025_v13  ;;  %v18082_v13 = vld [vmem:[#allocation17 + $0x870] ss:$8 sps:$4 sm:$0xff]  }
 0x642   : > { %9699 = vmatpush1.bf16.msra.mxu1 %v18028_v10  ;;  %9460 = vmatprep.subr.bf16.mxu0 %v18033_v14  ;;  %v18090_v10 = vld [vmem:[#allocation17 + $0x884] ss:$8 sps:$4 sm:$0xff]  }
 0x643   : > { %9700 = vmatprep.subr.bf16.mxu1 %v18036_v16  ;;  %v18085_v14 = vld [vmem:[#allocation14 + $0x880] ss:$8 sps:$4 sm:$0xff]   ;;  %v18093_v16 = vld [vmem:[#allocation14 + $0x894] ss:$8 sps:$4 sm:$0xff]  }
 0x645   : > { %9461 = vmatpush1.bf16.msra.mxu0 %v18031_v19  ;;  %v18094_v19 = vld [vmem:[#allocation17 + $0x890] ss:$8 sps:$4 sm:$0xff]  }
 0x646   : > { %9701 = vmatpush1.bf16.msra.mxu1 %v18034_v22  ;;  %9964 = vmatprep.subr.bf16.mxu0 %v18039_v58  ;;  %v18102_v22 = vld [vmem:[#allocation17 + $0x8a4] ss:$8 sps:$4 sm:$0xff]  }
 0x647   : > { %10230 = vmatprep.subr.bf16.mxu1 %v18042_v34  ;;  %v18097_v58 = vld [vmem:[#allocation14 + $0x8a0] ss:$8 sps:$4 sm:$0xff]   ;;  %v18105_v34 = vld [vmem:[#allocation14 + $0x8b4] ss:$8 sps:$4 sm:$0xff]  }
 0x648   : > { %9463 = vmatmul.mubr.bf16.vlgmr.msra.gmra.mrb[4].mxu0 %v9233_v36  ;;  %v18114_v36 = vld [vmem:[#allocation17 + $0x8c4] ss:$8 sps:$4 sm:$0xff]  }
 0x649   : > { %9703 = vmatmul.mubr.bf16.vlgmr.msra.gmra.mrb[4].mxu1 %v9235_v40  ;;  %9965 = vmatpush1.bf16.msra.mxu0 %v18037_v32  ;;  %v18106_v32 = vld [vmem:[#allocation17 + $0x8b0] ss:$8 sps:$4 sm:$0xff]   ;;  %v18109_v40 = vld [vmem:[#allocation14 + $0x8c0] ss:$8 sps:$4 sm:$0xff]  }
 0x64a   : > { %9996 = vmatprep.mubr.bf16.mxu0 %v9801_v45  ;;  %10231 = vmatpush1.bf16.msra.mxu1 %v18040_v37  ;;  %v9729_v37 = vpack.c.bf16 %v19561_v24, %v9717_v0  ;;  %v18118_v24 = vld [vmem:[#allocation17 + $0x8d0] ss:$8 sps:$4 sm:$0xff]  }
 0x64b   : > { %10262 = vmatprep.mubr.bf16.mxu1 %v10067_v62  ;;  %9966 = vmatprep.subr.bf16.mxu0 %v18045_v42  ;;  %v18117_v42 = vld [vmem:[#allocation14 + $0x8d4] ss:$8 sps:$4 sm:$0xff]   ;;  %v9739_v62 = vmul.bf16 %v9731_v39, %v19351_v49  ;;  %v18153_v39 = vld [vmem:[#allocation20 + $0x168] sm:$0xff]  }
 0x64c   : > { %10232 = vmatprep.subr.bf16.mxu1 %v18048_v44  ;;  %v18120_v44 = vld [vmem:[#allocation17 + $0x8d4] ss:$8 sps:$4 sm:$0xff]   ;;  %v9737_v45 = vmul.bf16 %v9729_v37, %v19351_v49  ;;  %v18152_v37 = vld [vmem:[#allocation20 + $0x1a0] sm:$0xff]  }
 0x64d   : > { %9967 = vmatpush1.bf16.msra.mxu0 %v18043_v35  ;;  %v9727_v35 = vld [vmem:[#allocation3 + $0x90] sm:$0x1] }
 0x64e   : > { %10233 = vmatpush1.bf16.msra.mxu1 %v18046_v46  ;;  %9968 = vmatprep.subr.bf16.mxu0 %v18051_v8  ;;  %v18115_v46 = vld [vmem:[#allocation14 + $0x8d0] ss:$8 sps:$4 sm:$0xff]   ;;  %v9733_v8 = vpack.c.bf16 %v9725_v43, %v9725_v43  ;;  %v18146_v0 = vld [vmem:[#allocation20 + $0x1d8] sm:$0xff]  }
 0x64f   : > { %10234 = vmatprep.subr.bf16.mxu1 %v18054_v7  ;;  %v9735_v7 = vpack.c.bf16 %v9727_v35, %v9727_v35  ;;  %v18157_v43 = vld [vmem:[#allocation20 + $0x170] sm:$0xff]  }
 0x650   : > { %v18160_v35 = vld [vmem:[#allocation20 + $0x1b0] sm:$0xff]  }
 0x651   : > { %9969 = vmatpush1.bf16.msra.mxu0 %v18049_v48  ;;  %v18126_v48 = vld [vmem:[#allocation17 + $0x8e4] ss:$8 sps:$4 sm:$0xff]  }
 0x652   : > { %10235 = vmatpush1.bf16.msra.mxu1 %v18052_v28  ;;  %9970 = vmatprep.subr.bf16.mxu0 %v18057_v51  ;;  %v9781_v28 = vshll.u32 %v9737_v45, 16  ;;  %v10047_v51 = vshll.u32 %v9739_v62, 16 }
 0x653   : > { %10236 = vmatprep.subr.bf16.mxu1 %v18060_v56  ;;  %v18121_v56 = vld [vmem:[#allocation14 + $0x8e0] ss:$8 sps:$4 sm:$0xff]  }
 0x655   : > { %9971 = vmatpush1.bf16.msra.mxu0 %v18055_v57  ;;  %v9741_v57 = vmul.bf16 %v9733_v8, %v19347_v33  ;;  %v18163_v8 = vld [vmem:[#allocation20 + $0x138] sm:$0xff]  }
 0x656   : > { %10237 = vmatpush1.bf16.msra.mxu1 %v18058_v20  ;;  %9972 = vmatprep.subr.bf16.mxu0 %v18063_v38  ;;  %v18124_v20 = vld [vmem:[#allocation17 + $0x8e0] ss:$8 sps:$4 sm:$0xff]   ;;  %v18129_v38 = vld [vmem:[#allocation14 + $0x8f4] ss:$8 sps:$4 sm:$0xff]  }
 0x657   : > { %10238 = vmatprep.subr.bf16.mxu1 %v18066_v5  ;;  %v9743_v5 = vmul.bf16 %v9735_v7, %v19347_v33  ;;  %v18166_v7 = vld [vmem:[#allocation20 + $0xc0] sm:$0xff]  }
 0x659   : > { %9973 = vmatpush1.bf16.msra.mxu0 %v18061_v59  ;;  %v18132_v59 = vld [vmem:[#allocation17 + $0x8f4] ss:$8 sps:$4 sm:$0xff]  }
 0x65a   : > { %10239 = vmatpush1.bf16.msra.mxu1 %v18064_v61  ;;  %9974 = vmatprep.subr.bf16.mxu0 %v18069_v63  ;;  %v9783_v61 = vrot.slane %v9781_v28, 1  ;;  %v10049_v63 = vrot.slane %v10047_v51, 1  ;;  %v10297_v28 = vld [vmem:[#allocation18] sm:$0x3] }
 0x65b   : > { %10240 = vmatprep.subr.bf16.mxu1 %v18072_v1  ;;  %v18127_v1 = vld [vmem:[#allocation14 + $0x8f0] ss:$8 sps:$4 sm:$0xff]  }
 0x65d   : > { %9975 = vmatpush1.bf16.msra.mxu0 %v18067_v2  ;;  %v9779_v2 = vshrl.u32 %v9737_v45, 16  ;;  %v18159_v45 = vld [vmem:[#allocation20 + $0x130] sm:$0xff]  }
 0x65e   : > { %10241 = vmatpush1.bf16.msra.mxu1 %v18070_v55  ;;  %9976 = vmatprep.subr.bf16.mxu0 %v18075_v3  ;;  %v9786_v55 = vshll.u32 %v9741_v57, 16  ;;  %v18130_v3 = vld [vmem:[#allocation17 + $0x8f0] ss:$8 sps:$4 sm:$0xff]  }
 0x65f   : > { %10242 = vmatprep.subr.bf16.mxu1 %v18078_v4  ;;  %v10045_v4 = vshrl.u32 %v9739_v62, 16  ;;  %v18161_v62 = vld [vmem:[#allocation20 + $0x178] sm:$0xff]  }
 0x661   : > { %9977 = vmatpush1.bf16.msra.mxu0 %v18073_v6  ;;  %v10052_v6 = vshll.u32 %v9743_v5, 16 }
 0x662   : > { %10243 = vmatpush1.bf16.msra.mxu1 %v18076_v54  ;;  %9978 = vmatprep.subr.bf16.mxu0 %v18081_v60  ;;  %v18133_v54 = vld [vmem:[#allocation20 + $0x140] sm:$0xff]   ;;  %v9784_v60 = vor.u32 %v9783_v61, %v9779_v2 }
 0x663   : > { %10244 = vmatprep.subr.bf16.mxu1 %v18084_v9  ;;  %v18134_v9 = vld [vmem:[#allocation20 + $0x1c0] sm:$0xff]  }
 0x665   : > { %9979 = vmatpush1.bf16.msra.mxu0 %v18079_v12  ;;  %v10050_v12 = vor.u32 %v10049_v63, %v10045_v4 }
 0x666   : > { %10245 = vmatpush1.bf16.msra.mxu1 %v18082_v13  ;;  %9980 = vmatprep.subr.bf16.mxu0 %v18087_v11  ;;  %v9788_v13 = vrot.slane %v9786_v55, 1  ;;  %v18135_v11 = vld [vmem:[#allocation20 + $0x100] sm:$0xff]  }
 0x667   : > { %10246 = vmatprep.subr.bf16.mxu1 %v18090_v10  ;;  %v10054_v10 = vrot.slane %v10052_v6, 1 }
 0x669   : > { %9981 = vmatpush1.bf16.msra.mxu0 %v18085_v14  ;;  %v18136_v14 = vld [vmem:[#allocation20 + $0x180] sm:$0xff]  }
 0x66a   : > { %10247 = vmatpush1.bf16.msra.mxu1 %v18088_v15  ;;  %9982 = vmatprep.subr.bf16.mxu0 %v18093_v16  ;;  %v18137_v15 = vld [vmem:[#allocation20 + $0x148] sm:$0xff]   ;;  %v9789_v16 = vsel %vm1735_vm2, %v9784_v60, %v9788_v13 }
 0x66b   : > { %10248 = vmatprep.subr.bf16.mxu1 %v18096_v17  ;;  %v18138_v17 = vld [vmem:[#allocation20 + $0x1c8] sm:$0xff]  }
 0x66d   : > { %9983 = vmatpush1.bf16.msra.mxu0 %v18091_v18  ;;  %v10055_v18 = vsel %vm1735_vm2, %v10050_v12, %v10054_v10 }
 0x66e   : > { %10249 = vmatpush1.bf16.msra.mxu1 %v18094_v19  ;;  %9984 = vmatprep.subr.bf16.mxu0 %v18099_v21  ;;  %v18139_v19 = vld [vmem:[#allocation20 + $0x108] sm:$0xff]  }
 0x66f   : > { %10250 = vmatprep.subr.bf16.mxu1 %v18102_v22  ;;  %v18140_v21 = vld [vmem:[#allocation20 + $0x188] sm:$0xff]   ;;  %v18141_v22 = vld [vmem:[#allocation20 + $0x150] sm:$0xff]  }
 0x671   : > { %9985 = vmatpush1.bf16.msra.mxu0 %v18097_v58  ;;  %v18142_v58 = vld [vmem:[#allocation20 + $0x1d0] sm:$0xff]  }
 0x672   : > { %10251 = vmatpush1.bf16.msra.mxu1 %v18100_v23  ;;  %9986 = vmatprep.subr.bf16.mxu0 %v18105_v34  ;;  %v18143_v23 = vld [vmem:[#allocation20 + $0x110] sm:$0xff]  }
 0x673   : > { %10252 = vmatprep.subr.bf16.mxu1 %v18108_v26  ;;  %v18144_v34 = vld [vmem:[#allocation20 + $0x190] sm:$0xff]   ;;  %v18145_v26 = vld [vmem:[#allocation20 + $0x158] sm:$0xff]  }
 0x675   : > { %9987 = vmatpush1.bf16.msra.mxu0 %v18103_v30  ;;  %v18147_v30 = vld [vmem:[#allocation20 + $0x118] sm:$0xff]  }
 0x676   : > { %10253 = vmatpush1.bf16.msra.mxu1 %v18106_v32  ;;  %9988 = vmatprep.subr.bf16.mxu0 %v18111_v47  ;;  %v18149_v32 = vld [vmem:[#allocation20 + $0x160] sm:$0xff]  }
 0x677   : > { %10254 = vmatprep.subr.bf16.mxu1 %v18114_v36  ;;  %v18150_v47 = vld [vmem:[#allocation20 + $0x1e0] sm:$0xff]  }
 0x678   : > { %v18151_v36 = vld [vmem:[#allocation20 + $0x120] sm:$0xff]  }
 0x679   : > { %9989 = vmatpush1.bf16.msra.mxu0 %v18109_v40  ;;  %v18154_v40 = vld [vmem:[#allocation20 + $0x1e8] sm:$0xff]  }
 0x67a   : > { %10255 = vmatpush1.bf16.msra.mxu1 %v18112_v41  ;;  %9990 = vmatprep.subr.bf16.mxu0 %v18117_v42  ;;  %v18155_v41 = vld [vmem:[#allocation20 + $0x128] sm:$0xff]  }
 0x67b   : > { %10256 = vmatprep.subr.bf16.mxu1 %v18120_v44  ;;  %v18156_v42 = vld [vmem:[#allocation20 + $0x1a8] sm:$0xff]   ;;  %v18158_v44 = vld [vmem:[#allocation20 + $0x1f0] sm:$0xff]  }
 0x67d   : > { %9991 = vmatpush1.bf16.msra.mxu0 %v18115_v46  ;;  %v18162_v46 = vld [vmem:[#allocation20 + $0x1f8] sm:$0xff]  }
 0x67e   : > { %10257 = vmatpush1.bf16.msra.mxu1 %v18118_v24  ;;  %9992 = vmatprep.subr.bf16.mxu0 %v18123_v29  ;;  %v18164_v24 = vld [vmem:[#allocation20 + $0x1b8] sm:$0xff]   ;;  %v18165_v29 = vld [vmem:[#allocation20 + $0x40] sm:$0xff]  }
 0x67f   : > { %10258 = vmatprep.subr.bf16.mxu1 %v18126_v48  ;;  %v10277_v48 = vld [vmem:[#allocation15] sm:$0x3] }
 0x680   : > { %v10282_v51 = vrot.slane %v10277_v48, %v19416_v25  ;;  %v10286_v57 = vrot.slane %v10277_v48, %v19420_v27 }
 0x681   : > { %9993 = vmatpush1.bf16.msra.mxu0 %v18121_v56  ;;  %v10302_v56 = vrot.slane %v10297_v28, %v19416_v25 }
 0x682   : > { %10259 = vmatpush1.bf16.msra.mxu1 %v18124_v20  ;;  %9994 = vmatprep.subr.bf16.mxu0 %v18129_v38  ;;  %v10306_v20 = vrot.slane %v10297_v28, %v19420_v27 }
 0x683   : > { %10260 = vmatprep.subr.bf16.mxu1 %v18132_v59 }
 0x685   : > { %9995 = vmatpush1.bf16.msra.mxu0 %v18127_v1 }
 0x686   : > { %10261 = vmatpush1.bf16.msra.mxu1 %v18130_v3  ;;  %15721 = vmatprep.subr.bf16.mxu0 %v18133_v54 }
 0x687   : > { %15743 = vmatprep.subr.bf16.mxu1 %v18134_v9 }
 0x688   : > { %9997 = vmatmul.mubr.bf16.vlgmr.msra.gmra.mrb[4].mxu0 %v9789_v16 }
 0x689   : > { %10263 = vmatmul.mubr.bf16.vlgmr.msra.gmra.mrb[4].mxu1 %v10055_v18  ;;  %15722 = vmatpush3.bf16.msra.mxu0 %v18135_v11 }
 0x68a   : > { %15744 = vmatpush3.bf16.msra.mxu1 %v18136_v14  ;;  %15723 = vmatprep.subr.bf16.mxu0 %v18137_v15 }
 0x68b   : > { %15745 = vmatprep.subr.bf16.mxu1 %v18138_v17 }
 0x68d   : > { %15724 = vmatpush3.bf16.msra.mxu0 %v18139_v19 }
 0x68e   : > { %15746 = vmatpush3.bf16.msra.mxu1 %v18140_v21  ;;  %15725 = vmatprep.subr.bf16.mxu0 %v18141_v22 }
 0x68f   : > { %15747 = vmatprep.subr.bf16.mxu1 %v18142_v58 }
 0x691   : > { %15726 = vmatpush3.bf16.msra.mxu0 %v18143_v23 }
 0x692   : > { %15748 = vmatpush3.bf16.msra.mxu1 %v18144_v34  ;;  %15727 = vmatprep.subr.bf16.mxu0 %v18145_v26 }
 0x693   : > { %15749 = vmatprep.subr.bf16.mxu1 %v18146_v0 }
 0x695   : > { %15728 = vmatpush3.bf16.msra.mxu0 %v18147_v30 }
 0x696   : > { %15750 = vmatpush3.bf16.msra.mxu1 %v18148_v31  ;;  %15729 = vmatprep.subr.bf16.mxu0 %v18149_v32 }
 0x697   : > { %15751 = vmatprep.subr.bf16.mxu1 %v18150_v47  ;;  %v10382_v47 = vld [vmem:[#allocation4 + $0x8] sm:$0x80] }
 0x699   : > { %15730 = vmatpush3.bf16.msra.mxu0 %v18151_v36  ;;  %v10384_v36 = vld [vmem:[#allocation4 + $0x18] sm:$0x80] }
 0x69a   : > { %15752 = vmatpush3.bf16.msra.mxu1 %v18152_v37  ;;  %15731 = vmatprep.subr.bf16.mxu0 %v18153_v39 }
 0x69b   : > { %15753 = vmatprep.subr.bf16.mxu1 %v18154_v40 }
 0x69d   : > { %15732 = vmatpush3.bf16.msra.mxu0 %v18155_v41 }
 0x69e   : > { %15754 = vmatpush3.bf16.msra.mxu1 %v18156_v42  ;;  %15733 = vmatprep.subr.bf16.mxu0 %v18157_v43 }
 0x69f   : > { %15755 = vmatprep.subr.bf16.mxu1 %v18158_v44  ;;  %v18167_v44 = vld [vmem:[#allocation20] sm:$0xff]  }
 0x6a1   : > { %15734 = vmatpush3.bf16.msra.mxu0 %v18159_v45 }
 0x6a2   : > { %15756 = vmatpush3.bf16.msra.mxu1 %v18160_v35  ;;  %15735 = vmatprep.subr.bf16.mxu0 %v18161_v62 }
 0x6a3   : > { %15757 = vmatprep.subr.bf16.mxu1 %v18162_v46  ;;  %v18168_v46 = vld [vmem:[#allocation20 + $0x80] sm:$0xff]  }
 0x6a5   : > { %15736 = vmatpush3.bf16.msra.mxu0 %v18163_v8  ;;  %v18169_v8 = vld [vmem:[#allocation20 + $0x48] sm:$0xff]  }
 0x6a6   : > { %15758 = vmatpush3.bf16.msra.mxu1 %v18164_v24  ;;  %15765 = vmatprep.subr.bf16.mxu0 %v18165_v29 }
 0x6a7   : > { %15787 = vmatprep.subr.bf16.mxu1 %v18166_v7  ;;  %v18170_v7 = vld [vmem:[#allocation20 + $0xc8] sm:$0xff]  }
 0x75b   : > { %v9998_v38 = vpop.f32.mrb[4].mxu0 }
 0x75c   : > { %v10289_v5 = vadd.f32 %v10282_v51, %v9998_v38  ;;  %v10264_v59 = vpop.f32.mrb[4].mxu1  ;;  %v10000_v61 = vpop.f32.mrb[5].mxu0 }
 0x75d   : > { %v10309_v63 = vadd.f32 %v10302_v56, %v10264_v59  ;;  %v10290_v1 = vadd.f32 %v10286_v57, %v10000_v61  ;;  %v10266_v2 = vpop.f32.mrb[5].mxu1  ;;  %v10002_v55 = vpop.f32.mrb[6].mxu0  ;;  %v18172_v59 = vld [vmem:[#allocation20 + $0x88] sm:$0xff]   ;;  %v18173_v61 = vld [vmem:[#allocation20 + $0x50] sm:$0xff]  }
 0x75e   : > { %v10293_v3 = vmax.f32 %v10289_v5, 0.0  ;;  %v10310_v4 = vadd.f32 %v10306_v20, %v10266_v2  ;;  %v10291_v6 = vadd.f32 %v10282_v51, %v10002_v55  ;;  %v10268_v54 = vpop.f32.mrb[6].mxu1  ;;  %v10004_v60 = vpop.f32.mrb[7].mxu0  ;;  %v18174_v55 = vld [vmem:[#allocation20 + $0xd0] sm:$0xff]  }
 0x75f   : > { %v10313_v9 = vmax.f32 %v10309_v63, 0.0  ;;  %v10294_v12 = vmax.f32 %v10290_v1, 0.0  ;;  %v10311_v25 = vadd.f32 %v10302_v56, %v10268_v54  ;;  %v10292_v13 = vadd.f32 %v10286_v57, %v10004_v60  ;;  %v10270_v11 = vpop.f32.mrb[7].mxu1  ;;  %v18171_v57 = vld [vmem:[#allocation20 + $0x8] sm:$0xff]  }
 0x760   : > { %v10341_v10 = vrot.slane %v10293_v3, 4  ;;  %v10314_v27 = vmax.f32 %v10310_v4, 0.0  ;;  %v10295_v14 = vmax.f32 %v10291_v6, 0.0  ;;  %v10312_v15 = vadd.f32 %v10306_v20, %v10270_v11 }
 0x761   : > { %v10363_v16 = vrot.slane %v10313_v9, 4  ;;  %v10342_v17 = vrot.slane %v10294_v12, 4  ;;  %v10315_v18 = vmax.f32 %v10311_v25, 0.0  ;;  %v10296_v19 = vmax.f32 %v10292_v13, 0.0  ;;  %v18175_v9 = vld [vmem:[#allocation20 + $0x10] sm:$0xff]  }
 0x762   : > { %10353 = vst [vmem:[#allocation4 + $0x20] sm:$0xf0] %v10341_v10  ;;  %v10364_v21 = vrot.slane %v10314_v27, 4  ;;  %v10343_v22 = vrot.slane %v10295_v14, 4  ;;  %v10316_v58 = vmax.f32 %v10312_v15, 0.0  ;;  %v18176_v14 = vld [vmem:[#allocation20 + $0x90] sm:$0xff]  }
 0x763   : > { %10375 = vst [vmem:[#allocation4 + $0x30] sm:$0xf0] %v10363_v16  ;;  %10354 = vst [vmem:[#allocation4 + $0x28] sm:$0xf0] %v10342_v17  ;;  %v10365_v23 = vrot.slane %v10315_v18, 4  ;;  %v10345_v34 = vrot.slane %v10296_v19, 4 }
 0x764   : > { %10376 = vst [vmem:[#allocation4 + $0x38] sm:$0xf0] %v10364_v21  ;;  %v19584_v26 = vsel %vm565_vm0, %v10341_v10, %v10343_v22  ;;  %10357 = vst [vmem:[#allocation4 + $0x60] sm:$0xf] %v10343_v22  ;;  %v10367_v0 = vrot.slane %v10316_v58, 4  ;;  %v18177_v15 = vld [vmem:[#allocation20 + $0x58] sm:$0xff]  }
 0x765   : > { %10355 = vst [vmem:[#allocation4 + $0x40] sm:$0xff] %v19584_v26  ;;  %v19588_v30 = vsel %vm565_vm0, %v10363_v16, %v10365_v23  ;;  %10379 = vst [vmem:[#allocation4 + $0x70] sm:$0xf] %v10365_v23  ;;  %v19591_v31 = vsel %vm565_vm0, %v10342_v17, %v10345_v34  ;;  %v18178_v18 = vld [vmem:[#allocation20 + $0xd8] sm:$0xff]   ;;  %v10381_v58 = vld [vmem:[#allocation4] sm:$0x80] }
 0x766   : > { %10358 = vst [vmem:[#allocation4 + $0x68] sm:$0xf] %v10345_v34  ;;  %10377 = vst [vmem:[#allocation4 + $0x50] sm:$0xff] %v19588_v30  ;;  %v19596_v32 = vsel %vm565_vm0, %v10364_v21, %v10367_v0 }
 0x767   : > { %10356 = vst [vmem:[#allocation4 + $0x48] sm:$0xff] %v19591_v31  ;;  %10380 = vst [vmem:[#allocation4 + $0x78] sm:$0xf] %v10367_v0  ;;  %v18179_v0 = vld [vmem:[#allocation20 + $0x18] sm:$0xff]  }
 0x768   : > { %10378 = vst [vmem:[#allocation4 + $0x58] sm:$0xff] %v19596_v32 }
 0x769   : > { %v19599_v37 = vld [vmem:[#allocation4 + $0x20] sm:$0xff] }
 0x76a   : > { %v10386_v39 = vld [vmem:[#allocation4 + $0x28] sm:$0xff]  ;;  %v19601_v40 = vld [vmem:[#allocation4 + $0x30] sm:$0xff]  ;;  %v10477_v62 = vpack.c.bf16 %v19584_v26, %v19599_v37 }
 0x76b   : > { %v10394_v41 = vpack.c.bf16 %v10386_v39, %v10382_v47  ;;  %v10478_v42 = vpack.c.bf16 %v19591_v31, %v10386_v39  ;;  %v10388_v43 = vld [vmem:[#allocation4 + $0x38] sm:$0xff]  ;;  %v10479_v29 = vpack.c.bf16 %v19588_v30, %v19601_v40  ;;  %v18180_v39 = vld [vmem:[#allocation20 + $0x98] sm:$0xff]  }
 0x76c   : > { %v10396_v45 = vpack.c.bf16 %v10388_v43, %v10384_v36  ;;  %v10480_v35 = vpack.c.bf16 %v19596_v32, %v10388_v43  ;;  %v10389_v22 = vld [vmem:[#allocation4 + $0x40] sm:$0x7f]  ;;  %v10383_v43 = vld [vmem:[#allocation4 + $0x10] sm:$0x80] }
 0x76d   : > { %v10402_v24 = vmul.bf16 %v10394_v41, %v19335_v52  ;;  %10770 = vmatprep.mubr.bf16.mxu0 %v10478_v42  ;;  %v10391_v47 = vld [vmem:[#allocation4 + $0x50] sm:$0x7f]  ;;  %v18181_v41 = vld [vmem:[#allocation20 + $0x60] sm:$0xff]   ;;  %v11167_v42 = vld [vmem:[#allocation4 + $0x28] sm:$0xfe] }
 0x76e   : > { %v10390_v48 = vld [vmem:[#allocation4 + $0x48] sm:$0x7f]  ;;  %v10404_v28 = vmul.bf16 %v10396_v45, %v19335_v52  ;;  %10811 = vmatprep.mubr.bf16.mxu1 %v10480_v35  ;;  %10771 = vmatmul.mubr.bf16.vlgmr.msra.gmra.mrb[8].mxu0 %v10477_v62  ;;  %v18182_v45 = vld [vmem:[#allocation20 + $0xe0] sm:$0xff]   ;;  %v10397_v35 = vpack.c.bf16 %v10389_v22, %v10389_v22 }
 0x76f   : > { %v10398_v51 = vpack.c.bf16 %v10390_v48, %v10390_v48  ;;  %v10392_v56 = vld [vmem:[#allocation4 + $0x58] sm:$0x7f]  ;;  %10812 = vmatmul.mubr.bf16.vlgmr.msra.gmra.mrb[8].mxu1 %v10479_v29  ;;  %15766 = vmatpush3.bf16.msra.mxu0 %v18167_v44  ;;  %v10838_v20 = vshrl.u32 %v10402_v24, 16  ;;  %v10841_v38 = vshll.u32 %v10402_v24, 16  ;;  %v11179_v29 = vpack.c.bf16 %v19591_v31, %v11167_v42 }
 0x770   : > { %v10400_v5 = vpack.c.bf16 %v10392_v56, %v10392_v56  ;;  %15788 = vmatpush3.bf16.msra.mxu1 %v18168_v46  ;;  %15767 = vmatprep.subr.bf16.mxu0 %v18169_v8  ;;  %v10872_v1 = vshrl.u32 %v10404_v28, 16  ;;  %v10875_v2 = vshll.u32 %v10404_v28, 16  ;;  %v11169_v62 = vld [vmem:[#allocation4 + $0x38] sm:$0xfe]  ;;  %v10399_v46 = vpack.c.bf16 %v10391_v47, %v10391_v47  ;;  %v18185_v28 = vld [vmem:[#allocation20 + $0x68] sm:$0xff]  }
 0x771   : > { %v10406_v63 = vmul.bf16 %v10398_v51, %v19335_v52  ;;  %15789 = vmatprep.subr.bf16.mxu1 %v18170_v7  ;;  %v10840_v4 = vrot.slane %v10838_v20, 3  ;;  %v10843_v6 = vrot.slane %v10841_v38, 4  ;;  %v10393_v8 = vpack.c.bf16 %v19599_v37, %v10381_v58  ;;  %v18183_v24 = vld [vmem:[#allocation20 + $0x20] sm:$0xff]   ;;  %v11175_v51 = vld [vmem:[#allocation4 + $0x68] sm:$0x1] }
 0x772   : > { %v10408_v3 = vmul.bf16 %v10400_v5, %v19335_v52  ;;  %v10874_v12 = vrot.slane %v10872_v1, 3  ;;  %v10877_v25 = vrot.slane %v10875_v2, 4  ;;  %v10395_v7 = vpack.c.bf16 %v19601_v40, %v10383_v43  ;;  %v18184_v48 = vld [vmem:[#allocation20 + $0xa0] sm:$0xff]   ;;  %v18188_v1 = vld [vmem:[#allocation20 + $0xa8] sm:$0xff]   ;;  %v18189_v2 = vld [vmem:[#allocation20 + $0x70] sm:$0xff]  }
 0x773   : > { %v10846_v54 = vshrl.u32 %v10406_v63, 16  ;;  %v10849_v60 = vshll.u32 %v10406_v63, 16  ;;  %15768 = vmatpush3.bf16.msra.mxu0 %v18171_v57  ;;  %v10844_v19 = vor.u32 %v10843_v6, %v10840_v4  ;;  %v11181_v56 = vpack.c.bf16 %v19596_v32, %v11169_v62  ;;  %v18186_v57 = vld [vmem:[#allocation20 + $0xe8] sm:$0xff]   ;;  %v11177_v38 = vld [vmem:[#allocation4 + $0x78] sm:$0x1]  ;;  %v18190_v4 = vld [vmem:[#allocation20 + $0xf0] sm:$0xff]  }
 0x774   : > { %v10880_v13 = vshrl.u32 %v10408_v3, 16  ;;  %v10883_v11 = vshll.u32 %v10408_v3, 16  ;;  %15790 = vmatpush3.bf16.msra.mxu1 %v18172_v59  ;;  %15769 = vmatprep.subr.bf16.mxu0 %v18173_v61  ;;  %v10878_v23 = vor.u32 %v10877_v25, %v10874_v12  ;;  %v10405_v20 = vmul.bf16 %v10397_v35, %v19335_v52  ;;  %v18187_v59 = vld [vmem:[#allocation20 + $0x28] sm:$0xff]   ;;  %v18191_v12 = vld [vmem:[#allocation20 + $0x30] sm:$0xff]  }
 0x775   : > { %v10848_v10 = vrot.slane %v10846_v54, 3  ;;  %v10851_v27 = vrot.slane %v10849_v60, 4  ;;  %15791 = vmatprep.subr.bf16.mxu1 %v18174_v55  ;;  %v10407_v37 = vmul.bf16 %v10399_v46, %v19335_v52  ;;  %v10401_v5 = vmul.bf16 %v10393_v8, %v19335_v52  ;;  %v18198_v46 = vld [vmem:[#allocation20 + $0x2c0] sm:$0xff]  }
 0x776   : > { %v10882_v16 = vrot.slane %v10880_v13, 3  ;;  %v10885_v17 = vrot.slane %v10883_v11, 4  ;;  %v11183_v61 = vpack.c.bf16 %v11175_v51, %v11175_v51  ;;  %v11187_v40 = vmul.bf16 %v11179_v29, %v19351_v49 }
 0x777   : > { %v10852_v21 = vor.u32 %v10851_v27, %v10848_v10  ;;  %15770 = vmatpush3.bf16.msra.mxu0 %v18175_v9  ;;  %v10403_v63 = vmul.bf16 %v10395_v7, %v19335_v52  ;;  %v11185_v55 = vpack.c.bf16 %v11177_v38, %v11177_v38  ;;  %v11189_v3 = vmul.bf16 %v11181_v56, %v19351_v49  ;;  %v18192_v27 = vld [vmem:[#allocation20 + $0xb0] sm:$0xff]  }
 0x778   : > { %v10886_v34 = vor.u32 %v10885_v17, %v10882_v16  ;;  %15792 = vmatpush3.bf16.msra.mxu1 %v18176_v14  ;;  %15771 = vmatprep.subr.bf16.mxu0 %v18177_v15  ;;  %v10829_v6 = vshrl.u32 %v10405_v20, 16  ;;  %v10832_v54 = vshll.u32 %v10405_v20, 16  ;;  %v10863_v60 = vshrl.u32 %v10407_v37, 16  ;;  %v18193_v14 = vld [vmem:[#allocation20 + $0x78] sm:$0xff]  }
 0x779   : > { %v10853_v36 = vsel %vm1175_vm1, %v10844_v19, %v10852_v21  ;;  %15793 = vmatprep.subr.bf16.mxu1 %v18178_v18  ;;  %v10866_v9 = vshll.u32 %v10407_v37, 16  ;;  %v10821_v25 = vshrl.u32 %v10401_v5, 16  ;;  %v10824_v13 = vshll.u32 %v10401_v5, 16  ;;  %v18194_v19 = vld [vmem:[#allocation20 + $0xf8] sm:$0xff]   ;;  %v18201_v5 = vld [vmem:[#allocation20 + $0x248] sm:$0xff]  }
 0x77a   : > { %11116 = vmatprep.mubr.bf16.mxu0 %v10853_v36  ;;  %v10887_v44 = vsel %vm1175_vm1, %v10878_v23, %v10886_v34  ;;  %v11191_v11 = vmul.bf16 %v11183_v61, %v19347_v33  ;;  %v11274_v10 = vshll.u32 %v11187_v40, 16  ;;  %v10855_v15 = vshrl.u32 %v10403_v63, 16  ;;  %v18195_v34 = vld [vmem:[#allocation20 + $0x38] sm:$0xff]   ;;  %v18202_v61 = vld [vmem:[#allocation20 + $0x2c8] sm:$0xff]  }
 0x77b   : > { %11157 = vmatprep.mubr.bf16.mxu1 %v10887_v44  ;;  %15772 = vmatpush3.bf16.msra.mxu0 %v18179_v0  ;;  %v10858_v16 = vshll.u32 %v10403_v63, 16  ;;  %v11193_v17 = vmul.bf16 %v11185_v55, %v19347_v33  ;;  %v11298_v18 = vshll.u32 %v11189_v3, 16  ;;  %v10831_v21 = vrot.slane %v10829_v6, 3  ;;  %v18197_v44 = vld [vmem:[#allocation20 + $0x240] sm:$0xff]   ;;  %v18203_v63 = vld [vmem:[#allocation20 + $0x208] sm:$0xff]   ;;  %v18205_v55 = vld [vmem:[#allocation20 + $0x250] sm:$0xff]  }
 0x77c   : > { %15794 = vmatpush3.bf16.msra.mxu1 %v18180_v39  ;;  %15773 = vmatprep.subr.bf16.mxu0 %v18181_v41  ;;  %v10834_v22 = vrot.slane %v10832_v54, 4  ;;  %v10865_v58 = vrot.slane %v10863_v60, 3  ;;  %v10868_v23 = vrot.slane %v10866_v9, 4  ;;  %v10823_v0 = vrot.slane %v10821_v25, 3  ;;  %v18196_v41 = vld [vmem:[#allocation20 + $0xb8] sm:$0xff]   ;;  %v18208_v6 = vld [vmem:[#allocation20 + $0x290] sm:$0xff]  }
 0x77d   : > { %15795 = vmatprep.subr.bf16.mxu1 %v18182_v45  ;;  %v10826_v47 = vrot.slane %v10824_v13, 4  ;;  %v11276_v36 = vrot.slane %v11274_v10, 1  ;;  %v11279_v39 = vshll.u32 %v11191_v11, 16  ;;  %v10857_v42 = vrot.slane %v10855_v15, 3  ;;  %v18209_v54 = vld [vmem:[#allocation20 + $0x258] sm:$0xff]   ;;  %v18213_v11 = vld [vmem:[#allocation20 + $0x260] sm:$0xff]  }
 0x77e   : > { %v10860_v43 = vrot.slane %v10858_v16, 4  ;;  %v11300_v45 = vrot.slane %v11298_v18, 1  ;;  %v11303_v35 = vshll.u32 %v11193_v17, 16  ;;  %v10835_v62 = vor.u32 %v10834_v22, %v10831_v21  ;;  %v18210_v60 = vld [vmem:[#allocation20 + $0x2d8] sm:$0xff]   ;;  %v11166_v9 = vld [vmem:[#allocation4 + $0x20] sm:$0xfe] }
 0x77f   : > { %15774 = vmatpush3.bf16.msra.mxu0 %v18183_v24  ;;  %v11272_v8 = vshrl.u32 %v11187_v40, 16  ;;  %v10869_v24 = vor.u32 %v10868_v23, %v10865_v58  ;;  %v11296_v29 = vshrl.u32 %v11189_v3, 16  ;;  %v10827_v7 = vor.u32 %v10826_v47, %v10823_v0  ;;  %v18206_v3 = vld [vmem:[#allocation20 + $0x2d0] sm:$0xff]   ;;  %v11168_v25 = vld [vmem:[#allocation4 + $0x30] sm:$0xfe]  ;;  %v18216_v23 = vld [vmem:[#allocation20 + $0x2a0] sm:$0xff]  }
 0x780   : > { %15796 = vmatpush3.bf16.msra.mxu1 %v18184_v48  ;;  %15775 = vmatprep.subr.bf16.mxu0 %v18185_v28  ;;  %v18199_v48 = vld [vmem:[#allocation20 + $0x200] sm:$0xff]   ;;  %v11281_v51 = vrot.slane %v11279_v39, 1  ;;  %v10861_v56 = vor.u32 %v10860_v43, %v10857_v42  ;;  %v11305_v38 = vrot.slane %v11303_v35, 1  ;;  %v18212_v13 = vld [vmem:[#allocation20 + $0x298] sm:$0xff]   ;;  %v11592_v10 = vld [vmem:[#allocation4 + $0x68] sm:$0x7]  ;;  %v11180_v17 = vpack.c.bf16 %v19588_v30, %v11168_v25 }
 0x781   : > { %15797 = vmatprep.subr.bf16.mxu1 %v18186_v57  ;;  %v11277_v28 = vor.u32 %v11276_v36, %v11272_v8  ;;  %v18200_v57 = vld [vmem:[#allocation20 + $0x280] sm:$0xff]   ;;  %v11301_v20 = vor.u32 %v11300_v45, %v11296_v29  ;;  %v10836_v37 = vsel %vm1175_vm1, %v10827_v7, %v10835_v62  ;;  %v11174_v16 = vld [vmem:[#allocation4 + $0x60] sm:$0x1]  ;;  %v11588_v18 = vld [vmem:[#allocation4 + $0x28] sm:$0xf8]  ;;  %v11600_v22 = vpack.c.bf16 %v11592_v10, %v11592_v10 }
 0x782   : > { %v11594_v15 = vld [vmem:[#allocation4 + $0x78] sm:$0x7]  ;;  %v11176_v21 = vld [vmem:[#allocation4 + $0x70] sm:$0x1]  ;;  %v11590_v58 = vld [vmem:[#allocation4 + $0x38] sm:$0xf8]  ;;  %v11182_v36 = vpack.c.bf16 %v11174_v16, %v11174_v16  ;;  %v11188_v43 = vmul.bf16 %v11180_v17, %v19351_v49 }
 0x783   : > { %15776 = vmatpush3.bf16.msra.mxu0 %v18187_v59  ;;  %v10870_v59 = vsel %vm1175_vm1, %v10861_v56, %v10869_v24  ;;  %v11282_v40 = vsel %vm1735_vm2, %v11277_v28, %v11281_v51  ;;  %v11602_v0 = vpack.c.bf16 %v11594_v15, %v11594_v15  ;;  %v18218_v47 = vld [vmem:[#allocation20 + $0x2e8] sm:$0xff]   ;;  %v11184_v42 = vpack.c.bf16 %v11176_v21, %v11176_v21  ;;  %v18222_v24 = vld [vmem:[#allocation20 + $0x2f0] sm:$0xff]   ;;  %v18229_v10 = vld [vmem:[#allocation20 + $0x340] sm:$0xff]  }
 0x784   : > { %15798 = vmatpush3.bf16.msra.mxu1 %v18188_v1  ;;  %15777 = vmatprep.subr.bf16.mxu0 %v18189_v2  ;;  %v11306_v1 = vsel %vm1735_vm2, %v11301_v20, %v11305_v38  ;;  %v18204_v2 = vld [vmem:[#allocation20 + $0x288] sm:$0xff]   ;;  %v11608_v35 = vmul.bf16 %v11600_v22, %v19337_v53  ;;  %v11190_v29 = vmul.bf16 %v11182_v36, %v19347_v33  ;;  %v11286_v51 = vshll.u32 %v11188_v43, 16  ;;  %v18230_v17 = vld [vmem:[#allocation20 + $0x3c0] sm:$0xff]  }
 0x785   : > { %15799 = vmatprep.subr.bf16.mxu1 %v18190_v4  ;;  %v18207_v4 = vld [vmem:[#allocation20 + $0x210] sm:$0xff]   ;;  %v18219_v45 = vld [vmem:[#allocation20 + $0x228] sm:$0xff]   ;;  %v11610_v8 = vmul.bf16 %v11602_v0, %v19337_v53  ;;  %v11192_v28 = vmul.bf16 %v11184_v42, %v19347_v33 }
 0x786   : > { %v18220_v62 = vld [vmem:[#allocation20 + $0x2a8] sm:$0xff]   ;;  %v11702_v20 = vshrl.u32 %v11608_v35, 16  ;;  %v11705_v38 = vshll.u32 %v11608_v35, 16 }
 0x787   : > { %15778 = vmatpush3.bf16.msra.mxu0 %v18191_v12  ;;  %v18211_v12 = vld [vmem:[#allocation20 + $0x218] sm:$0xff]   ;;  %v18233_v42 = vld [vmem:[#allocation20 + $0x348] sm:$0xff]  }
 0x788   : > { %15800 = vmatpush3.bf16.msra.mxu1 %v18192_v27  ;;  %15779 = vmatprep.subr.bf16.mxu0 %v18193_v14  ;;  %v18214_v27 = vld [vmem:[#allocation20 + $0x2e0] sm:$0xff]   ;;  %v11178_v14 = vpack.c.bf16 %v19584_v26, %v11166_v9  ;;  %v11707_v25 = vrot.slane %v11705_v38, 2  ;;  %v18244_v38 = vld [vmem:[#allocation20 + $0x398] sm:$0xff]  }
 0x789   : > { %15801 = vmatprep.subr.bf16.mxu1 %v18194_v19  ;;  %v18215_v19 = vld [vmem:[#allocation20 + $0x220] sm:$0xff]  }
 0x78a   : > { %v11186_v39 = vmul.bf16 %v11178_v14, %v19351_v49 }
 0x78b   : > { %15780 = vmatpush3.bf16.msra.mxu0 %v18195_v34  ;;  %v18217_v34 = vld [vmem:[#allocation20 + $0x268] sm:$0xff]  }
 0x78c   : > { %15802 = vmatpush3.bf16.msra.mxu1 %v18196_v41  ;;  %15809 = vmatprep.subr.bf16.mxu0 %v18197_v44  ;;  %v11596_v41 = vpack.c.bf16 %v19591_v31, %v11588_v18  ;;  %v11598_v44 = vpack.c.bf16 %v19596_v32, %v11590_v58  ;;  %v11262_v7 = vshll.u32 %v11186_v39, 16  ;;  %v11260_v9 = vshrl.u32 %v11186_v39, 16 }
 0x78d   : > { %15831 = vmatprep.subr.bf16.mxu1 %v18198_v46  ;;  %v18221_v46 = vld [vmem:[#allocation20 + $0x270] sm:$0xff]  }
 0x78e   : > { %11117 = vmatmul.mubr.bf16.vlgmr.msra.gmra.mrb[12].mxu0 %v10836_v37  ;;  %v11606_v56 = vmul.bf16 %v11598_v44, %v19337_v53  ;;  %v18224_v37 = vld [vmem:[#allocation20 + $0x2b0] sm:$0xff]  }
 0x78f   : > { %11158 = vmatmul.mubr.bf16.vlgmr.msra.gmra.mrb[12].mxu1 %v10870_v59  ;;  %15810 = vmatpush3.bf16.msra.mxu0 %v18199_v48  ;;  %v11604_v48 = vmul.bf16 %v11596_v41, %v19337_v53  ;;  %v11736_v59 = vshrl.u32 %v11610_v8, 16 }
 0x790   : > { %11535 = vmatprep.mubr.bf16.mxu0 %v11282_v40  ;;  %15832 = vmatpush3.bf16.msra.mxu1 %v18200_v57  ;;  %v18223_v57 = vld [vmem:[#allocation20 + $0x230] sm:$0xff]   ;;  %v18226_v40 = vld [vmem:[#allocation20 + $0x2f8] sm:$0xff]  }
 0x791   : > { %11576 = vmatprep.mubr.bf16.mxu1 %v11306_v1  ;;  %15811 = vmatprep.subr.bf16.mxu0 %v18201_v5  ;;  %v18225_v5 = vld [vmem:[#allocation20 + $0x278] sm:$0xff]   ;;  %v11267_v1 = vshll.u32 %v11190_v29, 16  ;;  %v18238_v29 = vld [vmem:[#allocation20 + $0x3d0] sm:$0xff]  }
 0x792   : > { %15833 = vmatprep.subr.bf16.mxu1 %v18202_v61  ;;  %v11739_v61 = vshll.u32 %v11610_v8, 16  ;;  %v18236_v8 = vld [vmem:[#allocation20 + $0x388] sm:$0xff]  }
 0x793   : > { %15812 = vmatpush3.bf16.msra.mxu0 %v18203_v63  ;;  %v11264_v63 = vrot.slane %v11262_v7, 1  ;;  %v11269_v16 = vrot.slane %v11267_v1, 1  ;;  %v18239_v7 = vld [vmem:[#allocation20 + $0x310] sm:$0xff]   ;;  %v18247_v1 = vld [vmem:[#allocation20 + $0x320] sm:$0xff]  }
 0x794   : > { %15834 = vmatpush3.bf16.msra.mxu1 %v18204_v2  ;;  %15813 = vmatprep.subr.bf16.mxu0 %v18205_v55  ;;  %v11694_v2 = vshrl.u32 %v11604_v48, 16  ;;  %v11697_v55 = vshll.u32 %v11604_v48, 16  ;;  %v11741_v14 = vrot.slane %v11739_v61, 2  ;;  %v18240_v48 = vld [vmem:[#allocation20 + $0x390] sm:$0xff]  }
 0x795   : > { %15835 = vmatprep.subr.bf16.mxu1 %v18206_v3  ;;  %v11288_v3 = vrot.slane %v11286_v51, 1  ;;  %v11265_v15 = vor.u32 %v11264_v63, %v11260_v9  ;;  %v18242_v51 = vld [vmem:[#allocation20 + $0x3d8] sm:$0xff]   ;;  %v18251_v9 = vld [vmem:[#allocation20 + $0x328] sm:$0xff]  }
 0x796   : > { %v11696_v18 = vrot.slane %v11694_v2, 1 }
 0x797   : > { %15814 = vmatpush3.bf16.msra.mxu0 %v18207_v4  ;;  %v11291_v4 = vshll.u32 %v11192_v28, 16  ;;  %v11270_v39 = vsel %vm1735_vm2, %v11265_v15, %v11269_v16  ;;  %v18241_v28 = vld [vmem:[#allocation20 + $0x358] sm:$0xff]  }
 0x798   : > { %15836 = vmatpush3.bf16.msra.mxu1 %v18208_v6  ;;  %15815 = vmatprep.subr.bf16.mxu0 %v18209_v54  ;;  %v11728_v6 = vshrl.u32 %v11606_v56, 16  ;;  %v11731_v54 = vshll.u32 %v11606_v56, 16  ;;  %v11591_v56 = vld [vmem:[#allocation4 + $0x60] sm:$0x7] }
 0x799   : > { %15837 = vmatprep.subr.bf16.mxu1 %v18210_v60  ;;  %v18227_v60 = vld [vmem:[#allocation20 + $0x238] sm:$0xff]   ;;  %v11293_v22 = vrot.slane %v11291_v4, 1  ;;  %v11599_v61 = vpack.c.bf16 %v11591_v56, %v11591_v56 }
 0x79a   : > { %v11730_v58 = vrot.slane %v11728_v6, 1  ;;  %v18250_v6 = vld [vmem:[#allocation20 + $0x3e8] sm:$0xff]  }
 0x79b   : > { %15816 = vmatpush3.bf16.msra.mxu0 %v18211_v12  ;;  %v11704_v12 = vrot.slane %v11702_v20, 1  ;;  %v11593_v20 = vld [vmem:[#allocation4 + $0x70] sm:$0x7] }
 0x79c   : > { %15838 = vmatpush3.bf16.msra.mxu1 %v18212_v13  ;;  %15817 = vmatprep.subr.bf16.mxu0 %v18213_v11  ;;  %v18228_v13 = vld [vmem:[#allocation20 + $0x2b8] sm:$0xff]   ;;  %v11284_v11 = vshrl.u32 %v11188_v43, 16  ;;  %v11601_v63 = vpack.c.bf16 %v11593_v20, %v11593_v20 }
 0x79d   : > { %15839 = vmatprep.subr.bf16.mxu1 %v18214_v27  ;;  %v11738_v27 = vrot.slane %v11736_v59, 1  ;;  %v11708_v0 = vor.u32 %v11707_v25, %v11704_v12  ;;  %v18246_v59 = vld [vmem:[#allocation20 + $0x3e0] sm:$0xff]   ;;  %v18252_v25 = vld [vmem:[#allocation20 + $0x3a8] sm:$0xff]  }
 0x79e   : > { %v11289_v21 = vor.u32 %v11288_v3, %v11284_v11  ;;  %v18249_v3 = vld [vmem:[#allocation20 + $0x368] sm:$0xff]  }
 0x79f   : > { %15818 = vmatpush3.bf16.msra.mxu0 %v18215_v19  ;;  %v11699_v19 = vrot.slane %v11697_v55, 2  ;;  %v11742_v36 = vor.u32 %v11741_v14, %v11738_v27  ;;  %v18248_v55 = vld [vmem:[#allocation20 + $0x3a0] sm:$0xff]  }
 0x7a0   : > { %15840 = vmatpush3.bf16.msra.mxu1 %v18216_v23  ;;  %15819 = vmatprep.subr.bf16.mxu0 %v18217_v34  ;;  %v11733_v23 = vrot.slane %v11731_v54, 2  ;;  %v18231_v34 = vld [vmem:[#allocation20 + $0x300] sm:$0xff]   ;;  %v11294_v43 = vsel %vm1735_vm2, %v11289_v21, %v11293_v22  ;;  %v11607_v54 = vmul.bf16 %v11599_v61, %v19337_v53  ;;  %v18256_v21 = vld [vmem:[#allocation20 + $0x3b0] sm:$0xff]   ;;  %v18257_v22 = vld [vmem:[#allocation20 + $0x378] sm:$0xff]  }
 0x7a1   : > { %15841 = vmatprep.subr.bf16.mxu1 %v18218_v47  ;;  %v18232_v47 = vld [vmem:[#allocation20 + $0x380] sm:$0xff]   ;;  %v11700_v41 = vor.u32 %v11699_v19, %v11696_v18 }
 0x7a2   : > { %v11734_v44 = vor.u32 %v11733_v23, %v11730_v58  ;;  %v11685_v27 = vshrl.u32 %v11607_v54, 16  ;;  %v11688_v14 = vshll.u32 %v11607_v54, 16 }
 0x7a3   : > { %15820 = vmatpush3.bf16.msra.mxu0 %v18219_v45  ;;  %v18234_v45 = vld [vmem:[#allocation20 + $0x3c8] sm:$0xff]   ;;  %v11709_v35 = vsel %vm2257_vm3, %v11700_v41, %v11708_v0  ;;  %v18258_v0 = vld [vmem:[#allocation20 + $0x3f8] sm:$0xff]  }
 0x7a4   : > { %15842 = vmatpush3.bf16.msra.mxu1 %v18220_v62  ;;  %15821 = vmatprep.subr.bf16.mxu0 %v18221_v46  ;;  %v18235_v62 = vld [vmem:[#allocation20 + $0x308] sm:$0xff]   ;;  %v11743_v46 = vsel %vm2257_vm3, %v11734_v44, %v11742_v36  ;;  %v12031_v36 = vld [vmem:[#allocation4 + $0x78] sm:$0xf] }
 0x7a5   : > { %15843 = vmatprep.subr.bf16.mxu1 %v18222_v24  ;;  %v18237_v24 = vld [vmem:[#allocation20 + $0x350] sm:$0xff]  }
 0x7a7   : > { %15822 = vmatpush3.bf16.msra.mxu0 %v18223_v57  ;;  %v18243_v57 = vld [vmem:[#allocation20 + $0x318] sm:$0xff]  }
 0x7a8   : > { %15844 = vmatpush3.bf16.msra.mxu1 %v18224_v37  ;;  %15823 = vmatprep.subr.bf16.mxu0 %v18225_v5  ;;  %v18245_v37 = vld [vmem:[#allocation20 + $0x360] sm:$0xff]   ;;  %v11587_v5 = vld [vmem:[#allocation4 + $0x20] sm:$0xf8] }
 0x7a9   : > { %15845 = vmatprep.subr.bf16.mxu1 %v18226_v40  ;;  %v11589_v40 = vld [vmem:[#allocation4 + $0x30] sm:$0xf8]  ;;  %v11595_v2 = vpack.c.bf16 %v19584_v26, %v11587_v5 }
 0x7aa   : > { %v11597_v4 = vpack.c.bf16 %v19588_v30, %v11589_v40 }
 0x7ab   : > { %15824 = vmatpush3.bf16.msra.mxu0 %v18227_v60  ;;  %v11609_v60 = vmul.bf16 %v11601_v63, %v19337_v53  ;;  %v11603_v12 = vmul.bf16 %v11595_v2, %v19337_v53 }
 0x7ac   : > { %15846 = vmatpush3.bf16.msra.mxu1 %v18228_v13  ;;  %15853 = vmatprep.subr.bf16.mxu0 %v18229_v10  ;;  %v18253_v13 = vld [vmem:[#allocation20 + $0x370] sm:$0xff]   ;;  %v11605_v11 = vmul.bf16 %v11597_v4, %v19337_v53  ;;  %v11687_v53 = vrot.slane %v11685_v27, 1  ;;  %v18275_v27 = vld [vmem:[#allocation20 + $0x418] sm:$0xff]  }
 0x7ad   : > { %15875 = vmatprep.subr.bf16.mxu1 %v18230_v17  ;;  %v18254_v10 = vld [vmem:[#allocation20 + $0x3f0] sm:$0xff]   ;;  %v11719_v15 = vshrl.u32 %v11609_v60, 16  ;;  %v11722_v16 = vshll.u32 %v11609_v60, 16  ;;  %v11677_v18 = vshrl.u32 %v11603_v12, 16  ;;  %v11680_v19 = vshll.u32 %v11603_v12, 16  ;;  %v18268_v60 = vld [vmem:[#allocation20 + $0x488] sm:$0xff]  }
 0x7ae   : > { %11536 = vmatmul.mubr.bf16.vlgmr.msra.gmra.mrb[16].mxu0 %v11270_v39  ;;  %v18255_v17 = vld [vmem:[#allocation20 + $0x330] sm:$0xff]   ;;  %v11711_v58 = vshrl.u32 %v11605_v11, 16  ;;  %v11714_v23 = vshll.u32 %v11605_v11, 16  ;;  %v18273_v11 = vld [vmem:[#allocation20 + $0x458] sm:$0xff]  }
 0x7af   : > { %11577 = vmatmul.mubr.bf16.vlgmr.msra.gmra.mrb[16].mxu1 %v11294_v43  ;;  %15854 = vmatpush3.bf16.msra.mxu0 %v18231_v34  ;;  %v12029_v34 = vld [vmem:[#allocation4 + $0x68] sm:$0xf]  ;;  %v11721_v39 = vrot.slane %v11719_v15, 1  ;;  %v11724_v41 = vrot.slane %v11722_v16, 2  ;;  %v18259_v43 = vld [vmem:[#allocation20 + $0x338] sm:$0xff]   ;;  %v11679_v44 = vrot.slane %v11677_v18, 1 }
 0x7b0   : > { %11972 = vmatprep.mubr.bf16.mxu0 %v11709_v35  ;;  %15876 = vmatpush3.bf16.msra.mxu1 %v18232_v47  ;;  %v11690_v47 = vrot.slane %v11688_v14, 2  ;;  %v12037_v35 = vpack.c.bf16 %v12029_v34, %v12029_v34  ;;  %v18270_v12 = vld [vmem:[#allocation20 + $0x4d0] sm:$0xff]   ;;  %v18276_v14 = vld [vmem:[#allocation20 + $0x498] sm:$0xff]   ;;  %v18277_v15 = vld [vmem:[#allocation20 + $0x460] sm:$0xff]  }
 0x7b1   : > { %12013 = vmatprep.mubr.bf16.mxu1 %v11743_v46  ;;  %15855 = vmatprep.subr.bf16.mxu0 %v18233_v42  ;;  %v12025_v42 = vld [vmem:[#allocation4 + $0x28] sm:$0xf0]  ;;  %v18260_v46 = vld [vmem:[#allocation20 + $0x3b8] sm:$0xff]   ;;  %v11725_v56 = vor.u32 %v11724_v41, %v11721_v39  ;;  %v12412_v18 = vld [vmem:[#allocation4 + $0x78] sm:$0x1f] }
 0x7b2   : > { %15877 = vmatprep.subr.bf16.mxu1 %v18234_v45  ;;  %v11682_v45 = vrot.slane %v11680_v19, 2  ;;  %v12410_v16 = vld [vmem:[#allocation4 + $0x68] sm:$0x1f]  ;;  %v12406_v19 = vld [vmem:[#allocation4 + $0x28] sm:$0xe0]  ;;  %v18281_v34 = vld [vmem:[#allocation20 + $0x468] sm:$0xff]  }
 0x7b3   : > { %15856 = vmatpush3.bf16.msra.mxu0 %v18235_v62  ;;  %v12027_v62 = vld [vmem:[#allocation4 + $0x38] sm:$0xf0]  ;;  %v18283_v39 = vld [vmem:[#allocation20 + $0x428] sm:$0xff]  }
 0x7b4   : > { %15878 = vmatpush3.bf16.msra.mxu1 %v18236_v8  ;;  %15857 = vmatprep.subr.bf16.mxu0 %v18237_v24  ;;  %v11713_v8 = vrot.slane %v11711_v58, 1  ;;  %v11716_v24 = vrot.slane %v11714_v23, 2  ;;  %v11683_v20 = vor.u32 %v11682_v45, %v11679_v44  ;;  %v12408_v58 = vld [vmem:[#allocation4 + $0x38] sm:$0xe0]  ;;  %v18286_v45 = vld [vmem:[#allocation20 + $0x4f0] sm:$0xff]  }
 0x7b5   : > { %15879 = vmatprep.subr.bf16.mxu1 %v18238_v29  ;;  %v18261_v29 = vld [vmem:[#allocation20 + $0x440] sm:$0xff]  }
 0x7b6   : > { %v11717_v5 = vor.u32 %v11716_v24, %v11713_v8  ;;  %v18280_v23 = vld [vmem:[#allocation20 + $0x4a0] sm:$0xff]  }
 0x7b7   : > { %15858 = vmatpush3.bf16.msra.mxu0 %v18239_v7  ;;  %v12039_v7 = vpack.c.bf16 %v12031_v36, %v12031_v36  ;;  %v12416_v36 = vpack.c.bf16 %v19596_v32, %v12408_v58  ;;  %v18298_v58 = vld [vmem:[#allocation20 + $0x5c8] sm:$0xff]  }
 0x7b8   : > { %15880 = vmatpush3.bf16.msra.mxu1 %v18240_v48  ;;  %15859 = vmatprep.subr.bf16.mxu0 %v18241_v28  ;;  %v11691_v48 = vor.u32 %v11690_v47, %v11687_v53  ;;  %v18262_v28 = vld [vmem:[#allocation20 + $0x4c0] sm:$0xff]   ;;  %v11726_v2 = vsel %vm2257_vm3, %v11717_v5, %v11725_v56  ;;  %v18282_v53 = vld [vmem:[#allocation20 + $0x4e8] sm:$0xff]   ;;  %v12414_v47 = vpack.c.bf16 %v19591_v31, %v12406_v19  ;;  %v18290_v56 = vld [vmem:[#allocation20 + $0x4f8] sm:$0xff]  }
 0x7b9   : > { %15881 = vmatprep.subr.bf16.mxu1 %v18242_v51  ;;  %v12033_v51 = vpack.c.bf16 %v19591_v31, %v12025_v42  ;;  %v12123_v61 = vrot.slane %v12039_v7, 2  ;;  %v18284_v42 = vld [vmem:[#allocation20 + $0x4a8] sm:$0xff]   ;;  %v18287_v31 = vld [vmem:[#allocation20 + $0x430] sm:$0xff]   ;;  %v18289_v7 = vld [vmem:[#allocation20 + $0x478] sm:$0xff]  }
 0x7ba   : > { %v11692_v40 = vsel %vm2257_vm3, %v11683_v20, %v11691_v48  ;;  %v12024_v48 = vld [vmem:[#allocation4 + $0x20] sm:$0xf0]  ;;  %v12026_v20 = vld [vmem:[#allocation4 + $0x30] sm:$0xf0] }
 0x7bb   : > { %15860 = vmatpush3.bf16.msra.mxu0 %v18243_v57  ;;  %v12035_v57 = vpack.c.bf16 %v19596_v32, %v12027_v62  ;;  %v12116_v63 = vrot.slane %v12033_v51, 2  ;;  %v12028_v62 = vld [vmem:[#allocation4 + $0x60] sm:$0xf]  ;;  %v12030_v32 = vld [vmem:[#allocation4 + $0x70] sm:$0xf] }
 0x7bc   : > { %15882 = vmatpush3.bf16.msra.mxu1 %v18244_v38  ;;  %15861 = vmatprep.subr.bf16.mxu0 %v18245_v37  ;;  %v18263_v38 = vld [vmem:[#allocation20 + $0x400] sm:$0xff]   ;;  %v12117_v37 = vrot.slane %v12037_v35, 2  ;;  %v12422_v35 = vmul.bf16 %v12414_v47, %v19353_v50  ;;  %v12038_v5 = vpack.c.bf16 %v12030_v32, %v12030_v32  ;;  %v18297_v19 = vld [vmem:[#allocation20 + $0x548] sm:$0xff]   ;;  %v18301_v47 = vld [vmem:[#allocation20 + $0x550] sm:$0xff]  }
 0x7bd   : > { %15883 = vmatprep.subr.bf16.mxu1 %v18246_v59  ;;  %v18264_v59 = vld [vmem:[#allocation20 + $0x480] sm:$0xff]   ;;  %v12847_v32 = vld [vmem:[#allocation4 + $0x68] sm:$0x7f] }
 0x7be   : > { %v12118_v4 = vsel %vm2785_vm4, %v12116_v63, %v12117_v37  ;;  %v12515_v37 = vshll.u32 %v12422_v35, 16  ;;  %v12032_v63 = vpack.c.bf16 %v19584_v26, %v12024_v48 }
 0x7bf   : > { %15862 = vmatpush3.bf16.msra.mxu0 %v18247_v1  ;;  %v18265_v1 = vld [vmem:[#allocation20 + $0x448] sm:$0xff]  }
 0x7c0   : > { %15884 = vmatpush3.bf16.msra.mxu1 %v18248_v55  ;;  %15863 = vmatprep.subr.bf16.mxu0 %v18249_v3  ;;  %v12122_v55 = vrot.slane %v12035_v57, 2  ;;  %v18266_v3 = vld [vmem:[#allocation20 + $0x4c8] sm:$0xff]   ;;  %v12036_v57 = vpack.c.bf16 %v12028_v62, %v12028_v62  ;;  %v12113_v26 = vrot.slane %v12032_v63, 2  ;;  %v12411_v62 = vld [vmem:[#allocation4 + $0x70] sm:$0x1f] }
 0x7c1   : > { %15885 = vmatprep.subr.bf16.mxu1 %v18250_v6  ;;  %v18267_v6 = vld [vmem:[#allocation20 + $0x408] sm:$0xff]   ;;  %v12419_v48 = vpack.c.bf16 %v12411_v62, %v12411_v62  ;;  %v18323_v62 = vld [vmem:[#allocation20 + $0x538] sm:$0xff]  }
 0x7c2   : > { %v12124_v54 = vsel %vm2785_vm4, %v12122_v55, %v12123_v61  ;;  %v18292_v55 = vld [vmem:[#allocation20 + $0x4b8] sm:$0xff]   ;;  %v18314_v63 = vld [vmem:[#allocation20 + $0x5e8] sm:$0xff]  }
 0x7c3   : > { %15864 = vmatpush3.bf16.msra.mxu0 %v18251_v9  ;;  %v18269_v9 = vld [vmem:[#allocation20 + $0x450] sm:$0xff]  }
 0x7c4   : > { %15886 = vmatpush3.bf16.msra.mxu1 %v18252_v25  ;;  %15865 = vmatprep.subr.bf16.mxu0 %v18253_v13  ;;  %v18271_v25 = vld [vmem:[#allocation20 + $0x410] sm:$0xff]  }
 0x7c5   : > { %15887 = vmatprep.subr.bf16.mxu1 %v18254_v10  ;;  %v18272_v13 = vld [vmem:[#allocation20 + $0x490] sm:$0xff]   ;;  %v18274_v10 = vld [vmem:[#allocation20 + $0x4d8] sm:$0xff]  }
 0x7c7   : > { %15866 = vmatpush3.bf16.msra.mxu0 %v18255_v17  ;;  %v18278_v17 = vld [vmem:[#allocation20 + $0x4e0] sm:$0xff]  }
 0x7c8   : > { %15888 = vmatpush3.bf16.msra.mxu1 %v18256_v21  ;;  %15867 = vmatprep.subr.bf16.mxu0 %v18257_v22  ;;  %v18279_v21 = vld [vmem:[#allocation20 + $0x420] sm:$0xff]   ;;  %v12418_v22 = vpack.c.bf16 %v12410_v16, %v12410_v16 }
 0x7c9   : > { %15889 = vmatprep.subr.bf16.mxu1 %v18258_v0  ;;  %v12420_v0 = vpack.c.bf16 %v12412_v18, %v12412_v18  ;;  %v18296_v16 = vld [vmem:[#allocation20 + $0x580] sm:$0xff]  }
 0x7ca   : > { %v12426_v41 = vmul.bf16 %v12418_v22, %v19353_v50 }
 0x7cb   : > { %15868 = vmatpush3.bf16.msra.mxu0 %v18259_v43  ;;  %v18285_v43 = vld [vmem:[#allocation20 + $0x470] sm:$0xff]   ;;  %v12428_v44 = vmul.bf16 %v12420_v0, %v19353_v50 }
 0x7cc   : > { %15890 = vmatpush3.bf16.msra.mxu1 %v18260_v46  ;;  %15897 = vmatprep.subr.bf16.mxu0 %v18261_v29  ;;  %v12424_v46 = vmul.bf16 %v12416_v36, %v19353_v50  ;;  %v12520_v8 = vshrl.u32 %v12426_v41, 16  ;;  %v12523_v24 = vshll.u32 %v12426_v41, 16  ;;  %v18288_v29 = vld [vmem:[#allocation20 + $0x4b0] sm:$0xff]  }
 0x7cd   : > { %15919 = vmatprep.subr.bf16.mxu1 %v18262_v28  ;;  %v12554_v28 = vshrl.u32 %v12428_v44, 16  ;;  %v12557_v51 = vshll.u32 %v12428_v44, 16  ;;  %v18302_v36 = vld [vmem:[#allocation20 + $0x5d0] sm:$0xff]   ;;  %v12409_v44 = vld [vmem:[#allocation4 + $0x60] sm:$0x1f] }
 0x7ce   : > { %11973 = vmatmul.mubr.bf16.vlgmr.msra.gmra.mrb[20].mxu0 %v11692_v40  ;;  %v12549_v61 = vshll.u32 %v12424_v46, 16  ;;  %v18291_v40 = vld [vmem:[#allocation20 + $0x438] sm:$0xff]   ;;  %v18304_v41 = vld [vmem:[#allocation20 + $0x590] sm:$0xff]  }
 0x7cf   : > { %12014 = vmatmul.mubr.bf16.vlgmr.msra.gmra.mrb[20].mxu1 %v11726_v2  ;;  %15898 = vmatpush3.bf16.msra.mxu0 %v18263_v38  ;;  %v12512_v38 = vshrl.u32 %v12422_v35, 16  ;;  %v12525_v2 = vrot.slane %v12523_v24, 3  ;;  %v18308_v35 = vld [vmem:[#allocation20 + $0x598] sm:$0xff]   ;;  %v12417_v24 = vpack.c.bf16 %v12409_v44, %v12409_v44 }
 0x7d0   : > { %12353 = vmatprep.mubr.bf16.mxu0 %v12118_v4  ;;  %15920 = vmatpush3.bf16.msra.mxu1 %v18264_v59  ;;  %v12546_v59 = vshrl.u32 %v12424_v46, 16  ;;  %v18293_v4 = vld [vmem:[#allocation20 + $0x540] sm:$0xff]  }
 0x7d1   : > { %12394 = vmatprep.mubr.bf16.mxu1 %v12124_v54  ;;  %15899 = vmatprep.subr.bf16.mxu0 %v18265_v1  ;;  %v12522_v1 = vrot.slane %v12520_v8, 2  ;;  %v12559_v54 = vrot.slane %v12557_v51, 3  ;;  %v18309_v46 = vld [vmem:[#allocation20 + $0x560] sm:$0xff]  }
 0x7d2   : > { %15921 = vmatprep.subr.bf16.mxu1 %v18266_v3  ;;  %v12034_v3 = vpack.c.bf16 %v19588_v30, %v12026_v20  ;;  %v18310_v8 = vld [vmem:[#allocation20 + $0x5e0] sm:$0xff]   ;;  %v12855_v20 = vpack.c.bf16 %v12847_v32, %v12847_v32 }
 0x7d3   : > { %15900 = vmatpush3.bf16.msra.mxu0 %v18267_v6  ;;  %v12556_v6 = vrot.slane %v12554_v28, 2  ;;  %v12843_v28 = vld [vmem:[#allocation4 + $0x28] sm:$0x80]  ;;  %v18311_v51 = vld [vmem:[#allocation20 + $0x520] sm:$0xff]  }
 0x7d4   : > { %15922 = vmatpush3.bf16.msra.mxu1 %v18268_v60  ;;  %15901 = vmatprep.subr.bf16.mxu0 %v18269_v9  ;;  %v12114_v60 = vrot.slane %v12036_v57, 2  ;;  %v18294_v9 = vld [vmem:[#allocation20 + $0x5c0] sm:$0xff]  }
 0x7d5   : > { %15923 = vmatprep.subr.bf16.mxu1 %v18270_v12  ;;  %v12514_v12 = vrot.slane %v12512_v38, 2  ;;  %v12560_v30 = vor.u32 %v12559_v54, %v12556_v6  ;;  %v12845_v38 = vld [vmem:[#allocation4 + $0x38] sm:$0x80]  ;;  %v18315_v54 = vld [vmem:[#allocation20 + $0x528] sm:$0xff]  }
 0x7d7   : > { %15902 = vmatpush3.bf16.msra.mxu0 %v18271_v25  ;;  %v12517_v25 = vrot.slane %v12515_v37, 3  ;;  %v18312_v37 = vld [vmem:[#allocation20 + $0x5a0] sm:$0xff]  }
 0x7d8   : > { %15924 = vmatpush3.bf16.msra.mxu1 %v18272_v13  ;;  %15903 = vmatprep.subr.bf16.mxu0 %v18273_v11  ;;  %v12120_v13 = vrot.slane %v12038_v5, 2  ;;  %v12548_v11 = vrot.slane %v12546_v59, 2  ;;  %v18313_v5 = vld [vmem:[#allocation20 + $0x568] sm:$0xff]   ;;  %v19674_v59 = vld [vmem:[#allocation4 + $0x50] sm:$0xff] }
 0x7d9   : > { %15925 = vmatprep.subr.bf16.mxu1 %v18274_v10  ;;  %v12551_v10 = vrot.slane %v12549_v61, 3  ;;  %v12518_v18 = vor.u32 %v12517_v25, %v12514_v12  ;;  %v18316_v12 = vld [vmem:[#allocation20 + $0x5a8] sm:$0xff]   ;;  %v18317_v25 = vld [vmem:[#allocation20 + $0x570] sm:$0xff]  }
 0x7db   : > { %15904 = vmatpush3.bf16.msra.mxu0 %v18275_v27  ;;  %v18295_v27 = vld [vmem:[#allocation20 + $0x500] sm:$0xff]   ;;  %v12552_v22 = vor.u32 %v12551_v10, %v12548_v11  ;;  %v18318_v10 = vld [vmem:[#allocation20 + $0x5f0] sm:$0xff]  }
 0x7dc   : > { %15926 = vmatpush3.bf16.msra.mxu1 %v18276_v14  ;;  %15905 = vmatprep.subr.bf16.mxu0 %v18277_v15  ;;  %v12526_v14 = vor.u32 %v12525_v2, %v12522_v1  ;;  %v12119_v15 = vrot.slane %v12034_v3, 2  ;;  %v12425_v1 = vmul.bf16 %v12417_v24, %v19353_v50  ;;  %v19678_v2 = vld [vmem:[#allocation4 + $0x48] sm:$0xff]  ;;  %v12427_v3 = vmul.bf16 %v12419_v48, %v19353_v50  ;;  %v18324_v24 = vld [vmem:[#allocation20 + $0x5b8] sm:$0xff]   ;;  %v18325_v48 = vld [vmem:[#allocation20 + $0x640] sm:$0xff]  }
 0x7dd   : > { %15927 = vmatprep.subr.bf16.mxu1 %v18278_v17  ;;  %v12115_v17 = vsel %vm2785_vm4, %v12113_v26, %v12114_v60  ;;  %v12561_v0 = vsel %vm3289_vm5, %v12552_v22, %v12560_v30 }
 0x7de   : > { %v12503_v26 = vshrl.u32 %v12425_v1, 16 }
 0x7df   : > { %15906 = vmatpush3.bf16.msra.mxu0 %v18279_v21  ;;  %v12121_v21 = vsel %vm2785_vm4, %v12119_v15, %v12120_v13  ;;  %v12537_v15 = vshrl.u32 %v12427_v3, 16 }
 0x7e0   : > { %15928 = vmatpush3.bf16.msra.mxu1 %v18280_v23  ;;  %15907 = vmatprep.subr.bf16.mxu0 %v18281_v34  ;;  %v12527_v23 = vsel %vm3289_vm5, %v12518_v18, %v12526_v14  ;;  %v18299_v34 = vld [vmem:[#allocation20 + $0x508] sm:$0xff]  }
 0x7e1   : > { %15929 = vmatprep.subr.bf16.mxu1 %v18282_v53  ;;  %v18300_v53 = vld [vmem:[#allocation20 + $0x588] sm:$0xff]  }
 0x7e3   : > { %15908 = vmatpush3.bf16.msra.mxu0 %v18283_v39  ;;  %v18303_v39 = vld [vmem:[#allocation20 + $0x510] sm:$0xff]  }
 0x7e4   : > { %15930 = vmatpush3.bf16.msra.mxu1 %v18284_v42  ;;  %15909 = vmatprep.subr.bf16.mxu0 %v18285_v43  ;;  %v18305_v42 = vld [vmem:[#allocation20 + $0x558] sm:$0xff]  }
 0x7e5   : > { %15931 = vmatprep.subr.bf16.mxu1 %v18286_v45  ;;  %v18306_v43 = vld [vmem:[#allocation20 + $0x5d8] sm:$0xff]  }
 0x7e6   : > { %v18307_v45 = vld [vmem:[#allocation20 + $0x518] sm:$0xff]  }
 0x7e7   : > { %15910 = vmatpush3.bf16.msra.mxu0 %v18287_v31  ;;  %v12405_v31 = vld [vmem:[#allocation4 + $0x20] sm:$0xe0] }
 0x7e8   : > { %15932 = vmatpush3.bf16.msra.mxu1 %v18288_v29  ;;  %15911 = vmatprep.subr.bf16.mxu0 %v18289_v7  ;;  %v12407_v29 = vld [vmem:[#allocation4 + $0x30] sm:$0xe0]  ;;  %v12849_v7 = vld [vmem:[#allocation4 + $0x78] sm:$0x7f] }
 0x7e9   : > { %15933 = vmatprep.subr.bf16.mxu1 %v18290_v56  ;;  %v19671_v56 = vld [vmem:[#allocation4 + $0x40] sm:$0xff]  ;;  %v12415_v61 = vpack.c.bf16 %v19674_v59, %v12407_v29 }
 0x7ea   : > { %v12413_v57 = vpack.c.bf16 %v19671_v56, %v12405_v31 }
 0x7eb   : > { %15912 = vmatpush3.bf16.msra.mxu0 %v18291_v40  ;;  %v12857_v40 = vpack.c.bf16 %v12849_v7, %v12849_v7  ;;  %v12423_v13 = vmul.bf16 %v12415_v61, %v19353_v50 }
 0x7ec   : > { %15934 = vmatpush3.bf16.msra.mxu1 %v18292_v55  ;;  %15941 = vmatprep.subr.bf16.mxu0 %v18293_v4  ;;  %v12851_v55 = vpack.c.bf16 %v19678_v2, %v12843_v28  ;;  %v19682_v4 = vld [vmem:[#allocation4 + $0x58] sm:$0xff]  ;;  %v12421_v60 = vmul.bf16 %v12413_v57, %v19353_v50  ;;  %v18320_v50 = vld [vmem:[#allocation20 + $0x5b0] sm:$0xff]  }
 0x7ed   : > { %15963 = vmatprep.subr.bf16.mxu1 %v18294_v9  ;;  %v12853_v6 = vpack.c.bf16 %v19682_v4, %v12845_v38  ;;  %v12863_v9 = vmul.bf16 %v12855_v20, %v19335_v52  ;;  %v12865_v11 = vmul.bf16 %v12857_v40, %v19335_v52  ;;  %v18326_v20 = vld [vmem:[#allocation20 + $0x6c0] sm:$0xff]  }
 0x7ee   : > { %12354 = vmatmul.mubr.bf16.vlgmr.msra.gmra.mrb[24].mxu0 %v12115_v17  ;;  %v12859_v14 = vmul.bf16 %v12851_v55, %v19335_v52  ;;  %v18319_v17 = vld [vmem:[#allocation20 + $0x530] sm:$0xff]   ;;  %v12495_v18 = vshrl.u32 %v12421_v60, 16 }
 0x7ef   : > { %12395 = vmatmul.mubr.bf16.vlgmr.msra.gmra.mrb[24].mxu1 %v12121_v21  ;;  %15942 = vmatpush3.bf16.msra.mxu0 %v18295_v27  ;;  %v12506_v27 = vshll.u32 %v12425_v1, 16  ;;  %v12861_v30 = vmul.bf16 %v12853_v6, %v19335_v52  ;;  %v12957_v21 = vshrl.u32 %v12863_v9, 16  ;;  %v12960_v22 = vshll.u32 %v12863_v9, 16  ;;  %v18327_v1 = vld [vmem:[#allocation20 + $0x600] sm:$0xff]  }
 0x7f0   : > { %12790 = vmatprep.mubr.bf16.mxu0 %v12527_v23  ;;  %15964 = vmatpush3.bf16.msra.mxu1 %v18296_v16  ;;  %v12540_v16 = vshll.u32 %v12427_v3, 16  ;;  %v12529_v23 = vshrl.u32 %v12423_v13, 16  ;;  %v18328_v6 = vld [vmem:[#allocation20 + $0x680] sm:$0xff]  }
 0x7f1   : > { %12831 = vmatprep.mubr.bf16.mxu1 %v12561_v0  ;;  %15943 = vmatprep.subr.bf16.mxu0 %v18297_v19  ;;  %v12498_v19 = vshll.u32 %v12421_v60, 16  ;;  %v12991_v0 = vshrl.u32 %v12865_v11, 16  ;;  %v12959_v32 = vrot.slane %v12957_v21, 3  ;;  %v12846_v21 = vld [vmem:[#allocation4 + $0x60] sm:$0x7f] }
 0x7f2   : > { %15965 = vmatprep.subr.bf16.mxu1 %v18298_v58  ;;  %v18321_v58 = vld [vmem:[#allocation20 + $0x578] sm:$0xff]   ;;  %v12542_v44 = vrot.slane %v12540_v16, 3  ;;  %v12531_v29 = vrot.slane %v12529_v23, 2  ;;  %v18334_v16 = vld [vmem:[#allocation20 + $0x6d0] sm:$0xff]   ;;  %v18341_v23 = vld [vmem:[#allocation20 + $0x660] sm:$0xff]  }
 0x7f3   : > { %15944 = vmatpush3.bf16.msra.mxu0 %v18299_v34  ;;  %v12532_v34 = vshll.u32 %v12423_v13, 16  ;;  %v12500_v31 = vrot.slane %v12498_v19, 3  ;;  %v12993_v28 = vrot.slane %v12991_v0, 3  ;;  %v18338_v19 = vld [vmem:[#allocation20 + $0x6d8] sm:$0xff]   ;;  %v18342_v0 = vld [vmem:[#allocation20 + $0x6e0] sm:$0xff]  }
 0x7f4   : > { %15966 = vmatpush3.bf16.msra.mxu1 %v18300_v53  ;;  %15945 = vmatprep.subr.bf16.mxu0 %v18301_v47  ;;  %v12994_v53 = vshll.u32 %v12865_v11, 16  ;;  %v18322_v47 = vld [vmem:[#allocation20 + $0x5f8] sm:$0xff]   ;;  %v18330_v11 = vld [vmem:[#allocation20 + $0x6c8] sm:$0xff]  }
 0x7f5   : > { %15967 = vmatprep.subr.bf16.mxu1 %v18302_v36  ;;  %v12505_v36 = vrot.slane %v12503_v26, 2  ;;  %v12534_v7 = vrot.slane %v12532_v34, 3  ;;  %v18331_v26 = vld [vmem:[#allocation20 + $0x608] sm:$0xff]  }
 0x7f6   : > { %v12842_v34 = vld [vmem:[#allocation4 + $0x20] sm:$0x80] }
 0x7f7   : > { %15946 = vmatpush3.bf16.msra.mxu0 %v18303_v39  ;;  %v12508_v39 = vrot.slane %v12506_v27, 3  ;;  %v12535_v3 = vor.u32 %v12534_v7, %v12531_v29  ;;  %v18350_v29 = vld [vmem:[#allocation20 + $0x6f0] sm:$0xff]  }
 0x7f8   : > { %15968 = vmatpush3.bf16.msra.mxu1 %v18304_v41  ;;  %15947 = vmatprep.subr.bf16.mxu0 %v18305_v42  ;;  %v12949_v41 = vshrl.u32 %v12859_v14, 16  ;;  %v12952_v42 = vshll.u32 %v12859_v14, 16  ;;  %v18332_v14 = vld [vmem:[#allocation20 + $0x688] sm:$0xff]  }
 0x7f9   : > { %15969 = vmatprep.subr.bf16.mxu1 %v18306_v43  ;;  %v12539_v43 = vrot.slane %v12537_v15, 2  ;;  %v12509_v57 = vor.u32 %v12508_v39, %v12505_v36  ;;  %v18333_v15 = vld [vmem:[#allocation20 + $0x650] sm:$0xff]   ;;  %v18343_v39 = vld [vmem:[#allocation20 + $0x620] sm:$0xff]  }
 0x7fa   : > { %v12951_v38 = vrot.slane %v12949_v41, 3  ;;  %v12850_v41 = vpack.c.bf16 %v19671_v56, %v12842_v34  ;;  %v18364_v34 = vld [vmem:[#allocation20 + $0x788] sm:$0xff]  }
 0x7fb   : > { %15948 = vmatpush3.bf16.msra.mxu0 %v18307_v45  ;;  %v12983_v45 = vshrl.u32 %v12861_v30, 16 }
 0x7fc   : > { %15970 = vmatpush3.bf16.msra.mxu1 %v18308_v35  ;;  %15949 = vmatprep.subr.bf16.mxu0 %v18309_v46  ;;  %v12986_v35 = vshll.u32 %v12861_v30, 16  ;;  %v12497_v46 = vrot.slane %v12495_v18, 2  ;;  %v18335_v30 = vld [vmem:[#allocation20 + $0x610] sm:$0xff]   ;;  %v18337_v18 = vld [vmem:[#allocation20 + $0x658] sm:$0xff]  }
 0x7fd   : > { %15971 = vmatprep.subr.bf16.mxu1 %v18310_v8  ;;  %v12962_v8 = vrot.slane %v12960_v22, 4  ;;  %v12985_v61 = vrot.slane %v12983_v45, 3  ;;  %v18339_v22 = vld [vmem:[#allocation20 + $0x618] sm:$0xff]   ;;  %v18346_v45 = vld [vmem:[#allocation20 + $0x6e8] sm:$0xff]  }
 0x7fe   : > { %v12988_v40 = vrot.slane %v12986_v35, 4 }
 0x7ff   : > { %15950 = vmatpush3.bf16.msra.mxu0 %v18311_v51  ;;  %v12996_v51 = vrot.slane %v12994_v53, 4  ;;  %v12963_v55 = vor.u32 %v12962_v8, %v12959_v32  ;;  %v12854_v53 = vpack.c.bf16 %v12846_v21, %v12846_v21  ;;  %v18348_v32 = vld [vmem:[#allocation20 + $0x6a8] sm:$0xff]   ;;  %v18349_v8 = vld [vmem:[#allocation20 + $0x670] sm:$0xff]  }
 0x800   : > { %15972 = vmatpush3.bf16.msra.mxu1 %v18312_v37  ;;  %15951 = vmatprep.subr.bf16.mxu0 %v18313_v5  ;;  %v12954_v37 = vrot.slane %v12952_v42, 4  ;;  %v12543_v5 = vor.u32 %v12542_v44, %v12539_v43  ;;  %v12989_v13 = vor.u32 %v12988_v40, %v12985_v61  ;;  %v18344_v42 = vld [vmem:[#allocation20 + $0x6a0] sm:$0xff]   ;;  %v18345_v43 = vld [vmem:[#allocation20 + $0x668] sm:$0xff]  }
 0x801   : > { %15973 = vmatprep.subr.bf16.mxu1 %v18314_v63  ;;  %v12501_v63 = vor.u32 %v12500_v31, %v12497_v46  ;;  %v12862_v35 = vmul.bf16 %v12854_v53, %v19335_v52  ;;  %v18347_v46 = vld [vmem:[#allocation20 + $0x628] sm:$0xff]   ;;  %v12858_v31 = vmul.bf16 %v12850_v41, %v19335_v52  ;;  %v18366_v53 = vld [vmem:[#allocation20 + $0x7d0] sm:$0xff]   ;;  %v18371_v41 = vld [vmem:[#allocation20 + $0x718] sm:$0xff]  }
 0x802   : > { %v12955_v9 = vor.u32 %v12954_v37, %v12951_v38  ;;  %v18352_v37 = vld [vmem:[#allocation20 + $0x6b0] sm:$0xff]  }
 0x803   : > { %15952 = vmatpush3.bf16.msra.mxu0 %v18315_v54  ;;  %v12997_v54 = vor.u32 %v12996_v51, %v12993_v28  ;;  %v12510_v60 = vsel %vm3289_vm5, %v12501_v63, %v12509_v57  ;;  %v12940_v7 = vshrl.u32 %v12862_v35, 16  ;;  %v18351_v57 = vld [vmem:[#allocation20 + $0x630] sm:$0xff]   ;;  %v12935_v38 = vshll.u32 %v12858_v31, 16  ;;  %v18354_v63 = vld [vmem:[#allocation20 + $0x6f8] sm:$0xff]  }
 0x804   : > { %15974 = vmatpush3.bf16.msra.mxu1 %v18316_v12  ;;  %15953 = vmatprep.subr.bf16.mxu0 %v18317_v25  ;;  %v18329_v12 = vld [vmem:[#allocation20 + $0x648] sm:$0xff]   ;;  %v12544_v25 = vsel %vm3289_vm5, %v12535_v3, %v12543_v5  ;;  %v18353_v5 = vld [vmem:[#allocation20 + $0x678] sm:$0xff]  }
 0x805   : > { %15975 = vmatprep.subr.bf16.mxu1 %v18318_v10  ;;  %v12964_v10 = vsel %vm1175_vm1, %v12955_v9, %v12963_v55  ;;  %v12998_v27 = vsel %vm1175_vm1, %v12989_v13, %v12997_v54  ;;  %v18356_v9 = vld [vmem:[#allocation20 + $0x6b8] sm:$0xff]   ;;  %v18357_v13 = vld [vmem:[#allocation20 + $0x740] sm:$0xff]  }
 0x807   : > { %15954 = vmatpush3.bf16.msra.mxu0 %v18319_v17  ;;  %v18336_v17 = vld [vmem:[#allocation20 + $0x690] sm:$0xff]  }
 0x808   : > { %15976 = vmatpush3.bf16.msra.mxu1 %v18320_v50  ;;  %15955 = vmatprep.subr.bf16.mxu0 %v18321_v58  ;;  %v12848_v50 = vld [vmem:[#allocation4 + $0x70] sm:$0x7f] }
 0x809   : > { %15977 = vmatprep.subr.bf16.mxu1 %v18322_v47  ;;  %v18340_v58 = vld [vmem:[#allocation20 + $0x698] sm:$0xff]   ;;  %v12856_v36 = vpack.c.bf16 %v12848_v50, %v12848_v50  ;;  %v18362_v50 = vld [vmem:[#allocation20 + $0x7c8] sm:$0xff]  }
 0x80a   : > { %v12844_v47 = vld [vmem:[#allocation4 + $0x30] sm:$0x80] }
 0x80b   : > { %15956 = vmatpush3.bf16.msra.mxu0 %v18323_v62  ;;  %v12852_v44 = vpack.c.bf16 %v19674_v59, %v12844_v47  ;;  %v12864_v62 = vmul.bf16 %v12856_v36, %v19335_v52  ;;  %v18367_v47 = vld [vmem:[#allocation20 + $0x710] sm:$0xff]  }
 0x80c   : > { %15978 = vmatpush3.bf16.msra.mxu1 %v18324_v24  ;;  %15985 = vmatprep.subr.bf16.mxu0 %v18325_v48  ;;  %v12943_v48 = vshll.u32 %v12862_v35, 16  ;;  %v18368_v36 = vld [vmem:[#allocation20 + $0x790] sm:$0xff]   ;;  %v18375_v35 = vld [vmem:[#allocation20 + $0x720] sm:$0xff]  }
 0x80d   : > { %16007 = vmatprep.subr.bf16.mxu1 %v18326_v20  ;;  %v12860_v24 = vmul.bf16 %v12852_v44, %v19335_v52  ;;  %v12974_v28 = vshrl.u32 %v12864_v62, 16  ;;  %v12977_v51 = vshll.u32 %v12864_v62, 16  ;;  %v12932_v20 = vshrl.u32 %v12858_v31, 16  ;;  %v18374_v44 = vld [vmem:[#allocation20 + $0x7e0] sm:$0xff]   ;;  %v18377_v31 = vld [vmem:[#allocation20 + $0x768] sm:$0xff]  }
 0x80e   : > { %12791 = vmatmul.mubr.bf16.vlgmr.msra.gmra.mrb[28].mxu0 %v12510_v60  ;;  %v12945_v52 = vrot.slane %v12943_v48, 4  ;;  %v12937_v60 = vrot.slane %v12935_v38, 4  ;;  %v13639_v48 = vld [vmem:[#allocation4 + $0x98] sm:$0x1]  ;;  %v18382_v38 = vld [vmem:[#allocation20 + $0x7f0] sm:$0xff]  }
 0x80f   : > { %12832 = vmatmul.mubr.bf16.vlgmr.msra.gmra.mrb[28].mxu1 %v12544_v25  ;;  %15986 = vmatpush3.bf16.msra.mxu0 %v18327_v1  ;;  %v12966_v61 = vshrl.u32 %v12860_v24, 16  ;;  %v12969_v40 = vshll.u32 %v12860_v24, 16  ;;  %v12942_v1 = vrot.slane %v12940_v7, 3  ;;  %v12976_v55 = vrot.slane %v12974_v28, 3  ;;  %v13637_v24 = vld [vmem:[#allocation4 + $0x88] sm:$0x1] }
 0x810   : > { %13227 = vmatprep.mubr.bf16.mxu0 %v12964_v10  ;;  %16008 = vmatpush3.bf16.msra.mxu1 %v18328_v6  ;;  %v12979_v3 = vrot.slane %v12977_v51, 4  ;;  %v18355_v6 = vld [vmem:[#allocation20 + $0x638] sm:$0xff]   ;;  %v12934_v54 = vrot.slane %v12932_v20, 3  ;;  %v18358_v10 = vld [vmem:[#allocation20 + $0x7c0] sm:$0xff]   ;;  %v18380_v28 = vld [vmem:[#allocation20 + $0x7a8] sm:$0xff]  }
 0x811   : > { %13268 = vmatprep.mubr.bf16.mxu1 %v12998_v27  ;;  %15987 = vmatprep.subr.bf16.mxu0 %v18329_v12  ;;  %v12968_v12 = vrot.slane %v12966_v61, 3  ;;  %v12971_v25 = vrot.slane %v12969_v40, 4  ;;  %v18381_v51 = vld [vmem:[#allocation20 + $0x770] sm:$0xff]   ;;  %v13647_v40 = vpack.c.bf16 %v13639_v48, %v13639_v48  ;;  %v18403_v48 = vld [vmem:[#allocation20 + $0x818] sm:$0xff]  }
 0x812   : > { %16009 = vmatprep.subr.bf16.mxu1 %v18330_v11  ;;  %v12946_v11 = vor.u32 %v12945_v52, %v12942_v1  ;;  %v12938_v27 = vor.u32 %v12937_v60, %v12934_v54 }
 0x813   : > { %15988 = vmatpush3.bf16.msra.mxu0 %v18331_v26  ;;  %v12980_v26 = vor.u32 %v12979_v3, %v12976_v55  ;;  %v18383_v55 = vld [vmem:[#allocation20 + $0x730] sm:$0xff]  }
 0x814   : > { %16010 = vmatpush3.bf16.msra.mxu1 %v18332_v14  ;;  %15989 = vmatprep.subr.bf16.mxu0 %v18333_v15  ;;  %v18359_v14 = vld [vmem:[#allocation20 + $0x700] sm:$0xff]   ;;  %v13280_v15 = vld [vmem:[#allocation4 + $0x68] sm:$0xff] }
 0x815   : > { %16011 = vmatprep.subr.bf16.mxu1 %v18334_v16  ;;  %v12972_v16 = vor.u32 %v12971_v25, %v12968_v12  ;;  %v18385_v12 = vld [vmem:[#allocation20 + $0x778] sm:$0xff]  }
 0x817   : > { %15990 = vmatpush3.bf16.msra.mxu0 %v18335_v30  ;;  %v18360_v30 = vld [vmem:[#allocation20 + $0x780] sm:$0xff]   ;;  %v12981_v21 = vsel %vm1175_vm1, %v12972_v16, %v12980_v26  ;;  %v18387_v16 = vld [vmem:[#allocation20 + $0x738] sm:$0xff]  }
 0x818   : > { %16012 = vmatpush3.bf16.msra.mxu1 %v18336_v17  ;;  %15991 = vmatprep.subr.bf16.mxu0 %v18337_v18  ;;  %v13282_v17 = vld [vmem:[#allocation4 + $0x78] sm:$0xff]  ;;  %v12947_v18 = vsel %vm1175_vm1, %v12938_v27, %v12946_v11 }
 0x819   : > { %16013 = vmatprep.subr.bf16.mxu1 %v18338_v19  ;;  %v18361_v19 = vld [vmem:[#allocation20 + $0x748] sm:$0xff]  }
 0x81b   : > { %15992 = vmatpush3.bf16.msra.mxu0 %v18339_v22  ;;  %v13284_v22 = vpack.c.bf16 %v13280_v15, %v19678_v2  ;;  %v18369_v2 = vld [vmem:[#allocation20 + $0x758] sm:$0xff]  }
 0x81c   : > { %16014 = vmatpush3.bf16.msra.mxu1 %v18340_v58  ;;  %15993 = vmatprep.subr.bf16.mxu0 %v18341_v23  ;;  %v13286_v58 = vpack.c.bf16 %v13282_v17, %v19682_v4  ;;  %v18363_v23 = vld [vmem:[#allocation20 + $0x708] sm:$0xff]   ;;  %v18372_v4 = vld [vmem:[#allocation20 + $0x798] sm:$0xff]  }
 0x81d   : > { %16015 = vmatprep.subr.bf16.mxu1 %v18342_v0  ;;  %v18365_v0 = vld [vmem:[#allocation20 + $0x750] sm:$0xff]  }
 0x81f   : > { %15994 = vmatpush3.bf16.msra.mxu0 %v18343_v39  ;;  %v18370_v39 = vld [vmem:[#allocation20 + $0x7d8] sm:$0xff]  }
 0x820   : > { %16016 = vmatpush3.bf16.msra.mxu1 %v18344_v42  ;;  %15995 = vmatprep.subr.bf16.mxu0 %v18345_v43  ;;  %v18373_v42 = vld [vmem:[#allocation20 + $0x760] sm:$0xff]   ;;  %v13629_v43 = vld [vmem:[#allocation4 + $0x48] sm:$0xfe] }
 0x821   : > { %16017 = vmatprep.subr.bf16.mxu1 %v18346_v45  ;;  %v13631_v45 = vld [vmem:[#allocation4 + $0x58] sm:$0xfe]  ;;  %v13641_v62 = vpack.c.bf16 %v13280_v15, %v13629_v43  ;;  %v13655_v15 = vmul.bf16 %v13647_v40, %v19347_v33  ;;  %v18393_v43 = vld [vmem:[#allocation20 + $0x848] sm:$0xff]  }
 0x822   : > { %v18409_v40 = vld [vmem:[#allocation20 + $0x868] sm:$0xff]  }
 0x823   : > { %15996 = vmatpush3.bf16.msra.mxu0 %v18347_v46  ;;  %v18376_v46 = vld [vmem:[#allocation20 + $0x7a0] sm:$0xff]   ;;  %v13649_v7 = vmul.bf16 %v13641_v62, %v19351_v49  ;;  %v18395_v62 = vld [vmem:[#allocation20 + $0x808] sm:$0xff]  }
 0x824   : > { %16018 = vmatpush3.bf16.msra.mxu1 %v18348_v32  ;;  %15997 = vmatprep.subr.bf16.mxu0 %v18349_v8  ;;  %v13643_v32 = vpack.c.bf16 %v13282_v17, %v13631_v45  ;;  %v18378_v8 = vld [vmem:[#allocation20 + $0x7e8] sm:$0xff]  }
 0x825   : > { %16019 = vmatprep.subr.bf16.mxu1 %v18350_v29  ;;  %v18379_v29 = vld [vmem:[#allocation20 + $0x728] sm:$0xff]   ;;  %v13736_v3 = vshll.u32 %v13649_v7, 16 }
 0x826   : > { %v18394_v45 = vld [vmem:[#allocation20 + $0x8c8] sm:$0xff]  }
 0x827   : > { %15998 = vmatpush3.bf16.msra.mxu0 %v18351_v57  ;;  %v13651_v57 = vmul.bf16 %v13643_v32, %v19351_v49  ;;  %v18399_v32 = vld [vmem:[#allocation20 + $0x810] sm:$0xff]  }
 0x828   : > { %16020 = vmatpush3.bf16.msra.mxu1 %v18352_v37  ;;  %15999 = vmatprep.subr.bf16.mxu0 %v18353_v5  ;;  %v13645_v37 = vpack.c.bf16 %v13637_v24, %v13637_v24  ;;  %v18401_v24 = vld [vmem:[#allocation20 + $0x858] sm:$0xff]  }
 0x829   : > { %16021 = vmatprep.subr.bf16.mxu1 %v18354_v63  ;;  %v13760_v25 = vshll.u32 %v13651_v57, 16 }
 0x82a   : > { %v13653_v26 = vmul.bf16 %v13645_v37, %v19347_v33 }
 0x82b   : > { %16000 = vmatpush3.bf16.msra.mxu0 %v18355_v6 }
 0x82c   : > { %16022 = vmatpush3.bf16.msra.mxu1 %v18356_v9  ;;  %16029 = vmatprep.subr.bf16.mxu0 %v18357_v13  ;;  %v18384_v9 = vld [vmem:[#allocation20 + $0x7b0] sm:$0xff]  }
 0x82d   : > { %16051 = vmatprep.subr.bf16.mxu1 %v18358_v10  ;;  %v18386_v10 = vld [vmem:[#allocation20 + $0x7f8] sm:$0xff]  }
 0x82e   : > { %13228 = vmatmul.mubr.bf16.vlgmr.msra.gmra.mrb[32].mxu0 %v12947_v18  ;;  %v18388_v18 = vld [vmem:[#allocation20 + $0x7b8] sm:$0xff]  }
 0x82f   : > { %13269 = vmatmul.mubr.bf16.vlgmr.msra.gmra.mrb[32].mxu1 %v12981_v21  ;;  %16030 = vmatpush3.bf16.msra.mxu0 %v18359_v14  ;;  %v13762_v21 = vrot.slane %v13760_v25, 1 }
 0x830   : > { %13576 = vmatprep.mubr.bf16.mxu0 %v13284_v22  ;;  %16052 = vmatpush3.bf16.msra.mxu1 %v18360_v30  ;;  %v13738_v30 = vrot.slane %v13736_v3, 1  ;;  %v19713_v22 = vld [vmem:[#allocation4 + $0x60] sm:$0xff] }
 0x831   : > { %13617 = vmatprep.mubr.bf16.mxu1 %v13286_v58  ;;  %16031 = vmatprep.subr.bf16.mxu0 %v18361_v19  ;;  %v18389_v19 = vld [vmem:[#allocation20 + $0x840] sm:$0xff]   ;;  %v13734_v58 = vshrl.u32 %v13649_v7, 16  ;;  %v13628_v7 = vld [vmem:[#allocation4 + $0x40] sm:$0xfe] }
 0x832   : > { %16053 = vmatprep.subr.bf16.mxu1 %v18362_v50  ;;  %v18390_v50 = vld [vmem:[#allocation20 + $0x8c0] sm:$0xff]  }
 0x833   : > { %16032 = vmatpush3.bf16.msra.mxu0 %v18363_v23  ;;  %v13741_v23 = vshll.u32 %v13653_v26, 16 }
 0x834   : > { %16054 = vmatpush3.bf16.msra.mxu1 %v18364_v34  ;;  %16033 = vmatprep.subr.bf16.mxu0 %v18365_v0  ;;  %v19715_v34 = vld [vmem:[#allocation4 + $0x70] sm:$0xff]  ;;  %v13758_v0 = vshrl.u32 %v13651_v57, 16  ;;  %v18405_v57 = vld [vmem:[#allocation20 + $0x860] sm:$0xff]  }
 0x835   : > { %16055 = vmatprep.subr.bf16.mxu1 %v18366_v53  ;;  %v13765_v53 = vshll.u32 %v13655_v15, 16 }
 0x837   : > { %16034 = vmatpush3.bf16.msra.mxu0 %v18367_v47  ;;  %v18391_v47 = vld [vmem:[#allocation20 + $0x800] sm:$0xff]  }
 0x838   : > { %16056 = vmatpush3.bf16.msra.mxu1 %v18368_v36  ;;  %16035 = vmatprep.subr.bf16.mxu0 %v18369_v2  ;;  %v13739_v36 = vor.u32 %v13738_v30, %v13734_v58  ;;  %v13283_v2 = vpack.c.bf16 %v19713_v22, %v19671_v56  ;;  %v18417_v58 = vld [vmem:[#allocation20 + $0x878] sm:$0xff]  }
 0x839   : > { %16057 = vmatprep.subr.bf16.mxu1 %v18370_v39  ;;  %v18392_v39 = vld [vmem:[#allocation20 + $0x880] sm:$0xff]  }
 0x83b   : > { %16036 = vmatpush3.bf16.msra.mxu0 %v18371_v41  ;;  %v13763_v41 = vor.u32 %v13762_v21, %v13758_v0 }
 0x83c   : > { %16058 = vmatpush3.bf16.msra.mxu1 %v18372_v4  ;;  %16037 = vmatprep.subr.bf16.mxu0 %v18373_v42  ;;  %v13285_v4 = vpack.c.bf16 %v19715_v34, %v19674_v59  ;;  %v13743_v42 = vrot.slane %v13741_v23, 1  ;;  %v18398_v59 = vld [vmem:[#allocation20 + $0x8d0] sm:$0xff]  }
 0x83d   : > { %16059 = vmatprep.subr.bf16.mxu1 %v18374_v44  ;;  %v13767_v44 = vrot.slane %v13765_v53, 1 }
 0x83f   : > { %16038 = vmatpush3.bf16.msra.mxu0 %v18375_v35  ;;  %v13744_v35 = vsel %vm1735_vm2, %v13739_v36, %v13743_v42  ;;  %v13768_v56 = vsel %vm1735_vm2, %v13763_v41, %v13767_v44  ;;  %v18419_v42 = vld [vmem:[#allocation20 + $0x838] sm:$0xff]  }
 0x840   : > { %16060 = vmatpush3.bf16.msra.mxu1 %v18376_v46  ;;  %16039 = vmatprep.subr.bf16.mxu0 %v18377_v31  ;;  %v18396_v46 = vld [vmem:[#allocation20 + $0x888] sm:$0xff]   ;;  %v18397_v31 = vld [vmem:[#allocation20 + $0x850] sm:$0xff]  }
 0x841   : > { %v15737_v20 = vpop.f32.mrb[8].mxu0  ;;  %16061 = vmatprep.subr.bf16.mxu1 %v18378_v8  ;;  %v18400_v8 = vld [vmem:[#allocation20 + $0x890] sm:$0xff]  }
 0x842   : > { %v15759_v5 = vpop.f32.mrb[8].mxu1  ;;  %v15738_v61 = vpop.f32.mrb[9].mxu0 }
 0x843   : > { %v15739_v63 = vadd.f32 %v15738_v61, %v15737_v20  ;;  %v15760_v1 = vpop.f32.mrb[9].mxu1  ;;  %16040 = vmatpush3.bf16.msra.mxu0 %v18379_v29  ;;  %v15740_v52 = vpop.f32.mrb[10].mxu0  ;;  %v18402_v29 = vld [vmem:[#allocation20 + $0x8d8] sm:$0xff]   ;;  %v18406_v20 = vld [vmem:[#allocation20 + $0x8e0] sm:$0xff]  }
 0x844   : > { %v15761_v6 = vadd.f32 %v15760_v1, %v15759_v5  ;;  %16062 = vmatpush3.bf16.msra.mxu1 %v18380_v28  ;;  %v15762_v54 = vpop.f32.mrb[10].mxu1  ;;  %v15741_v60 = vpop.f32.mrb[11].mxu0  ;;  %16041 = vmatprep.subr.bf16.mxu0 %v18381_v51  ;;  %v13630_v28 = vld [vmem:[#allocation4 + $0x50] sm:$0xfe]  ;;  %v18407_v5 = vld [vmem:[#allocation20 + $0x820] sm:$0xff]   ;;  %v18410_v1 = vld [vmem:[#allocation20 + $0x8e8] sm:$0xff]  }
 0x845   : > { %v15742_v13 = vadd.f32 %v15741_v60, %v15740_v52  ;;  %v15763_v11 = vpop.f32.mrb[11].mxu1  ;;  %16063 = vmatprep.subr.bf16.mxu1 %v18382_v38  ;;  %v18404_v51 = vld [vmem:[#allocation20 + $0x898] sm:$0xff]   ;;  %v13640_v38 = vpack.c.bf16 %v19713_v22, %v13628_v7  ;;  %v13642_v37 = vpack.c.bf16 %v19715_v34, %v13630_v28  ;;  %v18408_v61 = vld [vmem:[#allocation20 + $0x8a0] sm:$0xff]   ;;  %v18412_v60 = vld [vmem:[#allocation20 + $0x8a8] sm:$0xff]  }
 0x846   : > { %v19708_v27 = vadd.f32 %v15761_v6, %v15739_v63  ;;  %v15764_v14 = vadd.f32 %v15763_v11, %v15762_v54  ;;  %v13636_v63 = vld [vmem:[#allocation4 + $0x80] sm:$0x1] }
 0x847   : > { %16042 = vmatpush3.bf16.msra.mxu0 %v18383_v55  ;;  %v13648_v52 = vmul.bf16 %v13640_v38, %v19351_v49  ;;  %v13638_v55 = vld [vmem:[#allocation4 + $0x90] sm:$0x1]  ;;  %v13650_v3 = vmul.bf16 %v13642_v37, %v19351_v49  ;;  %v18411_v6 = vld [vmem:[#allocation20 + $0x828] sm:$0xff]   ;;  %v13644_v54 = vpack.c.bf16 %v13636_v63, %v13636_v63  ;;  %v18415_v49 = vld [vmem:[#allocation20 + $0x830] sm:$0xff]  }
 0x848   : > { %v19711_v17 = vadd.f32 %v15764_v14, %v15742_v13  ;;  %16064 = vmatpush3.bf16.msra.mxu1 %v18384_v9  ;;  %16043 = vmatprep.subr.bf16.mxu0 %v18385_v12  ;;  %v18413_v9 = vld [vmem:[#allocation20 + $0x870] sm:$0xff]   ;;  %v13646_v12 = vpack.c.bf16 %v13638_v55, %v13638_v55 }
 0x849   : > { %16065 = vmatprep.subr.bf16.mxu1 %v18386_v10  ;;  %v18414_v13 = vld [vmem:[#allocation20 + $0x8f0] sm:$0xff]   ;;  %v13724_v11 = vshll.u32 %v13648_v52, 16  ;;  %v13748_v14 = vshll.u32 %v13650_v3, 16 }
 0x84a   : > { %v13654_v23 = vmul.bf16 %v13646_v12, %v19347_v33 }
 0x84b   : > { %16044 = vmatpush3.bf16.msra.mxu0 %v18387_v16  ;;  %v13726_v36 = vrot.slane %v13724_v11, 1 }
 0x84c   : > { %16066 = vmatpush3.bf16.msra.mxu1 %v18388_v18  ;;  %16073 = vmatprep.subr.bf16.mxu0 %v18389_v19  ;;  %v13652_v18 = vmul.bf16 %v13644_v54, %v19347_v33  ;;  %v13746_v33 = vshrl.u32 %v13650_v3, 16 }
 0x84d   : > { %16095 = vmatprep.subr.bf16.mxu1 %v18390_v50  ;;  %v18416_v50 = vld [vmem:[#allocation20 + $0x8b0] sm:$0xff]  }
 0x84e   : > { %13577 = vmatmul.mubr.bf16.vlgmr.msra.gmra.mrb[36].mxu0 %v13283_v2  ;;  %v13729_v44 = vshll.u32 %v13652_v18, 16 }
 0x84f   : > { %13618 = vmatmul.mubr.bf16.vlgmr.msra.gmra.mrb[36].mxu1 %v13285_v4  ;;  %16074 = vmatpush3.bf16.msra.mxu0 %v18391_v47  ;;  %v18418_v47 = vld [vmem:[#allocation20 + $0x8f8] sm:$0xff]  }
 0x850   : > { %13997 = vmatprep.mubr.bf16.mxu0 %v13744_v35  ;;  %16096 = vmatpush3.bf16.msra.mxu1 %v18392_v39  ;;  %v13750_v39 = vrot.slane %v13748_v14, 1  ;;  %v13753_v35 = vshll.u32 %v13654_v23, 16 }
 0x851   : > { %14038 = vmatprep.mubr.bf16.mxu1 %v13768_v56  ;;  %16075 = vmatprep.subr.bf16.mxu0 %v18393_v43  ;;  %v13722_v43 = vshrl.u32 %v13648_v52, 16 }
 0x852   : > { %16097 = vmatprep.subr.bf16.mxu1 %v18394_v45  ;;  %v18420_v45 = vld [vmem:[#allocation20 + $0x8b8] sm:$0xff]   ;;  %v13751_v56 = vor.u32 %v13750_v39, %v13746_v33 }
 0x853   : > { %16076 = vmatpush3.bf16.msra.mxu0 %v18395_v62  ;;  %v13727_v62 = vor.u32 %v13726_v36, %v13722_v43 }
 0x854   : > { %16098 = vmatpush3.bf16.msra.mxu1 %v18396_v46  ;;  %16077 = vmatprep.subr.bf16.mxu0 %v18397_v31  ;;  %v13731_v46 = vrot.slane %v13729_v44, 1  ;;  %v13755_v31 = vrot.slane %v13753_v35, 1 }
 0x855   : > { %16099 = vmatprep.subr.bf16.mxu1 %v18398_v59 }
 0x856   : > { %v13732_v59 = vsel %vm1735_vm2, %v13727_v62, %v13731_v46 }
 0x857   : > { %16078 = vmatpush3.bf16.msra.mxu0 %v18399_v32 }
 0x858   : > { %16100 = vmatpush3.bf16.msra.mxu1 %v18400_v8  ;;  %16079 = vmatprep.subr.bf16.mxu0 %v18401_v24 }
 0x859   : > { %16101 = vmatprep.subr.bf16.mxu1 %v18402_v29 }
 0x85b   : > { %16080 = vmatpush3.bf16.msra.mxu0 %v18403_v48 }
 0x85c   : > { %16102 = vmatpush3.bf16.msra.mxu1 %v18404_v51  ;;  %16081 = vmatprep.subr.bf16.mxu0 %v18405_v57 }
 0x85d   : > { %16103 = vmatprep.subr.bf16.mxu1 %v18406_v20 }
 0x85f   : > { %16082 = vmatpush3.bf16.msra.mxu0 %v18407_v5 }
 0x860   : > { %16104 = vmatpush3.bf16.msra.mxu1 %v18408_v61  ;;  %16083 = vmatprep.subr.bf16.mxu0 %v18409_v40 }
 0x861   : > { %v15781_v25 = vpop.f32.mrb[12].mxu0  ;;  %16105 = vmatprep.subr.bf16.mxu1 %v18410_v1 }
 0x862   : > { %v15803_v10 = vpop.f32.mrb[12].mxu1  ;;  %v15782_v26 = vpop.f32.mrb[13].mxu0 }
 0x863   : > { %v15783_v15 = vadd.f32 %v15782_v26, %v15781_v25  ;;  %v15804_v16 = vpop.f32.mrb[13].mxu1  ;;  %v15784_v30 = vpop.f32.mrb[14].mxu0  ;;  %16084 = vmatpush3.bf16.msra.mxu0 %v18411_v6 }
 0x864   : > { %v15805_v19 = vadd.f32 %v15804_v16, %v15803_v10  ;;  %v15806_v21 = vpop.f32.mrb[14].mxu1  ;;  %16106 = vmatpush3.bf16.msra.mxu1 %v18412_v60  ;;  %v15785_v22 = vpop.f32.mrb[15].mxu0  ;;  %16085 = vmatprep.subr.bf16.mxu0 %v18413_v9 }
 0x865   : > { %v11119_v34 = vadd.f32 %v15783_v15, %v19708_v27  ;;  %v15786_v0 = vadd.f32 %v15785_v22, %v15784_v30  ;;  %v15807_v53 = vpop.f32.mrb[15].mxu1  ;;  %16107 = vmatprep.subr.bf16.mxu1 %v18414_v13 }
 0x866   : > { %v15808_v2 = vadd.f32 %v15807_v53, %v15806_v21 }
 0x867   : > { %v11160_v41 = vadd.f32 %v15805_v19, %v11119_v34  ;;  %v11122_v4 = vadd.f32 %v15786_v0, %v19711_v17  ;;  %16086 = vmatpush3.bf16.msra.mxu0 %v18415_v49  ;;  %v13756_v17 = vsel %vm1735_vm2, %v13751_v56, %v13755_v31 }
 0x868   : > { %16108 = vmatpush3.bf16.msra.mxu1 %v18416_v50  ;;  %16087 = vmatprep.subr.bf16.mxu0 %v18417_v58 }
 0x869   : > { %v11163_v27 = vadd.f32 %v15808_v2, %v11122_v4  ;;  %16109 = vmatprep.subr.bf16.mxu1 %v18418_v47 }
 0x86b   : > { %16088 = vmatpush3.bf16.msra.mxu0 %v18419_v42 }
 0x86c   : > { %16110 = vmatpush3.bf16.msra.mxu1 %v18420_v45 }
 0x86e   : > { %13998 = vmatmul.mubr.bf16.vlgmr.msra.gmra.mrb[40].mxu0 %v13732_v59 }
 0x86f   : > { %14039 = vmatmul.mubr.bf16.vlgmr.msra.gmra.mrb[40].mxu1 %v13756_v17 }
 0x881   : > { %v15825_v32 = vpop.f32.mrb[16].mxu0 }
 0x882   : > { %v15847_v8 = vpop.f32.mrb[16].mxu1  ;;  %v15826_v24 = vpop.f32.mrb[17].mxu0 }
 0x883   : > { %v15827_v29 = vadd.f32 %v15826_v24, %v15825_v32  ;;  %v15848_v7 = vpop.f32.mrb[17].mxu1  ;;  %v15828_v48 = vpop.f32.mrb[18].mxu0 }
 0x884   : > { %v15849_v28 = vadd.f32 %v15848_v7, %v15847_v8  ;;  %v15850_v51 = vpop.f32.mrb[18].mxu1  ;;  %v15829_v57 = vpop.f32.mrb[19].mxu0 }
 0x885   : > { %v15830_v20 = vadd.f32 %v15829_v57, %v15828_v48  ;;  %v15851_v38 = vpop.f32.mrb[19].mxu1 }
 0x886   : > { %v11579_v37 = vadd.f32 %v15849_v28, %v15827_v29  ;;  %v15852_v5 = vadd.f32 %v15851_v38, %v15850_v51 }
 0x888   : > { %v11585_v61 = vadd.f32 %v11579_v37, %v11160_v41  ;;  %v11582_v40 = vadd.f32 %v15852_v5, %v15830_v20 }
 0x88a   : > { %v11586_v63 = vadd.f32 %v11582_v40, %v11163_v27 }
 0x8a1   : > { %v15869_v1 = vpop.f32.mrb[20].mxu0 }
 0x8a2   : > { %v15891_v52 = vpop.f32.mrb[20].mxu1  ;;  %v15870_v55 = vpop.f32.mrb[21].mxu0 }
 0x8a3   : > { %v15871_v3 = vadd.f32 %v15870_v55, %v15869_v1  ;;  %v15892_v6 = vpop.f32.mrb[21].mxu1  ;;  %v15872_v54 = vpop.f32.mrb[22].mxu0 }
 0x8a4   : > { %v15893_v60 = vadd.f32 %v15892_v6, %v15891_v52  ;;  %v15894_v9 = vpop.f32.mrb[22].mxu1  ;;  %v15873_v12 = vpop.f32.mrb[23].mxu0 }
 0x8a5   : > { %v15874_v25 = vadd.f32 %v15873_v12, %v15872_v54  ;;  %v15895_v13 = vpop.f32.mrb[23].mxu1 }
 0x8a6   : > { %v12016_v11 = vadd.f32 %v15893_v60, %v15871_v3  ;;  %v15896_v10 = vadd.f32 %v15895_v13, %v15894_v9 }
 0x8a8   : > { %v12022_v26 = vadd.f32 %v12016_v11, %v11585_v61  ;;  %v12019_v14 = vadd.f32 %v15896_v10, %v15874_v25 }
 0x8aa   : > { %v12023_v15 = vadd.f32 %v12019_v14, %v11586_v63 }
 0x8c1   : > { %v15913_v16 = vpop.f32.mrb[24].mxu0 }
 0x8c2   : > { %v15935_v30 = vpop.f32.mrb[24].mxu1  ;;  %v15914_v49 = vpop.f32.mrb[25].mxu0 }
 0x8c3   : > { %v15915_v18 = vadd.f32 %v15914_v49, %v15913_v16  ;;  %v15936_v19 = vpop.f32.mrb[25].mxu1  ;;  %v15916_v21 = vpop.f32.mrb[26].mxu0 }
 0x8c4   : > { %v15937_v22 = vadd.f32 %v15936_v19, %v15935_v30  ;;  %v15938_v50 = vpop.f32.mrb[26].mxu1  ;;  %v15917_v58 = vpop.f32.mrb[27].mxu0 }
 0x8c5   : > { %v15918_v23 = vadd.f32 %v15917_v58, %v15916_v21  ;;  %v15939_v34 = vpop.f32.mrb[27].mxu1 }
 0x8c6   : > { %v12397_v0 = vadd.f32 %v15937_v22, %v15915_v18  ;;  %v15940_v53 = vadd.f32 %v15939_v34, %v15938_v50 }
 0x8c8   : > { %v12403_v47 = vadd.f32 %v12397_v0, %v12022_v26  ;;  %v12400_v36 = vadd.f32 %v15940_v53, %v15918_v23 }
 0x8ca   : > { %v12404_v2 = vadd.f32 %v12400_v36, %v12023_v15 }
 0x8e1   : > { %v15957_v39 = vpop.f32.mrb[28].mxu0 }
 0x8e2   : > { %v15979_v41 = vpop.f32.mrb[28].mxu1  ;;  %v15958_v4 = vpop.f32.mrb[29].mxu0 }
 0x8e3   : > { %v15959_v42 = vadd.f32 %v15958_v4, %v15957_v39  ;;  %v15980_v43 = vpop.f32.mrb[29].mxu1  ;;  %v15960_v44 = vpop.f32.mrb[30].mxu0 }
 0x8e4   : > { %v15981_v45 = vadd.f32 %v15980_v43, %v15979_v41  ;;  %v15982_v33 = vpop.f32.mrb[30].mxu1  ;;  %v15961_v35 = vpop.f32.mrb[31].mxu0 }
 0x8e5   : > { %v15962_v27 = vadd.f32 %v15961_v35, %v15960_v44  ;;  %v15983_v62 = vpop.f32.mrb[31].mxu1 }
 0x8e6   : > { %v12834_v56 = vadd.f32 %v15981_v45, %v15959_v42  ;;  %v15984_v46 = vadd.f32 %v15983_v62, %v15982_v33 }
 0x8e8   : > { %v12840_v31 = vadd.f32 %v12834_v56, %v12403_v47  ;;  %v12837_v59 = vadd.f32 %v15984_v46, %v15962_v27  ;;  %v15713_v47 = vld [vmem:[#allocation21] ss:$0 sm:$0xff] }
 0x8ea   : > { %v12841_v17 = vadd.f32 %v12837_v59, %v12404_v2 }
 0x901   : > { %v16001_v32 = vpop.f32.mrb[32].mxu0 }
 0x902   : > { %v16023_v8 = vpop.f32.mrb[32].mxu1  ;;  %v16002_v24 = vpop.f32.mrb[33].mxu0 }
 0x903   : > { %v16003_v29 = vadd.f32 %v16002_v24, %v16001_v32  ;;  %v16024_v7 = vpop.f32.mrb[33].mxu1  ;;  %v16004_v48 = vpop.f32.mrb[34].mxu0 }
 0x904   : > { %v16025_v28 = vadd.f32 %v16024_v7, %v16023_v8  ;;  %v16026_v51 = vpop.f32.mrb[34].mxu1  ;;  %v16005_v57 = vpop.f32.mrb[35].mxu0 }
 0x905   : > { %v16006_v20 = vadd.f32 %v16005_v57, %v16004_v48  ;;  %v16027_v38 = vpop.f32.mrb[35].mxu1 }
 0x906   : > { %v13271_v37 = vadd.f32 %v16025_v28, %v16003_v29  ;;  %v16028_v5 = vadd.f32 %v16027_v38, %v16026_v51 }
 0x908   : > { %v13277_v61 = vadd.f32 %v13271_v37, %v12840_v31  ;;  %v13274_v40 = vadd.f32 %v16028_v5, %v16006_v20 }
 0x90a   : > { %v13278_v63 = vadd.f32 %v13274_v40, %v12841_v17 }
 0x921   : > { %v16045_v1 = vpop.f32.mrb[36].mxu0 }
 0x922   : > { %v16067_v52 = vpop.f32.mrb[36].mxu1  ;;  %v16046_v55 = vpop.f32.mrb[37].mxu0 }
 0x923   : > { %v16047_v3 = vadd.f32 %v16046_v55, %v16045_v1  ;;  %v16068_v6 = vpop.f32.mrb[37].mxu1  ;;  %v16048_v54 = vpop.f32.mrb[38].mxu0 }
 0x924   : > { %v16069_v60 = vadd.f32 %v16068_v6, %v16067_v52  ;;  %v16070_v9 = vpop.f32.mrb[38].mxu1  ;;  %v16049_v12 = vpop.f32.mrb[39].mxu0 }
 0x925   : > { %v16050_v25 = vadd.f32 %v16049_v12, %v16048_v54  ;;  %v16071_v13 = vpop.f32.mrb[39].mxu1 }
 0x926   : > { %v13620_v11 = vadd.f32 %v16069_v60, %v16047_v3  ;;  %v16072_v10 = vadd.f32 %v16071_v13, %v16070_v9 }
 0x928   : > { %v13626_v26 = vadd.f32 %v13620_v11, %v13277_v61  ;;  %v13623_v14 = vadd.f32 %v16072_v10, %v16050_v25 }
 0x92a   : > { %v13627_v15 = vadd.f32 %v13623_v14, %v13278_v63 }
 0x941   : > { %v16089_v16 = vpop.f32.mrb[40].mxu0 }
 0x942   : > { %v16111_v30 = vpop.f32.mrb[40].mxu1  ;;  %v16090_v49 = vpop.f32.mrb[41].mxu0 }
 0x943   : > { %v16091_v18 = vadd.f32 %v16090_v49, %v16089_v16  ;;  %v16112_v19 = vpop.f32.mrb[41].mxu1  ;;  %v16092_v21 = vpop.f32.mrb[42].mxu0 }
 0x944   : > { %v16113_v22 = vadd.f32 %v16112_v19, %v16111_v30  ;;  %v16114_v50 = vpop.f32.mrb[42].mxu1  ;;  %v16093_v58 = vpop.f32.mrb[43].mxu0 }
 0x945   : > { %v16094_v23 = vadd.f32 %v16093_v58, %v16092_v21  ;;  %v16115_v34 = vpop.f32.mrb[43].mxu1 }
 0x946   : > { %v14041_v0 = vadd.f32 %v16113_v22, %v16091_v18  ;;  %v16116_v53 = vadd.f32 %v16115_v34, %v16114_v50 }
 0x948   : > { %v14047_v36 = vadd.f32 %v14041_v0, %v13626_v26  ;;  %v14044_v2 = vadd.f32 %v16116_v53, %v16094_v23 }
 0x94a   : > { %v14056_v39 = vadd.f32 %v15713_v47, %v14047_v36  ;;  %v14048_v41 = vadd.f32 %v14044_v2, %v13627_v15 }
 0x94c   : > { %14058 = vst [vmem:[%s539_s12] sm:$0xff] %v14056_v39  ;;  %v14057_v4 = vadd.f32 %v15713_v47, %v14048_v41 }
 0x94e   : > { %14059 = vst [vmem:[%s539_s12 + $0x8] sm:$0xff] %v14057_v4 }
 0x94f   : > { %18760 = shalt.err (!%p18757_p12)
}
 0x950   : > { %s18761_s24 = scalar_lea.hbm %s19738_s30, 256  ;;  %s18765_s15 = scalar_lea.hbm %s19843_s11, 512 }
 0x951   : > { %p18762_p13 = scmp.ne.s32.totalorder %s19738_s30, %s18761_s24  ;;  %p18766_p3 = scmp.lt.u32.totalorder %s19738_s30, %s19843_s11 }
 0x952   : > { %p18767_p2 = scmp.lt.u32.totalorder %s18765_s15, %s18761_s24  ;;  %p18769_p0 = scmp.lt.u32.totalorder %s18761_s24, %s19738_s30 }
 0x953   : > { %p18763_p1 = pnand %p18762_p13, %p19844_p5 }
 0x954   : > { %p18768_p8 = por %p18767_p2, %p18766_p3 }
 0x955   : > { %p18764_p6 = pneg %p18763_p1 }
 0x956   : > { %p18770_p4 = por %p18769_p0, %p18768_p8 }
 0x958   : > { %p18771_p10 = pnand %p18770_p4, %p18764_p6 }
 0x95a   : > { %18774 = shalt.err (!%p18771_p10)
}
 0x95b   : > { %s18864_s22 = smov 128   ;;  %s18865_s23 = smov 8  }
 0x95c   : > { %16287 = dma.vmem_to_hbm [thread:$0]  (%p19844_p5), %s19740_s16, 256, %s19738_s30, %s19744_s21, %s18864_s22, %s18864_s22, %s18865_s23  }
 0x95d PF: > { %s14089_s0 = sand.u32 1, %s18829_s17   ;;  %p19845_p11 = scmp.ne.s32.totalorder %s19823_s28, 0 }
 0x95e   : > { %p19846_p7 = scmp.ge.s32.totalorder %s18841_s20, 2  ;;  %s14090_s1 = scalar_lea.sflag [#allocation7], %s14089_s0 }
 0x960   : > { %p16325_p9 = pnand %p19846_p7, %p19845_p11 }
 0x962   : > { %18824 = dma.done.wait (!%p16325_p9), %s14090_s1, 256  }
 0x963   : > { %18826 = vsyncadd (!%p16325_p9), %s14090_s1, 4294967040  ;;  %p27_p12 = scmp.ge.s32.totalorder %s19189_s27, 4   ;;  %s19847_s17 = smov %s18833_s18 }
 0x964   : > { %s19848_s18 = smov %s18837_s19  ;;  %s19849_s19 = smov %s19200_s29 }
 0x965   : > { %s19850_s20 = smov %s19189_s27  ;;  %29 = sbr.rel (!%p27_p12) target bundleno = 14 (0xe), region = 180 }
 0x96c   :  { %14095 = vsyncpa [#allocation6], 1 }
 0x96d   :  { %14097 = vsyncpa [#allocation6 + $0x1], 1 }
 0x96e   :  { %14098 = vsyncpa [#allocation9], 1 }
 0x96f   :  { %14099 = vsyncpa [#allocation13], 1 }
 0x970   :  { %14100 = vsyncpa [#allocation16], 1 }
 0x971   :  { %14101 = vsyncpa [#allocation19], 1 }
 0x972   :  { %14102 = vsyncpa [#allocation22], 1 }
 0x973   :  { %14103 = vsyncpa [#allocation7], 1 }
 0x974   :  { %14105 = vsyncpa [#allocation7 + $0x1], 1 }

</bundles_post_ra>
